<compile_context>
chip_gen: v5e
topology: v5e:2x2
jax: 0.10.0
libtpu: 0.0.40
codegen_flags: <defaults>
</compile_context>

<pallas_src>
import jax
import jax.numpy as jnp
from jax.experimental import pallas as pl
from jax.experimental.pallas import tpu as pltpu

# ---------------- model hyper-parameters (scaled-down but structurally faithful) -------
QUES = 64                  # C.QUES
EMB = 32                   # emb_dim            (original: 256)
CONT = 96                  # content emb dim    (original: 768)
D_MODEL = EMB + CONT       # == EMB * 4 == input_size + CONT
D_STATE = 8
D_CONV = 4
EXPAND = 2
D_INNER = EXPAND * D_MODEL            # 256
DT_RANK = (D_MODEL + 15) // 16        # mamba "auto" dt_rank = ceil(d_model/16)

XP_SEG = 128                           # lane-padded B / C segments of fused x_proj
XP_PAD = D_INNER + 2 * XP_SEG          # [dt(dt_proj folded, D_INNER) | B(128) | C(128)]
OUT_PAD = 128                          # lane-padded fc output width (QUES=64 -> 128)

BATCH = 8
SEQ = 8
M_ROWS = SEQ * BATCH                   # time-major rows per (single) grid step


# ---------------- shared math (reference + kernel-safe) --------------------------------
def _layernorm(v, g, b, eps=1e-12):
    mu = jnp.mean(v, axis=-1, keepdims=True)
    var = jnp.mean((v - mu) ** 2, axis=-1, keepdims=True)
    return (v - mu) / jnp.sqrt(var + eps) * g + b


def _softplus(x):
    return jnp.maximum(x, 0.0) + jnp.log(1.0 + jnp.exp(-jnp.abs(x)))


# exact versions (pure-JAX reference)
def _sigmoid_ref(x):
    return 1.0 / (1.0 + jnp.exp(-x))


def _silu_ref(x):
    return x * _sigmoid_ref(x)


# in-kernel versions: approximate reciprocal lands on the EUP slot instead of VALU divide
def _sigmoid_k(x):
    return pl.reciprocal(1.0 + jnp.exp(-x), approx=True)


def _silu_k(x):
    return x * _sigmoid_k(x)


# ---------------- Pallas kernel: LayerNorm -> Mamba block -> LayerNorm -> fc -> sigmoid -
def mamba_cont_kernel(inp_ref,
                      ln0_g, ln0_b, w_inx, w_inz, conv_w, conv_b,
                      w_xp, b_dt, a_log, d_par,
                      w_out, ln1_g, ln1_b, w_fc, b_fc,
                      out_ref,
                      decay_scr, binp_scr):
    f32 = jnp.float32

    # ---- LayerNorm over the fused (interaction ++ content) embedding (dropout = id) ---
    x2 = inp_ref[...]                                            # (M, D_MODEL), time-major
    h2 = _layernorm(x2, ln0_g[...], ln0_b[...])

    # ---- in_proj x-half only (z-half deferred to the gate to cut vreg liveness) -------
    xi2 = jnp.dot(h2.astype(w_inx.dtype), w_inx[...],
                  preferred_element_type=f32)                    # (M, D_INNER)

    # ---- causal depthwise conv along time: one timestep shift == BATCH rows -----------
    # TODO(synk): at production SEQ use pltpu.roll(axis=0) + a (row >= sft*BATCH) mask to
    # put the shift on the XLU slot instead of a zero-padded concatenate.
    cw = conv_w[...]                                             # (D_CONV, D_INNER)
    acc = conv_b[...] + xi2 * cw[D_CONV - 1:D_CONV, :]           # tap k = D_CONV-1
    for sft in range(1, D_CONV):
        k = sft * BATCH
        shifted = jnp.concatenate(
            [jnp.zeros((k, D_INNER), f32), xi2[:M_ROWS - k, :]], axis=0)
        acc = acc + shifted * cw[D_CONV - 1 - sft:D_CONV - sft, :]
    xc2 = _silu_k(acc)                                           # (M, D_INNER)

    # ---- fused, lane-padded x_proj with dt_proj folded in: [dt | B | C], one matmul ---
    xp = jnp.dot(xc2.astype(w_xp.dtype), w_xp[...],
                 preferred_element_type=f32)                     # (M, XP_PAD)
    dt2 = _softplus(xp[:, :D_INNER] + b_dt[...])                 # (M, D_INNER)
    bm2 = xp[:, D_INNER:D_INNER + D_STATE]                       # (M, D_STATE)
    cm2 = xp[:, D_INNER + XP_SEG:D_INNER + XP_SEG + D_STATE]     # (M, D_STATE)

    a_t = -jnp.exp(a_log[...])                                   # (D_STATE, D_INNER)
    d_row = d_par[...]                                           # (1, D_INNER)

    # ---- hoist exp(dt*A) and B*(dt*x) off the serial scan path into VMEM scratch ------
    for t in range(SEQ):
        r0 = t * BATCH
        dt_t = dt2[r0:r0 + BATCH, :]                             # (BATCH, D_INNER)
        decay_scr[t] = jnp.exp(dt_t[:, None, :] * a_t[None, :, :])
        dtx_t = dt_t * xc2[r0:r0 + BATCH, :]                     # (BATCH, D_INNER)
        binp_scr[t] = bm2[r0:r0 + BATCH, :][:, :, None] * dtx_t[:, None, :]

    # ---- selective scan: batch-vectorized, SEQ serial steps of pure multiply-adds -----
    # TODO(synk): at production SEQ replace the unrolled Python time loop with
    # lax.fori_loop (hstate carry + VMEM y scratch) to bound vreg live ranges.
    hstate = jnp.zeros((BATCH, D_STATE, D_INNER), f32)
    ys = []
    for t in range(SEQ):
        r0 = t * BATCH
        hstate = decay_scr[t] * hstate + binp_scr[t]             # (BATCH, D_STATE, D_INNER)
        c_t = cm2[r0:r0 + BATCH, :]                              # (BATCH, D_STATE)
        ys.append(jnp.sum(hstate * c_t[:, :, None], axis=1))     # (BATCH, D_INNER)
    y2 = jnp.concatenate(ys, axis=0) + d_row * xc2               # (M, D_INNER)

    # ---- gate (z-half matmul computed only now) + out_proj -----------------------------
    zg2 = jnp.dot(h2.astype(w_inz.dtype), w_inz[...],
                  preferred_element_type=f32)                    # (M, D_INNER)
    y2 = y2 * _silu_k(zg2)
    m_out = jnp.dot(y2.astype(w_out.dtype), w_out[...],
                    preferred_element_type=f32)                  # (M, D_MODEL)

    # MambaLayer with num_layers == 1: LayerNorm(dropout(mamba_out)), no residual.
    h1 = _layernorm(m_out, ln1_g[...], ln1_b[...])

    # final fc + sigmoid; weight/bias zero-padded to 128 lanes -> lane-dense store
    logits = jnp.dot(h1.astype(w_fc.dtype), w_fc[...],
                     preferred_element_type=f32) + b_fc[...]
    out_ref[...] = _sigmoid_k(logits)                            # (M, OUT_PAD)


# ---------------- wrapper: JAX glue (embedding gathers, packing) + pallas_call ----------
@jax.jit
def mamba_cont_forward(x_ids, q_ids, params):
    # Embedding gathers + concat stay in XLA: tables are tiny and fuse into one op.
    x_e = jnp.take(params["emb"], x_ids, axis=0)                 # (B, S, EMB)
    x_c = jnp.take(params["qcont"], q_ids, axis=0)               # (B, S, CONT)
    inp = jnp.concatenate([x_e, x_c], axis=-1)                   # (B, S, D_MODEL)
    b, s, _ = inp.shape
    assert b == BATCH and s == SEQ
    # time-major rows (row r = t*BATCH + b): per-timestep batch rows are contiguous
    inp_tm = jnp.transpose(inp, (1, 0, 2)).reshape(M_ROWS, D_MODEL)

    bf16 = jnp.bfloat16
    w_inx = params["w_inx"].astype(bf16)
    w_inz = params["w_inz"].astype(bf16)

    # fused x_proj [dt | B | C] with dt_proj folded in (product formed exactly in f32).
    # TODO(synk): at production SEQ keep the dt segment / dt_proj in f32 — its bf16 error
    # compounds through exp(dt*A) over long scans.
    w_dtfold = params["w_xdt"] @ params["w_dt"]                  # (D_INNER, D_INNER)
    w_xp = jnp.zeros((D_INNER, XP_PAD), jnp.float32)
    w_xp = w_xp.at[:, 0:D_INNER].set(w_dtfold)
    w_xp = w_xp.at[:, D_INNER:D_INNER + D_STATE].set(params["w_xb"])
    w_xp = w_xp.at[:, D_INNER + XP_SEG:D_INNER + XP_SEG + D_STATE].set(params["w_xc"])
    w_xp = w_xp.astype(bf16)

    w_out = params["w_out"].astype(bf16)
    # lane-pad fc so the final store is lane-dense; wrapper slices back to QUES columns
    w_fc = jnp.pad(params["w_fc"], ((0, 0), (0, OUT_PAD - QUES))).astype(bf16)
    b_fc = jnp.pad(params["b_fc"], ((0, 0), (0, OUT_PAD - QUES)))

    weights = [params["ln0_g"], params["ln0_b"], w_inx, w_inz,
               params["conv_w"], params["conv_b"], w_xp,
               params["b_dt"], params["a_log"], params["d_par"],
               w_out, params["ln1_g"], params["ln1_b"], w_fc, b_fc]

    in_specs = [pl.BlockSpec((M_ROWS, D_MODEL), lambda i: (0, 0))]
    in_specs += [pl.BlockSpec(w.shape, lambda i, n=w.ndim: (0,) * n) for w in weights]

    out2 = pl.pallas_call(
        mamba_cont_kernel,
        out_shape=jax.ShapeDtypeStruct((M_ROWS, OUT_PAD), jnp.float32),
        grid=(1,),
        in_specs=in_specs,
        out_specs=pl.BlockSpec((M_ROWS, OUT_PAD), lambda i: (0, 0)),
        scratch_shapes=[
            pltpu.VMEM((SEQ, BATCH, D_STATE, D_INNER), jnp.float32),   # hoisted exp(dt*A)
            pltpu.VMEM((SEQ, BATCH, D_STATE, D_INNER), jnp.float32),   # hoisted B*(dt*x)
        ],
        compiler_params=pltpu.CompilerParams(
            dimension_semantics=("arbitrary",),
            # TODO(synk): at full model scale (d_model=1024, d_inner=2048) set
            # vmem_limit_bytes and mark weight inputs pipeline_mode=pl.Buffered(1).
        ),
    )(inp_tm, *weights)

    out = out2.reshape(SEQ, BATCH, OUT_PAD).transpose(1, 0, 2)   # back to (B, S, OUT_PAD)
    return out[:, :, :QUES]


# ---------------- pure-JAX reference (same math, f32, unfused weights) ------------------
def forward_ref(params, x_ids, q_ids):
    e = params["emb"][x_ids]
    c = params["qcont"][q_ids]
    inp = jnp.concatenate([e, c], axis=-1)                       # (B, S, D_MODEL)
    h = _layernorm(inp, params["ln0_g"], params["ln0_b"])

    xi = h @ params["w_inx"]
    zg = h @ params["w_inz"]
    xpad = jnp.pad(xi, ((0, 0), (D_CONV - 1, 0), (0, 0)))
    acc = jnp.zeros_like(xi) + params["conv_b"]
    for k in range(D_CONV):
        acc = acc + xpad[:, k:k + SEQ, :] * params["conv_w"][k]
    xc = _silu_ref(acc)

    dtr = xc @ params["w_xdt"]
    bm = xc @ params["w_xb"]
    cm = xc @ params["w_xc"]
    dt = _softplus(dtr @ params["w_dt"] + params["b_dt"])
    a_t = -jnp.exp(params["a_log"])                              # (D_STATE, D_INNER)

    def step(hst, xs):
        dt_t, x_t, b_t, c_t = xs                                 # (B,DI),(B,DI),(B,DS),(B,DS)
        d_a = jnp.exp(dt_t[:, None, :] * a_t[None])
        hst = d_a * hst + b_t[:, :, None] * (dt_t * x_t)[:, None, :]
        y_t = jnp.sum(hst * c_t[:, :, None], axis=1) + params["d_par"] * x_t
        return hst, y_t

    xs = (jnp.swapaxes(dt, 0, 1), jnp.swapaxes(xc, 0, 1),
          jnp.swapaxes(bm, 0, 1), jnp.swapaxes(cm, 0, 1))
    h0 = jnp.zeros((x_ids.shape[0], D_STATE, D_INNER), jnp.float32)
    _, ys = jax.lax.scan(step, h0, xs)
    y = jnp.swapaxes(ys, 0, 1) * _silu_ref(zg)

    m = y @ params["w_out"]
    h1 = _layernorm(m, params["ln1_g"], params["ln1_b"])
    return _sigmoid_ref(h1 @ params["w_fc"] + params["b_fc"])


# ---------------- deterministic parameter init ------------------------------------------
def init_params(key):
    ks = jax.random.split(key, 20)

    def nrm(k, shape, scale=0.02):
        return (scale * jax.random.normal(k, shape)).astype(jnp.float32)

    p = {}
    p["emb"] = nrm(ks[0], (2 * QUES + 1, EMB), 1.0)              # interaction_emb.weight
    p["qcont"] = nrm(ks[1], (QUES, CONT), 1.0)                   # ques_cont table
    p["ln0_g"] = (jnp.ones((1, D_MODEL), jnp.float32) + nrm(ks[2], (1, D_MODEL), 0.1))
    p["ln0_b"] = nrm(ks[3], (1, D_MODEL), 0.1)
    p["w_inx"] = nrm(ks[4], (D_MODEL, D_INNER))                  # in_proj (x half), no bias
    p["w_inz"] = nrm(ks[5], (D_MODEL, D_INNER))                  # in_proj (z half), no bias
    p["conv_w"] = nrm(ks[6], (D_CONV, D_INNER), 0.1)             # depthwise conv1d weight
    p["conv_b"] = nrm(ks[7], (1, D_INNER), 0.1)                  # conv bias
    p["w_xdt"] = nrm(ks[8], (D_INNER, DT_RANK))                  # x_proj dt columns
    p["w_xb"] = nrm(ks[9], (D_INNER, D_STATE))                   # x_proj B columns
    p["w_xc"] = nrm(ks[10], (D_INNER, D_STATE))                  # x_proj C columns
    p["w_dt"] = nrm(ks[11], (DT_RANK, D_INNER), 0.1)             # dt_proj weight
    p["b_dt"] = nrm(ks[12], (1, D_INNER), 0.1)                   # dt_proj bias
    # Mamba A init: A[d, n] = n+1 -> A_log = log(A); stored transposed (d_state, d_inner)
    p["a_log"] = jnp.log(jnp.broadcast_to(
        jnp.arange(1, D_STATE + 1, dtype=jnp.float32)[:, None], (D_STATE, D_INNER)))
    p["d_par"] = jnp.ones((1, D_INNER), jnp.float32)             # Mamba D
    p["w_out"] = nrm(ks[13], (D_INNER, D_MODEL))                 # out_proj, no bias
    p["ln1_g"] = (jnp.ones((1, D_MODEL), jnp.float32) + nrm(ks[14], (1, D_MODEL), 0.1))
    p["ln1_b"] = nrm(ks[15], (1, D_MODEL), 0.1)
    p["w_fc"] = nrm(ks[16], (D_MODEL, QUES))                     # fc weight (transposed)
    p["b_fc"] = nrm(ks[17], (1, QUES), 0.1)                      # fc bias
    return p


if __name__ == "__main__":
    key = jax.random.PRNGKey(0)
    pkey, xkey, qkey = jax.random.split(key, 3)
    params = init_params(pkey)

    x = jax.random.randint(xkey, (BATCH, SEQ), 0, 2 * QUES + 1, dtype=jnp.int32)
    q_id = jax.random.randint(qkey, (BATCH, SEQ), 0, QUES, dtype=jnp.int32)

    out = jax.block_until_ready(mamba_cont_forward(x, q_id, params))
    assert out.shape == (BATCH, SEQ, QUES) and out.dtype == jnp.float32

    with jax.default_matmul_precision("highest"):
        ref = jax.block_until_ready(forward_ref(params, x, q_id))

    # kernel uses bf16 MXU operands (f32 accumulation) + approx-reciprocal sigmoid;
    # the reference is all-f32 / exact.
    max_err = float(jnp.max(jnp.abs(out - ref)))
    assert max_err < 2e-2, f"mismatch vs reference: {max_err}"
    print("KERNEL_OK")
</pallas_src>

<mosaic_0001>
module attributes {stable_mosaic.version = 11 : i64} {
  func.func @mamba_cont_kernel(%arg0: i32, %arg1: memref<64x128xf32, #tpu.memory_space<vmem>>, %arg2: memref<1x128xf32, #tpu.memory_space<vmem>>, %arg3: memref<1x128xf32, #tpu.memory_space<vmem>>, %arg4: memref<128x256xbf16, #tpu.memory_space<vmem>>, %arg5: memref<128x256xbf16, #tpu.memory_space<vmem>>, %arg6: memref<4x256xf32, #tpu.memory_space<vmem>>, %arg7: memref<1x256xf32, #tpu.memory_space<vmem>>, %arg8: memref<256x512xbf16, #tpu.memory_space<vmem>>, %arg9: memref<1x256xf32, #tpu.memory_space<vmem>>, %arg10: memref<8x256xf32, #tpu.memory_space<vmem>>, %arg11: memref<1x256xf32, #tpu.memory_space<vmem>>, %arg12: memref<256x128xbf16, #tpu.memory_space<vmem>>, %arg13: memref<1x128xf32, #tpu.memory_space<vmem>>, %arg14: memref<1x128xf32, #tpu.memory_space<vmem>>, %arg15: memref<128x128xbf16, #tpu.memory_space<vmem>>, %arg16: memref<1x128xf32, #tpu.memory_space<vmem>>, %arg17: memref<64x128xf32, #tpu.memory_space<vmem>>, %arg18: memref<8x8x8x256xf32, #tpu.memory_space<vmem>>, %arg19: memref<8x8x8x256xf32, #tpu.memory_space<vmem>>) attributes {dimension_semantics = [#tpu.dimension_semantics<arbitrary>], iteration_bounds = array<i64: 1>, scalar_prefetch = 0 : i64, scratch_operands = 2 : i64, tpu.core_type = #tpu.core_type<tc>, window_params = [{pipeline_mode = #tpu.pipeline_mode<synchronous>, transform_indices = @transform_0, window_bounds = array<i64: 64, 128>}, {pipeline_mode = #tpu.pipeline_mode<synchronous>, transform_indices = @transform_1, window_bounds = array<i64: 1, 128>}, {pipeline_mode = #tpu.pipeline_mode<synchronous>, transform_indices = @transform_2, window_bounds = array<i64: 1, 128>}, {pipeline_mode = #tpu.pipeline_mode<synchronous>, transform_indices = @transform_3, window_bounds = array<i64: 128, 256>}, {pipeline_mode = #tpu.pipeline_mode<synchronous>, transform_indices = @transform_4, window_bounds = array<i64: 128, 256>}, {pipeline_mode = #tpu.pipeline_mode<synchronous>, transform_indices = @transform_5, window_bounds = array<i64: 4, 256>}, {pipeline_mode = #tpu.pipeline_mode<synchronous>, transform_indices = @transform_6, window_bounds = array<i64: 1, 256>}, {pipeline_mode = #tpu.pipeline_mode<synchronous>, transform_indices = @transform_7, window_bounds = array<i64: 256, 512>}, {pipeline_mode = #tpu.pipeline_mode<synchronous>, transform_indices = @transform_8, window_bounds = array<i64: 1, 256>}, {pipeline_mode = #tpu.pipeline_mode<synchronous>, transform_indices = @transform_9, window_bounds = array<i64: 8, 256>}, {pipeline_mode = #tpu.pipeline_mode<synchronous>, transform_indices = @transform_10, window_bounds = array<i64: 1, 256>}, {pipeline_mode = #tpu.pipeline_mode<synchronous>, transform_indices = @transform_11, window_bounds = array<i64: 256, 128>}, {pipeline_mode = #tpu.pipeline_mode<synchronous>, transform_indices = @transform_12, window_bounds = array<i64: 1, 128>}, {pipeline_mode = #tpu.pipeline_mode<synchronous>, transform_indices = @transform_13, window_bounds = array<i64: 1, 128>}, {pipeline_mode = #tpu.pipeline_mode<synchronous>, transform_indices = @transform_14, window_bounds = array<i64: 128, 128>}, {pipeline_mode = #tpu.pipeline_mode<synchronous>, transform_indices = @transform_15, window_bounds = array<i64: 1, 128>}, {pipeline_mode = #tpu.pipeline_mode<synchronous>, transform_indices = @transform_16, window_bounds = array<i64: 64, 128>}]} {
    %c0 = arith.constant 0 : index
    %c0_0 = arith.constant 0 : index
    %0 = vector.load %arg1[%c0, %c0_0] : memref<64x128xf32, #tpu.memory_space<vmem>>, vector<64x128xf32>
    %c0_1 = arith.constant 0 : index
    %c0_2 = arith.constant 0 : index
    %1 = vector.load %arg2[%c0_1, %c0_2] : memref<1x128xf32, #tpu.memory_space<vmem>>, vector<1x128xf32>
    %c0_3 = arith.constant 0 : index
    %c0_4 = arith.constant 0 : index
    %2 = vector.load %arg3[%c0_3, %c0_4] : memref<1x128xf32, #tpu.memory_space<vmem>>, vector<1x128xf32>
    %cst = arith.constant dense<0.000000e+00> : vector<64xf32>
    %3 = vector.multi_reduction <add>, %0, %cst [1] : vector<64x128xf32> to vector<64xf32>
    %4 = vector.shape_cast %3 : vector<64xf32> to vector<64x1xf32>
    %cst_5 = arith.constant 1.280000e+02 : f32
    %5 = vector.broadcast %cst_5 : f32 to vector<64x1xf32>
    %6 = arith.divf %4, %5 : vector<64x1xf32>
    %7 = vector.broadcast %6 : vector<64x1xf32> to vector<64x128xf32>
    %8 = arith.subf %0, %7 : vector<64x128xf32>
    %9 = arith.mulf %8, %8 : vector<64x128xf32>
    %cst_6 = arith.constant dense<0.000000e+00> : vector<64xf32>
    %10 = vector.multi_reduction <add>, %9, %cst_6 [1] : vector<64x128xf32> to vector<64xf32>
    %11 = vector.shape_cast %10 : vector<64xf32> to vector<64x1xf32>
    %cst_7 = arith.constant 1.280000e+02 : f32
    %12 = vector.broadcast %cst_7 : f32 to vector<64x1xf32>
    %13 = arith.divf %11, %12 : vector<64x1xf32>
    %14 = vector.broadcast %6 : vector<64x1xf32> to vector<64x128xf32>
    %15 = arith.subf %0, %14 : vector<64x128xf32>
    %cst_8 = arith.constant 9.99999996E-13 : f32
    %16 = vector.broadcast %cst_8 : f32 to vector<64x1xf32>
    %17 = arith.addf %13, %16 : vector<64x1xf32>
    %18 = math.sqrt %17 : vector<64x1xf32>
    %19 = vector.broadcast %18 : vector<64x1xf32> to vector<64x128xf32>
    %20 = arith.divf %15, %19 : vector<64x128xf32>
    %21 = vector.broadcast %1 : vector<1x128xf32> to vector<64x128xf32>
    %22 = arith.mulf %20, %21 : vector<64x128xf32>
    %23 = vector.broadcast %2 : vector<1x128xf32> to vector<64x128xf32>
    %24 = arith.addf %22, %23 : vector<64x128xf32>
    %25 = arith.truncf %24 : vector<64x128xf32> to vector<64x128xbf16>
    %c0_9 = arith.constant 0 : index
    %c0_10 = arith.constant 0 : index
    %26 = vector.load %arg4[%c0_9, %c0_10] : memref<128x256xbf16, #tpu.memory_space<vmem>>, vector<128x256xbf16>
    %cst_11 = arith.constant dense<0.000000e+00> : vector<64x256xf32>
    %27 = tpu.matmul %25, %26, %cst_11 {dimension_numbers = #tpu.dot_dimension_numbers<[1], [0], [0], [1], [0, 0, 1, 1], [], []>} : vector<64x128xbf16>, vector<128x256xbf16>, vector<64x256xf32> -> vector<64x256xf32>
    %c0_12 = arith.constant 0 : index
    %c0_13 = arith.constant 0 : index
    %28 = vector.load %arg6[%c0_12, %c0_13] : memref<4x256xf32, #tpu.memory_space<vmem>>, vector<4x256xf32>
    %c0_14 = arith.constant 0 : index
    %c0_15 = arith.constant 0 : index
    %29 = vector.load %arg7[%c0_14, %c0_15] : memref<1x256xf32, #tpu.memory_space<vmem>>, vector<1x256xf32>
    %30 = vector.extract_strided_slice %28 {offsets = [3, 0], sizes = [1, 256], strides = [1, 1]} : vector<4x256xf32> to vector<1x256xf32>
    %31 = vector.broadcast %30 : vector<1x256xf32> to vector<64x256xf32>
    %32 = arith.mulf %27, %31 : vector<64x256xf32>
    %33 = vector.broadcast %29 : vector<1x256xf32> to vector<64x256xf32>
    %34 = arith.addf %33, %32 : vector<64x256xf32>
    %cst_16 = arith.constant 0.000000e+00 : f32
    %35 = vector.broadcast %cst_16 : f32 to vector<8x256xf32>
    %36 = vector.extract_strided_slice %27 {offsets = [0, 0], sizes = [56, 256], strides = [1, 1]} : vector<64x256xf32> to vector<56x256xf32>
    %37 = tpu.concatenate %35, %36 in 0 : vector<8x256xf32>, vector<56x256xf32> -> vector<64x256xf32>
    %38 = vector.extract_strided_slice %28 {offsets = [2, 0], sizes = [1, 256], strides = [1, 1]} : vector<4x256xf32> to vector<1x256xf32>
    %39 = vector.broadcast %38 : vector<1x256xf32> to vector<64x256xf32>
    %40 = arith.mulf %37, %39 : vector<64x256xf32>
    %41 = arith.addf %34, %40 : vector<64x256xf32>
    %cst_17 = arith.constant 0.000000e+00 : f32
    %42 = vector.broadcast %cst_17 : f32 to vector<16x256xf32>
    %43 = vector.extract_strided_slice %27 {offsets = [0, 0], sizes = [48, 256], strides = [1, 1]} : vector<64x256xf32> to vector<48x256xf32>
    %44 = tpu.concatenate %42, %43 in 0 : vector<16x256xf32>, vector<48x256xf32> -> vector<64x256xf32>
    %45 = vector.extract_strided_slice %28 {offsets = [1, 0], sizes = [1, 256], strides = [1, 1]} : vector<4x256xf32> to vector<1x256xf32>
    %46 = vector.broadcast %45 : vector<1x256xf32> to vector<64x256xf32>
    %47 = arith.mulf %44, %46 : vector<64x256xf32>
    %48 = arith.addf %41, %47 : vector<64x256xf32>
    %cst_18 = arith.constant 0.000000e+00 : f32
    %49 = vector.broadcast %cst_18 : f32 to vector<24x256xf32>
    %50 = vector.extract_strided_slice %27 {offsets = [0, 0], sizes = [40, 256], strides = [1, 1]} : vector<64x256xf32> to vector<40x256xf32>
    %51 = tpu.concatenate %49, %50 in 0 : vector<24x256xf32>, vector<40x256xf32> -> vector<64x256xf32>
    %52 = vector.extract_strided_slice %28 {offsets = [0, 0], sizes = [1, 256], strides = [1, 1]} : vector<4x256xf32> to vector<1x256xf32>
    %53 = vector.broadcast %52 : vector<1x256xf32> to vector<64x256xf32>
    %54 = arith.mulf %51, %53 : vector<64x256xf32>
    %55 = arith.addf %48, %54 : vector<64x256xf32>
    %cst_19 = arith.constant 0.000000e+00 : f32
    %56 = vector.broadcast %cst_19 : f32 to vector<64x256xf32>
    %57 = arith.subf %56, %55 : vector<64x256xf32>
    %58 = math.exp %57 : vector<64x256xf32>
    %cst_20 = arith.constant 1.000000e+00 : f32
    %59 = vector.broadcast %cst_20 : f32 to vector<64x256xf32>
    %60 = arith.addf %59, %58 : vector<64x256xf32>
    %61 = tpu.reciprocal %60 {approx = true} : vector<64x256xf32> -> vector<64x256xf32>
    %62 = arith.mulf %55, %61 : vector<64x256xf32>
    %63 = arith.truncf %62 : vector<64x256xf32> to vector<64x256xbf16>
    %c0_21 = arith.constant 0 : index
    %c0_22 = arith.constant 0 : index
    %64 = vector.load %arg8[%c0_21, %c0_22] : memref<256x512xbf16, #tpu.memory_space<vmem>>, vector<256x512xbf16>
    %cst_23 = arith.constant dense<0.000000e+00> : vector<64x512xf32>
    %65 = tpu.matmul %63, %64, %cst_23 {dimension_numbers = #tpu.dot_dimension_numbers<[1], [0], [0], [1], [0, 0, 1, 1], [], []>} : vector<64x256xbf16>, vector<256x512xbf16>, vector<64x512xf32> -> vector<64x512xf32>
    %66 = vector.extract_strided_slice %65 {offsets = [0, 0], sizes = [64, 256], strides = [1, 1]} : vector<64x512xf32> to vector<64x256xf32>
    %c0_24 = arith.constant 0 : index
    %c0_25 = arith.constant 0 : index
    %67 = vector.load %arg9[%c0_24, %c0_25] : memref<1x256xf32, #tpu.memory_space<vmem>>, vector<1x256xf32>
    %68 = vector.broadcast %67 : vector<1x256xf32> to vector<64x256xf32>
    %69 = arith.addf %66, %68 : vector<64x256xf32>
    %cst_26 = arith.constant 0.000000e+00 : f32
    %70 = vector.broadcast %cst_26 : f32 to vector<64x256xf32>
    %71 = arith.maximumf %69, %70 : vector<64x256xf32>
    %72 = math.absf %69 : vector<64x256xf32>
    %cst_27 = arith.constant 0.000000e+00 : f32
    %73 = vector.broadcast %cst_27 : f32 to vector<64x256xf32>
    %74 = arith.subf %73, %72 : vector<64x256xf32>
    %75 = math.exp %74 : vector<64x256xf32>
    %cst_28 = arith.constant 1.000000e+00 : f32
    %76 = vector.broadcast %cst_28 : f32 to vector<64x256xf32>
    %77 = arith.addf %76, %75 : vector<64x256xf32>
    %78 = math.log %77 : vector<64x256xf32>
    %79 = arith.addf %71, %78 : vector<64x256xf32>
    %80 = vector.extract_strided_slice %65 {offsets = [0, 256], sizes = [64, 8], strides = [1, 1]} : vector<64x512xf32> to vector<64x8xf32>
    %81 = vector.extract_strided_slice %65 {offsets = [0, 384], sizes = [64, 8], strides = [1, 1]} : vector<64x512xf32> to vector<64x8xf32>
    %c0_29 = arith.constant 0 : index
    %c0_30 = arith.constant 0 : index
    %82 = vector.load %arg10[%c0_29, %c0_30] : memref<8x256xf32, #tpu.memory_space<vmem>>, vector<8x256xf32>
    %83 = math.exp %82 : vector<8x256xf32>
    %cst_31 = arith.constant 0.000000e+00 : f32
    %84 = vector.broadcast %cst_31 : f32 to vector<8x256xf32>
    %85 = arith.subf %84, %83 : vector<8x256xf32>
    %c0_32 = arith.constant 0 : index
    %c0_33 = arith.constant 0 : index
    %86 = vector.load %arg11[%c0_32, %c0_33] : memref<1x256xf32, #tpu.memory_space<vmem>>, vector<1x256xf32>
    %87 = vector.extract_strided_slice %79 {offsets = [0, 0], sizes = [8, 256], strides = [1, 1]} : vector<64x256xf32> to vector<8x256xf32>
    %88 = vector.shape_cast %87 : vector<8x256xf32> to vector<8x1x256xf32>
    %89 = vector.shape_cast %85 : vector<8x256xf32> to vector<1x8x256xf32>
    %90 = vector.broadcast %88 : vector<8x1x256xf32> to vector<8x8x256xf32>
    %91 = vector.broadcast %89 : vector<1x8x256xf32> to vector<8x8x256xf32>
    %92 = arith.mulf %90, %91 : vector<8x8x256xf32>
    %93 = math.exp %92 : vector<8x8x256xf32>
    %c0_34 = arith.constant 0 : index
    %c0_35 = arith.constant 0 : index
    %c0_36 = arith.constant 0 : index
    %c0_37 = arith.constant 0 : index
    %94 = vector.load %arg18[%c0_34, %c0_35, %c0_36, %c0_37] : memref<8x8x8x256xf32, #tpu.memory_space<vmem>>, vector<1x8x8x256xf32>
    %95 = vector.shape_cast %94 : vector<1x8x8x256xf32> to vector<8x8x256xf32>
    %96 = vector.shape_cast %93 : vector<8x8x256xf32> to vector<1x8x8x256xf32>
    tpu.vector_store %arg18[%c0_34, %c0_35, %c0_36, %c0_37], %96 {strides = array<i32>} : memref<8x8x8x256xf32, #tpu.memory_space<vmem>>, vector<1x8x8x256xf32>,
    %97 = vector.extract_strided_slice %62 {offsets = [0, 0], sizes = [8, 256], strides = [1, 1]} : vector<64x256xf32> to vector<8x256xf32>
    %98 = arith.mulf %87, %97 : vector<8x256xf32>
    %99 = vector.extract_strided_slice %80 {offsets = [0, 0], sizes = [8, 8], strides = [1, 1]} : vector<64x8xf32> to vector<8x8xf32>
    %100 = vector.shape_cast %99 : vector<8x8xf32> to vector<8x8x1xf32>
    %101 = vector.shape_cast %98 : vector<8x256xf32> to vector<8x1x256xf32>
    %102 = vector.broadcast %100 : vector<8x8x1xf32> to vector<8x8x256xf32>
    %103 = vector.broadcast %101 : vector<8x1x256xf32> to vector<8x8x256xf32>
    %104 = arith.mulf %102, %103 : vector<8x8x256xf32>
    %c0_38 = arith.constant 0 : index
    %c0_39 = arith.constant 0 : index
    %c0_40 = arith.constant 0 : index
    %c0_41 = arith.constant 0 : index
    %105 = vector.load %arg19[%c0_38, %c0_39, %c0_40, %c0_41] : memref<8x8x8x256xf32, #tpu.memory_space<vmem>>, vector<1x8x8x256xf32>
    %106 = vector.shape_cast %105 : vector<1x8x8x256xf32> to vector<8x8x256xf32>
    %107 = vector.shape_cast %104 : vector<8x8x256xf32> to vector<1x8x8x256xf32>
    tpu.vector_store %arg19[%c0_38, %c0_39, %c0_40, %c0_41], %107 {strides = array<i32>} : memref<8x8x8x256xf32, #tpu.memory_space<vmem>>, vector<1x8x8x256xf32>,
    %108 = vector.extract_strided_slice %79 {offsets = [8, 0], sizes = [8, 256], strides = [1, 1]} : vector<64x256xf32> to vector<8x256xf32>
    %109 = vector.shape_cast %108 : vector<8x256xf32> to vector<8x1x256xf32>
    %110 = vector.shape_cast %85 : vector<8x256xf32> to vector<1x8x256xf32>
    %111 = vector.broadcast %109 : vector<8x1x256xf32> to vector<8x8x256xf32>
    %112 = vector.broadcast %110 : vector<1x8x256xf32> to vector<8x8x256xf32>
    %113 = arith.mulf %111, %112 : vector<8x8x256xf32>
    %114 = math.exp %113 : vector<8x8x256xf32>
    %c1 = arith.constant 1 : index
    %c0_42 = arith.constant 0 : index
    %c0_43 = arith.constant 0 : index
    %c0_44 = arith.constant 0 : index
    %115 = vector.load %arg18[%c1, %c0_42, %c0_43, %c0_44] : memref<8x8x8x256xf32, #tpu.memory_space<vmem>>, vector<1x8x8x256xf32>
    %116 = vector.shape_cast %115 : vector<1x8x8x256xf32> to vector<8x8x256xf32>
    %117 = vector.shape_cast %114 : vector<8x8x256xf32> to vector<1x8x8x256xf32>
    tpu.vector_store %arg18[%c1, %c0_42, %c0_43, %c0_44], %117 {strides = array<i32>} : memref<8x8x8x256xf32, #tpu.memory_space<vmem>>, vector<1x8x8x256xf32>,
    %118 = vector.extract_strided_slice %62 {offsets = [8, 0], sizes = [8, 256], strides = [1, 1]} : vector<64x256xf32> to vector<8x256xf32>
    %119 = arith.mulf %108, %118 : vector<8x256xf32>
    %120 = vector.extract_strided_slice %80 {offsets = [8, 0], sizes = [8, 8], strides = [1, 1]} : vector<64x8xf32> to vector<8x8xf32>
    %121 = vector.shape_cast %120 : vector<8x8xf32> to vector<8x8x1xf32>
    %122 = vector.shape_cast %119 : vector<8x256xf32> to vector<8x1x256xf32>
    %123 = vector.broadcast %121 : vector<8x8x1xf32> to vector<8x8x256xf32>
    %124 = vector.broadcast %122 : vector<8x1x256xf32> to vector<8x8x256xf32>
    %125 = arith.mulf %123, %124 : vector<8x8x256xf32>
    %c1_45 = arith.constant 1 : index
    %c0_46 = arith.constant 0 : index
    %c0_47 = arith.constant 0 : index
    %c0_48 = arith.constant 0 : index
    %126 = vector.load %arg19[%c1_45, %c0_46, %c0_47, %c0_48] : memref<8x8x8x256xf32, #tpu.memory_space<vmem>>, vector<1x8x8x256xf32>
    %127 = vector.shape_cast %126 : vector<1x8x8x256xf32> to vector<8x8x256xf32>
    %128 = vector.shape_cast %125 : vector<8x8x256xf32> to vector<1x8x8x256xf32>
    tpu.vector_store %arg19[%c1_45, %c0_46, %c0_47, %c0_48], %128 {strides = array<i32>} : memref<8x8x8x256xf32, #tpu.memory_space<vmem>>, vector<1x8x8x256xf32>,
    %129 = vector.extract_strided_slice %79 {offsets = [16, 0], sizes = [8, 256], strides = [1, 1]} : vector<64x256xf32> to vector<8x256xf32>
    %130 = vector.shape_cast %129 : vector<8x256xf32> to vector<8x1x256xf32>
    %131 = vector.shape_cast %85 : vector<8x256xf32> to vector<1x8x256xf32>
    %132 = vector.broadcast %130 : vector<8x1x256xf32> to vector<8x8x256xf32>
    %133 = vector.broadcast %131 : vector<1x8x256xf32> to vector<8x8x256xf32>
    %134 = arith.mulf %132, %133 : vector<8x8x256xf32>
    %135 = math.exp %134 : vector<8x8x256xf32>
    %c2 = arith.constant 2 : index
    %c0_49 = arith.constant 0 : index
    %c0_50 = arith.constant 0 : index
    %c0_51 = arith.constant 0 : index
    %136 = vector.load %arg18[%c2, %c0_49, %c0_50, %c0_51] : memref<8x8x8x256xf32, #tpu.memory_space<vmem>>, vector<1x8x8x256xf32>
    %137 = vector.shape_cast %136 : vector<1x8x8x256xf32> to vector<8x8x256xf32>
    %138 = vector.shape_cast %135 : vector<8x8x256xf32> to vector<1x8x8x256xf32>
    tpu.vector_store %arg18[%c2, %c0_49, %c0_50, %c0_51], %138 {strides = array<i32>} : memref<8x8x8x256xf32, #tpu.memory_space<vmem>>, vector<1x8x8x256xf32>,
    %139 = vector.extract_strided_slice %62 {offsets = [16, 0], sizes = [8, 256], strides = [1, 1]} : vector<64x256xf32> to vector<8x256xf32>
    %140 = arith.mulf %129, %139 : vector<8x256xf32>
    %141 = vector.extract_strided_slice %80 {offsets = [16, 0], sizes = [8, 8], strides = [1, 1]} : vector<64x8xf32> to vector<8x8xf32>
    %142 = vector.shape_cast %141 : vector<8x8xf32> to vector<8x8x1xf32>
    %143 = vector.shape_cast %140 : vector<8x256xf32> to vector<8x1x256xf32>
    %144 = vector.broadcast %142 : vector<8x8x1xf32> to vector<8x8x256xf32>
    %145 = vector.broadcast %143 : vector<8x1x256xf32> to vector<8x8x256xf32>
    %146 = arith.mulf %144, %145 : vector<8x8x256xf32>
    %c2_52 = arith.constant 2 : index
    %c0_53 = arith.constant 0 : index
    %c0_54 = arith.constant 0 : index
    %c0_55 = arith.constant 0 : index
    %147 = vector.load %arg19[%c2_52, %c0_53, %c0_54, %c0_55] : memref<8x8x8x256xf32, #tpu.memory_space<vmem>>, vector<1x8x8x256xf32>
    %148 = vector.shape_cast %147 : vector<1x8x8x256xf32> to vector<8x8x256xf32>
    %149 = vector.shape_cast %146 : vector<8x8x256xf32> to vector<1x8x8x256xf32>
    tpu.vector_store %arg19[%c2_52, %c0_53, %c0_54, %c0_55], %149 {strides = array<i32>} : memref<8x8x8x256xf32, #tpu.memory_space<vmem>>, vector<1x8x8x256xf32>,
    %150 = vector.extract_strided_slice %79 {offsets = [24, 0], sizes = [8, 256], strides = [1, 1]} : vector<64x256xf32> to vector<8x256xf32>
    %151 = vector.shape_cast %150 : vector<8x256xf32> to vector<8x1x256xf32>
    %152 = vector.shape_cast %85 : vector<8x256xf32> to vector<1x8x256xf32>
    %153 = vector.broadcast %151 : vector<8x1x256xf32> to vector<8x8x256xf32>
    %154 = vector.broadcast %152 : vector<1x8x256xf32> to vector<8x8x256xf32>
    %155 = arith.mulf %153, %154 : vector<8x8x256xf32>
    %156 = math.exp %155 : vector<8x8x256xf32>
    %c3 = arith.constant 3 : index
    %c0_56 = arith.constant 0 : index
    %c0_57 = arith.constant 0 : index
    %c0_58 = arith.constant 0 : index
    %157 = vector.load %arg18[%c3, %c0_56, %c0_57, %c0_58] : memref<8x8x8x256xf32, #tpu.memory_space<vmem>>, vector<1x8x8x256xf32>
    %158 = vector.shape_cast %157 : vector<1x8x8x256xf32> to vector<8x8x256xf32>
    %159 = vector.shape_cast %156 : vector<8x8x256xf32> to vector<1x8x8x256xf32>
    tpu.vector_store %arg18[%c3, %c0_56, %c0_57, %c0_58], %159 {strides = array<i32>} : memref<8x8x8x256xf32, #tpu.memory_space<vmem>>, vector<1x8x8x256xf32>,
    %160 = vector.extract_strided_slice %62 {offsets = [24, 0], sizes = [8, 256], strides = [1, 1]} : vector<64x256xf32> to vector<8x256xf32>
    %161 = arith.mulf %150, %160 : vector<8x256xf32>
    %162 = vector.extract_strided_slice %80 {offsets = [24, 0], sizes = [8, 8], strides = [1, 1]} : vector<64x8xf32> to vector<8x8xf32>
    %163 = vector.shape_cast %162 : vector<8x8xf32> to vector<8x8x1xf32>
    %164 = vector.shape_cast %161 : vector<8x256xf32> to vector<8x1x256xf32>
    %165 = vector.broadcast %163 : vector<8x8x1xf32> to vector<8x8x256xf32>
    %166 = vector.broadcast %164 : vector<8x1x256xf32> to vector<8x8x256xf32>
    %167 = arith.mulf %165, %166 : vector<8x8x256xf32>
    %c3_59 = arith.constant 3 : index
    %c0_60 = arith.constant 0 : index
    %c0_61 = arith.constant 0 : index
    %c0_62 = arith.constant 0 : index
    %168 = vector.load %arg19[%c3_59, %c0_60, %c0_61, %c0_62] : memref<8x8x8x256xf32, #tpu.memory_space<vmem>>, vector<1x8x8x256xf32>
    %169 = vector.shape_cast %168 : vector<1x8x8x256xf32> to vector<8x8x256xf32>
    %170 = vector.shape_cast %167 : vector<8x8x256xf32> to vector<1x8x8x256xf32>
    tpu.vector_store %arg19[%c3_59, %c0_60, %c0_61, %c0_62], %170 {strides = array<i32>} : memref<8x8x8x256xf32, #tpu.memory_space<vmem>>, vector<1x8x8x256xf32>,
    %171 = vector.extract_strided_slice %79 {offsets = [32, 0], sizes = [8, 256], strides = [1, 1]} : vector<64x256xf32> to vector<8x256xf32>
    %172 = vector.shape_cast %171 : vector<8x256xf32> to vector<8x1x256xf32>
    %173 = vector.shape_cast %85 : vector<8x256xf32> to vector<1x8x256xf32>
    %174 = vector.broadcast %172 : vector<8x1x256xf32> to vector<8x8x256xf32>
    %175 = vector.broadcast %173 : vector<1x8x256xf32> to vector<8x8x256xf32>
    %176 = arith.mulf %174, %175 : vector<8x8x256xf32>
    %177 = math.exp %176 : vector<8x8x256xf32>
    %c4 = arith.constant 4 : index
    %c0_63 = arith.constant 0 : index
    %c0_64 = arith.constant 0 : index
    %c0_65 = arith.constant 0 : index
    %178 = vector.load %arg18[%c4, %c0_63, %c0_64, %c0_65] : memref<8x8x8x256xf32, #tpu.memory_space<vmem>>, vector<1x8x8x256xf32>
    %179 = vector.shape_cast %178 : vector<1x8x8x256xf32> to vector<8x8x256xf32>
    %180 = vector.shape_cast %177 : vector<8x8x256xf32> to vector<1x8x8x256xf32>
    tpu.vector_store %arg18[%c4, %c0_63, %c0_64, %c0_65], %180 {strides = array<i32>} : memref<8x8x8x256xf32, #tpu.memory_space<vmem>>, vector<1x8x8x256xf32>,
    %181 = vector.extract_strided_slice %62 {offsets = [32, 0], sizes = [8, 256], strides = [1, 1]} : vector<64x256xf32> to vector<8x256xf32>
    %182 = arith.mulf %171, %181 : vector<8x256xf32>
    %183 = vector.extract_strided_slice %80 {offsets = [32, 0], sizes = [8, 8], strides = [1, 1]} : vector<64x8xf32> to vector<8x8xf32>
    %184 = vector.shape_cast %183 : vector<8x8xf32> to vector<8x8x1xf32>
    %185 = vector.shape_cast %182 : vector<8x256xf32> to vector<8x1x256xf32>
    %186 = vector.broadcast %184 : vector<8x8x1xf32> to vector<8x8x256xf32>
    %187 = vector.broadcast %185 : vector<8x1x256xf32> to vector<8x8x256xf32>
    %188 = arith.mulf %186, %187 : vector<8x8x256xf32>
    %c4_66 = arith.constant 4 : index
    %c0_67 = arith.constant 0 : index
    %c0_68 = arith.constant 0 : index
    %c0_69 = arith.constant 0 : index
    %189 = vector.load %arg19[%c4_66, %c0_67, %c0_68, %c0_69] : memref<8x8x8x256xf32, #tpu.memory_space<vmem>>, vector<1x8x8x256xf32>
    %190 = vector.shape_cast %189 : vector<1x8x8x256xf32> to vector<8x8x256xf32>
    %191 = vector.shape_cast %188 : vector<8x8x256xf32> to vector<1x8x8x256xf32>
    tpu.vector_store %arg19[%c4_66, %c0_67, %c0_68, %c0_69], %191 {strides = array<i32>} : memref<8x8x8x256xf32, #tpu.memory_space<vmem>>, vector<1x8x8x256xf32>,
    %192 = vector.extract_strided_slice %79 {offsets = [40, 0], sizes = [8, 256], strides = [1, 1]} : vector<64x256xf32> to vector<8x256xf32>
    %193 = vector.shape_cast %192 : vector<8x256xf32> to vector<8x1x256xf32>
    %194 = vector.shape_cast %85 : vector<8x256xf32> to vector<1x8x256xf32>
    %195 = vector.broadcast %193 : vector<8x1x256xf32> to vector<8x8x256xf32>
    %196 = vector.broadcast %194 : vector<1x8x256xf32> to vector<8x8x256xf32>
    %197 = arith.mulf %195, %196 : vector<8x8x256xf32>
    %198 = math.exp %197 : vector<8x8x256xf32>
    %c5 = arith.constant 5 : index
    %c0_70 = arith.constant 0 : index
    %c0_71 = arith.constant 0 : index
    %c0_72 = arith.constant 0 : index
    %199 = vector.load %arg18[%c5, %c0_70, %c0_71, %c0_72] : memref<8x8x8x256xf32, #tpu.memory_space<vmem>>, vector<1x8x8x256xf32>
    %200 = vector.shape_cast %199 : vector<1x8x8x256xf32> to vector<8x8x256xf32>
    %201 = vector.shape_cast %198 : vector<8x8x256xf32> to vector<1x8x8x256xf32>
    tpu.vector_store %arg18[%c5, %c0_70, %c0_71, %c0_72], %201 {strides = array<i32>} : memref<8x8x8x256xf32, #tpu.memory_space<vmem>>, vector<1x8x8x256xf32>,
    %202 = vector.extract_strided_slice %62 {offsets = [40, 0], sizes = [8, 256], strides = [1, 1]} : vector<64x256xf32> to vector<8x256xf32>
    %203 = arith.mulf %192, %202 : vector<8x256xf32>
    %204 = vector.extract_strided_slice %80 {offsets = [40, 0], sizes = [8, 8], strides = [1, 1]} : vector<64x8xf32> to vector<8x8xf32>
    %205 = vector.shape_cast %204 : vector<8x8xf32> to vector<8x8x1xf32>
    %206 = vector.shape_cast %203 : vector<8x256xf32> to vector<8x1x256xf32>
    %207 = vector.broadcast %205 : vector<8x8x1xf32> to vector<8x8x256xf32>
    %208 = vector.broadcast %206 : vector<8x1x256xf32> to vector<8x8x256xf32>
    %209 = arith.mulf %207, %208 : vector<8x8x256xf32>
    %c5_73 = arith.constant 5 : index
    %c0_74 = arith.constant 0 : index
    %c0_75 = arith.constant 0 : index
    %c0_76 = arith.constant 0 : index
    %210 = vector.load %arg19[%c5_73, %c0_74, %c0_75, %c0_76] : memref<8x8x8x256xf32, #tpu.memory_space<vmem>>, vector<1x8x8x256xf32>
    %211 = vector.shape_cast %210 : vector<1x8x8x256xf32> to vector<8x8x256xf32>
    %212 = vector.shape_cast %209 : vector<8x8x256xf32> to vector<1x8x8x256xf32>
    tpu.vector_store %arg19[%c5_73, %c0_74, %c0_75, %c0_76], %212 {strides = array<i32>} : memref<8x8x8x256xf32, #tpu.memory_space<vmem>>, vector<1x8x8x256xf32>,
    %213 = vector.extract_strided_slice %79 {offsets = [48, 0], sizes = [8, 256], strides = [1, 1]} : vector<64x256xf32> to vector<8x256xf32>
    %214 = vector.shape_cast %213 : vector<8x256xf32> to vector<8x1x256xf32>
    %215 = vector.shape_cast %85 : vector<8x256xf32> to vector<1x8x256xf32>
    %216 = vector.broadcast %214 : vector<8x1x256xf32> to vector<8x8x256xf32>
    %217 = vector.broadcast %215 : vector<1x8x256xf32> to vector<8x8x256xf32>
    %218 = arith.mulf %216, %217 : vector<8x8x256xf32>
    %219 = math.exp %218 : vector<8x8x256xf32>
    %c6 = arith.constant 6 : index
    %c0_77 = arith.constant 0 : index
    %c0_78 = arith.constant 0 : index
    %c0_79 = arith.constant 0 : index
    %220 = vector.load %arg18[%c6, %c0_77, %c0_78, %c0_79] : memref<8x8x8x256xf32, #tpu.memory_space<vmem>>, vector<1x8x8x256xf32>
    %221 = vector.shape_cast %220 : vector<1x8x8x256xf32> to vector<8x8x256xf32>
    %222 = vector.shape_cast %219 : vector<8x8x256xf32> to vector<1x8x8x256xf32>
    tpu.vector_store %arg18[%c6, %c0_77, %c0_78, %c0_79], %222 {strides = array<i32>} : memref<8x8x8x256xf32, #tpu.memory_space<vmem>>, vector<1x8x8x256xf32>,
    %223 = vector.extract_strided_slice %62 {offsets = [48, 0], sizes = [8, 256], strides = [1, 1]} : vector<64x256xf32> to vector<8x256xf32>
    %224 = arith.mulf %213, %223 : vector<8x256xf32>
    %225 = vector.extract_strided_slice %80 {offsets = [48, 0], sizes = [8, 8], strides = [1, 1]} : vector<64x8xf32> to vector<8x8xf32>
    %226 = vector.shape_cast %225 : vector<8x8xf32> to vector<8x8x1xf32>
    %227 = vector.shape_cast %224 : vector<8x256xf32> to vector<8x1x256xf32>
    %228 = vector.broadcast %226 : vector<8x8x1xf32> to vector<8x8x256xf32>
    %229 = vector.broadcast %227 : vector<8x1x256xf32> to vector<8x8x256xf32>
    %230 = arith.mulf %228, %229 : vector<8x8x256xf32>
    %c6_80 = arith.constant 6 : index
    %c0_81 = arith.constant 0 : index
    %c0_82 = arith.constant 0 : index
    %c0_83 = arith.constant 0 : index
    %231 = vector.load %arg19[%c6_80, %c0_81, %c0_82, %c0_83] : memref<8x8x8x256xf32, #tpu.memory_space<vmem>>, vector<1x8x8x256xf32>
    %232 = vector.shape_cast %231 : vector<1x8x8x256xf32> to vector<8x8x256xf32>
    %233 = vector.shape_cast %230 : vector<8x8x256xf32> to vector<1x8x8x256xf32>
    tpu.vector_store %arg19[%c6_80, %c0_81, %c0_82, %c0_83], %233 {strides = array<i32>} : memref<8x8x8x256xf32, #tpu.memory_space<vmem>>, vector<1x8x8x256xf32>,
    %234 = vector.extract_strided_slice %79 {offsets = [56, 0], sizes = [8, 256], strides = [1, 1]} : vector<64x256xf32> to vector<8x256xf32>
    %235 = vector.shape_cast %234 : vector<8x256xf32> to vector<8x1x256xf32>
    %236 = vector.shape_cast %85 : vector<8x256xf32> to vector<1x8x256xf32>
    %237 = vector.broadcast %235 : vector<8x1x256xf32> to vector<8x8x256xf32>
    %238 = vector.broadcast %236 : vector<1x8x256xf32> to vector<8x8x256xf32>
    %239 = arith.mulf %237, %238 : vector<8x8x256xf32>
    %240 = math.exp %239 : vector<8x8x256xf32>
    %c7 = arith.constant 7 : index
    %c0_84 = arith.constant 0 : index
    %c0_85 = arith.constant 0 : index
    %c0_86 = arith.constant 0 : index
    %241 = vector.load %arg18[%c7, %c0_84, %c0_85, %c0_86] : memref<8x8x8x256xf32, #tpu.memory_space<vmem>>, vector<1x8x8x256xf32>
    %242 = vector.shape_cast %241 : vector<1x8x8x256xf32> to vector<8x8x256xf32>
    %243 = vector.shape_cast %240 : vector<8x8x256xf32> to vector<1x8x8x256xf32>
    tpu.vector_store %arg18[%c7, %c0_84, %c0_85, %c0_86], %243 {strides = array<i32>} : memref<8x8x8x256xf32, #tpu.memory_space<vmem>>, vector<1x8x8x256xf32>,
    %244 = vector.extract_strided_slice %62 {offsets = [56, 0], sizes = [8, 256], strides = [1, 1]} : vector<64x256xf32> to vector<8x256xf32>
    %245 = arith.mulf %234, %244 : vector<8x256xf32>
    %246 = vector.extract_strided_slice %80 {offsets = [56, 0], sizes = [8, 8], strides = [1, 1]} : vector<64x8xf32> to vector<8x8xf32>
    %247 = vector.shape_cast %246 : vector<8x8xf32> to vector<8x8x1xf32>
    %248 = vector.shape_cast %245 : vector<8x256xf32> to vector<8x1x256xf32>
    %249 = vector.broadcast %247 : vector<8x8x1xf32> to vector<8x8x256xf32>
    %250 = vector.broadcast %248 : vector<8x1x256xf32> to vector<8x8x256xf32>
    %251 = arith.mulf %249, %250 : vector<8x8x256xf32>
    %c7_87 = arith.constant 7 : index
    %c0_88 = arith.constant 0 : index
    %c0_89 = arith.constant 0 : index
    %c0_90 = arith.constant 0 : index
    %252 = vector.load %arg19[%c7_87, %c0_88, %c0_89, %c0_90] : memref<8x8x8x256xf32, #tpu.memory_space<vmem>>, vector<1x8x8x256xf32>
    %253 = vector.shape_cast %252 : vector<1x8x8x256xf32> to vector<8x8x256xf32>
    %254 = vector.shape_cast %251 : vector<8x8x256xf32> to vector<1x8x8x256xf32>
    tpu.vector_store %arg19[%c7_87, %c0_88, %c0_89, %c0_90], %254 {strides = array<i32>} : memref<8x8x8x256xf32, #tpu.memory_space<vmem>>, vector<1x8x8x256xf32>,
    %cst_91 = arith.constant 0.000000e+00 : f32
    %255 = vector.broadcast %cst_91 : f32 to vector<8x8x256xf32>
    %c0_92 = arith.constant 0 : index
    %c0_93 = arith.constant 0 : index
    %c0_94 = arith.constant 0 : index
    %c0_95 = arith.constant 0 : index
    %256 = vector.load %arg18[%c0_92, %c0_93, %c0_94, %c0_95] : memref<8x8x8x256xf32, #tpu.memory_space<vmem>>, vector<1x8x8x256xf32>
    %257 = vector.shape_cast %256 : vector<1x8x8x256xf32> to vector<8x8x256xf32>
    %258 = arith.mulf %257, %255 : vector<8x8x256xf32>
    %c0_96 = arith.constant 0 : index
    %c0_97 = arith.constant 0 : index
    %c0_98 = arith.constant 0 : index
    %c0_99 = arith.constant 0 : index
    %259 = vector.load %arg19[%c0_96, %c0_97, %c0_98, %c0_99] : memref<8x8x8x256xf32, #tpu.memory_space<vmem>>, vector<1x8x8x256xf32>
    %260 = vector.shape_cast %259 : vector<1x8x8x256xf32> to vector<8x8x256xf32>
    %261 = arith.addf %258, %260 : vector<8x8x256xf32>
    %262 = vector.extract_strided_slice %81 {offsets = [0, 0], sizes = [8, 8], strides = [1, 1]} : vector<64x8xf32> to vector<8x8xf32>
    %263 = vector.shape_cast %262 : vector<8x8xf32> to vector<8x8x1xf32>
    %264 = vector.broadcast %263 : vector<8x8x1xf32> to vector<8x8x256xf32>
    %265 = arith.mulf %261, %264 : vector<8x8x256xf32>
    %cst_100 = arith.constant dense<0.000000e+00> : vector<8x256xf32>
    %266 = vector.multi_reduction <add>, %265, %cst_100 [1] : vector<8x8x256xf32> to vector<8x256xf32>
    %c1_101 = arith.constant 1 : index
    %c0_102 = arith.constant 0 : index
    %c0_103 = arith.constant 0 : index
    %c0_104 = arith.constant 0 : index
    %267 = vector.load %arg18[%c1_101, %c0_102, %c0_103, %c0_104] : memref<8x8x8x256xf32, #tpu.memory_space<vmem>>, vector<1x8x8x256xf32>
    %268 = vector.shape_cast %267 : vector<1x8x8x256xf32> to vector<8x8x256xf32>
    %269 = arith.mulf %268, %261 : vector<8x8x256xf32>
    %c1_105 = arith.constant 1 : index
    %c0_106 = arith.constant 0 : index
    %c0_107 = arith.constant 0 : index
    %c0_108 = arith.constant 0 : index
    %270 = vector.load %arg19[%c1_105, %c0_106, %c0_107, %c0_108] : memref<8x8x8x256xf32, #tpu.memory_space<vmem>>, vector<1x8x8x256xf32>
    %271 = vector.shape_cast %270 : vector<1x8x8x256xf32> to vector<8x8x256xf32>
    %272 = arith.addf %269, %271 : vector<8x8x256xf32>
    %273 = vector.extract_strided_slice %81 {offsets = [8, 0], sizes = [8, 8], strides = [1, 1]} : vector<64x8xf32> to vector<8x8xf32>
    %274 = vector.shape_cast %273 : vector<8x8xf32> to vector<8x8x1xf32>
    %275 = vector.broadcast %274 : vector<8x8x1xf32> to vector<8x8x256xf32>
    %276 = arith.mulf %272, %275 : vector<8x8x256xf32>
    %cst_109 = arith.constant dense<0.000000e+00> : vector<8x256xf32>
    %277 = vector.multi_reduction <add>, %276, %cst_109 [1] : vector<8x8x256xf32> to vector<8x256xf32>
    %c2_110 = arith.constant 2 : index
    %c0_111 = arith.constant 0 : index
    %c0_112 = arith.constant 0 : index
    %c0_113 = arith.constant 0 : index
    %278 = vector.load %arg18[%c2_110, %c0_111, %c0_112, %c0_113] : memref<8x8x8x256xf32, #tpu.memory_space<vmem>>, vector<1x8x8x256xf32>
    %279 = vector.shape_cast %278 : vector<1x8x8x256xf32> to vector<8x8x256xf32>
    %280 = arith.mulf %279, %272 : vector<8x8x256xf32>
    %c2_114 = arith.constant 2 : index
    %c0_115 = arith.constant 0 : index
    %c0_116 = arith.constant 0 : index
    %c0_117 = arith.constant 0 : index
    %281 = vector.load %arg19[%c2_114, %c0_115, %c0_116, %c0_117] : memref<8x8x8x256xf32, #tpu.memory_space<vmem>>, vector<1x8x8x256xf32>
    %282 = vector.shape_cast %281 : vector<1x8x8x256xf32> to vector<8x8x256xf32>
    %283 = arith.addf %280, %282 : vector<8x8x256xf32>
    %284 = vector.extract_strided_slice %81 {offsets = [16, 0], sizes = [8, 8], strides = [1, 1]} : vector<64x8xf32> to vector<8x8xf32>
    %285 = vector.shape_cast %284 : vector<8x8xf32> to vector<8x8x1xf32>
    %286 = vector.broadcast %285 : vector<8x8x1xf32> to vector<8x8x256xf32>
    %287 = arith.mulf %283, %286 : vector<8x8x256xf32>
    %cst_118 = arith.constant dense<0.000000e+00> : vector<8x256xf32>
    %288 = vector.multi_reduction <add>, %287, %cst_118 [1] : vector<8x8x256xf32> to vector<8x256xf32>
    %c3_119 = arith.constant 3 : index
    %c0_120 = arith.constant 0 : index
    %c0_121 = arith.constant 0 : index
    %c0_122 = arith.constant 0 : index
    %289 = vector.load %arg18[%c3_119, %c0_120, %c0_121, %c0_122] : memref<8x8x8x256xf32, #tpu.memory_space<vmem>>, vector<1x8x8x256xf32>
    %290 = vector.shape_cast %289 : vector<1x8x8x256xf32> to vector<8x8x256xf32>
    %291 = arith.mulf %290, %283 : vector<8x8x256xf32>
    %c3_123 = arith.constant 3 : index
    %c0_124 = arith.constant 0 : index
    %c0_125 = arith.constant 0 : index
    %c0_126 = arith.constant 0 : index
    %292 = vector.load %arg19[%c3_123, %c0_124, %c0_125, %c0_126] : memref<8x8x8x256xf32, #tpu.memory_space<vmem>>, vector<1x8x8x256xf32>
    %293 = vector.shape_cast %292 : vector<1x8x8x256xf32> to vector<8x8x256xf32>
    %294 = arith.addf %291, %293 : vector<8x8x256xf32>
    %295 = vector.extract_strided_slice %81 {offsets = [24, 0], sizes = [8, 8], strides = [1, 1]} : vector<64x8xf32> to vector<8x8xf32>
    %296 = vector.shape_cast %295 : vector<8x8xf32> to vector<8x8x1xf32>
    %297 = vector.broadcast %296 : vector<8x8x1xf32> to vector<8x8x256xf32>
    %298 = arith.mulf %294, %297 : vector<8x8x256xf32>
    %cst_127 = arith.constant dense<0.000000e+00> : vector<8x256xf32>
    %299 = vector.multi_reduction <add>, %298, %cst_127 [1] : vector<8x8x256xf32> to vector<8x256xf32>
    %c4_128 = arith.constant 4 : index
    %c0_129 = arith.constant 0 : index
    %c0_130 = arith.constant 0 : index
    %c0_131 = arith.constant 0 : index
    %300 = vector.load %arg18[%c4_128, %c0_129, %c0_130, %c0_131] : memref<8x8x8x256xf32, #tpu.memory_space<vmem>>, vector<1x8x8x256xf32>
    %301 = vector.shape_cast %300 : vector<1x8x8x256xf32> to vector<8x8x256xf32>
    %302 = arith.mulf %301, %294 : vector<8x8x256xf32>
    %c4_132 = arith.constant 4 : index
    %c0_133 = arith.constant 0 : index
    %c0_134 = arith.constant 0 : index
    %c0_135 = arith.constant 0 : index
    %303 = vector.load %arg19[%c4_132, %c0_133, %c0_134, %c0_135] : memref<8x8x8x256xf32, #tpu.memory_space<vmem>>, vector<1x8x8x256xf32>
    %304 = vector.shape_cast %303 : vector<1x8x8x256xf32> to vector<8x8x256xf32>
    %305 = arith.addf %302, %304 : vector<8x8x256xf32>
    %306 = vector.extract_strided_slice %81 {offsets = [32, 0], sizes = [8, 8], strides = [1, 1]} : vector<64x8xf32> to vector<8x8xf32>
    %307 = vector.shape_cast %306 : vector<8x8xf32> to vector<8x8x1xf32>
    %308 = vector.broadcast %307 : vector<8x8x1xf32> to vector<8x8x256xf32>
    %309 = arith.mulf %305, %308 : vector<8x8x256xf32>
    %cst_136 = arith.constant dense<0.000000e+00> : vector<8x256xf32>
    %310 = vector.multi_reduction <add>, %309, %cst_136 [1] : vector<8x8x256xf32> to vector<8x256xf32>
    %c5_137 = arith.constant 5 : index
    %c0_138 = arith.constant 0 : index
    %c0_139 = arith.constant 0 : index
    %c0_140 = arith.constant 0 : index
    %311 = vector.load %arg18[%c5_137, %c0_138, %c0_139, %c0_140] : memref<8x8x8x256xf32, #tpu.memory_space<vmem>>, vector<1x8x8x256xf32>
    %312 = vector.shape_cast %311 : vector<1x8x8x256xf32> to vector<8x8x256xf32>
    %313 = arith.mulf %312, %305 : vector<8x8x256xf32>
    %c5_141 = arith.constant 5 : index
    %c0_142 = arith.constant 0 : index
    %c0_143 = arith.constant 0 : index
    %c0_144 = arith.constant 0 : index
    %314 = vector.load %arg19[%c5_141, %c0_142, %c0_143, %c0_144] : memref<8x8x8x256xf32, #tpu.memory_space<vmem>>, vector<1x8x8x256xf32>
    %315 = vector.shape_cast %314 : vector<1x8x8x256xf32> to vector<8x8x256xf32>
    %316 = arith.addf %313, %315 : vector<8x8x256xf32>
    %317 = vector.extract_strided_slice %81 {offsets = [40, 0], sizes = [8, 8], strides = [1, 1]} : vector<64x8xf32> to vector<8x8xf32>
    %318 = vector.shape_cast %317 : vector<8x8xf32> to vector<8x8x1xf32>
    %319 = vector.broadcast %318 : vector<8x8x1xf32> to vector<8x8x256xf32>
    %320 = arith.mulf %316, %319 : vector<8x8x256xf32>
    %cst_145 = arith.constant dense<0.000000e+00> : vector<8x256xf32>
    %321 = vector.multi_reduction <add>, %320, %cst_145 [1] : vector<8x8x256xf32> to vector<8x256xf32>
    %c6_146 = arith.constant 6 : index
    %c0_147 = arith.constant 0 : index
    %c0_148 = arith.constant 0 : index
    %c0_149 = arith.constant 0 : index
    %322 = vector.load %arg18[%c6_146, %c0_147, %c0_148, %c0_149] : memref<8x8x8x256xf32, #tpu.memory_space<vmem>>, vector<1x8x8x256xf32>
    %323 = vector.shape_cast %322 : vector<1x8x8x256xf32> to vector<8x8x256xf32>
    %324 = arith.mulf %323, %316 : vector<8x8x256xf32>
    %c6_150 = arith.constant 6 : index
    %c0_151 = arith.constant 0 : index
    %c0_152 = arith.constant 0 : index
    %c0_153 = arith.constant 0 : index
    %325 = vector.load %arg19[%c6_150, %c0_151, %c0_152, %c0_153] : memref<8x8x8x256xf32, #tpu.memory_space<vmem>>, vector<1x8x8x256xf32>
    %326 = vector.shape_cast %325 : vector<1x8x8x256xf32> to vector<8x8x256xf32>
    %327 = arith.addf %324, %326 : vector<8x8x256xf32>
    %328 = vector.extract_strided_slice %81 {offsets = [48, 0], sizes = [8, 8], strides = [1, 1]} : vector<64x8xf32> to vector<8x8xf32>
    %329 = vector.shape_cast %328 : vector<8x8xf32> to vector<8x8x1xf32>
    %330 = vector.broadcast %329 : vector<8x8x1xf32> to vector<8x8x256xf32>
    %331 = arith.mulf %327, %330 : vector<8x8x256xf32>
    %cst_154 = arith.constant dense<0.000000e+00> : vector<8x256xf32>
    %332 = vector.multi_reduction <add>, %331, %cst_154 [1] : vector<8x8x256xf32> to vector<8x256xf32>
    %c7_155 = arith.constant 7 : index
    %c0_156 = arith.constant 0 : index
    %c0_157 = arith.constant 0 : index
    %c0_158 = arith.constant 0 : index
    %333 = vector.load %arg18[%c7_155, %c0_156, %c0_157, %c0_158] : memref<8x8x8x256xf32, #tpu.memory_space<vmem>>, vector<1x8x8x256xf32>
    %334 = vector.shape_cast %333 : vector<1x8x8x256xf32> to vector<8x8x256xf32>
    %335 = arith.mulf %334, %327 : vector<8x8x256xf32>
    %c7_159 = arith.constant 7 : index
    %c0_160 = arith.constant 0 : index
    %c0_161 = arith.constant 0 : index
    %c0_162 = arith.constant 0 : index
    %336 = vector.load %arg19[%c7_159, %c0_160, %c0_161, %c0_162] : memref<8x8x8x256xf32, #tpu.memory_space<vmem>>, vector<1x8x8x256xf32>
    %337 = vector.shape_cast %336 : vector<1x8x8x256xf32> to vector<8x8x256xf32>
    %338 = arith.addf %335, %337 : vector<8x8x256xf32>
    %339 = vector.extract_strided_slice %81 {offsets = [56, 0], sizes = [8, 8], strides = [1, 1]} : vector<64x8xf32> to vector<8x8xf32>
    %340 = vector.shape_cast %339 : vector<8x8xf32> to vector<8x8x1xf32>
    %341 = vector.broadcast %340 : vector<8x8x1xf32> to vector<8x8x256xf32>
    %342 = arith.mulf %338, %341 : vector<8x8x256xf32>
    %cst_163 = arith.constant dense<0.000000e+00> : vector<8x256xf32>
    %343 = vector.multi_reduction <add>, %342, %cst_163 [1] : vector<8x8x256xf32> to vector<8x256xf32>
    %344 = tpu.concatenate %266, %277, %288, %299, %310, %321, %332, %343 in 0 : vector<8x256xf32>, vector<8x256xf32>, vector<8x256xf32>, vector<8x256xf32>, vector<8x256xf32>, vector<8x256xf32>, vector<8x256xf32>, vector<8x256xf32> -> vector<64x256xf32>
    %345 = vector.broadcast %86 : vector<1x256xf32> to vector<64x256xf32>
    %346 = arith.mulf %345, %62 : vector<64x256xf32>
    %347 = arith.addf %344, %346 : vector<64x256xf32>
    %348 = arith.truncf %24 : vector<64x128xf32> to vector<64x128xbf16>
    %c0_164 = arith.constant 0 : index
    %c0_165 = arith.constant 0 : index
    %349 = vector.load %arg5[%c0_164, %c0_165] : memref<128x256xbf16, #tpu.memory_space<vmem>>, vector<128x256xbf16>
    %cst_166 = arith.constant dense<0.000000e+00> : vector<64x256xf32>
    %350 = tpu.matmul %348, %349, %cst_166 {dimension_numbers = #tpu.dot_dimension_numbers<[1], [0], [0], [1], [0, 0, 1, 1], [], []>} : vector<64x128xbf16>, vector<128x256xbf16>, vector<64x256xf32> -> vector<64x256xf32>
    %cst_167 = arith.constant 0.000000e+00 : f32
    %351 = vector.broadcast %cst_167 : f32 to vector<64x256xf32>
    %352 = arith.subf %351, %350 : vector<64x256xf32>
    %353 = math.exp %352 : vector<64x256xf32>
    %cst_168 = arith.constant 1.000000e+00 : f32
    %354 = vector.broadcast %cst_168 : f32 to vector<64x256xf32>
    %355 = arith.addf %354, %353 : vector<64x256xf32>
    %356 = tpu.reciprocal %355 {approx = true} : vector<64x256xf32> -> vector<64x256xf32>
    %357 = arith.mulf %350, %356 : vector<64x256xf32>
    %358 = arith.mulf %347, %357 : vector<64x256xf32>
    %359 = arith.truncf %358 : vector<64x256xf32> to vector<64x256xbf16>
    %c0_169 = arith.constant 0 : index
    %c0_170 = arith.constant 0 : index
    %360 = vector.load %arg12[%c0_169, %c0_170] : memref<256x128xbf16, #tpu.memory_space<vmem>>, vector<256x128xbf16>
    %cst_171 = arith.constant dense<0.000000e+00> : vector<64x128xf32>
    %361 = tpu.matmul %359, %360, %cst_171 {dimension_numbers = #tpu.dot_dimension_numbers<[1], [0], [0], [1], [0, 0, 1, 1], [], []>} : vector<64x256xbf16>, vector<256x128xbf16>, vector<64x128xf32> -> vector<64x128xf32>
    %c0_172 = arith.constant 0 : index
    %c0_173 = arith.constant 0 : index
    %362 = vector.load %arg13[%c0_172, %c0_173] : memref<1x128xf32, #tpu.memory_space<vmem>>, vector<1x128xf32>
    %c0_174 = arith.constant 0 : index
    %c0_175 = arith.constant 0 : index
    %363 = vector.load %arg14[%c0_174, %c0_175] : memref<1x128xf32, #tpu.memory_space<vmem>>, vector<1x128xf32>
    %cst_176 = arith.constant dense<0.000000e+00> : vector<64xf32>
    %364 = vector.multi_reduction <add>, %361, %cst_176 [1] : vector<64x128xf32> to vector<64xf32>
    %365 = vector.shape_cast %364 : vector<64xf32> to vector<64x1xf32>
    %cst_177 = arith.constant 1.280000e+02 : f32
    %366 = vector.broadcast %cst_177 : f32 to vector<64x1xf32>
    %367 = arith.divf %365, %366 : vector<64x1xf32>
    %368 = vector.broadcast %367 : vector<64x1xf32> to vector<64x128xf32>
    %369 = arith.subf %361, %368 : vector<64x128xf32>
    %370 = arith.mulf %369, %369 : vector<64x128xf32>
    %cst_178 = arith.constant dense<0.000000e+00> : vector<64xf32>
    %371 = vector.multi_reduction <add>, %370, %cst_178 [1] : vector<64x128xf32> to vector<64xf32>
    %372 = vector.shape_cast %371 : vector<64xf32> to vector<64x1xf32>
    %cst_179 = arith.constant 1.280000e+02 : f32
    %373 = vector.broadcast %cst_179 : f32 to vector<64x1xf32>
    %374 = arith.divf %372, %373 : vector<64x1xf32>
    %375 = vector.broadcast %367 : vector<64x1xf32> to vector<64x128xf32>
    %376 = arith.subf %361, %375 : vector<64x128xf32>
    %cst_180 = arith.constant 9.99999996E-13 : f32
    %377 = vector.broadcast %cst_180 : f32 to vector<64x1xf32>
    %378 = arith.addf %374, %377 : vector<64x1xf32>
    %379 = math.sqrt %378 : vector<64x1xf32>
    %380 = vector.broadcast %379 : vector<64x1xf32> to vector<64x128xf32>
    %381 = arith.divf %376, %380 : vector<64x128xf32>
    %382 = vector.broadcast %362 : vector<1x128xf32> to vector<64x128xf32>
    %383 = arith.mulf %381, %382 : vector<64x128xf32>
    %384 = vector.broadcast %363 : vector<1x128xf32> to vector<64x128xf32>
    %385 = arith.addf %383, %384 : vector<64x128xf32>
    %386 = arith.truncf %385 : vector<64x128xf32> to vector<64x128xbf16>
    %c0_181 = arith.constant 0 : index
    %c0_182 = arith.constant 0 : index
    %387 = vector.load %arg15[%c0_181, %c0_182] : memref<128x128xbf16, #tpu.memory_space<vmem>>, vector<128x128xbf16>
    %cst_183 = arith.constant dense<0.000000e+00> : vector<64x128xf32>
    %388 = tpu.matmul %386, %387, %cst_183 {dimension_numbers = #tpu.dot_dimension_numbers<[1], [0], [0], [1], [0, 0, 1, 1], [], []>} : vector<64x128xbf16>, vector<128x128xbf16>, vector<64x128xf32> -> vector<64x128xf32>
    %c0_184 = arith.constant 0 : index
    %c0_185 = arith.constant 0 : index
    %389 = vector.load %arg16[%c0_184, %c0_185] : memref<1x128xf32, #tpu.memory_space<vmem>>, vector<1x128xf32>
    %390 = vector.broadcast %389 : vector<1x128xf32> to vector<64x128xf32>
    %391 = arith.addf %388, %390 : vector<64x128xf32>
    %cst_186 = arith.constant 0.000000e+00 : f32
    %392 = vector.broadcast %cst_186 : f32 to vector<64x128xf32>
    %393 = arith.subf %392, %391 : vector<64x128xf32>
    %394 = math.exp %393 : vector<64x128xf32>
    %cst_187 = arith.constant 1.000000e+00 : f32
    %395 = vector.broadcast %cst_187 : f32 to vector<64x128xf32>
    %396 = arith.addf %395, %394 : vector<64x128xf32>
    %397 = tpu.reciprocal %396 {approx = true} : vector<64x128xf32> -> vector<64x128xf32>
    %c0_188 = arith.constant 0 : index
    %c0_189 = arith.constant 0 : index
    %398 = vector.load %arg17[%c0_188, %c0_189] : memref<64x128xf32, #tpu.memory_space<vmem>>, vector<64x128xf32>
    tpu.vector_store %arg17[%c0_188, %c0_189], %397 {strides = array<i32>} : memref<64x128xf32, #tpu.memory_space<vmem>>, vector<64x128xf32>,
    return
  }
  func.func @transform_0(%arg0: i32) -> (i32, i32) {
    %c0_i32 = arith.constant 0 : i32
    %c0_i32_0 = arith.constant 0 : i32
    %c0_i32_1 = arith.constant 0 : i32
    return %c0_i32, %c0_i32_0 : i32, i32
  }
  func.func @transform_1(%arg0: i32) -> (i32, i32) {
    %c0_i32 = arith.constant 0 : i32
    %c0_i32_0 = arith.constant 0 : i32
    %c0_i32_1 = arith.constant 0 : i32
    return %c0_i32, %c0_i32_0 : i32, i32
  }
  func.func @transform_2(%arg0: i32) -> (i32, i32) {
    %c0_i32 = arith.constant 0 : i32
    %c0_i32_0 = arith.constant 0 : i32
    %c0_i32_1 = arith.constant 0 : i32
    return %c0_i32, %c0_i32_0 : i32, i32
  }
  func.func @transform_3(%arg0: i32) -> (i32, i32) {
    %c0_i32 = arith.constant 0 : i32
    %c0_i32_0 = arith.constant 0 : i32
    %c0_i32_1 = arith.constant 0 : i32
    return %c0_i32, %c0_i32_0 : i32, i32
  }
  func.func @transform_4(%arg0: i32) -> (i32, i32) {
    %c0_i32 = arith.constant 0 : i32
    %c0_i32_0 = arith.constant 0 : i32
    %c0_i32_1 = arith.constant 0 : i32
    return %c0_i32, %c0_i32_0 : i32, i32
  }
  func.func @transform_5(%arg0: i32) -> (i32, i32) {
    %c0_i32 = arith.constant 0 : i32
    %c0_i32_0 = arith.constant 0 : i32
    %c0_i32_1 = arith.constant 0 : i32
    return %c0_i32, %c0_i32_0 : i32, i32
  }
  func.func @transform_6(%arg0: i32) -> (i32, i32) {
    %c0_i32 = arith.constant 0 : i32
    %c0_i32_0 = arith.constant 0 : i32
    %c0_i32_1 = arith.constant 0 : i32
    return %c0_i32, %c0_i32_0 : i32, i32
  }
  func.func @transform_7(%arg0: i32) -> (i32, i32) {
    %c0_i32 = arith.constant 0 : i32
    %c0_i32_0 = arith.constant 0 : i32
    %c0_i32_1 = arith.constant 0 : i32
    return %c0_i32, %c0_i32_0 : i32, i32
  }
  func.func @transform_8(%arg0: i32) -> (i32, i32) {
    %c0_i32 = arith.constant 0 : i32
    %c0_i32_0 = arith.constant 0 : i32
    %c0_i32_1 = arith.constant 0 : i32
    return %c0_i32, %c0_i32_0 : i32, i32
  }
  func.func @transform_9(%arg0: i32) -> (i32, i32) {
    %c0_i32 = arith.constant 0 : i32
    %c0_i32_0 = arith.constant 0 : i32
    %c0_i32_1 = arith.constant 0 : i32
    return %c0_i32, %c0_i32_0 : i32, i32
  }
  func.func @transform_10(%arg0: i32) -> (i32, i32) {
    %c0_i32 = arith.constant 0 : i32
    %c0_i32_0 = arith.constant 0 : i32
    %c0_i32_1 = arith.constant 0 : i32
    return %c0_i32, %c0_i32_0 : i32, i32
  }
  func.func @transform_11(%arg0: i32) -> (i32, i32) {
    %c0_i32 = arith.constant 0 : i32
    %c0_i32_0 = arith.constant 0 : i32
    %c0_i32_1 = arith.constant 0 : i32
    return %c0_i32, %c0_i32_0 : i32, i32
  }
  func.func @transform_12(%arg0: i32) -> (i32, i32) {
    %c0_i32 = arith.constant 0 : i32
    %c0_i32_0 = arith.constant 0 : i32
    %c0_i32_1 = arith.constant 0 : i32
    return %c0_i32, %c0_i32_0 : i32, i32
  }
  func.func @transform_13(%arg0: i32) -> (i32, i32) {
    %c0_i32 = arith.constant 0 : i32
    %c0_i32_0 = arith.constant 0 : i32
    %c0_i32_1 = arith.constant 0 : i32
    return %c0_i32, %c0_i32_0 : i32, i32
  }
  func.func @transform_14(%arg0: i32) -> (i32, i32) {
    %c0_i32 = arith.constant 0 : i32
    %c0_i32_0 = arith.constant 0 : i32
    %c0_i32_1 = arith.constant 0 : i32
    return %c0_i32, %c0_i32_0 : i32, i32
  }
  func.func @transform_15(%arg0: i32) -> (i32, i32) {
    %c0_i32 = arith.constant 0 : i32
    %c0_i32_0 = arith.constant 0 : i32
    %c0_i32_1 = arith.constant 0 : i32
    return %c0_i32, %c0_i32_0 : i32, i32
  }
  func.func @transform_16(%arg0: i32) -> (i32, i32) {
    %c0_i32 = arith.constant 0 : i32
    %c0_i32_0 = arith.constant 0 : i32
    %c0_i32_1 = arith.constant 0 : i32
    return %c0_i32, %c0_i32_0 : i32, i32
  }
}

</mosaic_0001>

<bundles_post_ra>
// kernel: mamba_cont_forward.1
= control target key start
LH: loop header
LB: loop body
LE: loop exit
PB: predicated region body
PF: predicated region fallthrough
CT: control target
= control target key end

     0   :  { %v7899_v8 = vmov 128.0   ;;  %s12628_s0 = inlined_call_operand.vmem [shape: f32[64,128], index: 0, kind: input, shape index: {}]   ;;  %s12629_s1 = inlined_call_operand.vmem [shape: f32[1,128], index: 1, kind: input, shape index: {}]   ;;  %s12630_s2 = inlined_call_operand.vmem [shape: f32[1,128], index: 2, kind: input, shape index: {}]   ;;  %s12631_s3 = inlined_call_operand.vmem [shape: bf16[128,256], index: 3, kind: input, shape index: {}]   ;;  %s12632_s7 = inlined_call_operand.vmem [shape: bf16[256,512], index: 7, kind: input, shape index: {}]   ;;  %s12633_s5 = inlined_call_operand.vmem [shape: f32[4,256], index: 5, kind: input, shape index: {}]   ;;  %s12634_s6 = inlined_call_operand.vmem [shape: f32[1,256], index: 6, kind: input, shape index: {}]   ;;  %s12635_s4 = inlined_call_operand.vmem [shape: bf16[128,256], index: 4, kind: input, shape index: {}]   ;;  %s12636_s8 = inlined_call_operand.vmem [shape: f32[1,256], index: 8, kind: input, shape index: {}]   ;;  %s12637_s9 = inlined_call_operand.vmem [shape: f32[8,256], index: 9, kind: input, shape index: {}]   ;;  %s12638_s10 = inlined_call_operand.vmem [shape: f32[1,256], index: 10, kind: input, shape index: {}]   ;;  %s12639_s11 = inlined_call_operand.vmem [shape: bf16[256,128], index: 11, kind: input, shape index: {}]   ;;  %s12640_s14 = inlined_call_operand.vmem [shape: bf16[128,128], index: 14, kind: input, shape index: {}]   ;;  %s12641_s12 = inlined_call_operand.vmem [shape: f32[1,128], index: 12, kind: input, shape index: {}]   ;;  %s12642_s13 = inlined_call_operand.vmem [shape: f32[1,128], index: 13, kind: input, shape index: {}]   ;;  %s12643_s15 = inlined_call_operand.vmem [shape: f32[1,128], index: 15, kind: input, shape index: {}]   ;;  %s12644_s16 = inlined_call_operand.vmem [shape: f32[64,128], index: 16, kind: output, shape index: {}]  }
   0x1   :  { %12753 = sst [smem:[#allocation126_spill]] %s12628_s0  ;;  %7349 = vrcp.f32 %v7899_v8  ;;  %v6774_v47 = vld [vmem:[%s12631_s3 + $0x70] sm:$0xf]  ;;  %v7211_v48 = vld [vmem:[%s12631_s3 + $0x74] sm:$0xf0] }
   0x2   :  { %s12754_s23 = sld [smem:[#allocation126_spill]]  ;;  %v7210_v49 = vld [vmem:[%s12631_s3 + $0x74] sm:$0xf]  ;;  %v6775_v50 = vor.u32 %v7211_v48, %v6774_v47  ;;  %v6776_v51 = vld [vmem:[%s12631_s3 + $0x78] sm:$0xf0] }
   0x3   :  { %v6779_v52 = vor.u32 %v7210_v49, %v6776_v51  ;;  %v6766_v54 = vld [vmem:[%s12631_s3 + $0x60] sm:$0xf]  ;;  %v7209_v55 = vld [vmem:[%s12631_s3 + $0x64] sm:$0xf0]  ;;  %v7208_v56 = vld [vmem:[%s12631_s3 + $0x64] sm:$0xf] }
   0x4   :  { %480 = vmatpush.bf16.msra.mxu0 %v6775_v50  ;;  %7316 = vmatpush.bf16.msra.mxu3 %v6775_v50  ;;  %v6767_v59 = vor.u32 %v7209_v55, %v6766_v54  ;;  %v6768_v60 = vld [vmem:[%s12631_s3 + $0x68] sm:$0xf0]  ;;  %v6750_v8 = vld [vmem:[%s12631_s3 + $0x40] sm:$0xf]  ;;  %v7200_v50 = vld [vmem:[%s12631_s3 + $0x24] sm:$0xf] }
   0x5   :  { %509 = vmatpush.bf16.msra.mxu1 %v6779_v52  ;;  %v6771_v62 = vor.u32 %v7208_v56, %v6768_v60  ;;  %v6736_v51 = vld [vmem:[%s12631_s3 + $0x28] sm:$0xf0]  ;;  %v6726_v55 = vld [vmem:[%s12631_s3 + $0x10] sm:$0xf]  ;;  %v7199_v56 = vld [vmem:[%s12631_s3 + $0x14] sm:$0xf0] }
   0x6   :  { %v6739_v54 = vor.u32 %v7200_v50, %v6736_v51  ;;  %v6728_v60 = vld [vmem:[%s12631_s3 + $0x18] sm:$0xf0] }
   0x7   :  { %v7350_v9 = vpop.eup %7349 }
   0x8   :  { %v57_v0 = vld [vmem:[%s12754_s23 + $0x20] sm:$0xff]  ;;  %v55_v1 = vld [vmem:[%s12754_s23 + $0x10] sm:$0xff]  ;;  %v58_v3 = vld [vmem:[%s12754_s23 + $0x28] sm:$0xff]  ;;  %v80_v10 = vmul.f32 128.0, %v7350_v9  ;;  %vm84_vm0 = vweird.f32 %v7350_v9  ;;  %481 = vmatpush.bf16.msra.mxu0 %v6767_v59  ;;  %7317 = vmatpush.bf16.msra.mxu3 %v6767_v59 }
   0x9   :  { %v53_v2 = vld [vmem:[%s12754_s23] sm:$0xff]  ;;  %71 = vadd.xlane.f32.xlu2 %v57_v0  ;;  %67 = vadd.xlane.f32.xlu1 %v55_v1  ;;  %v56_v4 = vld [vmem:[%s12754_s23 + $0x18] sm:$0xff]  ;;  %v54_v5 = vld [vmem:[%s12754_s23 + $0x8] sm:$0xff] }
   0xa   :  { %63 = vadd.xlane.f32.xlu0 %v53_v2  ;;  %v60_v6 = vld [vmem:[%s12754_s23 + $0x38] sm:$0xff]  ;;  %v59_v7 = vld [vmem:[%s12754_s23 + $0x30] sm:$0xff]  ;;  %v81_v11 = vsub.f32 1.0, %v80_v10  ;;  %510 = vmatpush.bf16.msra.mxu1 %v6771_v62  ;;  %v7204_v10 = vld [vmem:[%s12631_s3 + $0x44] sm:$0xf] }
   0xb   :  { %v7198_v59 = vld [vmem:[%s12631_s3 + $0x14] sm:$0xf] }
   0xc   :  { %v82_v12 = vmul.f32 %v7350_v9, %v81_v11 }
   0xe   :  { %v83_v13 = vadd.f32 %v7350_v9, %v82_v12 }
  0x10   :  { %v8009_v14 = vsel %vm84_vm0, %v7350_v9, %v83_v13  ;;  %v7205_v9 = vld [vmem:[%s12631_s3 + $0x44] sm:$0xf0] }
  0x11   :  { %73 = vadd.xlane.f32.xlu2 %v58_v3  ;;  %69 = vadd.xlane.f32.xlu1 %v56_v4  ;;  %12755 = vst [vmem:[#allocation4_spill] sm:$0xff] %v8009_v14 }
  0x12   :  { %65 = vadd.xlane.f32.xlu0 %v54_v5 }
  0x19   :  { %77 = vadd.xlane.f32.xlu1 %v60_v6 }
  0x1a   :  { %75 = vadd.xlane.f32.xlu0 %v59_v7 }
  0x7c   :  { %v72_v15 = vpop.xlane.xlu2 %71  ;;  %v68_v16 = vpop.xlane.xlu1 %67 }
  0x7d   :  { %v88_v17 = vmul.f32 %v8009_v14, %v68_v16  ;;  %v64_v18 = vpop.xlane.xlu0 %63  ;;  %v90_v32 = vmul.f32 %v8009_v14, %v72_v15  ;;  %v6751_v15 = vor.u32 %v7205_v9, %v6750_v8  ;;  %v6752_v16 = vld [vmem:[%s12631_s3 + $0x48] sm:$0xf0] }
  0x7e   :  { %v86_v19 = vmul.f32 %v8009_v14, %v64_v18 }
  0x7f   :  { %v8013_v20 = vsub.f32 %v55_v1, %v88_v17  ;;  %v8037_v37 = vsub.f32 %v57_v0, %v90_v32  ;;  %v6758_v1 = vld [vmem:[%s12631_s3 + $0x50] sm:$0xf]  ;;  %v7203_v32 = vld [vmem:[%s12631_s3 + $0x34] sm:$0xf0] }
  0x80   :  { %v8015_v21 = vsub.f32 %v53_v2, %v86_v19  ;;  %v7207_v2 = vld [vmem:[%s12631_s3 + $0x54] sm:$0xf0]  ;;  %v6755_v19 = vor.u32 %v7204_v10, %v6752_v16  ;;  %v6731_v10 = vor.u32 %v7198_v59, %v6728_v60  ;;  %v7196_v16 = vld [vmem:[%s12631_s3 + $0x4] sm:$0xf] }
  0x81   :  { %v104_v22 = vmul.f32 %v8013_v20, %v8013_v20  ;;  %v106_v41 = vmul.f32 %v8037_v37, %v8037_v37 }
  0x82   :  { %v102_v23 = vmul.f32 %v8015_v21, %v8015_v21 }
  0x83   :  { %114 = vadd.xlane.f32.xlu1 %v104_v22 }
  0x84   :  { %110 = vadd.xlane.f32.xlu2 %v102_v23  ;;  %v74_v24 = vpop.xlane.xlu2 %73  ;;  %v70_v25 = vpop.xlane.xlu1 %69 }
  0x85   :  { %v91_v26 = vmul.f32 %v8009_v14, %v74_v24  ;;  %v89_v27 = vmul.f32 %v8009_v14, %v70_v25  ;;  %v66_v28 = vpop.xlane.xlu0 %65 }
  0x86   :  { %v87_v29 = vmul.f32 %v8009_v14, %v66_v28 }
  0x87   :  { %v8024_v30 = vsub.f32 %v58_v3, %v91_v26  ;;  %v8026_v31 = vsub.f32 %v56_v4, %v89_v27  ;;  %v6759_v3 = vor.u32 %v7207_v2, %v6758_v1  ;;  %v7206_v4 = vld [vmem:[%s12631_s3 + $0x54] sm:$0xf] }
  0x88   :  { %v8029_v33 = vsub.f32 %v54_v5, %v87_v29  ;;  %v6760_v5 = vld [vmem:[%s12631_s3 + $0x58] sm:$0xf0]  ;;  %v6742_v29 = vld [vmem:[%s12631_s3 + $0x30] sm:$0xf] }
  0x89   :  { %v107_v34 = vmul.f32 %v8024_v30, %v8024_v30  ;;  %v105_v35 = vmul.f32 %v8026_v31, %v8026_v31  ;;  %482 = vmatpush.bf16.msra.mxu0 %v6759_v3  ;;  %7318 = vmatpush.bf16.msra.mxu3 %v6759_v3 }
  0x8a   :  { %v103_v36 = vmul.f32 %v8029_v33, %v8029_v33 }
  0x8b   :  { %120 = vadd.xlane.f32.xlu1 %v107_v34  ;;  %v7202_v34 = vld [vmem:[%s12631_s3 + $0x34] sm:$0xf] }
  0x8c   :  { %116 = vadd.xlane.f32.xlu2 %v105_v35  ;;  %112 = vadd.xlane.f32.xlu0 %v103_v36  ;;  %v78_v39 = vpop.xlane.xlu1 %77  ;;  %v6744_v36 = vld [vmem:[%s12631_s3 + $0x38] sm:$0xf0] }
  0x8d   :  { %v76_v38 = vpop.xlane.xlu0 %75  ;;  %v93_v43 = vmul.f32 %v8009_v14, %v78_v39  ;;  %483 = vmatpush.bf16.msra.mxu0 %v6751_v15  ;;  %7319 = vmatpush.bf16.msra.mxu3 %v6751_v15  ;;  %v6743_v39 = vor.u32 %v7203_v32, %v6742_v29 }
  0x8e   :  { %v92_v40 = vmul.f32 %v8009_v14, %v76_v38 }
  0x8f   :  { %v8047_v45 = vsub.f32 %v60_v6, %v93_v43  ;;  %v6763_v6 = vor.u32 %v7206_v4, %v6760_v5  ;;  %v7201_v43 = vld [vmem:[%s12631_s3 + $0x24] sm:$0xf0] }
  0x90   :  { %v8042_v42 = vsub.f32 %v59_v7, %v92_v40  ;;  %v6747_v40 = vor.u32 %v7202_v34, %v6744_v36 }
  0x91   :  { %v109_v46 = vmul.f32 %v8047_v45, %v8047_v45  ;;  %511 = vmatpush.bf16.msra.mxu1 %v6763_v6  ;;  %484 = vmatpush.bf16.msra.mxu0 %v6743_v39 }
  0x92   :  { %v108_v44 = vmul.f32 %v8042_v42, %v8042_v42  ;;  %7320 = vmatpush.bf16.msra.mxu3 %v6743_v39 }
  0x94   :  { %118 = vadd.xlane.f32.xlu0 %v106_v41  ;;  %122 = vadd.xlane.f32.xlu2 %v108_v44  ;;  %v6734_v41 = vld [vmem:[%s12631_s3 + $0x20] sm:$0xf] }
  0x95   :  { %512 = vmatpush.bf16.msra.mxu1 %v6755_v19  ;;  %v6735_v49 = vor.u32 %v7201_v43, %v6734_v41 }
  0x97   :  { %485 = vmatpush.bf16.msra.mxu0 %v6735_v49  ;;  %7321 = vmatpush.bf16.msra.mxu3 %v6735_v49 }
  0x99   :  { %513 = vmatpush.bf16.msra.mxu1 %v6747_v40 }
  0x9c   :  { %124 = vadd.xlane.f32.xlu0 %v109_v46 }
  0x9d   :  { %514 = vmatpush.bf16.msra.mxu1 %v6739_v54 }
  0xa1   :  { %515 = vmatpush.bf16.msra.mxu1 %v6731_v10 }
  0xf6   :  { %v115_v53 = vpop.xlane.xlu1 %114 }
  0xf7   :  { %v128_v57 = vmul.f32 %v115_v53, %v8009_v14  ;;  %v111_v58 = vpop.xlane.xlu2 %110 }
  0xf8   :  { %v126_v61 = vmul.f32 %v111_v58, %v8009_v14 }
  0xf9   :  { %v8077_v63 = vadd.f32 1e-12, %v128_v57 }
  0xfa   :  { %v8079_v0 = vadd.f32 1e-12, %v126_v61 }
  0xfb   :  { %7351 = vrsqrt.f32 %v8077_v63  ;;  %vm173_vm1 = vcmp.eq.f32.partialorder %v8077_v63, inf  ;;  %vm175_vm5 = vcmp.eq.f32.partialorder %v8077_v63, 0.0 }
  0xfc   :  { %7353 = vrsqrt.f32 %v8079_v0  ;;  %vm149_vm2 = vcmp.eq.f32.partialorder %v8079_v0, inf  ;;  %vm151_vm3 = vcmp.eq.f32.partialorder %v8079_v0, 0.0 }
  0xfe   :  { %v121_v7 = vpop.xlane.xlu1 %120 }
  0xff   :  { %v131_v11 = vmul.f32 %v121_v7, %v8009_v14  ;;  %v117_v12 = vpop.xlane.xlu2 %116  ;;  %v113_v13 = vpop.xlane.xlu0 %112  ;;  %v6727_v7 = vor.u32 %v7199_v56, %v6726_v55 }
 0x100   :  { %v129_v17 = vmul.f32 %v117_v12, %v8009_v14  ;;  %v127_v18 = vmul.f32 %v113_v13, %v8009_v14  ;;  %v7197_v12 = vld [vmem:[%s12631_s3 + $0x4] sm:$0xf0] }
 0x101   :  { %v8110_v22 = vpop.eup %7351  ;;  %v8112_v23 = vadd.f32 1e-12, %v131_v11  ;;  %v6718_v11 = vld [vmem:[%s12631_s3] sm:$0xf]  ;;  %486 = vmatpush.bf16.msra.mxu0 %v6727_v7  ;;  %7322 = vmatpush.bf16.msra.mxu3 %v6727_v7 }
 0x102   :  { %v7354_v24 = vpop.eup %7353  ;;  %v167_v25 = vmul.f32 %v8110_v22, %v8077_v63  ;;  %v8116_v26 = vadd.f32 1e-12, %v129_v17  ;;  %v8118_v27 = vadd.f32 1e-12, %v127_v18  ;;  %v6720_v17 = vld [vmem:[%s12631_s3 + $0x8] sm:$0xf0]  ;;  %v6719_v29 = vor.u32 %v7197_v12, %v6718_v11 }
 0x103   :  { %v143_v28 = vmul.f32 %v7354_v24, %v8079_v0  ;;  %7355 = vrsqrt.f32 %v8112_v23  ;;  %v6723_v36 = vor.u32 %v7196_v16, %v6720_v17  ;;  %vm209_vm4 = vcmp.eq.f32.partialorder %v8112_v23, inf }
 0x104   :  { %v168_v35 = vmul.f32 %v8110_v22, %v167_v25  ;;  %7357 = vrsqrt.f32 %v8116_v26  ;;  %v152_v25 = vand.u32 2147483648, %v8079_v0  ;;  %vm211_vm6 = vcmp.eq.f32.partialorder %v8112_v23, 0.0 }
 0x105   :  { %v144_v38 = vmul.f32 %v7354_v24, %v143_v28  ;;  %7359 = vrsqrt.f32 %v8118_v27  ;;  %487 = vmatpush.bf16.msra.mxu0 %v6719_v29  ;;  %516 = vmatpush.bf16.msra.mxu1 %v6723_v36  ;;  %v188_v55 = vand.u32 2147483648, %v8116_v26  ;;  %vm161_vm7 = vcmp.eq.f32.partialorder %v8118_v27, inf }
 0x106   :  { %v169_v44 = vmul.f32 0.5, %v168_v35  ;;  %7323 = vmatpush.bf16.msra.mxu3 %v6719_v29  ;;  %vm163_vm8 = vcmp.eq.f32.partialorder %v8118_v27, 0.0  ;;  %vm185_vm10 = vcmp.eq.f32.partialorder %v8116_v26, inf  ;;  %vm187_vm13 = vcmp.eq.f32.partialorder %v8116_v26, 0.0 }
 0x107   :  { %v145_v46 = vmul.f32 0.5, %v144_v38  ;;  %v123_v47 = vpop.xlane.xlu2 %122  ;;  %v119_v48 = vpop.xlane.xlu0 %118  ;;  %v176_v38 = vand.u32 2147483648, %v8077_v63 }
 0x108   :  { %v132_v52 = vmul.f32 %v123_v47, %v8009_v14  ;;  %v130_v53 = vmul.f32 %v119_v48, %v8009_v14  ;;  %v170_v4 = vsub.f32 1.5, %v169_v44  ;;  %v212_v47 = vand.u32 2147483648, %v8112_v23 }
 0x109   :  { %v7356_v57 = vpop.eup %7355  ;;  %v146_v58 = vsub.f32 1.5, %v145_v46 }
 0x10a   :  { %v8163_v61 = vpop.eup %7357  ;;  %v203_v62 = vmul.f32 %v7356_v57, %v8112_v23  ;;  %v8166_v1 = vadd.f32 1e-12, %v132_v52  ;;  %v8168_v2 = vadd.f32 1e-12, %v130_v53 }
 0x10b   :  { %v7360_v3 = vpop.eup %7359  ;;  %v147_v5 = vmul.f32 %v7354_v24, %v146_v58  ;;  %v179_v6 = vmul.f32 %v8163_v61, %v8116_v26  ;;  %v171_v24 = vmul.f32 %v8110_v22, %v170_v4 }
 0x10c   :  { %v204_v8 = vmul.f32 %v7356_v57, %v203_v62  ;;  %v155_v9 = vmul.f32 %v7360_v3, %v8118_v27  ;;  %7361 = vrsqrt.f32 %v8166_v1  ;;  %v224_v58 = vand.u32 2147483648, %v8166_v1 }
 0x10d   :  { %v148_v13 = vmul.f32 %v147_v5, %v8079_v0  ;;  %v180_v15 = vmul.f32 %v8163_v61, %v179_v6  ;;  %7363 = vrsqrt.f32 %v8168_v2  ;;  %v172_v49 = vmul.f32 %v171_v24, %v8077_v63 }
 0x10e   :  { %v205_v18 = vmul.f32 0.5, %v204_v8  ;;  %v156_v19 = vmul.f32 %v7360_v3, %v155_v9  ;;  %vm197_vm9 = vcmp.eq.f32.partialorder %v8168_v2, inf  ;;  %vm199_vm11 = vcmp.eq.f32.partialorder %v8168_v2, 0.0 }
 0x10f   :  { %v125_v28 = vpop.xlane.xlu0 %124  ;;  %v181_v39 = vmul.f32 0.5, %v180_v15  ;;  %v150_v22 = vsel %vm149_vm2, %v8079_v0, %v148_v13  ;;  %v174_v5 = vsel %vm173_vm1, %v8077_v63, %v172_v49 }
 0x110   :  { %v206_v32 = vsub.f32 1.5, %v205_v18  ;;  %v157_v34 = vmul.f32 0.5, %v156_v19  ;;  %v133_v35 = vmul.f32 %v125_v28, %v8009_v14  ;;  %v8201_v46 = vsel %vm151_vm3, %v152_v25, %v150_v22 }
 0x111   :  { %7365 = vrcp.f32 %v8201_v46  ;;  %v182_v52 = vsub.f32 1.5, %v181_v39  ;;  %v247_v10 = vand.u32 2147483647, %v8201_v46  ;;  %v249_v11 = vand.u32 2147483648, %v8201_v46 }
 0x112   :  { %v8197_v40 = vpop.eup %7361  ;;  %v207_v41 = vmul.f32 %v7356_v57, %v206_v32  ;;  %v158_v43 = vsub.f32 1.5, %v157_v34  ;;  %v8199_v44 = vadd.f32 1e-12, %v133_v35  ;;  %v164_v57 = vand.u32 2147483648, %v8118_v27 }
 0x113   :  { %v215_v48 = vmul.f32 %v8197_v40, %v8166_v1  ;;  %v7364_v0 = vpop.eup %7363  ;;  %v183_v7 = vmul.f32 %v8163_v61, %v182_v52  ;;  %v200_v61 = vand.u32 2147483648, %v8168_v2  ;;  %vm243_vm12 = vweird.f32 %v8201_v46 }
 0x114   :  { %v208_v50 = vmul.f32 %v207_v41, %v8112_v23  ;;  %v159_v51 = vmul.f32 %v7360_v3, %v158_v43  ;;  %7367 = vrsqrt.f32 %v8199_v44  ;;  %v191_v54 = vmul.f32 %v7364_v0, %v8168_v2 }
 0x115   :  { %v216_v53 = vmul.f32 %v8197_v40, %v215_v48  ;;  %v8246_v17 = vsel %vm175_vm5, %v176_v38, %v174_v5  ;;  %v184_v18 = vmul.f32 %v183_v7, %v8116_v26  ;;  %v236_v25 = vand.u32 2147483648, %v8199_v44 }
 0x116   :  { %v160_v56 = vmul.f32 %v159_v51, %v8118_v27  ;;  %v192_v59 = vmul.f32 %v7364_v0, %v191_v54  ;;  %v210_v60 = vsel %vm209_vm4, %v8112_v23, %v208_v50  ;;  %vm8251_vm15 = vcmp.eq.f32.partialorder %v247_v10, 8.507059e+37 }
 0x117   :  { %v217_v3 = vmul.f32 0.5, %v216_v53  ;;  %v8226_v4 = vsel %vm211_vm6, %v212_v47, %v210_v60  ;;  %v7366_v6 = vpop.eup %7365  ;;  %v250_v32 = vor.u32 1.1754944e-38, %v249_v11  ;;  %vm233_vm1 = vcmp.eq.f32.partialorder %v8199_v44, inf }
 0x118   :  { %v162_v62 = vsel %vm161_vm7, %v8118_v27, %v160_v56  ;;  %v193_v8 = vmul.f32 0.5, %v192_v59  ;;  %7369 = vrcp.f32 %v8226_v4  ;;  %v239_v27 = vmul.f32 %v7366_v6, %v8201_v46 }
 0x119   :  { %v8232_v9 = vsel %vm163_vm8, %v164_v57, %v162_v62  ;;  %v218_v15 = vsub.f32 1.5, %v217_v3  ;;  %vm244_vm14 = vweird.f32 %v7366_v6  ;;  %vm221_vm3 = vcmp.eq.f32.partialorder %v8166_v1, inf }
 0x11a   :  { %v7368_v23 = vpop.eup %7367  ;;  %7371 = vrcp.f32 %v8232_v9  ;;  %v194_v12 = vsub.f32 1.5, %v193_v8  ;;  %v240_v16 = vsub.f32 1.0, %v239_v27  ;;  %vm258_vm0 = vweird.f32 %v8232_v9  ;;  %vm245_vm2 = vmor %vm243_vm12, %vm244_vm14 }
 0x11b   :  { %v227_v13 = vmul.f32 %v7368_v23, %v8199_v44  ;;  %7373 = vrcp.f32 %v8246_v17  ;;  %v219_v38 = vmul.f32 %v8197_v40, %v218_v15  ;;  %v262_v22 = vand.u32 2147483647, %v8232_v9 }
 0x11c   :  { %v195_v19 = vmul.f32 %v7364_v0, %v194_v12  ;;  %v241_v28 = vmul.f32 %v7366_v6, %v240_v16  ;;  %v264_v40 = vand.u32 2147483648, %v8232_v9  ;;  %vm318_vm4 = vweird.f32 %v8226_v4 }
 0x11d   :  { %v228_v24 = vmul.f32 %v7368_v23, %v227_v13  ;;  %v322_v46 = vand.u32 2147483647, %v8226_v4  ;;  %v186_v52 = vsel %vm185_vm10, %v8116_v26, %v184_v18  ;;  %v220_v57 = vmul.f32 %v219_v38, %v8166_v1 }
 0x11e   :  { %v8255_v34 = vpop.eup %7369  ;;  %v196_v63 = vmul.f32 %v195_v19, %v8168_v2  ;;  %v242_v39 = vadd.f32 %v7366_v6, %v241_v28  ;;  %vm235_vm7 = vcmp.eq.f32.partialorder %v8199_v44, 0.0  ;;  %vm8293_vm8 = vcmp.eq.f32.partialorder %v262_v22, 8.507059e+37 }
 0x11f   :  { %v229_v35 = vmul.f32 0.5, %v228_v24  ;;  %v314_v41 = vmul.f32 %v8255_v34, %v8226_v4  ;;  %vm319_vm5 = vweird.f32 %v8255_v34  ;;  %v265_v3 = vor.u32 1.1754944e-38, %v264_v40  ;;  %v8343_v24 = vld [vmem:[%s12630_s2] ss:$0 sm:$0xff] }
 0x120   :  { %v7372_v36 = vpop.eup %7371  ;;  %v198_v43 = vsel %vm197_vm9, %v8168_v2, %v196_v63  ;;  %v246_v0 = vsel %vm245_vm2, %v7366_v6, %v242_v39  ;;  %v324_v2 = vand.u32 2147483648, %v8226_v4  ;;  %v8301_v5 = vsel %vm187_vm13, %v188_v55, %v186_v52  ;;  %vm8317_vm9 = vmor %vm318_vm4, %vm319_vm5 }
 0x121   :  { %v230_v47 = vsub.f32 1.5, %v229_v35  ;;  %v254_v48 = vmul.f32 %v7372_v36, %v8232_v9  ;;  %v8276_v49 = vsel %vm199_vm11, %v200_v61, %v198_v43  ;;  %v315_v50 = vsub.f32 1.0, %v314_v41  ;;  %v8288_v56 = vpop.eup %7373 }
 0x122   :  { %7375 = vrcp.f32 %v8276_v49  ;;  %v251_v54 = vsel %vm8251_vm15, %v250_v32, %v246_v0  ;;  %vm259_vm6 = vweird.f32 %v7372_v36  ;;  %v269_v6 = vmul.f32 %v8288_v56, %v8246_v17 }
 0x123   :  { %v255_v51 = vsub.f32 1.0, %v254_v48  ;;  %v231_v53 = vmul.f32 %v7368_v23, %v230_v47  ;;  %v316_v60 = vmul.f32 %v8255_v34, %v315_v50  ;;  %v252_v7 = vmul.f32 %v251_v54, %v8015_v21  ;;  %v8309_v23 = vld [vmem:[%s12629_s1] ss:$0 sm:$0xff]  ;;  %vm260_vm10 = vmor %vm258_vm0, %vm259_vm6 }
 0x124   :  { %v307_v27 = vand.u32 2147483647, %v8276_v49  ;;  %vm8324_vm11 = vcmp.eq.f32.partialorder %v322_v46, 8.507059e+37  ;;  %v325_v11 = vor.u32 1.1754944e-38, %v324_v2  ;;  %v270_v12 = vsub.f32 1.0, %v269_v6 }
 0x125   :  { %v256_v59 = vmul.f32 %v7372_v36, %v255_v51  ;;  %v317_v10 = vadd.f32 %v8255_v34, %v316_v60  ;;  %v232_v21 = vmul.f32 %v231_v53, %v8199_v44  ;;  %vm303_vm12 = vweird.f32 %v8276_v49 }
 0x126   :  { %7377 = vrcp.f32 %v8301_v5  ;;  %v309_v16 = vand.u32 2147483648, %v8276_v49  ;;  %vm273_vm13 = vweird.f32 %v8246_v17  ;;  %v361_v19 = vmul.f32 %v8309_v23, %v252_v7 }
 0x127   :  { %v257_v8 = vadd.f32 %v7372_v36, %v256_v59  ;;  %v321_v4 = vsel %vm8317_vm9, %v8255_v34, %v317_v10  ;;  %vm8345_vm14 = vcmp.eq.f32.partialorder %v307_v27, 8.507059e+37  ;;  %v271_v29 = vmul.f32 %v8288_v56, %v270_v12 }
 0x128   :  { %v7376_v61 = vpop.eup %7375  ;;  %v234_v32 = vsel %vm233_vm1, %v8199_v44, %v232_v21  ;;  %v277_v63 = vand.u32 2147483647, %v8246_v17  ;;  %vm274_vm15 = vweird.f32 %v8288_v56  ;;  %v222_v38 = vsel %vm221_vm3, %v8166_v1, %v220_v57 }
 0x129   :  { %v261_v13 = vsel %vm260_vm10, %v7372_v36, %v257_v8  ;;  %v299_v15 = vmul.f32 %v7376_v61, %v8276_v49  ;;  %v272_v36 = vadd.f32 %v8288_v56, %v271_v29  ;;  %vm304_vm0 = vweird.f32 %v7376_v61  ;;  %vm8371_vm2 = vmor %vm273_vm13, %vm274_vm15 }
 0x12a   :  { %v266_v9 = vsel %vm8293_vm8, %v265_v3, %v261_v13  ;;  %v279_v22 = vand.u32 2147483648, %v8246_v17  ;;  %vm223_vm1 = vcmp.eq.f32.partialorder %v8166_v1, 0.0  ;;  %v372_v43 = vadd.f32 %v8343_v24, %v361_v19  ;;  %vm305_vm4 = vmor %vm303_vm12, %vm304_vm0 }
 0x12b   :  { %v267_v18 = vmul.f32 %v266_v9, %v8029_v33  ;;  %v300_v34 = vsub.f32 1.0, %v299_v15  ;;  %v326_v33 = vsel %vm8324_vm11, %v325_v11, %v321_v4  ;;  %v225_v40 = vsel %vm223_vm1, %v224_v58, %v222_v38 }
 0x12c   :  { %v7378_v41 = vpop.eup %7377  ;;  %v327_v48 = vmul.f32 %v326_v33, %v8024_v30  ;;  %v310_v50 = vor.u32 1.1754944e-38, %v309_v16  ;;  %vm8375_vm3 = vcmp.eq.f32.partialorder %v277_v63, 8.507059e+37  ;;  %v276_v30 = vsel %vm8371_vm2, %v8288_v56, %v272_v36 }
 0x12d   :  { %v362_v35 = vmul.f32 %v8309_v23, %v267_v18  ;;  %v301_v39 = vmul.f32 %v7376_v61, %v300_v34  ;;  %v284_v52 = vmul.f32 %v7378_v41, %v8301_v5  ;;  %v8391_v1 = vsel %vm235_vm7, %v236_v25, %v234_v32 }
 0x12e   :  { %7379 = vrcp.f32 %v225_v40  ;;  %v280_v17 = vor.u32 1.1754944e-38, %v279_v22  ;;  %v292_v2 = vand.u32 2147483647, %v8301_v5  ;;  %v366_v56 = vmul.f32 %v8309_v23, %v327_v48  ;;  %v7268_v48 = vld [vmem:[%s12632_s7 + $0x1c4] sm:$0xf] }
 0x12f   :  { %v373_v47 = vadd.f32 %v8343_v24, %v362_v35  ;;  %v302_v0 = vadd.f32 %v7376_v61, %v301_v39  ;;  %v285_v54 = vsub.f32 1.0, %v284_v52  ;;  %v294_v57 = vand.u32 2147483648, %v8301_v5  ;;  %v7264_v52 = vld [vmem:[%s12632_s7 + $0x1a4] sm:$0xf] }
 0x130   :  { %7381 = vrcp.f32 %v8391_v1  ;;  %v281_v25 = vsel %vm8375_vm3, %v280_v17, %v276_v30  ;;  %vm289_vm5 = vweird.f32 %v7378_v41  ;;  %vm288_vm6 = vweird.f32 %v8301_v5  ;;  %v6992_v30 = vld [vmem:[%s12632_s7 + $0x1b0] sm:$0xf0] }
 0x131   :  { %v8380_v53 = vpack.c.bf16 %v373_v47, %v372_v43  ;;  %v306_v58 = vsel %vm305_vm4, %v7376_v61, %v302_v0  ;;  %v286_v59 = vmul.f32 %v7378_v41, %v285_v54  ;;  %v377_v6 = vadd.f32 %v8343_v24, %v366_v56  ;;  %vm290_vm7 = vmor %vm288_vm6, %vm289_vm5  ;;  %v7272_v43 = vld [vmem:[%s12632_s7 + $0x1e4] sm:$0xf]  ;;  %v7024_v47 = vld [vmem:[%s12632_s7 + $0x1f0] sm:$0xf0] }
 0x132   :  { %v311_v49 = vsel %vm8345_vm14, %v310_v50, %v306_v58  ;;  %v282_v7 = vmul.f32 %v281_v25, %v8013_v20  ;;  %vm293_vm8 = vcmp.eq.f32.partialorder %v292_v2, 8.507059e+37  ;;  %v295_v8 = vor.u32 1.1754944e-38, %v294_v57  ;;  %v7008_v50 = vld [vmem:[%s12632_s7 + $0x1d0] sm:$0xf0]  ;;  %v7240_v2 = vld [vmem:[%s12632_s7 + $0xe4] sm:$0xf] }
 0x133   :  { %488 = vmatmul.bf16.vlgmr.msra.gmra.mxu0 %v8380_v53  ;;  %517 = vmatmul.bf16.vlgmr.msra.gmra.mxu1 %v8380_v53  ;;  %v312_v44 = vmul.f32 %v311_v49, %v8037_v37  ;;  %v287_v62 = vadd.f32 %v7378_v41, %v286_v59  ;;  %v337_v26 = vand.u32 2147483647, %v225_v40  ;;  %vm333_vm9 = vweird.f32 %v225_v40  ;;  %v6976_v54 = vld [vmem:[%s12632_s7 + $0x190] sm:$0xf0] }
 0x134   :  { %v7380_v3 = vpop.eup %7379  ;;  %v339_v11 = vand.u32 2147483648, %v225_v40  ;;  %v363_v13 = vmul.f32 %v8309_v23, %v282_v7  ;;  %vm348_vm13 = vweird.f32 %v8391_v1  ;;  %v354_v19 = vand.u32 2147483648, %v8391_v1  ;;  %v6896_v49 = vld [vmem:[%s12632_s7 + $0xf0] sm:$0xf0]  ;;  %v7022_v7 = vld [vmem:[%s12632_s7 + $0x1e0] sm:$0xf] }
 0x135   :  { %v365_v60 = vmul.f32 %v8309_v23, %v312_v44  ;;  %v291_v27 = vsel %vm290_vm7, %v7378_v41, %v287_v62  ;;  %v329_v10 = vmul.f32 %v7380_v3, %v225_v40  ;;  %vm334_vm10 = vweird.f32 %v7380_v3  ;;  %v7256_v44 = vld [vmem:[%s12632_s7 + $0x164] sm:$0xf]  ;;  %v6960_v59 = vld [vmem:[%s12632_s7 + $0x170] sm:$0xf0]  ;;  %v7242_v62 = vld [vmem:[%s12632_s7 + $0xec] sm:$0xf0] }
 0x136   :  { %v7382_v21 = vpop.eup %7381  ;;  %v296_v55 = vsel %vm293_vm8, %v295_v8, %v291_v27  ;;  %vm8416_vm11 = vcmp.eq.f32.partialorder %v337_v26, 8.507059e+37  ;;  %vm335_vm12 = vmor %vm333_vm9, %vm334_vm10  ;;  %v340_v18 = vor.u32 1.1754944e-38, %v339_v11  ;;  %v374_v34 = vadd.f32 %v8343_v24, %v363_v13  ;;  %v7274_v8 = vld [vmem:[%s12632_s7 + $0x1ec] sm:$0xf0]  ;;  %v6880_v26 = vld [vmem:[%s12632_s7 + $0xd0] sm:$0xf0] }
 0x137   :  { %v376_v37 = vadd.f32 %v8343_v24, %v365_v60  ;;  %v297_v5 = vmul.f32 %v296_v55, %v8026_v31  ;;  %v330_v61 = vsub.f32 1.0, %v329_v10  ;;  %v344_v20 = vmul.f32 %v7382_v21, %v8391_v1  ;;  %v6894_v60 = vld [vmem:[%s12632_s7 + $0xe0] sm:$0xf] }
 0x138   :  { %v352_v31 = vand.u32 2147483647, %v8391_v1  ;;  %vm349_vm14 = vweird.f32 %v7382_v21  ;;  %v355_v38 = vor.u32 1.1754944e-38, %v354_v19  ;;  %v7027_v0 = vor.u32 %v7272_v43, %v7024_v47 }
 0x139   :  { %v8409_v12 = vpack.c.bf16 %v377_v6, %v376_v37  ;;  %v364_v4 = vmul.f32 %v8309_v23, %v297_v5  ;;  %v331_v9 = vmul.f32 %v7380_v3, %v330_v61  ;;  %v345_v16 = vsub.f32 1.0, %v344_v20  ;;  %vm350_vm15 = vmor %vm348_vm13, %vm349_vm14  ;;  %v7236_v37 = vld [vmem:[%s12632_s7 + $0xc4] sm:$0xf]  ;;  %v539_v5 = vld [vmem:[%s12634_s6] sm:$0x3] }
 0x13a   :  { %vm353_vm0 = vcmp.eq.f32.partialorder %v352_v31, 8.507059e+37  ;;  %1267 = vmatpush.bf16.msrb.mxu1 %v7027_v0  ;;  %v7011_v46 = vor.u32 %v7268_v48, %v7008_v50  ;;  %v6995_v17 = vor.u32 %v7264_v52, %v6992_v30  ;;  %v6899_v25 = vor.u32 %v7240_v2, %v6896_v49  ;;  %v7232_v48 = vld [vmem:[%s12632_s7 + $0xa4] sm:$0xf]  ;;  %v6848_v49 = vld [vmem:[%s12632_s7 + $0x90] sm:$0xf0] }
 0x13b   :  { %498 = vmatmul.bf16.vlgmr.msra.gmra.mxu3 %v8409_v12  ;;  %v375_v28 = vadd.f32 %v8343_v24, %v364_v4  ;;  %v332_v29 = vadd.f32 %v7380_v3, %v331_v9  ;;  %v346_v32 = vmul.f32 %v7382_v21, %v345_v16  ;;  %v6895_v6 = vor.u32 %v7242_v62, %v6894_v60  ;;  %v7252_v30 = vld [vmem:[%s12632_s7 + $0x144] sm:$0xf] }
 0x13c   :  { %1238 = vmatpush.bf16.msrb.mxu0 %v6899_v25  ;;  %v7023_v10 = vor.u32 %v7274_v8, %v7022_v7  ;;  %v8519_v16 = vperm.slane %v539_v5, 0  ;;  %v8525_v19 = vperm.slane %v539_v5, 1  ;;  %v7228_v2 = vld [vmem:[%s12632_s7 + $0x84] sm:$0xf]  ;;  %v6846_v8 = vld [vmem:[%s12632_s7 + $0x80] sm:$0xf] }
 0x13d   :  { %v336_v33 = vsel %vm335_vm12, %v7380_v3, %v332_v29  ;;  %v347_v63 = vadd.f32 %v7382_v21, %v346_v32  ;;  %v8425_v35 = vpack.c.bf16 %v375_v28, %v374_v34  ;;  %v6963_v3 = vor.u32 %v7256_v44, %v6960_v59  ;;  %1180 = vmatpush.bf16.msra.mxu2 %v6895_v6  ;;  %v6878_v29 = vld [vmem:[%s12632_s7 + $0xc0] sm:$0xf]  ;;  %v7238_v32 = vld [vmem:[%s12632_s7 + $0xcc] sm:$0xf0] }
 0x13e   :  { %v341_v36 = vsel %vm8416_vm11, %v340_v18, %v336_v33  ;;  %1268 = vmatpush.bf16.msrb.mxu1 %v7011_v46  ;;  %1209 = vmatpush.bf16.msrb.mxu3 %v7023_v10  ;;  %v7006_v34 = vld [vmem:[%s12632_s7 + $0x1c0] sm:$0xf]  ;;  %v6851_v7 = vor.u32 %v7228_v2, %v6848_v49  ;;  %v7220_v2 = vld [vmem:[%s12632_s7 + $0x44] sm:$0xf]  ;;  %v6816_v49 = vld [vmem:[%s12632_s7 + $0x50] sm:$0xf0] }
 0x13f   :  { %v342_v39 = vmul.f32 %v341_v36, %v8042_v42  ;;  %v351_v22 = vsel %vm350_vm15, %v7382_v21, %v347_v63  ;;  %v6883_v21 = vor.u32 %v7236_v37, %v6880_v26  ;;  %v7230_v37 = vld [vmem:[%s12632_s7 + $0x8c] sm:$0xf0]  ;;  %v6974_v26 = vld [vmem:[%s12632_s7 + $0x180] sm:$0xf]  ;;  %vm1592_vm1 = vcmask 1041409  }
 0x140   :  { %v356_v41 = vsel %vm353_vm0, %v355_v38, %v351_v22  ;;  %v6879_v38 = vor.u32 %v7238_v32, %v6878_v29  ;;  %v6847_v10 = vor.u32 %v7230_v37, %v6846_v8  ;;  %vm1598_vm2 = vcmask 1043459  }
 0x141   :  { %v357_v42 = vmul.f32 %v356_v41, %v8047_v45  ;;  %v367_v40 = vmul.f32 %v8309_v23, %v342_v39  ;;  %1239 = vmatpush.bf16.msrb.mxu0 %v6883_v21  ;;  %v7270_v39 = vld [vmem:[%s12632_s7 + $0x1cc] sm:$0xf0]  ;;  %vm1604_vm3 = vcmask 1045509   ;;  %vm1590_vm4 = vcmask 1040384  }
 0x142   :  { %1269 = vmatpush.bf16.msrb.mxu1 %v6995_v17  ;;  %v7007_v47 = vor.u32 %v7270_v39, %v7006_v34  ;;  %1181 = vmatpush.bf16.msra.mxu2 %v6879_v38  ;;  %v7234_v17 = vld [vmem:[%s12632_s7 + $0xac] sm:$0xf0]  ;;  %v7224_v34 = vld [vmem:[%s12632_s7 + $0x64] sm:$0xf]  ;;  %vm1595_vm5 = vcmask 1042434   ;;  %vm1610_vm6 = vcmask 1046528  }
 0x143   :  { %493 = vmatmul.bf16.gmra.mxu0 %v8425_v35  ;;  %522 = vmatmul.bf16.gmra.mxu1 %v8425_v35  ;;  %v368_v51 = vmul.f32 %v8309_v23, %v357_v42  ;;  %v378_v45 = vadd.f32 %v8343_v24, %v367_v40  ;;  %v8463_v23 = vld [vmem:[%s12633_s5] sm:$0xff]  ;;  %v6864_v42 = vld [vmem:[%s12632_s7 + $0xb0] sm:$0xf0]  ;;  %v7262_v21 = vld [vmem:[%s12632_s7 + $0x18c] sm:$0xf0]  ;;  %vm1601_vm7 = vcmask 1044484  }
 0x144   :  { %v541_v56 = vperm.slane %v8463_v23, 3  ;;  %v542_v27 = vperm.slane %v8463_v23, 7  ;;  %v584_v61 = vperm.slane %v8463_v23, 2  ;;  %v622_v4 = vperm.slane %v8463_v23, 1  ;;  %1210 = vmatpush.bf16.msrb.mxu3 %v7007_v47  ;;  %v7248_v38 = vld [vmem:[%s12632_s7 + $0x124] sm:$0xf] }
 0x145   :  { %v379_v1 = vadd.f32 %v8343_v24, %v368_v51  ;;  %v7260_v24 = vld [vmem:[%s12632_s7 + $0x184] sm:$0xf]  ;;  %v585_v9 = vperm.slane %v8463_v23, 6  ;;  %v623_v28 = vperm.slane %v8463_v23, 5  ;;  %v658_v41 = vperm.slane %v8463_v23, 0 }
 0x146   :  { %v6979_v57 = vor.u32 %v7260_v24, %v6976_v54  ;;  %v8503_v55 = vperm.slane %v541_v56, 3  ;;  %v8513_v13 = vperm.slane %v542_v27, 3  ;;  %v8521_v18 = vperm.slane %v584_v61, 2  ;;  %v7266_v54 = vld [vmem:[%s12632_s7 + $0x1ac] sm:$0xf0] }
 0x147   :  { %v8455_v58 = vpack.c.bf16 %v379_v1, %v378_v45  ;;  %v8538_v63 = vperm.slane %v622_v4, 1  ;;  %v8540_v36 = vperm.slane %v585_v9, 2  ;;  %v659_v43 = vperm.slane %v8463_v23, 4  ;;  %v6944_v45 = vld [vmem:[%s12632_s7 + $0x150] sm:$0xf0] }
 0x148   :  { %1270 = vmatpush.bf16.msrb.mxu1 %v6979_v57  ;;  %v590_v33 = vmul.f32 0.0, %v8521_v18  ;;  %v8556_v50 = vperm.slane %v623_v28, 1  ;;  %v6867_v52 = vor.u32 %v7232_v48, %v6864_v42  ;;  %v6862_v1 = vld [vmem:[%s12632_s7 + $0xa0] sm:$0xf]  ;;  %v6947_v59 = vor.u32 %v7252_v30, %v6944_v45  ;;  %v7226_v47 = vld [vmem:[%s12632_s7 + $0x6c] sm:$0xf0] }
 0x149   :  { %v591_v0 = vmul.f32 0.0, %v8540_v36  ;;  %v6990_v23 = vld [vmem:[%s12632_s7 + $0x1a0] sm:$0xf]  ;;  %v628_v57 = vmul.f32 0.0, %v8538_v63  ;;  %v6863_v60 = vor.u32 %v7234_v17, %v6862_v1  ;;  %v8592_v62 = vperm.slane %v658_v41, 0 }
 0x14a   :  { %1240 = vmatpush.bf16.msrb.mxu0 %v6867_v52  ;;  %v8590_v25 = vmul.f32 0.0, %v8556_v50  ;;  %v6991_v6 = vor.u32 %v7266_v54, %v6990_v23  ;;  %v6928_v41 = vld [vmem:[%s12632_s7 + $0x130] sm:$0xf0]  ;;  %vm1607_vm8 = vcmask 1046534   ;;  %vm5519_vm9 = vcmask 1047559  }
 0x14b   :  { %503 = vmatmul.bf16.gmra.mxu3 %v8455_v58  ;;  %1182 = vmatpush.bf16.msra.mxu2 %v6863_v60  ;;  %v8610_v61 = vmul.f32 0.0, %v8592_v62  ;;  %v6931_v1 = vor.u32 %v7248_v38, %v6928_v41  ;;  %v6819_v60 = vor.u32 %v7220_v2, %v6816_v49  ;;  %v7244_v49 = vld [vmem:[%s12632_s7 + $0x104] sm:$0xf] }
 0x14c   :  { %1271 = vmatpush.bf16.msrb.mxu1 %v6963_v3  ;;  %v8594_v3 = vperm.slane %v659_v43, 0  ;;  %1211 = vmatpush.bf16.msrb.mxu3 %v6991_v6  ;;  %v6830_v43 = vld [vmem:[%s12632_s7 + $0x60] sm:$0xf]  ;;  %v7222_v6 = vld [vmem:[%s12632_s7 + $0x4c] sm:$0xf0] }
 0x14d   :  { %v6831_v17 = vor.u32 %v7226_v47, %v6830_v43 }
 0x14e   :  { %v8613_v4 = vmul.f32 0.0, %v8594_v3  ;;  %1241 = vmatpush.bf16.msrb.mxu0 %v6851_v7 }
 0x14f   :  { %1183 = vmatpush.bf16.msra.mxu2 %v6847_v10 }
 0x150   :  { %1272 = vmatpush.bf16.msrb.mxu1 %v6947_v59 }
 0x153   :  { %527 = vmatmul.bf16.gmra.mxu1 %v8409_v12  ;;  %1184 = vmatpush.bf16.msra.mxu2 %v6831_v17  ;;  %v7216_v17 = vld [vmem:[%s12632_s7 + $0x24] sm:$0xf] }
 0x154   :  { %1273 = vmatpush.bf16.msrb.mxu1 %v6931_v1 }
 0x163   :  { %532 = vmatmul.bf16.gmra.mxu1 %v8455_v58 }
 0x1b0   :  { %v8505_v11 = vpop.f32.mrf.mxu0  ;;  %v8511_v20 = vpop.f32.mrf.mxu1 }
 0x1b1   :  { %v547_v15 = vmul.f32 %v8503_v55, %v8505_v11  ;;  %v548_v31 = vmul.f32 %v8513_v13, %v8511_v20  ;;  %v593_v8 = vmul.f32 %v8540_v36, %v8511_v20  ;;  %v8697_v38 = vmul.f32 %v8592_v62, %v8505_v11 }
 0x1b2   :  { %v631_v47 = vmul.f32 %v8556_v50, %v8511_v20 }
 0x1b3   :  { %v568_v22 = vadd.f32 %v8519_v16, %v547_v15  ;;  %v569_v40 = vadd.f32 %v8525_v19, %v548_v31  ;;  %v6975_v15 = vor.u32 %v7262_v21, %v6974_v26  ;;  %v592_v31 = vmul.f32 %v8521_v18, %v8505_v11 }
 0x1b5   :  { %v606_v56 = vadd.f32 %v590_v33, %v568_v22  ;;  %v607_v44 = vadd.f32 %v591_v0, %v569_v40  ;;  %v6832_v33 = vld [vmem:[%s12632_s7 + $0x70] sm:$0xf0]  ;;  %v6958_v40 = vld [vmem:[%s12632_s7 + $0x160] sm:$0xf]  ;;  %v7258_v0 = vld [vmem:[%s12632_s7 + $0x16c] sm:$0xf0]  ;;  %1212 = vmatpush.bf16.msrb.mxu3 %v6975_v15 }
 0x1b6   :  { %v6835_v45 = vor.u32 %v7224_v34, %v6832_v33  ;;  %v6959_v54 = vor.u32 %v7258_v0, %v6958_v40  ;;  %v7254_v40 = vld [vmem:[%s12632_s7 + $0x14c] sm:$0xf0] }
 0x1b7   :  { %v642_v5 = vadd.f32 %v628_v57, %v606_v56  ;;  %v643_v28 = vadd.f32 %v8590_v25, %v607_v44  ;;  %v6814_v56 = vld [vmem:[%s12632_s7 + $0x40] sm:$0xf] }
 0x1b8   :  { %v8558_v51 = vpop.f32.mrf.mxu0  ;;  %v8560_v46 = vpop.f32.mrf.mxu1  ;;  %1242 = vmatpush.bf16.msrb.mxu0 %v6835_v45 }
 0x1b9   :  { %v549_v24 = vmul.f32 %v8503_v55, %v8558_v51  ;;  %v550_v39 = vmul.f32 %v8513_v13, %v8560_v46  ;;  %v8655_v52 = vadd.f32 %v8610_v61, %v642_v5  ;;  %v8658_v30 = vadd.f32 %v8613_v4, %v643_v28  ;;  %1213 = vmatpush.bf16.msrb.mxu3 %v6959_v54 }
 0x1ba   :  { %v594_v37 = vmul.f32 %v8521_v18, %v8558_v51  ;;  %v595_v26 = vmul.f32 %v8540_v36, %v8560_v46  ;;  %v632_v45 = vmul.f32 %v8538_v63, %v8558_v51  ;;  %v8720_v1 = vmul.f32 %v8592_v62, %v8558_v51 }
 0x1bb   :  { %v570_v27 = vadd.f32 %v8519_v16, %v549_v24  ;;  %v571_v23 = vadd.f32 %v8525_v19, %v550_v39  ;;  %v692_v7 = vsub.f32 0.0, %v8655_v52  ;;  %v693_v10 = vsub.f32 0.0, %v8658_v30 }
 0x1bc   :  { %1243 = vmatpush.bf16.msrb.mxu0 %v6819_v60 }
 0x1bd   :  { %v608_v48 = vadd.f32 %v592_v31, %v570_v27  ;;  %v630_v31 = vmul.f32 %v8538_v63, %v8505_v11  ;;  %v609_v28 = vadd.f32 %v593_v8, %v571_v23  ;;  %v708_v43 = vmul.f32 1.442695, %v692_v7  ;;  %v6942_v11 = vld [vmem:[%s12632_s7 + $0x140] sm:$0xf]  ;;  %v6800_v23 = vld [vmem:[%s12632_s7 + $0x30] sm:$0xf0] }
 0x1be   :  { %v8615_v9 = vpop.f32.mrf.mxu3  ;;  %v710_v0 = vmul.f32 1.442695, %v693_v10  ;;  %v6943_v60 = vor.u32 %v7254_v40, %v6942_v11  ;;  %v6803_v7 = vor.u32 %v7216_v17, %v6800_v23  ;;  %v6926_v10 = vld [vmem:[%s12632_s7 + $0x120] sm:$0xf]  ;;  %v7214_v11 = vld [vmem:[%s12632_s7 + $0xc] sm:$0xf0] }
 0x1bf   :  { %v644_v44 = vadd.f32 %v628_v57, %v608_v48  ;;  %v6815_v57 = vor.u32 %v7222_v6, %v6814_v56  ;;  %v8707_v48 = vmul.f32 %v8594_v3, %v8511_v20  ;;  %v600_v20 = vmul.f32 %v8521_v18, %v8615_v9  ;;  %v6912_v56 = vld [vmem:[%s12632_s7 + $0x110] sm:$0xf0]  ;;  %v6910_v23 = vld [vmem:[%s12632_s7 + $0x100] sm:$0xf] }
 0x1c0   :  { %v8620_v29 = vpop.f32.mrf.mxu0  ;;  %v8622_v32 = vpop.f32.mrf.mxu1  ;;  %7383 = vpow2.f32 %v708_v43  ;;  %v6915_v8 = vor.u32 %v7244_v49, %v6912_v56  ;;  %1214 = vmatpush.bf16.msrb.mxu3 %v6943_v60  ;;  %1244 = vmatpush.bf16.msrb.mxu0 %v6803_v7 }
 0x1c1   :  { %v551_v22 = vmul.f32 %v8503_v55, %v8620_v29  ;;  %v552_v42 = vmul.f32 %v8513_v13, %v8622_v32  ;;  %v8701_v41 = vadd.f32 %v8610_v61, %v644_v44  ;;  %1185 = vmatpush.bf16.msra.mxu2 %v6815_v57  ;;  %v596_v54 = vmul.f32 %v8521_v18, %v8620_v29  ;;  %v7218_v57 = vld [vmem:[%s12632_s7 + $0x2c] sm:$0xf0] }
 0x1c2   :  { %7385 = vpow2.f32 %v710_v0  ;;  %1274 = vmatpush.bf16.msrb.mxu1 %v6915_v8 }
 0x1c3   :  { %v572_v24 = vadd.f32 %v8519_v16, %v551_v22  ;;  %v573_v59 = vadd.f32 %v8525_v19, %v552_v42 }
 0x1c5   :  { %v610_v34 = vadd.f32 %v594_v37, %v572_v24  ;;  %v611_v39 = vadd.f32 %v595_v26, %v573_v59  ;;  %v645_v24 = vadd.f32 %v8590_v25, %v609_v28  ;;  %v694_v25 = vsub.f32 0.0, %v8701_v41  ;;  %v6798_v37 = vld [vmem:[%s12632_s7 + $0x20] sm:$0xf] }
 0x1c6   :  { %v8680_v27 = vpop.f32.mrf.mxu3  ;;  %v555_v26 = vmul.f32 %v8503_v55, %v8615_v9  ;;  %v6799_v17 = vor.u32 %v7218_v57, %v6798_v37  ;;  %v7384_v7 = vpop.eup %7383 }
 0x1c7   :  { %v557_v21 = vmul.f32 %v8503_v55, %v8680_v27  ;;  %v646_v2 = vadd.f32 %v630_v31, %v610_v34  ;;  %v647_v44 = vadd.f32 %v631_v47, %v611_v39  ;;  %v7250_v34 = vld [vmem:[%s12632_s7 + $0x12c] sm:$0xf0]  ;;  %v6784_v39 = vld [vmem:[%s12632_s7 + $0x10] sm:$0xf0]  ;;  %v8781_v40 = vadd.f32 %v8613_v4, %v645_v24 }
 0x1c8   :  { %v8687_v5 = vpop.f32.mrf.mxu0  ;;  %v8689_v15 = vpop.f32.mrf.mxu1  ;;  %v6927_v49 = vor.u32 %v7250_v34, %v6926_v10  ;;  %1186 = vmatpush.bf16.msra.mxu2 %v6799_v17  ;;  %v712_v60 = vmul.f32 1.442695, %v694_v25  ;;  %v633_v10 = vmul.f32 %v8556_v50, %v8560_v46  ;;  %v7241_v25 = vld [vmem:[%s12632_s7 + $0xec] sm:$0xf]  ;;  %v635_v17 = vmul.f32 %v8556_v50, %v8622_v32 }
 0x1c9   :  { %v553_v33 = vmul.f32 %v8503_v55, %v8687_v5  ;;  %v578_v22 = vadd.f32 %v8519_v16, %v557_v21  ;;  %v554_v51 = vmul.f32 %v8513_v13, %v8689_v15  ;;  %v670_v21 = vmul.f32 %v8592_v62, %v8620_v29  ;;  %v7386_v57 = vpop.eup %7385 }
 0x1ca   :  { %v636_v31 = vmul.f32 %v8538_v63, %v8687_v5  ;;  %v8786_v0 = vadd.f32 %v8613_v4, %v647_v44  ;;  %v598_v4 = vmul.f32 %v8521_v18, %v8687_v5  ;;  %v599_v44 = vmul.f32 %v8540_v36, %v8689_v15  ;;  %1215 = vmatpush.bf16.msrb.mxu3 %v6927_v49 }
 0x1cb   :  { %v574_v42 = vadd.f32 %v8519_v16, %v553_v33  ;;  %v616_v59 = vadd.f32 %v600_v20, %v578_v22  ;;  %v7212_v33 = vld [vmem:[%s12632_s7 + $0x4] sm:$0xf]  ;;  %v8769_v22 = vadd.f32 %v8610_v61, %v646_v2  ;;  %v575_v43 = vadd.f32 %v8525_v19, %v554_v51 }
 0x1cc   :  { %v597_v61 = vmul.f32 %v8540_v36, %v8622_v32  ;;  %v6787_v56 = vor.u32 %v7212_v33, %v6784_v39  ;;  %v697_v34 = vsub.f32 0.0, %v8786_v0  ;;  %v6904_v39 = vld [vmem:[%s12632_s7 + $0xf8] sm:$0xf0]  ;;  %7387 = vpow2.f32 %v712_v60 }
 0x1cd   :  { %v612_v6 = vadd.f32 %v596_v54, %v574_v42  ;;  %v6782_v42 = vld [vmem:[%s12632_s7] sm:$0xf]  ;;  %v652_v20 = vadd.f32 %v636_v31, %v616_v59  ;;  %v7246_v54 = vld [vmem:[%s12632_s7 + $0x10c] sm:$0xf0]  ;;  %v696_v8 = vsub.f32 0.0, %v8769_v22  ;;  %v576_v31 = vadd.f32 %v8519_v16, %v555_v26 }
 0x1ce   :  { %v8794_v24 = vpop.f32.mrf.mxu3  ;;  %v6783_v59 = vor.u32 %v7214_v11, %v6782_v42  ;;  %v613_v37 = vadd.f32 %v597_v61, %v575_v43  ;;  %1245 = vmatpush.bf16.msrb.mxu0 %v6787_v56  ;;  %v7273_v42 = vld [vmem:[%s12632_s7 + $0x1ec] sm:$0xf]  ;;  %v740_v11 = vadd.f32 1.0, %v7384_v7  ;;  %v669_v61 = vmul.f32 %v8594_v3, %v8560_v46 }
 0x1cf   :  { %v648_v2 = vadd.f32 %v632_v45, %v612_v6  ;;  %v6911_v45 = vor.u32 %v7246_v54, %v6910_v23  ;;  %v695_v6 = vsub.f32 0.0, %v8781_v40  ;;  %v8813_v43 = vadd.f32 %v670_v21, %v652_v20  ;;  %v7032_v20 = vld [vmem:[%s12632_s7 + $0x1f8] sm:$0xf0] }
 0x1d0   :  { %v8757_v28 = vpop.f32.mrf.mxu1  ;;  %1187 = vmatpush.bf16.msra.mxu2 %v6783_v59  ;;  %v6907_v21 = vor.u32 %v7241_v25, %v6904_v39  ;;  %v716_v54 = vmul.f32 1.442695, %v696_v8  ;;  %v649_v49 = vadd.f32 %v633_v10, %v613_v37  ;;  %v7035_v56 = vor.u32 %v7273_v42, %v7032_v20 }
 0x1d1   :  { %v556_v47 = vmul.f32 %v8513_v13, %v8757_v28  ;;  %v8819_v26 = vadd.f32 %v8697_v38, %v648_v2  ;;  %1216 = vmatpush.bf16.msrb.mxu3 %v6911_v45  ;;  %v718_v2 = vmul.f32 1.442695, %v697_v34  ;;  %v601_v59 = vmul.f32 %v8540_v36, %v8757_v28 }
 0x1d2   :  { %1354 = vmatpush.bf16.msra.mxu0 %v6907_v21  ;;  %v634_v8 = vmul.f32 %v8538_v63, %v8620_v29  ;;  %v671_v37 = vmul.f32 %v8594_v3, %v8622_v32  ;;  %v559_v45 = vmul.f32 %v8503_v55, %v8794_v24  ;;  %1383 = vmatpush.bf16.msra.mxu1 %v7035_v56 }
 0x1d3   :  { %v577_v51 = vadd.f32 %v8525_v19, %v556_v47  ;;  %v714_v47 = vmul.f32 1.442695, %v695_v6  ;;  %v698_v7 = vsub.f32 0.0, %v8819_v26  ;;  %v7388_v6 = vpop.eup %7387  ;;  %v637_v10 = vmul.f32 %v8556_v50, %v8689_v15 }
 0x1d4   :  { %v742_v25 = vadd.f32 1.0, %v7388_v6  ;;  %v580_v21 = vadd.f32 %v8519_v16, %v559_v45  ;;  %v7275_v6 = vld [vmem:[%s12632_s7 + $0x1f4] sm:$0xf0] }
 0x1d5   :  { %v615_v33 = vadd.f32 %v599_v44, %v577_v51  ;;  %v614_v51 = vadd.f32 %v598_v4, %v576_v31  ;;  %7389 = vpow2.f32 %v714_v47  ;;  %v702_v44 = vsub.f32 0.0, %v8813_v43 }
 0x1d6   :  { %v741_v4 = vadd.f32 1.0, %v7386_v57  ;;  %7391 = vpow2.f32 %v716_v54  ;;  %v506_v31 = vpop.f32.mrf.mxu3  ;;  %v720_v47 = vmul.f32 1.442695, %v698_v7  ;;  %v7269_v54 = vld [vmem:[%s12632_s7 + $0x1cc] sm:$0xf] }
 0x1d7   :  { %v651_v46 = vadd.f32 %v635_v17, %v615_v33  ;;  %v8846_v33 = vadd.f32 %v8707_v48, %v649_v49  ;;  %7393 = vpow2.f32 %v718_v2  ;;  %v650_v57 = vadd.f32 %v634_v8, %v614_v51 }
 0x1d8   :  { %v8825_v23 = vpop.f32.mrf.mxu1  ;;  %v728_v32 = vmul.f32 1.442695, %v702_v44  ;;  %7395 = vrcp.f32 %v740_v11  ;;  %v8852_v17 = vmul.f32 %v8538_v63, %v8615_v9  ;;  %v561_v20 = vmul.f32 %v8503_v55, %v506_v31  ;;  %v6888_v11 = vld [vmem:[%s12632_s7 + $0xd8] sm:$0xf0] }
 0x1d9   :  { %v558_v38 = vmul.f32 %v8513_v13, %v8825_v23  ;;  %v8848_v29 = vadd.f32 %v669_v61, %v651_v46  ;;  %7397 = vrcp.f32 %v741_v4  ;;  %v7237_v61 = vld [vmem:[%s12632_s7 + $0xcc] sm:$0xf]  ;;  %v7016_v55 = vld [vmem:[%s12632_s7 + $0x1d8] sm:$0xf0]  ;;  %v699_v2 = vsub.f32 0.0, %v8846_v33 }
 0x1da   :  { %7399 = vrcp.f32 %v742_v25  ;;  %v602_v46 = vmul.f32 %v8521_v18, %v8680_v27  ;;  %v6891_v44 = vor.u32 %v7237_v61, %v6888_v11  ;;  %v8886_v7 = vadd.f32 %v8720_v1, %v650_v57 }
 0x1db   :  { %v579_v60 = vadd.f32 %v8525_v19, %v558_v38  ;;  %v7390_v42 = vpop.eup %7389  ;;  %v6902_v38 = vld [vmem:[%s12632_s7 + $0xe8] sm:$0xf]  ;;  %v701_v56 = vsub.f32 0.0, %v8848_v29  ;;  %v8894_v31 = vmul.f32 %v8592_v62, %v8615_v9  ;;  %v640_v25 = vmul.f32 %v8538_v63, %v8680_v27  ;;  %v7233_v63 = vld [vmem:[%s12632_s7 + $0xac] sm:$0xf] }
 0x1dc   :  { %v743_v49 = vadd.f32 1.0, %v7390_v42  ;;  %v7392_v4 = vpop.eup %7391  ;;  %1355 = vmatpush.bf16.msra.mxu0 %v6891_v44  ;;  %v8901_v42 = vadd.f32 %v602_v46, %v580_v21  ;;  %v722_v61 = vmul.f32 1.442695, %v699_v2  ;;  %v6872_v27 = vld [vmem:[%s12632_s7 + $0xb8] sm:$0xf0] }
 0x1dd   :  { %v617_v34 = vadd.f32 %v601_v59, %v579_v60  ;;  %v7243_v59 = vld [vmem:[%s12632_s7 + $0xf4] sm:$0xf0]  ;;  %v7030_v60 = vld [vmem:[%s12632_s7 + $0x1e8] sm:$0xf]  ;;  %v744_v9 = vadd.f32 1.0, %v7392_v4  ;;  %v6875_v2 = vor.u32 %v7233_v63, %v6872_v27 }
 0x1de   :  { %7401 = vrcp.f32 %v743_v49  ;;  %v6903_v45 = vor.u32 %v7243_v59, %v6902_v38  ;;  %v7031_v1 = vor.u32 %v7275_v6, %v7030_v60  ;;  %v7265_v46 = vld [vmem:[%s12632_s7 + $0x1ac] sm:$0xf]  ;;  %v6886_v44 = vld [vmem:[%s12632_s7 + $0xc8] sm:$0xf]  ;;  %v7239_v4 = vld [vmem:[%s12632_s7 + $0xd4] sm:$0xf0] }
 0x1df   :  { %v653_v39 = vadd.f32 %v637_v10, %v617_v34  ;;  %v7394_v10 = vpop.eup %7393  ;;  %v582_v34 = vadd.f32 %v8519_v16, %v561_v20  ;;  %7403 = vpow2.f32 %v720_v47  ;;  %v7235_v63 = vld [vmem:[%s12632_s7 + $0xb4] sm:$0xf0]  ;;  %v6998_v27 = vld [vmem:[%s12632_s7 + $0x1a8] sm:$0xf] }
 0x1e0   :  { %v8856_v48 = vpop.f32.mrf.mxu1  ;;  %v7396_v57 = vpop.eup %7395  ;;  %1296 = vmatpush.bf16.msrb.mxu2 %v6903_v45  ;;  %1325 = vmatpush.bf16.msra.mxu3 %v7031_v1  ;;  %v8907_v20 = vadd.f32 1.0, %v7394_v10  ;;  %7405 = vpow2.f32 %v728_v32  ;;  %v6856_v1 = vld [vmem:[%s12632_s7 + $0x98] sm:$0xf0] }
 0x1e1   :  { %v8867_v51 = vadd.f32 %v671_v37, %v653_v39  ;;  %v7019_v37 = vor.u32 %v7269_v54, %v7016_v55  ;;  %v604_v39 = vmul.f32 %v8521_v18, %v8794_v24  ;;  %v7398_v11 = vpop.eup %7397  ;;  %v726_v54 = vmul.f32 1.442695, %v701_v56  ;;  %v7000_v56 = vld [vmem:[%s12632_s7 + $0x1b8] sm:$0xf0]  ;;  %1356 = vmatpush.bf16.msra.mxu0 %v6875_v2 }
 0x1e2   :  { %v560_v16 = vmul.f32 %v8513_v13, %v8856_v48  ;;  %v7400_v47 = vpop.eup %7399  ;;  %v603_v18 = vmul.f32 %v8540_v36, %v8825_v23  ;;  %v700_v24 = vsub.f32 0.0, %v8886_v7  ;;  %v8919_v55 = vmul.f32 %v7396_v57, %v8655_v52  ;;  %v7261_v57 = vld [vmem:[%s12632_s7 + $0x18c] sm:$0xf] }
 0x1e3   :  { %v703_v8 = vsub.f32 0.0, %v8867_v51  ;;  %1384 = vmatpush.bf16.msra.mxu1 %v7019_v37  ;;  %v620_v21 = vadd.f32 %v604_v39, %v582_v34  ;;  %v8922_v38 = vmul.f32 %v7400_v47, %v8701_v41  ;;  %v8934_v52 = vmul.f32 %v7398_v11, %v8658_v30  ;;  %v7271_v37 = vld [vmem:[%s12632_s7 + $0x1d4] sm:$0xf0]  ;;  %v7229_v34 = vld [vmem:[%s12632_s7 + $0x8c] sm:$0xf] }
 0x1e4   :  { %v7402_v59 = vpop.eup %7401  ;;  %7407 = vpow2.f32 %v722_v61  ;;  %v7003_v60 = vor.u32 %v7265_v46, %v7000_v56  ;;  %v581_v6 = vadd.f32 %v8525_v19, %v560_v16  ;;  %v605_v10 = vmul.f32 %v8540_v36, %v8856_v48  ;;  %v6984_v36 = vld [vmem:[%s12632_s7 + $0x198] sm:$0xf0]  ;;  %v6870_v48 = vld [vmem:[%s12632_s7 + $0xa8] sm:$0xf] }
 0x1e5   :  { %v8903_v49 = vmul.f32 1.442695, %v703_v8  ;;  %v7014_v8 = vld [vmem:[%s12632_s7 + $0x1c8] sm:$0xf]  ;;  %v7404_v45 = vpop.eup %7403  ;;  %v8948_v30 = vpack.c.bf16 %v8922_v38, %v8919_v55  ;;  %v6887_v61 = vor.u32 %v7239_v4, %v6886_v44  ;;  %v641_v16 = vmul.f32 %v8556_v50, %v8825_v23  ;;  %v7257_v4 = vld [vmem:[%s12632_s7 + $0x16c] sm:$0xf] }
 0x1e6   :  { %v746_v39 = vadd.f32 1.0, %v7404_v45  ;;  %v7015_v11 = vor.u32 %v7271_v37, %v7014_v8  ;;  %7409 = vrcp.f32 %v744_v9  ;;  %v6859_v47 = vor.u32 %v7229_v34, %v6856_v1  ;;  %v7267_v9 = vld [vmem:[%s12632_s7 + $0x1b4] sm:$0xf0] }
 0x1e7   :  { %1385 = vmatpush.bf16.msra.mxu1 %v7003_v60  ;;  %1188 = vmatmul.bf16.vlgmr.msra.gmra.mxu2 %v8948_v30  ;;  %v656_v23 = vadd.f32 %v640_v25, %v620_v21  ;;  %v6987_v46 = vor.u32 %v7261_v57, %v6984_v36  ;;  %v619_v56 = vadd.f32 %v603_v18, %v581_v6  ;;  %v7225_v25 = vld [vmem:[%s12632_s7 + $0x6c] sm:$0xf]  ;;  %v6840_v21 = vld [vmem:[%s12632_s7 + $0x78] sm:$0xf0]  ;;  %v724_v18 = vmul.f32 1.442695, %v700_v24 }
 0x1e8   :  { %v535_v32 = vpop.f32.mrf.mxu1  ;;  %1246 = vmatmul.bf16.vlgmr.msrb.gmra.mxu0 %v8948_v30  ;;  %7411 = vrcp.f32 %v746_v39  ;;  %1297 = vmatpush.bf16.msrb.mxu2 %v6887_v61  ;;  %v6871_v44 = vor.u32 %v7235_v63, %v6870_v48  ;;  %v639_v60 = vmul.f32 %v8556_v50, %v8757_v28  ;;  %v6843_v45 = vor.u32 %v7225_v25, %v6840_v21  ;;  %v6968_v50 = vld [vmem:[%s12632_s7 + $0x178] sm:$0xf0]  ;;  %v7263_v34 = vld [vmem:[%s12632_s7 + $0x194] sm:$0xf0]  ;;  %v7221_v57 = vld [vmem:[%s12632_s7 + $0x4c] sm:$0xf] }
 0x1e9   :  { %v562_v41 = vmul.f32 %v8513_v13, %v535_v32  ;;  %v8951_v13 = vmul.f32 %v7402_v59, %v8781_v40  ;;  %v8986_v32 = vpop.eup %7405  ;;  %1326 = vmatpush.bf16.msra.mxu3 %v7015_v11  ;;  %7413 = vpow2.f32 %v726_v54  ;;  %v6999_v59 = vor.u32 %v7267_v9, %v6998_v27  ;;  %1357 = vmatpush.bf16.msra.mxu0 %v6859_v47  ;;  %v7253_v39 = vld [vmem:[%s12632_s7 + $0x14c] sm:$0xf]  ;;  %v6952_v48 = vld [vmem:[%s12632_s7 + $0x158] sm:$0xf0] }
 0x1ea   :  { %v675_v54 = vmul.f32 %v8594_v3, %v8757_v28  ;;  %7415 = vpow2.f32 %v8903_v49  ;;  %v6854_v28 = vld [vmem:[%s12632_s7 + $0x88] sm:$0xf]  ;;  %v654_v49 = vadd.f32 %v8852_v17, %v8901_v42  ;;  %v9017_v24 = vadd.f32 %v8894_v31, %v656_v23 }
 0x1eb   :  { %v583_v40 = vadd.f32 %v8525_v19, %v562_v41  ;;  %v8977_v19 = vpack.c.bf16 %v8951_v13, %v8934_v52  ;;  %v7408_v41 = vpop.eup %7407  ;;  %1386 = vmatpush.bf16.msra.mxu1 %v6987_v46  ;;  %7417 = vrcp.f32 %v8907_v20  ;;  %v6971_v6 = vor.u32 %v7257_v4, %v6968_v50  ;;  %v7231_v20 = vld [vmem:[%s12632_s7 + $0x94] sm:$0xf0] }
 0x1ec   :  { %v747_v37 = vadd.f32 1.0, %v7408_v41  ;;  %1298 = vmatpush.bf16.msrb.mxu2 %v6871_v44  ;;  %7419 = vpow2.f32 %v724_v18  ;;  %v7410_v17 = vpop.eup %7409  ;;  %v655_v42 = vadd.f32 %v639_v60, %v619_v56  ;;  %v6855_v31 = vor.u32 %v7231_v20, %v6854_v28  ;;  %v7259_v46 = vld [vmem:[%s12632_s7 + $0x174] sm:$0xf0]  ;;  %v7217_v20 = vld [vmem:[%s12632_s7 + $0x2c] sm:$0xf] }
 0x1ed   :  { %v621_v2 = vadd.f32 %v605_v10, %v583_v40  ;;  %1217 = vmatmul.bf16.vlgmr.msrb.gmra.mxu3 %v8977_v19  ;;  %1275 = vmatmul.bf16.vlgmr.msrb.gmra.mxu1 %v8977_v19  ;;  %v6982_v10 = vld [vmem:[%s12632_s7 + $0x188] sm:$0xf]  ;;  %v6824_v40 = vld [vmem:[%s12632_s7 + $0x58] sm:$0xf0]  ;;  %v672_v11 = vmul.f32 %v8592_v62, %v8687_v5  ;;  %v673_v63 = vmul.f32 %v8594_v3, %v8689_v15  ;;  %v7227_v5 = vld [vmem:[%s12632_s7 + $0x74] sm:$0xf0] }
 0x1ee   :  { %1327 = vmatpush.bf16.msra.mxu3 %v6999_v59  ;;  %7421 = vrcp.f32 %v747_v37  ;;  %v6983_v1 = vor.u32 %v7263_v34, %v6982_v10  ;;  %v7412_v61 = vpop.eup %7411  ;;  %1358 = vmatpush.bf16.msra.mxu0 %v6843_v45  ;;  %v6827_v36 = vor.u32 %v7221_v57, %v6824_v40  ;;  %v6955_v62 = vor.u32 %v7253_v39, %v6952_v48  ;;  %v6808_v10 = vld [vmem:[%s12632_s7 + $0x38] sm:$0xf0]  ;;  %v7223_v57 = vld [vmem:[%s12632_s7 + $0x54] sm:$0xf0]  ;;  %v6950_v40 = vld [vmem:[%s12632_s7 + $0x148] sm:$0xf] }
 0x1ef   :  { %v657_v8 = vadd.f32 %v641_v16, %v621_v2  ;;  %1387 = vmatpush.bf16.msra.mxu1 %v6971_v6  ;;  %v6838_v16 = vld [vmem:[%s12632_s7 + $0x68] sm:$0xf]  ;;  %v7414_v47 = vpop.eup %7413  ;;  %v9050_v23 = vmul.f32 %v7412_v61, %v8819_v26  ;;  %v9061_v3 = vadd.f32 %v672_v11, %v654_v49  ;;  %v706_v44 = vsub.f32 0.0, %v9017_v24  ;;  %v7255_v39 = vld [vmem:[%s12632_s7 + $0x154] sm:$0xf0] }
 0x1f0   :  { %v6966_v2 = vld [vmem:[%s12632_s7 + $0x168] sm:$0xf]  ;;  %v7416_v9 = vpop.eup %7415  ;;  %1299 = vmatpush.bf16.msrb.mxu2 %v6855_v31  ;;  %v6839_v15 = vor.u32 %v7227_v5, %v6838_v16  ;;  %v9064_v59 = vadd.f32 %v673_v63, %v655_v42  ;;  %v9067_v25 = vmul.f32 %v7410_v17, %v8769_v22  ;;  %v750_v41 = vadd.f32 1.0, %v8986_v32  ;;  %v7249_v17 = vld [vmem:[%s12632_s7 + $0x12c] sm:$0xf] }
 0x1f1   :  { %v9047_v27 = vadd.f32 %v675_v54, %v657_v8  ;;  %12772 = vst [vmem:[#allocation5_spill] sm:$0xff] %v9050_v23  ;;  %v6967_v26 = vor.u32 %v7259_v46, %v6966_v2  ;;  %v7418_v56 = vpop.eup %7417  ;;  %v751_v54 = vadd.f32 1.0, %v7416_v9  ;;  %v704_v8 = vsub.f32 0.0, %v9061_v3  ;;  %v6936_v42 = vld [vmem:[%s12632_s7 + $0x138] sm:$0xf0] }
 0x1f2   :  { %1328 = vmatpush.bf16.msra.mxu3 %v6983_v1  ;;  %12773 = vst [vmem:[#allocation6_spill] sm:$0xff] %v9067_v25  ;;  %v7420_v21 = vpop.eup %7419  ;;  %1359 = vmatpush.bf16.msra.mxu0 %v6827_v36  ;;  %v9073_v4 = vpack.c.bf16 %v9050_v23, %v9067_v25  ;;  %v9077_v37 = vmul.f32 %v7418_v56, %v8786_v0  ;;  %v736_v32 = vmul.f32 1.442695, %v706_v44  ;;  %v705_v50 = vsub.f32 0.0, %v9064_v59  ;;  %v6822_v31 = vld [vmem:[%s12632_s7 + $0x48] sm:$0xf] }
 0x1f3   :  { %1388 = vmatpush.bf16.msra.mxu1 %v6955_v62  ;;  %v707_v18 = vsub.f32 0.0, %v9047_v27  ;;  %v748_v45 = vadd.f32 1.0, %v7420_v21  ;;  %7423 = vrcp.f32 %v750_v41  ;;  %v749_v28 = vadd.f32 1.0, %v7414_v47  ;;  %v7213_v48 = vld [vmem:[%s12632_s7 + $0xc] sm:$0xf] }
 0x1f4   :  { %v7422_v60 = vpop.eup %7421  ;;  %1300 = vmatpush.bf16.msrb.mxu2 %v6839_v15  ;;  %7425 = vrcp.f32 %v751_v54  ;;  %v732_v0 = vmul.f32 1.442695, %v704_v8  ;;  %v6811_v34 = vor.u32 %v7217_v20, %v6808_v10  ;;  %v6939_v1 = vor.u32 %v7249_v17, %v6936_v42  ;;  %v6792_v16 = vld [vmem:[%s12632_s7 + $0x18] sm:$0xf0]  ;;  %v7245_v47 = vld [vmem:[%s12632_s7 + $0x10c] sm:$0xf] }
 0x1f5   :  { %v9080_v22 = vmul.f32 %v7422_v60, %v8846_v33  ;;  %v738_v6 = vmul.f32 1.442695, %v707_v18  ;;  %7427 = vrcp.f32 %v748_v45  ;;  %v734_v33 = vmul.f32 1.442695, %v705_v50  ;;  %v6920_v5 = vld [vmem:[%s12632_s7 + $0x118] sm:$0xf0] }
 0x1f6   :  { %1329 = vmatpush.bf16.msra.mxu3 %v6967_v26  ;;  %7429 = vpow2.f32 %v736_v32  ;;  %1360 = vmatpush.bf16.msra.mxu0 %v6811_v34  ;;  %v6823_v11 = vor.u32 %v7223_v57, %v6822_v31  ;;  %v6951_v36 = vor.u32 %v7255_v39, %v6950_v40  ;;  %v6795_v62 = vor.u32 %v7213_v48, %v6792_v16  ;;  %v6806_v2 = vld [vmem:[%s12632_s7 + $0x28] sm:$0xf]  ;;  %v7219_v46 = vld [vmem:[%s12632_s7 + $0x34] sm:$0xf0] }
 0x1f7   :  { %v9085_v49 = vpack.c.bf16 %v9080_v22, %v9077_v37  ;;  %1193 = vmatmul.bf16.gmra.mxu2 %v9073_v4  ;;  %7431 = vrcp.f32 %v749_v28  ;;  %1389 = vmatpush.bf16.msra.mxu1 %v6939_v1  ;;  %v6923_v15 = vor.u32 %v7245_v47, %v6920_v5  ;;  %v6807_v26 = vor.u32 %v7219_v46, %v6806_v2  ;;  %v6934_v56 = vld [vmem:[%s12632_s7 + $0x128] sm:$0xf]  ;;  %v7251_v44 = vld [vmem:[%s12632_s7 + $0x134] sm:$0xf0]  ;;  %v7088_v5 = vld [vmem:[%s12635_s4 + $0x68] sm:$0xf0] }
 0x1f8   :  { %1251 = vmatmul.bf16.gmra.mxu0 %v9073_v4  ;;  %7433 = vpow2.f32 %v738_v6  ;;  %1301 = vmatpush.bf16.msrb.mxu2 %v6823_v11  ;;  %v6790_v21 = vld [vmem:[%s12632_s7 + $0x8] sm:$0xf]  ;;  %v6935_v60 = vor.u32 %v7251_v44, %v6934_v56  ;;  %v7215_v54 = vld [vmem:[%s12632_s7 + $0x14] sm:$0xf0]  ;;  %v7080_v56 = vld [vmem:[%s12635_s4 + $0x58] sm:$0xf0] }
 0x1f9   :  { %v7424_v61 = vpop.eup %7423  ;;  %7435 = vpow2.f32 %v732_v0  ;;  %v6918_v18 = vld [vmem:[%s12632_s7 + $0x108] sm:$0xf]  ;;  %v7247_v8 = vld [vmem:[%s12632_s7 + $0x114] sm:$0xf0] }
 0x1fa   :  { %v7426_v63 = vpop.eup %7425  ;;  %7437 = vpow2.f32 %v734_v33  ;;  %1330 = vmatpush.bf16.msra.mxu3 %v6951_v36  ;;  %1361 = vmatpush.bf16.msra.mxu0 %v6795_v62  ;;  %v9155_v28 = vmul.f32 %v7424_v61, %v8813_v43  ;;  %v6791_v33 = vor.u32 %v7215_v54, %v6790_v21  ;;  %v6919_v20 = vor.u32 %v7247_v8, %v6918_v18  ;;  %v7289_v47 = vld [vmem:[%s12635_s4 + $0x64] sm:$0xf0]  ;;  %v7288_v62 = vld [vmem:[%s12635_s4 + $0x64] sm:$0xf]  ;;  %v7072_v18 = vld [vmem:[%s12635_s4 + $0x48] sm:$0xf0] }
 0x1fb   :  { %v7428_v9 = vpop.eup %7427  ;;  %v9158_v6 = vmul.f32 %v7426_v63, %v8867_v51  ;;  %1390 = vmatpush.bf16.msra.mxu1 %v6923_v15  ;;  %v7091_v46 = vor.u32 %v7288_v62, %v7088_v5  ;;  %v7287_v15 = vld [vmem:[%s12635_s4 + $0x54] sm:$0xf0]  ;;  %v7284_v54 = vld [vmem:[%s12635_s4 + $0x44] sm:$0xf] }
 0x1fc   :  { %v7430_v41 = vpop.eup %7429  ;;  %v9152_v50 = vmul.f32 %v7428_v9, %v8886_v7  ;;  %12775 = vst [vmem:[#allocation8_spill] sm:$0xff] %v9155_v28  ;;  %1302 = vmatpush.bf16.msrb.mxu2 %v6807_v26  ;;  %v7078_v9 = vld [vmem:[%s12635_s4 + $0x50] sm:$0xf]  ;;  %v7286_v26 = vld [vmem:[%s12635_s4 + $0x54] sm:$0xf] }
 0x1fd   :  { %1222 = vmatmul.bf16.gmra.mxu3 %v9085_v49  ;;  %1280 = vmatmul.bf16.gmra.mxu1 %v9085_v49  ;;  %v7432_v45 = vpop.eup %7431  ;;  %12776 = vst [vmem:[#allocation9_spill] sm:$0xff] %v9158_v6  ;;  %v754_v34 = vadd.f32 1.0, %v7430_v41  ;;  %v7079_v44 = vor.u32 %v7287_v15, %v7078_v9  ;;  %v7083_v21 = vor.u32 %v7286_v26, %v7080_v56  ;;  %v7070_v41 = vld [vmem:[%s12635_s4 + $0x40] sm:$0xf] }
 0x1fe   :  { %v7434_v32 = vpop.eup %7433  ;;  %12774 = vst [vmem:[#allocation7_spill] sm:$0xff] %v9152_v50  ;;  %1331 = vmatpush.bf16.msra.mxu3 %v6935_v60  ;;  %v9161_v17 = vmul.f32 %v7432_v45, %v8848_v29  ;;  %v9165_v43 = vpack.c.bf16 %v9155_v28, %v9152_v50  ;;  %v7285_v60 = vld [vmem:[%s12635_s4 + $0x44] sm:$0xf0]  ;;  %v7075_v45 = vor.u32 %v7284_v54, %v7072_v18 }
 0x1ff   :  { %v7436_v0 = vpop.eup %7435  ;;  %v755_v42 = vadd.f32 1.0, %v7434_v32  ;;  %7439 = vrcp.f32 %v754_v34  ;;  %v7071_v8 = vor.u32 %v7285_v60, %v7070_v41  ;;  %v7062_v32 = vld [vmem:[%s12635_s4 + $0x30] sm:$0xf] }
 0x200   :  { %v7438_v10 = vpop.eup %7437  ;;  %12777 = vst [vmem:[#allocation10_spill] sm:$0xff] %v9161_v17  ;;  %v752_v7 = vadd.f32 1.0, %v7436_v0  ;;  %v9169_v51 = vpack.c.bf16 %v9158_v6, %v9161_v17  ;;  %1303 = vmatpush.bf16.msrb.mxu2 %v6791_v33  ;;  %v7283_v0 = vld [vmem:[%s12635_s4 + $0x34] sm:$0xf0]  ;;  %v7282_v33 = vld [vmem:[%s12635_s4 + $0x34] sm:$0xf] }
 0x201   :  { %v753_v31 = vadd.f32 1.0, %v7438_v10  ;;  %7441 = vrcp.f32 %v755_v42  ;;  %v7281_v10 = vld [vmem:[%s12635_s4 + $0x24] sm:$0xf0]  ;;  %v7280_v42 = vld [vmem:[%s12635_s4 + $0x24] sm:$0xf] }
 0x202   :  { %1332 = vmatpush.bf16.msra.mxu3 %v6919_v20  ;;  %7443 = vrcp.f32 %v752_v7  ;;  %v7063_v20 = vor.u32 %v7283_v0, %v7062_v32  ;;  %v7056_v7 = vld [vmem:[%s12635_s4 + $0x28] sm:$0xf0] }
 0x203   :  { %7445 = vrcp.f32 %v753_v31 }
 0x205   :  { %v7440_v29 = vpop.eup %7439 }
 0x206   :  { %v9176_v39 = vmul.f32 %v7440_v29, %v9017_v24  ;;  %v7094_v24 = vld [vmem:[%s12635_s4 + $0x70] sm:$0xf] }
 0x207   :  { %1198 = vmatmul.bf16.gmra.mxu2 %v9165_v43  ;;  %v7442_v1 = vpop.eup %7441  ;;  %v7046_v29 = vld [vmem:[%s12635_s4 + $0x10] sm:$0xf] }
 0x208   :  { %1256 = vmatmul.bf16.gmra.mxu0 %v9165_v43  ;;  %v7444_v57 = vpop.eup %7443  ;;  %12778 = vst [vmem:[#allocation11_spill] sm:$0xff] %v9176_v39  ;;  %v9179_v61 = vmul.f32 %v7442_v1, %v9047_v27  ;;  %v7291_v27 = vld [vmem:[%s12635_s4 + $0x74] sm:$0xf0] }
 0x209   :  { %v7446_v40 = vpop.eup %7445  ;;  %v9182_v11 = vmul.f32 %v7444_v57, %v9061_v3  ;;  %v7290_v3 = vld [vmem:[%s12635_s4 + $0x74] sm:$0xf]  ;;  %v7279_v1 = vld [vmem:[%s12635_s4 + $0x14] sm:$0xf0]  ;;  %v7059_v57 = vor.u32 %v7280_v42, %v7056_v7 }
 0x20a   :  { %12779 = vst [vmem:[#allocation12_spill] sm:$0xff] %v9179_v61  ;;  %v9185_v36 = vmul.f32 %v7446_v40, %v9064_v59  ;;  %v7095_v59 = vor.u32 %v7291_v27, %v7094_v24  ;;  %v7278_v40 = vld [vmem:[%s12635_s4 + $0x14] sm:$0xf]  ;;  %v7048_v24 = vld [vmem:[%s12635_s4 + $0x18] sm:$0xf0]  ;;  %v7047_v27 = vor.u32 %v7279_v1, %v7046_v29 }
 0x20b   :  { %12780 = vst [vmem:[#allocation13_spill] sm:$0xff] %v9182_v11  ;;  %v9189_v48 = vpack.c.bf16 %v9176_v39, %v9182_v11 }
 0x20c   :  { %12781 = vst [vmem:[#allocation14_spill] sm:$0xff] %v9185_v36  ;;  %v9193_v16 = vpack.c.bf16 %v9179_v61, %v9185_v36  ;;  %5887 = vmatpush.bf16.msra.mxu2 %v7095_v59  ;;  %v7038_v59 = vld [vmem:[%s12635_s4] sm:$0xf] }
 0x20d   :  { %1227 = vmatmul.bf16.gmra.mxu3 %v9169_v51  ;;  %1285 = vmatmul.bf16.gmra.mxu1 %v9169_v51 }
 0x217   :  { %1203 = vmatmul.bf16.gmra.mxu2 %v9189_v48 }
 0x218   :  { %1261 = vmatmul.bf16.gmra.mxu0 %v9189_v48 }
 0x21d   :  { %1232 = vmatmul.bf16.gmra.mxu3 %v9193_v16  ;;  %1290 = vmatmul.bf16.gmra.mxu1 %v9193_v16 }
 0x227   :  { %1304 = vmatmul.bf16.vlgmr.msrb.gmra.mxu2 %v8948_v30 }
 0x228   :  { %1362 = vmatmul.bf16.vlgmr.msra.gmra.mxu0 %v8948_v30  ;;  %v7096_v30 = vld [vmem:[%s12635_s4 + $0x78] sm:$0xf0] }
 0x229   :  { %v7099_v63 = vor.u32 %v7290_v3, %v7096_v30  ;;  %v7051_v3 = vor.u32 %v7278_v40, %v7048_v24  ;;  %v7277_v30 = vld [vmem:[%s12635_s4 + $0x4] sm:$0xf0] }
 0x22b   :  { %5916 = vmatpush.bf16.msrb.mxu3 %v7099_v63 }
 0x22d   :  { %1333 = vmatmul.bf16.vlgmr.msra.gmra.mxu3 %v8977_v19  ;;  %1391 = vmatmul.bf16.vlgmr.msra.gmra.mxu1 %v8977_v19  ;;  %v7086_v19 = vld [vmem:[%s12635_s4 + $0x60] sm:$0xf] }
 0x22e   :  { %v7087_v2 = vor.u32 %v7289_v47, %v7086_v19  ;;  %v7276_v19 = vld [vmem:[%s12635_s4 + $0x4] sm:$0xf]  ;;  %v7039_v47 = vor.u32 %v7277_v30, %v7038_v59 }
 0x22f   :  { %5917 = vmatpush.bf16.msrb.mxu3 %v7091_v46 }
 0x230   :  { %5888 = vmatpush.bf16.msra.mxu2 %v7087_v2 }
 0x233   :  { %5918 = vmatpush.bf16.msrb.mxu3 %v7083_v21 }
 0x234   :  { %5889 = vmatpush.bf16.msra.mxu2 %v7079_v44 }
 0x237   :  { %1309 = vmatmul.bf16.gmra.mxu2 %v9073_v4  ;;  %5919 = vmatpush.bf16.msrb.mxu3 %v7075_v45 }
 0x238   :  { %1367 = vmatmul.bf16.gmra.mxu0 %v9073_v4  ;;  %5890 = vmatpush.bf16.msra.mxu2 %v7071_v8  ;;  %v7064_v4 = vld [vmem:[%s12635_s4 + $0x38] sm:$0xf0] }
 0x239   :  { %v7067_v34 = vor.u32 %v7282_v33, %v7064_v4 }
 0x23b   :  { %5920 = vmatpush.bf16.msrb.mxu3 %v7067_v34 }
 0x23c   :  { %5891 = vmatpush.bf16.msra.mxu2 %v7063_v20 }
 0x23d   :  { %1338 = vmatmul.bf16.gmra.mxu3 %v9085_v49  ;;  %1396 = vmatmul.bf16.gmra.mxu1 %v9085_v49  ;;  %v7054_v49 = vld [vmem:[%s12635_s4 + $0x20] sm:$0xf] }
 0x23e   :  { %v7055_v31 = vor.u32 %v7281_v10, %v7054_v49 }
 0x23f   :  { %5921 = vmatpush.bf16.msrb.mxu3 %v7059_v57 }
 0x240   :  { %5892 = vmatpush.bf16.msra.mxu2 %v7055_v31 }
 0x243   :  { %5922 = vmatpush.bf16.msrb.mxu3 %v7051_v3 }
 0x244   :  { %5893 = vmatpush.bf16.msra.mxu2 %v7047_v27 }
 0x247   :  { %1314 = vmatmul.bf16.gmra.mxu2 %v9165_v43 }
 0x248   :  { %1372 = vmatmul.bf16.gmra.mxu0 %v9165_v43  ;;  %v7040_v43 = vld [vmem:[%s12635_s4 + $0x8] sm:$0xf0]  ;;  %5894 = vmatpush.bf16.msra.mxu2 %v7039_v47 }
 0x249   :  { %v7043_v63 = vor.u32 %v7276_v19, %v7040_v43 }
 0x24b   :  { %5923 = vmatpush.bf16.msrb.mxu3 %v7043_v63 }
 0x24d   :  { %1343 = vmatmul.bf16.gmra.mxu3 %v9169_v51  ;;  %1401 = vmatmul.bf16.gmra.mxu1 %v9169_v51  ;;  %v1412_v51 = vld [vmem:[%s12636_s8] sm:$0x3] }
 0x24e   :  { %v9314_v5 = vperm.slane %v1412_v51, 1  ;;  %v9319_v26 = vperm.slane %v1412_v51, 0 }
 0x257   :  { %1319 = vmatmul.bf16.gmra.mxu2 %v9189_v48 }
 0x258   :  { %1377 = vmatmul.bf16.gmra.mxu0 %v9189_v48 }
 0x25d   :  { %1348 = vmatmul.bf16.gmra.mxu3 %v9193_v16  ;;  %1406 = vmatmul.bf16.gmra.mxu1 %v9193_v16 }
 0x265   :  { %v1247_v62 = vpop.f32.mrf.mxu0 }
 0x267   :  { %5895 = vmatmul.bf16.vlgmr.msra.gmra.mxu2 %v8380_v53 }
 0x26a   :  { %v1276_v2 = vpop.f32.mrf.mxu1  ;;  %v1189_v48 = vpop.f32.mrf.mxu2 }
 0x26b   :  { %v1277_v46 = vadd.f32 %v1276_v2, %v1247_v62 }
 0x26d   :  { %v1419_v9 = vadd.f32 %v9314_v5, %v1277_v46  ;;  %5924 = vmatmul.bf16.vlgmr.msrb.gmra.mxu3 %v8380_v53  ;;  %v1249_v56 = vpop.f32.mrf.mxu0 }
 0x26f   :  { %v1451_v15 = vand.u32 2147483647, %v1419_v9 }
 0x270   :  { %v1218_v16 = vpop.f32.mrf.mxu3 }
 0x271   :  { %v1467_v44 = vsub.f32 0.0, %v1451_v15  ;;  %v1219_v21 = vadd.f32 %v1218_v16, %v1189_v48  ;;  %v1435_v15 = vmax.f32 %v1419_v9, 0.0  ;;  %v1578_v9 = vld [vmem:[%s12637_s9] sm:$0xff] }
 0x272   :  { %v1278_v41 = vpop.f32.mrf.mxu1  ;;  %v1191_v53 = vpop.f32.mrf.mxu2 }
 0x273   :  { %v1484_v60 = vmul.f32 1.442695, %v1467_v44  ;;  %v9322_v54 = vadd.f32 %v9319_v26, %v1219_v21  ;;  %v1279_v18 = vadd.f32 %v1278_v41, %v1249_v56 }
 0x275   :  { %7447 = vpow2.f32 %v1484_v60  ;;  %v1450_v8 = vand.u32 2147483647, %v9322_v54  ;;  %v9326_v45 = vadd.f32 %v9314_v5, %v1279_v18  ;;  %v1252_v33 = vpop.f32.mrf.mxu0 }
 0x277   :  { %v1466_v32 = vsub.f32 0.0, %v1450_v8  ;;  %v1453_v4 = vand.u32 2147483647, %v9326_v45  ;;  %5900 = vmatmul.bf16.gmra.mxu2 %v8425_v35 }
 0x278   :  { %v1220_v0 = vpop.f32.mrf.mxu3 }
 0x279   :  { %v1482_v20 = vmul.f32 1.442695, %v1466_v32  ;;  %v1221_v34 = vadd.f32 %v1220_v0, %v1191_v53  ;;  %v1469_v29 = vsub.f32 0.0, %v1453_v4  ;;  %v1434_v0 = vmax.f32 %v9322_v54, 0.0 }
 0x27a   :  { %v1281_v49 = vpop.f32.mrf.mxu1  ;;  %v1194_v1 = vpop.f32.mrf.mxu2 }
 0x27b   :  { %v7448_v10 = vpop.eup %7447  ;;  %7449 = vpow2.f32 %v1482_v20  ;;  %v1282_v42 = vadd.f32 %v1281_v49, %v1252_v33  ;;  %v9335_v57 = vadd.f32 %v9319_v26, %v1221_v34  ;;  %v1488_v19 = vmul.f32 1.442695, %v1469_v29 }
 0x27c   :  { %v1515_v7 = vadd.f32 1.0, %v7448_v10 }
 0x27d   :  { %v9331_v31 = vadd.f32 %v9314_v5, %v1282_v42  ;;  %5929 = vmatmul.bf16.gmra.mxu3 %v8425_v35  ;;  %v1254_v24 = vpop.f32.mrf.mxu0  ;;  %v1452_v43 = vand.u32 2147483647, %v9335_v57 }
 0x27e   :  { %7451 = vlog2.f32 %v1515_v7 }
 0x27f   :  { %v1455_v3 = vand.u32 2147483647, %v9331_v31  ;;  %v1468_v16 = vsub.f32 0.0, %v1452_v43 }
 0x280   :  { %v1223_v40 = vpop.f32.mrf.mxu3 }
 0x281   :  { %v7450_v27 = vpop.eup %7449  ;;  %v1224_v59 = vadd.f32 %v1223_v40, %v1194_v1  ;;  %v1471_v2 = vsub.f32 0.0, %v1455_v3  ;;  %v1486_v20 = vmul.f32 1.442695, %v1468_v16  ;;  %v1712_v40 = vlaneseq }
 0x282   :  { %v1514_v30 = vadd.f32 1.0, %v7450_v27  ;;  %v1283_v47 = vpop.f32.mrf.mxu1  ;;  %v1196_v48 = vpop.f32.mrf.mxu2  ;;  %v1586_v27 = vld [vmem:[%s12638_s10] sm:$0x3] }
 0x283   :  { %v9340_v63 = vadd.f32 %v9319_v26, %v1224_v59  ;;  %v1284_v35 = vadd.f32 %v1283_v47, %v1254_v24  ;;  %v1492_v60 = vmul.f32 1.442695, %v1471_v2  ;;  %v1580_v24 = vmul.f32 1.442695, %v1578_v9  ;;  %v1579_v59 = vld [vmem:[%s12637_s9 + $0x8] sm:$0xff] }
 0x284   :  { %v7452_v51 = vpop.eup %7451  ;;  %7453 = vlog2.f32 %v1514_v30  ;;  %v1582_v16 = vmul.f32 1.442695, %v1579_v59  ;;  %v9385_v9 = vperm.slane %v1586_v27, 0 }
 0x285   :  { %v1533_v62 = vmul.f32 0.6931472, %v7452_v51  ;;  %7455 = vpow2.f32 %v1488_v19  ;;  %v9343_v46 = vadd.f32 %v9314_v5, %v1284_v35  ;;  %v1454_v56 = vand.u32 2147483647, %v9340_v63  ;;  %v1257_v21 = vpop.f32.mrf.mxu0 }
 0x286   :  { %7457 = vpow2.f32 %v1492_v60  ;;  %v1713_v35 = vshrl.u32 %v1712_v40, 7  ;;  %12783 = vst [vmem:[#allocation16_spill] sm:$0xff] %v9385_v9 }
 0x287   :  { %v1563_v41 = vadd.f32 %v1533_v62, %v1435_v15  ;;  %v1457_v18 = vand.u32 2147483647, %v9343_v46  ;;  %5905 = vmatmul.bf16.gmra.mxu2 %v8409_v12  ;;  %v1470_v10 = vsub.f32 0.0, %v1454_v56  ;;  %7459 = vpow2.f32 %v1486_v20 }
 0x288   :  { %v1225_v44 = vpop.f32.mrf.mxu3  ;;  %7343 = vset.pattern.permute.xlu1 %v1713_v35  ;;  %7342 = vset.pattern.permute.xlu2 %v1713_v35  ;;  %7461 = vpow2.f32 %v1580_v24 }
 0x289   :  { %v1226_v8 = vadd.f32 %v1225_v44, %v1196_v48  ;;  %v9355_v42 = vrot.slane %v1563_v41, 7  ;;  %v1473_v54 = vsub.f32 0.0, %v1457_v18  ;;  %v1490_v30 = vmul.f32 1.442695, %v1470_v10  ;;  %7341 = vset.pattern.permute.xlu0 %v1713_v35 }
 0x28a   :  { %v7454_v53 = vpop.eup %7453  ;;  %v1286_v32 = vpop.f32.mrf.mxu1  ;;  %v9376_v44 = vperm.slane %v1586_v27, 1  ;;  %v1710_v60 = vmul.f32 %v1563_v41, %v8934_v52 }
 0x28b   :  { %v1531_v33 = vmul.f32 0.6931472, %v7454_v53  ;;  %v9349_v4 = vadd.f32 %v9319_v26, %v1226_v8  ;;  %v7456_v49 = vpop.eup %7455  ;;  %v1287_v34 = vadd.f32 %v1286_v32, %v1257_v21  ;;  %v1199_v1 = vpop.f32.mrf.mxu2  ;;  %v1496_v51 = vmul.f32 1.442695, %v1473_v54 }
 0x28c   :  { %v1517_v3 = vadd.f32 1.0, %v7456_v49  ;;  %v7458_v56 = vpop.eup %7457  ;;  %12782 = vst [vmem:[#allocation15_spill] sm:$0xff] %v9376_v44  ;;  %v9389_v49 = vmul.f32 %v9376_v44, %v8934_v52  ;;  %v9398_v54 = vmul.f32 %v9376_v44, %v8951_v13  ;;  %v9405_v59 = vmul.f32 %v9376_v44, %v9077_v37 }
 0x28d   :  { %v9357_v7 = vadd.f32 %v1531_v33, %v1434_v0  ;;  %5934 = vmatmul.bf16.gmra.mxu3 %v8409_v12  ;;  %v9361_v29 = vadd.f32 %v9314_v5, %v1287_v34  ;;  %v1259_v43 = vpop.f32.mrf.mxu0  ;;  %v1456_v62 = vand.u32 2147483647, %v9349_v4  ;;  %v7460_v53 = vpop.eup %7459  ;;  %v1519_v0 = vadd.f32 1.0, %v7458_v56 }
 0x28e   :  { %7463 = vlog2.f32 %v1517_v3  ;;  %12784 = vst [vmem:[#allocation17_spill] sm:$0xff] %v9389_v49  ;;  %v7462_v34 = vpop.eup %7461  ;;  %v1516_v40 = vadd.f32 1.0, %v7460_v53  ;;  %v9426_v56 = vmul.f32 %v9385_v9, %v8922_v38 }
 0x28f   :  { %v9372_v12 = vsel %vm1592_vm1, %v9357_v7, %v9355_v42  ;;  %v1459_v19 = vand.u32 2147483647, %v9361_v29  ;;  %7465 = vpow2.f32 %v1490_v30  ;;  %v1472_v32 = vsub.f32 0.0, %v1456_v62  ;;  %12785 = vst [vmem:[#allocation18_spill] sm:$0xff] %v9398_v54 }
 0x290   :  { %v1228_v47 = vpop.f32.mrf.mxu3  ;;  %7467 = vpow2.f32 %v1496_v51  ;;  %v9394_v10 = vmul.f32 %v9357_v7, %v8919_v55  ;;  %12786 = vst [vmem:[#allocation19_spill] sm:$0xff] %v9405_v59  ;;  %v9409_v30 = vmul.f32 %v9376_v44, %v9080_v22 }
 0x291   :  { %v1229_v2 = vadd.f32 %v1228_v47, %v1199_v1  ;;  %v1475_v48 = vsub.f32 0.0, %v1459_v19  ;;  %7469 = vpow2.f32 %v1582_v16  ;;  %v9400_v1 = vrot.slane %v1710_v60, 7  ;;  %12789 = vst [vmem:[#allocation22_spill] sm:$0xff] %v9426_v56 }
 0x292   :  { %v1288_v15 = vpop.f32.mrf.mxu1  ;;  %12787 = vst [vmem:[#allocation20_spill] sm:$0xff] %v9409_v30  ;;  %v1494_v19 = vmul.f32 1.442695, %v1472_v32 }
 0x293   :  { %v9379_v21 = vadd.f32 %v9319_v26, %v1229_v2  ;;  %v1500_v18 = vmul.f32 1.442695, %v1475_v48  ;;  %v1289_v8 = vadd.f32 %v1288_v15, %v1259_v43  ;;  %v1201_v20 = vpop.f32.mrf.mxu2  ;;  %v9414_v62 = vsel %vm1592_vm1, %v9394_v10, %v9400_v1 }
 0x294   :  { %v7464_v3 = vpop.eup %7463  ;;  %v9418_v2 = vmul.f32 %v9385_v9, %v8919_v55 }
 0x295   :  { %v9383_v33 = vadd.f32 %v9314_v5, %v1289_v8  ;;  %7471 = vpow2.f32 %v1500_v18  ;;  %v1458_v41 = vand.u32 2147483647, %v9379_v21  ;;  %v1262_v52 = vpop.f32.mrf.mxu0  ;;  %v7466_v43 = vpop.eup %7465  ;;  %v1537_v18 = vmul.f32 0.6931472, %v7464_v3 }
 0x296   :  { %7473 = vlog2.f32 %v1519_v0  ;;  %12788 = vst [vmem:[#allocation21_spill] sm:$0xff] %v9418_v2  ;;  %v7468_v48 = vpop.eup %7467  ;;  %v1518_v55 = vadd.f32 1.0, %v7466_v43 }
 0x297   :  { %v1461_v24 = vand.u32 2147483647, %v9383_v33  ;;  %v1474_v15 = vsub.f32 0.0, %v1458_v41  ;;  %5910 = vmatmul.bf16.gmra.mxu2 %v8455_v58  ;;  %v7470_v60 = vpop.eup %7469  ;;  %7475 = vlog2.f32 %v1516_v40  ;;  %v1437_v41 = vmax.f32 %v9326_v45, 0.0 }
 0x298   :  { %v1230_v27 = vpop.f32.mrf.mxu3  ;;  %7477 = vpow2.f32 %v1494_v19  ;;  %v9440_v19 = vsel %vm1598_vm2, %v9357_v7, %v9355_v42 }
 0x299   :  { %v1231_v47 = vadd.f32 %v1230_v27, %v1201_v20  ;;  %v1477_v35 = vsub.f32 0.0, %v1461_v24  ;;  %v1594_v20 = vrot.slane %v9372_v12, 1  ;;  %v1521_v24 = vadd.f32 1.0, %v7468_v48 }
 0x29a   :  { %v1291_v51 = vpop.f32.mrf.mxu1  ;;  %v1498_v40 = vmul.f32 1.442695, %v1474_v15  ;;  %v1565_v43 = vadd.f32 %v1537_v18, %v1437_v41  ;;  %v9443_v48 = vsub.f32 0.0, %v7470_v60  ;;  %v1439_v18 = vmax.f32 %v9331_v31, 0.0 }
 0x29b   :  { %v9421_v16 = vadd.f32 %v9319_v26, %v1231_v47  ;;  %v1504_v8 = vmul.f32 1.442695, %v1477_v35  ;;  %v1292_v53 = vadd.f32 %v1291_v51, %v1262_v52  ;;  %v7472_v32 = vpop.eup %7471  ;;  %v1204_v3 = vpop.f32.mrf.mxu2  ;;  %v9435_v52 = vsub.f32 0.0, %v7462_v34 }
 0x29c   :  { %v1523_v12 = vadd.f32 1.0, %v7472_v32  ;;  %12790 = vst [vmem:[#allocation23_spill] sm:$0xff] %v9443_v48  ;;  %v1616_v49 = vperm.slane %v1594_v20, 1 }
 0x29d   :  { %v1460_v0 = vand.u32 2147483647, %v9421_v16  ;;  %5939 = vmatmul.bf16.gmra.mxu3 %v8455_v58  ;;  %7479 = vpow2.f32 %v1504_v8  ;;  %v9433_v27 = vadd.f32 %v9314_v5, %v1292_v53  ;;  %v7474_v58 = vpop.eup %7473  ;;  %v1264_v51 = vpop.f32.mrf.mxu0  ;;  %v1615_v53 = vperm.slane %v1594_v20, 0 }
 0x29e   :  { %7481 = vlog2.f32 %v1518_v55  ;;  %v7476_v34 = vpop.eup %7475  ;;  %v1541_v32 = vmul.f32 0.6931472, %v7474_v58 }
 0x29f   :  { %v1476_v47 = vsub.f32 0.0, %v1460_v0  ;;  %v1463_v45 = vand.u32 2147483647, %v9433_v27  ;;  %v1436_v0 = vmax.f32 %v9335_v57, 0.0  ;;  %7483 = vlog2.f32 %v1521_v24  ;;  %v7478_v39 = vpop.eup %7477 }
 0x2a0   :  { %v1233_v35 = vpop.f32.mrf.mxu3  ;;  %7485 = vpow2.f32 %v1498_v40  ;;  %v1965_v57 = vmul.f32 %v1565_v43, %v8951_v13  ;;  %v1535_v24 = vmul.f32 0.6931472, %v7476_v34  ;;  %v1647_v20 = vmul.f32 %v1615_v53, %v9435_v52 }
 0x2a1   :  { %v1502_v8 = vmul.f32 1.442695, %v1476_v47  ;;  %v1234_v15 = vadd.f32 %v1233_v35, %v1204_v3  ;;  %v1479_v14 = vsub.f32 0.0, %v1463_v45  ;;  %7487 = vlog2.f32 %v1523_v12 }
 0x2a2   :  { %v1293_v54 = vpop.f32.mrf.mxu1  ;;  %v1648_v40 = vmul.f32 %v1616_v49, %v9443_v48  ;;  %v1443_v53 = vmax.f32 %v9361_v29, 0.0  ;;  %v9466_v49 = vsel %vm1598_vm2, %v9394_v10, %v9400_v1  ;;  %v9469_v41 = vrot.slane %v1965_v57, 7 }
 0x2a3   :  { %v7480_v60 = vpop.eup %7479  ;;  %v1508_v55 = vmul.f32 1.442695, %v1479_v14  ;;  %v9449_v3 = vadd.f32 %v9319_v26, %v1234_v15  ;;  %v1294_v47 = vadd.f32 %v1293_v54, %v1264_v51  ;;  %7489 = vpow2.f32 %v1502_v8  ;;  %v1206_v58 = vpop.f32.mrf.mxu2 }
 0x2a4   :  { %v1525_v45 = vadd.f32 1.0, %v7480_v60  ;;  %v7482_v35 = vpop.eup %7481  ;;  %v1441_v14 = vmax.f32 %v9343_v46, 0.0  ;;  %v1520_v15 = vadd.f32 1.0, %v7478_v39  ;;  %v9460_v51 = vrot.slane %v1565_v43, 7 }
 0x2a5   :  { %7491 = vpow2.f32 %v1508_v55  ;;  %v1462_v31 = vand.u32 2147483647, %v9449_v3  ;;  %v9458_v54 = vadd.f32 %v9314_v5, %v1294_v47  ;;  %v7484_v13 = vpop.eup %7483  ;;  %v1567_v8 = vadd.f32 %v1541_v32, %v1439_v18  ;;  %v1363_v60 = vpop.f32.mrf.mxu0 }
 0x2a6   :  { %v7486_v46 = vpop.eup %7485  ;;  %v1665_v5 = vmul.f32 1.442695, %v1647_v20  ;;  %v9471_v43 = vadd.f32 %v1535_v24, %v1436_v0  ;;  %7493 = vlog2.f32 %v1525_v45  ;;  %v1667_v18 = vmul.f32 1.442695, %v1648_v40 }
 0x2a7   :  { %v1478_v55 = vsub.f32 0.0, %v1462_v31  ;;  %v1465_v39 = vand.u32 2147483647, %v9458_v54  ;;  %v7488_v47 = vpop.eup %7487  ;;  %7495 = vlog2.f32 %v1520_v15  ;;  %v1522_v20 = vadd.f32 1.0, %v7486_v46 }
 0x2a8   :  { %v1235_v34 = vpop.f32.mrf.mxu3  ;;  %v1445_v57 = vmax.f32 %v9383_v33, 0.0  ;;  %v2221_v0 = vmul.f32 %v1567_v8, %v9077_v37  ;;  %7497 = vpow2.f32 %v1665_v5  ;;  %v1600_v45 = vrot.slane %v9440_v19, 3 }
 0x2a9   :  { %v1236_v12 = vadd.f32 %v1235_v34, %v1206_v58  ;;  %v7490_v32 = vpop.eup %7489  ;;  %v1545_v58 = vmul.f32 0.6931472, %v7484_v13  ;;  %v1481_v34 = vsub.f32 0.0, %v1465_v39  ;;  %v1506_v24 = vmul.f32 1.442695, %v1478_v55 }
 0x2aa   :  { %v1392_v29 = vpop.f32.mrf.mxu1  ;;  %v1539_v40 = vmul.f32 0.6931472, %v7482_v35  ;;  %7499 = vpow2.f32 %v1667_v18  ;;  %v9488_v35 = vrot.slane %v1567_v8, 7  ;;  %v9491_v18 = vrot.slane %v2221_v0, 7 }
 0x2ab   :  { %v9475_v44 = vadd.f32 %v9319_v26, %v1236_v12  ;;  %v9477_v31 = vadd.f32 %v1392_v29, %v1363_v60  ;;  %v7492_v28 = vpop.eup %7491  ;;  %v9483_v26 = vpop.f32.mrf.mxu2  ;;  %v1549_v12 = vmul.f32 0.6931472, %v7488_v47  ;;  %v1524_v60 = vadd.f32 1.0, %v7490_v32 }
 0x2ac   :  { %v1527_v15 = vadd.f32 1.0, %v7492_v28  ;;  %v7494_v46 = vpop.eup %7493  ;;  %v1569_v39 = vadd.f32 %v1545_v58, %v1441_v14  ;;  %7501 = vlog2.f32 %v1522_v20  ;;  %v1512_v37 = vmul.f32 1.442695, %v1481_v34  ;;  %12791 = vst [vmem:[#allocation24_spill] sm:$0xff] %v9488_v35 }
 0x2ad   :  { %v3733_v11 = vperm.slane %v9477_v31, 4  ;;  %v3712_v13 = vperm.slane %v9477_v31, 1  ;;  %v3705_v33 = vperm.slane %v9477_v31, 0  ;;  %v1464_v55 = vand.u32 2147483647, %v9475_v44  ;;  %v7496_v28 = vpop.eup %7495  ;;  %v1365_v5 = vpop.f32.mrf.mxu0  ;;  %12792 = vst [vmem:[#allocation25_spill] sm:$0xff] %v9491_v18 }
 0x2ae   :  { %7503 = vpow2.f32 %v1506_v24  ;;  %v1772_v47 = vrot.slane %v9414_v62, 1  ;;  %v1619_v29 = vperm.slane %v1600_v45, 0  ;;  %v12793_v14 = vmax.f32 %v9340_v63, 0.0  ;;  %v7498_v20 = vpop.eup %7497 }
 0x2af   :  { %3738 = vperm.xlu1 %7343, %v3733_v11   ;;  %3717 = vperm.xlu2 %7342, %v3712_v13   ;;  %7505 = vlog2.f32 %v1527_v15  ;;  %v1620_v11 = vperm.slane %v1600_v45, 1  ;;  %v1571_v34 = vadd.f32 %v1549_v12, %v1443_v53  ;;  %v1553_v8 = vmul.f32 0.6931472, %v7494_v46 }
 0x2b0   :  { %v1334_v19 = vpop.f32.mrf.mxu3  ;;  %3710 = vperm.xlu0 %7341, %v3705_v33   ;;  %v9495_v32 = vadd.f32 %v1539_v40, %v12793_v14  ;;  %7507 = vlog2.f32 %v1524_v60  ;;  %v7500_v13 = vpop.eup %7499  ;;  %v2477_v33 = vmul.f32 %v1569_v39, %v9080_v22  ;;  %v1543_v62 = vmul.f32 0.6931472, %v7496_v28 }
 0x2b1   :  { %7509 = vpow2.f32 %v1512_v37  ;;  %v1480_v0 = vsub.f32 0.0, %v1464_v55  ;;  %v1447_v30 = vmax.f32 %v9433_v27, 0.0  ;;  %v9500_v63 = vperm.slane %v1772_v47, 0 }
 0x2b2   :  { %12794 = vst [vmem:[#allocation26_spill] sm:$0xff] %v9495_v32  ;;  %v1394_v58 = vpop.f32.mrf.mxu1  ;;  %v9502_v40 = vperm.slane %v1772_v47, 1  ;;  %v1651_v45 = vmul.f32 %v1619_v29, %v9435_v52  ;;  %v7502_v15 = vpop.eup %7501  ;;  %v9505_v53 = vrot.slane %v1569_v39, 7  ;;  %v3754_v12 = vperm.slane %v9477_v31, 7 }
 0x2b3   :  { %v9508_v60 = vpop.f32.mrf.mxu2  ;;  %v9510_v46 = vmul.f32 0.0, %v7498_v20  ;;  %v1652_v22 = vmul.f32 %v1620_v11, %v9443_v48  ;;  %v2733_v27 = vmul.f32 %v1571_v34, %v9161_v17  ;;  %v1573_v55 = vadd.f32 %v1553_v8, %v1445_v57 }
 0x2b4   :  { %12795 = vst [vmem:[#allocation27_spill] sm:$0xff] %v9505_v53  ;;  %v7504_v37 = vpop.eup %7503  ;;  %v3719_v28 = vperm.slane %v9477_v31, 2  ;;  %v3726_v47 = vperm.slane %v9477_v31, 3  ;;  %v9516_v14 = vrot.slane %v2477_v33, 7  ;;  %v12797_v39 = vmax.f32 %v9349_v4, 0.0 }
 0x2b5   :  { %v7506_v29 = vpop.eup %7505  ;;  %v1510_v59 = vmul.f32 1.442695, %v1480_v0  ;;  %v1547_v23 = vmul.f32 0.6931472, %v7502_v15  ;;  %v9524_v8 = vmul.f32 0.0, %v7500_v13  ;;  %v1526_v4 = vadd.f32 1.0, %v7504_v37  ;;  %v1368_v20 = vpop.f32.mrf.mxu0 }
 0x2b6   :  { %12796 = vst [vmem:[#allocation28_spill] sm:$0xff] %v9516_v14  ;;  %v9520_v24 = vadd.f32 %v1543_v62, %v12797_v39  ;;  %v7508_v50 = vpop.eup %7507  ;;  %v1673_v17 = vmul.f32 1.442695, %v1651_v45  ;;  %v9526_v14 = vrot.slane %v1571_v34, 7  ;;  %v9529_v62 = vadd.f32 %v1334_v19, %v9483_v26 }
 0x2b7   :  { %3759 = vperm.xlu1 %7343, %v3754_v12   ;;  %3724 = vperm.xlu2 %7342, %v3719_v28   ;;  %v7510_v33 = vpop.eup %7509  ;;  %v1675_v39 = vmul.f32 1.442695, %v1652_v22  ;;  %v9531_v0 = vrot.slane %v2733_v27, 7  ;;  %v2989_v12 = vmul.f32 %v1573_v55, %v9158_v6  ;;  %v1557_v15 = vmul.f32 0.6931472, %v7506_v29 }
 0x2b8   :  { %12798 = vst [vmem:[#allocation29_spill] sm:$0xff] %v9520_v24  ;;  %v1336_v11 = vpop.f32.mrf.mxu3  ;;  %3731 = vperm.xlu0 %7341, %v3726_v47   ;;  %v1551_v13 = vmul.f32 0.6931472, %v7508_v50  ;;  %7511 = vpow2.f32 %v1510_v59  ;;  %v9535_v45 = vadd.f32 %v1394_v58, %v1365_v5  ;;  %v12801_v34 = vmax.f32 %v9379_v21, 0.0 }
 0x2b9   :  { %12799 = vst [vmem:[#allocation30_spill] sm:$0xff] %v9526_v14  ;;  %v1529_v26 = vadd.f32 1.0, %v7510_v33  ;;  %v3740_v22 = vperm.slane %v9477_v31, 5  ;;  %v9543_v27 = vrot.slane %v1573_v55, 7  ;;  %7513 = vlog2.f32 %v1526_v4 }
 0x2ba   :  { %12800 = vst [vmem:[#allocation31_spill] sm:$0xff] %v9531_v0  ;;  %v1397_v57 = vpop.f32.mrf.mxu1  ;;  %v9539_v37 = vadd.f32 %v1547_v23, %v12801_v34  ;;  %v3747_v47 = vperm.slane %v9477_v31, 6  ;;  %v1711_v50 = vperm.slane %v9529_v62, 0  ;;  %v9549_v5 = vrot.slane %v2989_v12, 7 }
 0x2bb   :  { %12803 = vst [vmem:[#allocation33_spill] sm:$0xff] %v9543_v27  ;;  %v9547_v59 = vpop.f32.mrf.mxu2  ;;  %v1575_v58 = vadd.f32 %v1557_v15, %v1447_v30  ;;  %v1725_v23 = vperm.slane %v9529_v62, 2  ;;  %7515 = vpow2.f32 %v1673_v17  ;;  %v12805_v21 = vmax.f32 %v9421_v16, 0.0 }
 0x2bc   :  { %12802 = vst [vmem:[#allocation32_spill] sm:$0xff] %v9539_v37  ;;  %v1718_v33 = vperm.slane %v9529_v62, 1  ;;  %v1739_v31 = vperm.slane %v9529_v62, 4  ;;  %7517 = vlog2.f32 %v1529_v26  ;;  %v1605_v16 = vsel %vm1604_vm3, %v9357_v7, %v9355_v42 }
 0x2bd   :  { %12804 = vst [vmem:[#allocation34_spill] sm:$0xff] %v9549_v5  ;;  %v9554_v29 = vadd.f32 %v1551_v13, %v12805_v21  ;;  %v9567_v15 = vadd.f32 %v1336_v11, %v9508_v60  ;;  %v9574_v26 = vsel %vm1604_vm3, %v9394_v10, %v9400_v1  ;;  %v9583_v30 = vrot.slane %v1575_v58, 7  ;;  %v1370_v17 = vpop.f32.mrf.mxu0 }
 0x2be   :  { %v7512_v12 = vpop.eup %7511  ;;  %7519 = vpow2.f32 %v1675_v39  ;;  %v12808_v34 = vrot.slane %v9466_v49, 3  ;;  %v9601_v39 = vsel %vm1590_vm4, %v9357_v7, %v9355_v42  ;;  %v12812_v60 = vmax.f32 %v9458_v54, 0.0 }
 0x2bf   :  { %12806 = vst [vmem:[#allocation35_spill] sm:$0xff] %v9554_v29  ;;  %1716 = vperm.xlu1 %7343, %v1711_v50   ;;  %3745 = vperm.xlu2 %7342, %v3740_v22   ;;  %v3245_v22 = vmul.f32 %v1575_v58, %v9185_v36  ;;  %v7514_v19 = vpop.eup %7513  ;;  %v1528_v4 = vadd.f32 1.0, %v7512_v12  ;;  %v9586_v50 = vadd.f32 %v1397_v57, %v1368_v20  ;;  %v12816_v49 = vperm.slane %v9529_v62, 3 }
 0x2c0   :  { %v9556_v55 = vpop.f32.mrf.mxu3  ;;  %3752 = vperm.xlu0 %7341, %v3747_v47   ;;  %12807 = vst [vmem:[#allocation36_spill] sm:$0xff] %v9583_v30  ;;  %v9594_v36 = vperm.slane %v12808_v34, 0  ;;  %v1555_v12 = vmul.f32 0.6931472, %v7514_v19  ;;  %v9606_v20 = vsel %vm1590_vm4, %v9394_v10, %v9400_v1  ;;  %v1613_v47 = vperm.slane %v9601_v39, 0 }
 0x2c1   :  { %v7516_v13 = vpop.eup %7515  ;;  %v9596_v30 = vrot.slane %v3245_v22, 7  ;;  %v1606_v22 = vrot.slane %v1605_v16, 5  ;;  %7521 = vlog2.f32 %v1528_v4  ;;  %v12810_v16 = vmax.f32 %v9449_v3, 0.0 }
 0x2c2   :  { %v1399_v28 = vpop.f32.mrf.mxu1  ;;  %v7518_v58 = vpop.eup %7517  ;;  %v9629_v4 = vsel %vm1595_vm5, %v9394_v10, %v9400_v1  ;;  %v12813_v54 = vmov %v12808_v34  ;;  %v12814_v34 = vperm.slane %v9529_v62, 6 }
 0x2c3   :  { %v9588_v21 = vpop.f32.mrf.mxu2  ;;  %12809 = vst [vmem:[#allocation37_spill] sm:$0xff] %v9596_v30  ;;  %v1561_v30 = vmul.f32 0.6931472, %v7518_v58  ;;  %v9620_v11 = vadd.f32 %v1555_v12, %v12810_v16  ;;  %v9633_v58 = vadd.f32 %v9556_v55, %v9547_v59  ;;  %v1623_v12 = vperm.slane %v1606_v22, 0 }
 0x2c4   :  { %v7520_v5 = vpop.eup %7519  ;;  %v1611_v59 = vsel %vm1610_vm6, %v9355_v42, %v9357_v7  ;;  %v9647_v3 = vadd.f32 %v1399_v28, %v1370_v17 }
 0x2c5   :  { %12811 = vst [vmem:[#allocation38_spill] sm:$0xff] %v9620_v11  ;;  %v1577_v6 = vadd.f32 %v1561_v30, %v12812_v60  ;;  %v9649_v16 = vpop.f32.mrf.mxu0  ;;  %v9656_v30 = vperm.slane %v12813_v54, 1  ;;  %v9658_v60 = vmul.f32 0.0, %v7516_v13  ;;  %v9665_v17 = vmul.f32 0.0, %v7520_v5 }
 0x2c6   :  { %v1655_v29 = vmul.f32 %v1623_v12, %v9435_v52  ;;  %v1614_v54 = vperm.slane %v9601_v39, 1  ;;  %v1602_v5 = vsel %vm1601_vm7, %v9357_v7, %v9355_v42  ;;  %v1612_v53 = vrot.slane %v1611_v59, 7 }
 0x2c7   :  { %1744 = vperm.xlu1 %7343, %v1739_v31   ;;  %1723 = vperm.xlu2 %7342, %v1718_v33   ;;  %v1596_v33 = vsel %vm1595_vm5, %v9357_v7, %v9355_v42  ;;  %v1624_v31 = vperm.slane %v1606_v22, 1  ;;  %v7522_v55 = vpop.eup %7521  ;;  %v12815_v22 = vperm.slane %v9535_v45, 1  ;;  %v9685_v28 = vrot.slane %v1577_v6, 7 }
 0x2c8   :  { %v9608_v57 = vpop.f32.mrf.mxu3  ;;  %1730 = vperm.xlu0 %7341, %v1725_v23   ;;  %v1597_v27 = vrot.slane %v1596_v33, 2  ;;  %v3501_v33 = vmul.f32 %v1577_v6, %v9179_v61  ;;  %v1559_v12 = vmul.f32 0.6931472, %v7522_v55  ;;  %v1681_v14 = vmul.f32 1.442695, %v1655_v29 }
 0x2c9   :  { %v1656_v13 = vmul.f32 %v1624_v31, %v9443_v48  ;;  %12817 = vst [vmem:[#allocation39_spill] sm:$0xff] %v9685_v28  ;;  %v12819_v6 = vmax.f32 %v9475_v44, 0.0  ;;  %v1780_v29 = vrot.slane %v9574_v26, 5  ;;  %v1603_v59 = vrot.slane %v1602_v5, 4 }
 0x2ca   :  { %v9651_v23 = vpop.f32.mrf.mxu1  ;;  %v1617_v24 = vperm.slane %v1597_v27, 0  ;;  %v1618_v56 = vperm.slane %v1597_v27, 1  ;;  %v12821_v27 = vperm.slane %v9535_v45, 0  ;;  %7523 = vpow2.f32 %v1681_v14 }
 0x2cb   :  { %v9641_v19 = vpop.f32.mrf.mxu2  ;;  %v1683_v55 = vmul.f32 1.442695, %v1656_v13  ;;  %v9697_v39 = vadd.f32 %v1559_v12, %v12819_v6  ;;  %v9706_v13 = vsel %vm1601_vm7, %v9394_v10, %v9400_v1  ;;  %v1608_v26 = vsel %vm1607_vm8, %v9357_v7, %v9355_v42 }
 0x2cc   :  { %v12823_v6 = vperm.slane %v9529_v62, 5  ;;  %v1650_v0 = vmul.f32 %v1618_v56, %v9443_v48  ;;  %v1628_v14 = vperm.slane %v1612_v53, 1  ;;  %v1774_v42 = vrot.slane %v9629_v4, 2 }
 0x2cd   :  { %12820 = vst [vmem:[#allocation41_spill] sm:$0xff] %v9697_v39  ;;  %v1375_v5 = vpop.f32.mrf.mxu0  ;;  %7525 = vpow2.f32 %v1683_v55  ;;  %v9729_v7 = vsel %vm1607_vm8, %v9394_v10, %v9400_v1  ;;  %v1621_v56 = vperm.slane %v1603_v59, 0  ;;  %v12829_v28 = vperm.slane %v9529_v62, 7 }
 0x2ce   :  { %v1671_v4 = vmul.f32 1.442695, %v1650_v0 }
 0x2cf   :  { %1758 = vperm.xlu1 %7343, %v12814_v34   ;;  %1737 = vperm.xlu2 %7342, %v12816_v49   ;;  %v9677_v34 = vsel %vm1610_vm6, %v9400_v1, %v9394_v10  ;;  %v1645_v49 = vmul.f32 %v1613_v47, %v9435_v52  ;;  %v9693_v47 = vrot.slane %v3501_v33, 7  ;;  %v1627_v33 = vperm.slane %v1612_v53, 0 }
 0x2d0   :  { %v9662_v11 = vpop.f32.mrf.mxu3  ;;  %3949 = vperm.xlu0 %7341, %v12815_v22   ;;  %v1646_v22 = vmul.f32 %v1614_v54, %v9443_v48  ;;  %v1649_v54 = vmul.f32 %v1617_v24, %v9435_v52  ;;  %v9723_v24 = vadd.f32 %v9608_v57, %v9588_v21  ;;  %v1622_v21 = vperm.slane %v1603_v59, 1  ;;  %v7524_v1 = vpop.eup %7523 }
 0x2d1   :  { %12818 = vst [vmem:[#allocation40_spill] sm:$0xff] %v9693_v47  ;;  %v1661_v37 = vmul.f32 1.442695, %v1645_v49  ;;  %v12822_v49 = vperm.slane %v9535_v45, 4  ;;  %v1659_v55 = vmul.f32 %v1627_v33, %v9435_v52  ;;  %v1609_v57 = vrot.slane %v1608_v26, 6 }
 0x2d2   :  { %v1404_v12 = vpop.f32.mrf.mxu1  ;;  %12824 = vst [vmem:[#allocation42_spill] sm:$0xff] %v9723_v24  ;;  %v1669_v53 = vmul.f32 1.442695, %v1649_v54  ;;  %v1660_v10 = vmul.f32 %v1628_v14, %v9443_v48  ;;  %v9747_v33 = vperm.slane %v1774_v42, 0  ;;  %v9749_v26 = vperm.slane %v1774_v42, 1 }
 0x2d3   :  { %v9699_v31 = vpop.f32.mrf.mxu2  ;;  %7527 = vpow2.f32 %v1661_v37  ;;  %v9739_v37 = vadd.f32 %v9651_v23, %v9649_v16  ;;  %v7526_v59 = vpop.eup %7525  ;;  %v1784_v23 = vrot.slane %v9677_v34, 7  ;;  %v1653_v0 = vmul.f32 %v1621_v56, %v9435_v52 }
 0x2d4   :  { %12825 = vst [vmem:[#allocation43_spill] sm:$0xff] %v9747_v33  ;;  %v1855_v16 = vsel %vm1595_vm5, %v9471_v43, %v9460_v51  ;;  %v12827_v14 = vperm.slane %v9535_v45, 2  ;;  %v1689_v54 = vmul.f32 1.442695, %v1659_v55  ;;  %v1625_v42 = vperm.slane %v1609_v57, 0 }
 0x2d5   :  { %12826 = vst [vmem:[#allocation44_spill] sm:$0xff] %v9749_v26  ;;  %v9763_v34 = vadd.f32 %v9662_v11, %v9641_v19  ;;  %v12828_v56 = vperm.slane %v9535_v45, 7  ;;  %v1691_v47 = vmul.f32 1.442695, %v1660_v10  ;;  %v9769_v39 = vadd.f32 %v1404_v12, %v1375_v5  ;;  %v1378_v9 = vpop.f32.mrf.mxu0 }
 0x2d6   :  { %v9772_v55 = vmul.f32 0.0, %v7524_v1  ;;  %v9774_v19 = vmul.f32 0.0, %v7526_v59  ;;  %v1677_v62 = vmul.f32 1.442695, %v1653_v0  ;;  %v1778_v5 = vrot.slane %v9706_v13, 4 }
 0x2d7   :  { %3942 = vperm.xlu1 %7343, %v12821_v27   ;;  %1751 = vperm.xlu2 %7342, %v12823_v6   ;;  %v1663_v27 = vmul.f32 1.442695, %v1646_v22  ;;  %v9733_v6 = vperm.slane %v1780_v29, 1  ;;  %v1657_v12 = vmul.f32 %v1625_v42, %v9435_v52  ;;  %v1861_v10 = vsel %vm1604_vm3, %v9471_v43, %v9460_v51 }
 0x2d8   :  { %v9710_v44 = vpop.f32.mrf.mxu3  ;;  %3970 = vperm.xlu0 %7341, %v12822_v49   ;;  %v9731_v49 = vperm.slane %v1780_v29, 0  ;;  %v1654_v29 = vmul.f32 %v1622_v21, %v9443_v48  ;;  %v1856_v21 = vrot.slane %v1855_v16, 2  ;;  %12830 = vst [vmem:[#allocation45_spill] sm:$0xff] %v9774_v19  ;;  %v1782_v0 = vrot.slane %v9729_v7, 6 }
 0x2d9   :  { %7529 = vpow2.f32 %v1663_v27  ;;  %v7528_v27 = vpop.eup %7527  ;;  %v9790_v59 = vadd.f32 %v9710_v44, %v9699_v31  ;;  %v12835_v31 = vperm.slane %v9535_v45, 5  ;;  %v1685_v42 = vmul.f32 1.442695, %v1657_v12 }
 0x2da   :  { %7531 = vpow2.f32 %v1669_v53  ;;  %v1407_v11 = vpop.f32.mrf.mxu1  ;;  %v9776_v26 = vmul.f32 0.0, %v7528_v27  ;;  %v1871_v13 = vperm.slane %v1856_v21, 0  ;;  %v1872_v16 = vperm.slane %v1856_v21, 1 }
 0x2db   :  { %v9742_v61 = vpop.f32.mrf.mxu2  ;;  %7533 = vpow2.f32 %v1671_v4  ;;  %12833 = vst [vmem:[#allocation48_spill] sm:$0xff] %v9790_v59  ;;  %v1853_v27 = vsel %vm1592_vm1, %v9471_v43, %v9460_v51  ;;  %v12839_v7 = vperm.slane %v9567_v15, 1  ;;  %v9818_v53 = vperm.slane %v1778_v5, 1 }
 0x2dc   :  { %7535 = vpow2.f32 %v1689_v54 }
 0x2dd   :  { %7537 = vpow2.f32 %v1691_v47  ;;  %v9798_v47 = vmul.f32 %v9471_v43, %v8922_v38  ;;  %v1862_v38 = vrot.slane %v1861_v10, 5  ;;  %12841 = vst [vmem:[#allocation53_spill] sm:$0xff] %v9818_v53 }
 0x2de   :  { %7539 = vpow2.f32 %v1677_v62  ;;  %v12838_v62 = vperm.slane %v9535_v45, 3 }
 0x2df   :  { %3956 = vperm.xlu1 %7343, %v12827_v14   ;;  %1765 = vperm.xlu2 %7342, %v12829_v28   ;;  %v1626_v14 = vperm.slane %v1609_v57, 1  ;;  %v7530_v2 = vpop.eup %7529  ;;  %v1679_v28 = vmul.f32 1.442695, %v1654_v29  ;;  %v9782_v57 = vperm.slane %v1784_v23, 1 }
 0x2e0   :  { %v9758_v22 = vpop.f32.mrf.mxu3  ;;  %3991 = vperm.xlu0 %7341, %v12828_v56   ;;  %v9778_v56 = vperm.slane %v1784_v23, 0  ;;  %v7532_v1 = vpop.eup %7531  ;;  %v9794_v29 = vmul.f32 0.0, %v7530_v2  ;;  %v9808_v2 = vperm.slane %v1778_v5, 0  ;;  %v1904_v5 = vmul.f32 %v1872_v16, %v9443_v48 }
 0x2e1   :  { %12832 = vst [vmem:[#allocation47_spill] sm:$0xff] %v9782_v57  ;;  %v1658_v4 = vmul.f32 %v1626_v14, %v9443_v48  ;;  %v7534_v23 = vpop.eup %7533  ;;  %7541 = vpow2.f32 %v1679_v28  ;;  %v9810_v14 = vadd.f32 %v1407_v11, %v1378_v9  ;;  %v9816_v21 = vmul.f32 0.0, %v7532_v1 }
 0x2e2   :  { %12831 = vst [vmem:[#allocation46_spill] sm:$0xff] %v9778_v56  ;;  %v7536_v59 = vpop.eup %7535  ;;  %v9820_v57 = vmul.f32 0.0, %v7534_v23  ;;  %v1903_v28 = vmul.f32 %v1871_v13, %v9435_v52  ;;  %v2028_v9 = vsel %vm1595_vm5, %v9798_v47, %v9469_v41  ;;  %v1854_v11 = vrot.slane %v1853_v27, 1 }
 0x2e3   :  { %v9792_v54 = vpop.f32.mrf.mxu2  ;;  %12834 = vst [vmem:[#allocation49_spill] sm:$0xff] %v9794_v29  ;;  %v7538_v12 = vpop.eup %7537  ;;  %v9828_v1 = vperm.slane %v1782_v0, 0  ;;  %7543 = vpow2.f32 %v1685_v42  ;;  %v2034_v13 = vsel %vm1604_vm3, %v9798_v47, %v9469_v41  ;;  %v1859_v23 = vsel %vm1601_vm7, %v9471_v43, %v9460_v51 }
 0x2e4   :  { %12836 = vst [vmem:[#allocation50_spill] sm:$0xff] %v9808_v2  ;;  %v7540_v27 = vpop.eup %7539  ;;  %v9837_v10 = vmul.f32 0.0, %v7536_v59  ;;  %v9841_v42 = vmul.f32 0.0, %v7538_v12  ;;  %v9843_v2 = vperm.slane %v1782_v0, 1  ;;  %v1869_v56 = vperm.slane %v1854_v11, 0 }
 0x2e5   :  { %12837 = vst [vmem:[#allocation51_spill] sm:$0xff] %v9810_v14  ;;  %v1409_v14 = vpop.f32.mrf.mxu1  ;;  %v1925_v33 = vmul.f32 1.442695, %v1904_v5  ;;  %v2035_v29 = vrot.slane %v2034_v13, 5  ;;  %v1860_v59 = vrot.slane %v1859_v23, 4 }
 0x2e6   :  { %12840 = vst [vmem:[#allocation52_spill] sm:$0xff] %v9816_v21  ;;  %v9847_v21 = vadd.f32 %v9758_v22, %v9742_v61  ;;  %v12851_v61 = vperm.slane %v9535_v45, 6  ;;  %v12852_v22 = vperm.slane %v9567_v15, 4 }
 0x2e7   :  { %3977 = vperm.xlu1 %7343, %v12835_v31   ;;  %3963 = vperm.xlu2 %7342, %v12838_v62   ;;  %v1687_v31 = vmul.f32 1.442695, %v1658_v4  ;;  %12842 = vst [vmem:[#allocation54_spill] sm:$0xff] %v9820_v57  ;;  %v1877_v4 = vperm.slane %v1862_v38, 0  ;;  %v2029_v62 = vrot.slane %v2028_v9, 2  ;;  %v7542_v53 = vpop.eup %7541  ;;  %v9855_v9 = vmul.f32 0.0, %v7540_v27 }
 0x2e8   :  { %v9806_v44 = vpop.f32.mrf.mxu3  ;;  %1978 = vperm.xlu0 %7341, %v12839_v7   ;;  %12843 = vst [vmem:[#allocation55_spill] sm:$0xff] %v9828_v1  ;;  %v1380_v7 = vpop.f32.mrf.mxu0  ;;  %v1878_v1 = vperm.slane %v1862_v38, 1  ;;  %v1923_v57 = vmul.f32 1.442695, %v1903_v28  ;;  %v12849_v38 = vperm.slane %v9567_v15, 0  ;;  %v2026_v28 = vsel %vm1592_vm1, %v9798_v47, %v9469_v41 }
 0x2e9   :  { %12844 = vst [vmem:[#allocation56_spill] sm:$0xff] %v9837_v10  ;;  %7545 = vpow2.f32 %v1687_v31  ;;  %v9849_v10 = vadd.f32 %v1409_v14, %v1380_v7  ;;  %v1909_v0 = vmul.f32 %v1877_v4, %v9435_v52  ;;  %v9866_v12 = vmul.f32 0.0, %v7542_v53  ;;  %v7544_v23 = vpop.eup %7543 }
 0x2ea   :  { %12845 = vst [vmem:[#allocation57_spill] sm:$0xff] %v9841_v42  ;;  %v9868_v5 = vperm.slane %v2029_v62, 0  ;;  %v1910_v13 = vmul.f32 %v1878_v1, %v9443_v48  ;;  %7547 = vpow2.f32 %v1923_v57  ;;  %v9871_v4 = vperm.slane %v2029_v62, 1 }
 0x2eb   :  { %v9839_v16 = vpop.f32.mrf.mxu2  ;;  %12846 = vst [vmem:[#allocation58_spill] sm:$0xff] %v9843_v2  ;;  %v1870_v27 = vperm.slane %v1854_v11, 1  ;;  %v1901_v7 = vmul.f32 %v1869_v56, %v9435_v52  ;;  %7549 = vpow2.f32 %v1925_v33  ;;  %v1935_v14 = vmul.f32 1.442695, %v1909_v0 }
 0x2ec   :  { %12847 = vst [vmem:[#allocation59_spill] sm:$0xff] %v9847_v21  ;;  %v5945_v53 = vsub.f32 0.0, %v9839_v16  ;;  %v2032_v1 = vsel %vm1601_vm7, %v9798_v47, %v9469_v41  ;;  %v1852_v57 = vsel %vm1590_vm4, %v9471_v43, %v9460_v51  ;;  %v9885_v56 = vadd.f32 %v9806_v44, %v9792_v54 }
 0x2ed   :  { %12848 = vst [vmem:[#allocation60_spill] sm:$0xff] %v9849_v10  ;;  %v9887_v33 = vmul.f32 0.0, %v7544_v23  ;;  %v1937_v11 = vmul.f32 1.442695, %v1910_v13  ;;  %v9889_v62 = vperm.slane %v2035_v29, 1  ;;  %v1902_v10 = vmul.f32 %v1870_v27, %v9443_v48 }
 0x2ee   :  { %12850 = vst [vmem:[#allocation61_spill] sm:$0xff] %v9855_v9  ;;  %v1919_v21 = vmul.f32 1.442695, %v1901_v7  ;;  %v2033_v2 = vrot.slane %v2032_v1, 4  ;;  %v1867_v54 = vperm.slane %v1852_v57, 0  ;;  %v12863_v13 = vperm.slane %v9567_v15, 3 }
 0x2ef   :  { %1971 = vperm.xlu1 %7343, %v12849_v38   ;;  %3984 = vperm.xlu2 %7342, %v12851_v61   ;;  %12853 = vst [vmem:[#allocation62_spill] sm:$0xff] %v9866_v12  ;;  %v7546_v45 = vpop.eup %7545  ;;  %v9874_v38 = vperm.slane %v2035_v29, 0  ;;  %v2027_v61 = vrot.slane %v2026_v28, 1  ;;  %v5961_v23 = vmul.f32 1.442695, %v5945_v53  ;;  %7551 = vpow2.f32 %v1935_v14 }
 0x2f0   :  { %v9853_v31 = vpop.f32.mrf.mxu3  ;;  %1999 = vperm.xlu0 %7341, %v12852_v22   ;;  %12854 = vst [vmem:[#allocation63_spill] sm:$0xff] %v9868_v5  ;;  %v1875_v22 = vperm.slane %v1860_v59, 0  ;;  %v9893_v0 = vmul.f32 0.0, %v7546_v45  ;;  %v9899_v44 = vpop.eup %7547  ;;  %v1868_v27 = vperm.slane %v1852_v57, 1  ;;  %7553 = vpow2.f32 %v1937_v11 }
 0x2f1   :  { %12855 = vst [vmem:[#allocation64_spill] sm:$0xff] %v9871_v4  ;;  %v9896_v4 = vperm.slane %v2027_v61, 0  ;;  %v5946_v29 = vsub.f32 0.0, %v9853_v31  ;;  %v9906_v7 = vpop.eup %7549  ;;  %7555 = vpow2.f32 %v1919_v21  ;;  %v9920_v57 = vsel %vm1590_vm4, %v9798_v47, %v9469_v41 }
 0x2f2   :  { %12856 = vst [vmem:[#allocation65_spill] sm:$0xff] %v9874_v38  ;;  %v1876_v38 = vperm.slane %v1860_v59, 1  ;;  %v1907_v5 = vmul.f32 %v1875_v22, %v9435_v52  ;;  %v12865_v59 = vperm.slane %v9567_v15, 2  ;;  %v12866_v22 = vperm.slane %v9567_v15, 7 }
 0x2f3   :  { %12857 = vst [vmem:[#allocation66_spill] sm:$0xff] %v9885_v56  ;;  %v9891_v28 = vpop.f32.mrf.mxu2  ;;  %v9914_v56 = vperm.slane %v2027_v61, 1  ;;  %v1865_v11 = vsel %vm1610_vm6, %v9460_v51, %v9471_v43  ;;  %7557 = vpow2.f32 %v5961_v23  ;;  %v5963_v61 = vmul.f32 1.442695, %v5946_v29 }
 0x2f4   :  { %12858 = vst [vmem:[#allocation67_spill] sm:$0xff] %v9887_v33  ;;  %v1908_v14 = vmul.f32 %v1876_v38, %v9443_v48  ;;  %v5947_v21 = vsub.f32 0.0, %v9891_v28  ;;  %v9932_v1 = vperm.slane %v2033_v2, 1  ;;  %v12875_v23 = vperm.slane %v9567_v15, 5 }
 0x2f5   :  { %12859 = vst [vmem:[#allocation68_spill] sm:$0xff] %v9889_v62 }
 0x2f6   :  { %12860 = vst [vmem:[#allocation69_spill] sm:$0xff] %v9893_v0  ;;  %v1933_v29 = vmul.f32 1.442695, %v1908_v14 }
 0x2f7   :  { %12861 = vst [vmem:[#allocation70_spill] sm:$0xff] %v9896_v4  ;;  %1992 = vperm.xlu1 %7343, %v12863_v13   ;;  %1985 = vperm.xlu2 %7342, %v12865_v59   ;;  %v1921_v13 = vmul.f32 1.442695, %v1902_v10  ;;  %v1931_v59 = vmul.f32 1.442695, %v1907_v5  ;;  %v9922_v4 = vperm.slane %v2033_v2, 0  ;;  %v1900_v10 = vmul.f32 %v1868_v27, %v9443_v48 }
 0x2f8   :  { %12862 = vst [vmem:[#allocation71_spill] sm:$0xff] %v9899_v44  ;;  %v9904_v45 = vpop.f32.mrf.mxu3  ;;  %2020 = vperm.xlu0 %7341, %v12866_v22   ;;  %v1899_v22 = vmul.f32 %v1867_v54, %v9435_v52  ;;  %v2038_v5 = vsel %vm1610_vm6, %v9469_v41, %v9798_v47  ;;  %v9937_v54 = vpop.eup %7551 }
 0x2f9   :  { %12864 = vst [vmem:[#allocation72_spill] sm:$0xff] %v9906_v7  ;;  %v5948_v38 = vsub.f32 0.0, %v9904_v45  ;;  %7559 = vpow2.f32 %v1921_v13  ;;  %v9942_v27 = vpop.eup %7553  ;;  %v5965_v7 = vmul.f32 1.442695, %v5947_v21  ;;  %v1917_v13 = vmul.f32 1.442695, %v1900_v10 }
 0x2fa   :  { %12867 = vst [vmem:[#allocation73_spill] sm:$0xff] %v9914_v56  ;;  %v1866_v56 = vrot.slane %v1865_v11, 7  ;;  %7561 = vpow2.f32 %v1931_v59  ;;  %v1915_v62 = vmul.f32 1.442695, %v1899_v22  ;;  %v2039_v14 = vrot.slane %v2038_v5, 7 }
 0x2fb   :  { %12868 = vst [vmem:[#allocation74_spill] sm:$0xff] %v9920_v57  ;;  %7563 = vpow2.f32 %v5963_v61  ;;  %v5967_v11 = vmul.f32 1.442695, %v5948_v38  ;;  %v12876_v59 = vperm.slane %v9586_v50, 4  ;;  %v1857_v61 = vsel %vm1598_vm2, %v9471_v43, %v9460_v51 }
 0x2fc   :  { %12869 = vst [vmem:[#allocation75_spill] sm:$0xff] %v9922_v4  ;;  %v9939_v4 = vpop.f32.mrf.mxu2  ;;  %v1881_v38 = vperm.slane %v1866_v56, 0  ;;  %v1882_v5 = vperm.slane %v1866_v56, 1  ;;  %7565 = vpow2.f32 %v1933_v29  ;;  %v1858_v22 = vrot.slane %v1857_v61, 3 }
 0x2fd   :  { %12870 = vst [vmem:[#allocation76_spill] sm:$0xff] %v9932_v1  ;;  %v9946_v1 = vpop.eup %7555  ;;  %7567 = vpow2.f32 %v5965_v7 }
 0x2fe   :  { %12871 = vst [vmem:[#allocation77_spill] sm:$0xff] %v9937_v54  ;;  %v12874_v54 = vperm.slane %v9567_v15, 6  ;;  %v7558_v21 = vpop.eup %7557  ;;  %v5949_v15 = vsub.f32 0.0, %v9939_v4  ;;  %7569 = vpow2.f32 %v5967_v11  ;;  %v1913_v7 = vmul.f32 %v1881_v38, %v9435_v52 }
 0x2ff   :  { %12872 = vst [vmem:[#allocation78_spill] sm:$0xff] %v9942_v27  ;;  %2006 = vperm.xlu2 %7342, %v12875_v23   ;;  %v9966_v2 = vpop.eup %7559  ;;  %v5993_v56 = vadd.f32 1.0, %v7558_v21  ;;  %7571 = vpow2.f32 %v1915_v62  ;;  %v1914_v61 = vmul.f32 %v1882_v5, %v9443_v48  ;;  %v9985_v11 = vperm.slane %v2039_v14, 0 }
 0x300   :  { %12873 = vst [vmem:[#allocation79_spill] sm:$0xff] %v9946_v1  ;;  %2013 = vperm.xlu1 %7343, %v12874_v54   ;;  %v9950_v44 = vpop.f32.mrf.mxu3  ;;  %4202 = vperm.xlu0 %7341, %v12876_v59   ;;  %v1863_v54 = vsel %vm1607_vm8, %v9471_v43, %v9460_v51  ;;  %v9972_v10 = vpop.eup %7561  ;;  %v9983_v51 = vsel %vm1590_vm4, %v9495_v32, %v9488_v35  ;;  %v5969_v43 = vmul.f32 1.442695, %v5949_v15  ;;  %7573 = vpow2.f32 %v1917_v13 }
 0x301   :  { %12877 = vst [vmem:[#allocation80_spill] sm:$0xff] %v9966_v2  ;;  %v5950_v53 = vsub.f32 0.0, %v9950_v44  ;;  %v7564_v59 = vpop.eup %7563  ;;  %v1864_v21 = vrot.slane %v1863_v54, 6  ;;  %v12880_v23 = vperm.slane %v9586_v50, 1  ;;  %v9992_v38 = vperm.slane %v2039_v14, 1 }
 0x302   :  { %12878 = vst [vmem:[#allocation81_spill] sm:$0xff] %v9972_v10  ;;  %v1873_v5 = vperm.slane %v1858_v22, 0  ;;  %v9994_v2 = vpop.eup %7565  ;;  %7575 = vrcp.f32 %v5993_v56  ;;  %v5994_v1 = vadd.f32 1.0, %v7564_v59  ;;  %v12883_v13 = vperm.slane %v9586_v50, 0 }
 0x303   :  { %12879 = vst [vmem:[#allocation82_spill] sm:$0xff] %v9985_v11  ;;  %v5971_v57 = vmul.f32 1.442695, %v5950_v53  ;;  %v12884_v54 = vperm.slane %v9586_v50, 7  ;;  %v1874_v53 = vperm.slane %v1858_v22, 1  ;;  %v2030_v15 = vsel %vm1598_vm2, %v9798_v47, %v9469_v41 }
 0x304   :  { %v9976_v29 = vpop.f32.mrf.mxu2  ;;  %12881 = vst [vmem:[#allocation83_spill] sm:$0xff] %v9992_v38  ;;  %v1943_v62 = vmul.f32 1.442695, %v1913_v7  ;;  %v1945_v38 = vmul.f32 1.442695, %v1914_v61  ;;  %v10006_v56 = vmul.f32 %v9495_v32, %v9067_v25  ;;  %7577 = vpow2.f32 %v5969_v43 }
 0x305   :  { %12882 = vst [vmem:[#allocation84_spill] sm:$0xff] %v9994_v2  ;;  %v1879_v22 = vperm.slane %v1864_v21, 0  ;;  %7579 = vpow2.f32 %v5971_v57  ;;  %v1905_v7 = vmul.f32 %v1873_v5, %v9435_v52  ;;  %v2031_v61 = vrot.slane %v2030_v15, 3 }
 0x306   :  { %12885 = vst [vmem:[#allocation85_spill] sm:$0xff] %v10006_v56  ;;  %v10022_v43 = vsel %vm1607_vm8, %v9798_v47, %v9469_v41  ;;  %7581 = vrcp.f32 %v5994_v1  ;;  %v1906_v27 = vmul.f32 %v1874_v53, %v9443_v48  ;;  %v10030_v0 = vsel %vm1590_vm4, %v10006_v56, %v9491_v18 }
 0x307   :  { %4174 = vperm.xlu2 %7342, %v12883_v13   ;;  %v5951_v13 = vsub.f32 0.0, %v9976_v29  ;;  %12888 = vst [vmem:[#allocation88_spill] sm:$0xff] %v10030_v0  ;;  %7583 = vpow2.f32 %v1943_v62  ;;  %v1880_v15 = vperm.slane %v1864_v21, 1  ;;  %v1911_v41 = vmul.f32 %v1879_v22, %v9435_v52 }
 0x308   :  { %4181 = vperm.xlu1 %7343, %v12880_v23   ;;  %v9989_v10 = vpop.f32.mrf.mxu3  ;;  %4223 = vperm.xlu0 %7341, %v12884_v54   ;;  %v7568_v23 = vpop.eup %7567  ;;  %v10014_v54 = vsel %vm1595_vm5, %v9495_v32, %v9488_v35  ;;  %7585 = vpow2.f32 %v1945_v38  ;;  %v2037_v47 = vrot.slane %v10022_v43, 6  ;;  %v12889_v1 = vperm.slane %v9586_v50, 2 }
 0x309   :  { %v7570_v59 = vpop.eup %7569  ;;  %v10009_v11 = vpop.permute.xlu2 %3717  ;;  %v5995_v25 = vadd.f32 1.0, %v7568_v23  ;;  %v5952_v5 = vsub.f32 0.0, %v9989_v10  ;;  %v5973_v33 = vmul.f32 1.442695, %v5951_v13  ;;  %v1927_v23 = vmul.f32 1.442695, %v1905_v7 }
 0x30a   :  { %v10016_v2 = vpop.eup %7571  ;;  %v5996_v57 = vadd.f32 1.0, %v7570_v59  ;;  %v10044_v62 = vsel %vm1595_vm5, %v10006_v56, %v9491_v18  ;;  %v10049_v21 = vsel %vm1598_vm2, %v9495_v32, %v9488_v35  ;;  %v12891_v59 = vperm.slane %v9586_v50, 3 }
 0x30b   :  { %12886 = vst [vmem:[#allocation86_spill] sm:$0xff] %v10016_v2  ;;  %v10024_v14 = vpop.eup %7573  ;;  %7587 = vrcp.f32 %v5995_v25  ;;  %v12892_v13 = vperm.slane %v9633_v58, 2  ;;  %v1929_v7 = vmul.f32 1.442695, %v1906_v27  ;;  %v10057_v43 = vperm.slane %v2031_v61, 1 }
 0x30c   :  { %12887 = vst [vmem:[#allocation87_spill] sm:$0xff] %v10024_v14  ;;  %v7576_v2 = vpop.eup %7575  ;;  %v10037_v53 = vpop.f32.mrf.mxu2  ;;  %v10039_v14 = vperm.slane %v2031_v61, 0  ;;  %7589 = vrcp.f32 %v5996_v57  ;;  %v5975_v9 = vmul.f32 1.442695, %v5952_v5  ;;  %v1912_v25 = vmul.f32 %v1880_v15, %v9443_v48 }
 0x30d   :  { %v7578_v38 = vpop.eup %7577  ;;  %12893 = vst [vmem:[#allocation90_spill] sm:$0xff] %v10057_v43  ;;  %v10061_v12 = vmul.f32 %v7576_v2, %v9839_v16  ;;  %7591 = vpow2.f32 %v5973_v33  ;;  %v1939_v24 = vmul.f32 1.442695, %v1911_v41  ;;  %v2124_v27 = vperm.slane %v9983_v51, 1 }
 0x30e   :  { %12890 = vst [vmem:[#allocation89_spill] sm:$0xff] %v10039_v14  ;;  %v7580_v14 = vpop.eup %7579  ;;  %v5997_v43 = vadd.f32 1.0, %v7578_v38  ;;  %7593 = vpow2.f32 %v1927_v23  ;;  %v2112_v16 = vrot.slane %v10014_v54, 2  ;;  %v10082_v41 = vsel %vm1598_vm2, %v10006_v56, %v9491_v18 }
 0x30f   :  { %4195 = vperm.xlu2 %7342, %v12891_v59   ;;  %12894 = vst [vmem:[#allocation91_spill] sm:$0xff] %v10061_v12  ;;  %v7582_v42 = vpop.eup %7581  ;;  %v5953_v59 = vsub.f32 0.0, %v10037_v53  ;;  %v5998_v57 = vadd.f32 1.0, %v7580_v14  ;;  %7595 = vpow2.f32 %v1929_v7  ;;  %v2156_v14 = vmul.f32 %v2124_v27, %v9443_v48 }
 0x310   :  { %4188 = vperm.xlu1 %7343, %v12889_v1   ;;  %2241 = vperm.xlu0 %7341, %v12892_v13   ;;  %v10055_v22 = vpop.f32.mrf.mxu3  ;;  %v2123_v1 = vperm.slane %v9983_v51, 0  ;;  %v10068_v61 = vpop.eup %7583  ;;  %v10077_v15 = vmul.f32 %v7582_v42, %v9853_v31  ;;  %7597 = vpow2.f32 %v5975_v9  ;;  %v1941_v51 = vmul.f32 1.442695, %v1912_v25 }
 0x311   :  { %v10065_v13 = vpop.permute.xlu2 %3724  ;;  %v5954_v19 = vsub.f32 0.0, %v10055_v22  ;;  %v10072_v2 = vpop.eup %7585  ;;  %v5977_v54 = vmul.f32 1.442695, %v5953_v59  ;;  %7599 = vpow2.f32 %v1939_v24  ;;  %v10088_v38 = vsel %vm1604_vm3, %v9495_v32, %v9488_v35 }
 0x312   :  { %v2155_v5 = vmul.f32 %v2123_v1, %v9435_v52  ;;  %12895 = vst [vmem:[#allocation92_spill] sm:$0xff] %v10077_v15  ;;  %v7588_v23 = vpop.eup %7587  ;;  %7601 = vrcp.f32 %v5997_v43  ;;  %v12896_v31 = vperm.slane %v9586_v50, 5  ;;  %v10092_v9 = vperm.slane %v2037_v47, 0 }
 0x313   :  { %v7590_v7 = vpop.eup %7589  ;;  %v5979_v42 = vmul.f32 1.442695, %v5954_v19  ;;  %v2127_v1 = vperm.slane %v2112_v16, 0  ;;  %7603 = vrcp.f32 %v5998_v57  ;;  %v12898_v24 = vperm.slane %v9586_v50, 6 }
 0x314   :  { %12897 = vst [vmem:[#allocation93_spill] sm:$0xff] %v10092_v9  ;;  %v7592_v25 = vpop.eup %7591  ;;  %v12899_v59 = vperm.slane %v9633_v58, 5  ;;  %v10098_v27 = vperm.slane %v2037_v47, 1  ;;  %v2171_v33 = vmul.f32 1.442695, %v2155_v5  ;;  %v2128_v15 = vperm.slane %v2112_v16, 1 }
 0x315   :  { %v10100_v43 = vpop.eup %7593  ;;  %v10103_v19 = vmul.f32 %v7588_v23, %v9891_v28  ;;  %7605 = vpow2.f32 %v1941_v51  ;;  %v2173_v16 = vmul.f32 1.442695, %v2156_v14  ;;  %v2114_v5 = vrot.slane %v10049_v21, 3 }
 0x316   :  { %12900 = vst [vmem:[#allocation94_spill] sm:$0xff] %v10098_v27  ;;  %v10109_v50 = vpop.eup %7595  ;;  %7607 = vpow2.f32 %v5977_v54  ;;  %v5999_v23 = vadd.f32 1.0, %v7592_v25  ;;  %v2159_v12 = vmul.f32 %v2127_v1, %v9435_v52  ;;  %v2160_v54 = vmul.f32 %v2128_v15, %v9443_v48 }
 0x317   :  { %4216 = vperm.xlu2 %7342, %v12898_v24   ;;  %12901 = vst [vmem:[#allocation95_spill] sm:$0xff] %v10103_v19  ;;  %v10112_v24 = vmul.f32 %v7590_v7, %v9904_v45  ;;  %v7598_v28 = vpop.eup %7597  ;;  %7609 = vpow2.f32 %v5979_v42  ;;  %v2285_v21 = vrot.slane %v10044_v62, 2  ;;  %v2118_v42 = vrot.slane %v10088_v38, 5 }
 0x318   :  { %4209 = vperm.xlu1 %7343, %v12896_v31   ;;  %2262 = vperm.xlu0 %7341, %v12899_v59   ;;  %v10105_v31 = vpop.f32.mrf.mxu2  ;;  %v10119_v57 = vpop.eup %7599  ;;  %7611 = vpow2.f32 %v2171_v33  ;;  %v10131_v1 = vsel %vm1604_vm3, %v10006_v56, %v9491_v18  ;;  %v10136_v33 = vsel %vm1607_vm8, %v9495_v32, %v9488_v35  ;;  %v6000_v45 = vadd.f32 1.0, %v7598_v28 }
 0x319   :  { %12902 = vst [vmem:[#allocation96_spill] sm:$0xff] %v10105_v31  ;;  %v10114_v47 = vpop.permute.xlu2 %3745  ;;  %v5955_v51 = vsub.f32 0.0, %v10105_v31  ;;  %v7602_v7 = vpop.eup %7601  ;;  %7613 = vpow2.f32 %v2173_v16  ;;  %v2129_v15 = vperm.slane %v2114_v5, 0  ;;  %v2130_v59 = vperm.slane %v2114_v5, 1 }
 0x31a   :  { %12903 = vst [vmem:[#allocation97_spill] sm:$0xff] %v10112_v24  ;;  %v10124_v14 = vpop.f32.mrf.mxu3  ;;  %v7604_v25 = vpop.eup %7603  ;;  %7615 = vrcp.f32 %v5999_v23  ;;  %v12907_v62 = vperm.slane %v9633_v58, 1  ;;  %v2179_v31 = vmul.f32 1.442695, %v2159_v12  ;;  %v10146_v19 = vsel %vm1607_vm8, %v10006_v56, %v9491_v18 }
 0x31b   :  { %12904 = vst [vmem:[#allocation98_spill] sm:$0xff] %v10119_v57  ;;  %v10138_v24 = vpop.eup %7605  ;;  %v10149_v28 = vmul.f32 %v7602_v7, %v9939_v4  ;;  %v5981_v16 = vmul.f32 1.442695, %v5955_v51  ;;  %v5956_v5 = vsub.f32 0.0, %v10124_v14  ;;  %v12909_v23 = vperm.slane %v9647_v3, 0 }
 0x31c   :  { %12905 = vst [vmem:[#allocation99_spill] sm:$0xff] %v10124_v14  ;;  %v7608_v27 = vpop.eup %7607  ;;  %v2181_v38 = vmul.f32 1.442695, %v2160_v54  ;;  %v10157_v0 = vmul.f32 %v7604_v25, %v9950_v44  ;;  %v10162_v4 = vperm.slane %v2285_v21, 0  ;;  %v2133_v51 = vperm.slane %v2118_v42, 0 }
 0x31d   :  { %12906 = vst [vmem:[#allocation100_spill] sm:$0xff] %v10138_v24  ;;  %v7610_v12 = vpop.eup %7609  ;;  %7617 = vrcp.f32 %v6000_v45  ;;  %v2162_v54 = vmul.f32 %v2130_v59, %v9443_v48  ;;  %v2287_v44 = vrot.slane %v10082_v41, 3  ;;  %v6001_v25 = vadd.f32 1.0, %v7608_v27 }
 0x31e   :  { %12908 = vst [vmem:[#allocation101_spill] sm:$0xff] %v10149_v28  ;;  %v10164_v7 = vpop.eup %7611  ;;  %7619 = vpow2.f32 %v2179_v31  ;;  %v5983_v45 = vmul.f32 1.442695, %v5956_v5  ;;  %v12921_v5 = vperm.slane %v9647_v3, 2 }
 0x31f   :  { %12911 = vst [vmem:[#allocation102_spill] sm:$0xff] %v10157_v0  ;;  %v10173_v28 = vpop.eup %7613  ;;  %7621 = vpow2.f32 %v5981_v16  ;;  %v2185_v31 = vmul.f32 1.442695, %v2162_v54 }
 0x320   :  { %2234 = vperm.xlu1 %7343, %v12907_v62   ;;  %4406 = vperm.xlu0 %7341, %v12909_v23   ;;  %v12910_v62 = vperm.slane %v9633_v58, 0  ;;  %12912 = vst [vmem:[#allocation103_spill] sm:$0xff] %v10162_v4  ;;  %v6002_v4 = vadd.f32 1.0, %v7610_v12  ;;  %v7616_v9 = vpop.eup %7615  ;;  %v10177_v24 = vpop.f32.mrf.mxu2  ;;  %7623 = vpow2.f32 %v2181_v38  ;;  %v10209_v12 = vperm.slane %v2287_v44, 1 }
 0x321   :  { %v10159_v56 = vpop.permute.xlu1 %3738  ;;  %12913 = vst [vmem:[#allocation104_spill] sm:$0xff] %v10164_v7  ;;  %v1724_v23 = vpop.permute.xlu2 %1723  ;;  %v10175_v7 = vperm.slane %v2285_v21, 1  ;;  %7625 = vrcp.f32 %v6001_v25 }
 0x322   :  { %2227 = vperm.xlu2 %7342, %v12910_v62   ;;  %v10166_v14 = vpop.permute.xlu0 %3710  ;;  %v2161_v62 = vmul.f32 %v2129_v15, %v9435_v52  ;;  %v1819_v0 = vmul.f32 %v9500_v63, %v1724_v23  ;;  %v1820_v18 = vmul.f32 %v9502_v40, %v1724_v23  ;;  %12914 = vst [vmem:[#allocation105_spill] sm:$0xff] %v10173_v28  ;;  %v2134_v63 = vperm.slane %v2118_v42, 1  ;;  %v10203_v38 = vpop.f32.mrf.mxu3 }
 0x323   :  { %12915 = vst [vmem:[#allocation106_spill] sm:$0xff] %v10175_v7  ;;  %v2165_v40 = vmul.f32 %v2133_v51, %v9435_v52  ;;  %v10186_v15 = vperm.slane %v2287_v44, 0  ;;  %7627 = vpow2.f32 %v5983_v45  ;;  %v5957_v42 = vsub.f32 0.0, %v10177_v24 }
 0x324   :  { %12916 = vst [vmem:[#allocation107_spill] sm:$0xff] %v10177_v24  ;;  %v10180_v59 = vadd.f32 %v9510_v46, %v1819_v0  ;;  %v10183_v41 = vadd.f32 %v9524_v8, %v1820_v18  ;;  %v2183_v27 = vmul.f32 1.442695, %v2161_v62  ;;  %v12918_v46 = vperm.slane %v9633_v58, 4  ;;  %v7618_v8 = vpop.eup %7617 }
 0x325   :  { %12917 = vst [vmem:[#allocation108_spill] sm:$0xff] %v10186_v15  ;;  %v10197_v18 = vsel %vm1592_vm1, %v9495_v32, %v9488_v35  ;;  %v10200_v0 = vmul.f32 %v7616_v9, %v9976_v29  ;;  %v10211_v51 = vpop.eup %7619  ;;  %7629 = vrcp.f32 %v6002_v4  ;;  %v2166_v9 = vmul.f32 %v2134_v63, %v9443_v48 }
 0x326   :  { %v3763_v21 = vmul.f32 %v10009_v11, %v10180_v59  ;;  %v3764_v16 = vmul.f32 %v10009_v11, %v10183_v41  ;;  %12920 = vst [vmem:[#allocation110_spill] sm:$0xff] %v10203_v38  ;;  %v12922_v11 = vperm.slane %v9633_v58, 3  ;;  %v2191_v62 = vmul.f32 1.442695, %v2165_v40  ;;  %v7622_v54 = vpop.eup %7621 }
 0x327   :  { %12919 = vst [vmem:[#allocation109_spill] sm:$0xff] %v10200_v0  ;;  %7631 = vpow2.f32 %v2183_v27  ;;  %v2120_v44 = vrot.slane %v10136_v33, 6  ;;  %v5958_v4 = vsub.f32 0.0, %v10203_v38  ;;  %v10225_v63 = vpop.eup %7623  ;;  %v5985_v40 = vmul.f32 1.442695, %v5957_v42 }
 0x328   :  { %2255 = vperm.xlu1 %7343, %v12918_v46   ;;  %4420 = vperm.xlu0 %7341, %v12921_v5   ;;  %12923 = vst [vmem:[#allocation111_spill] sm:$0xff] %v10209_v12  ;;  %v2291_v5 = vrot.slane %v10131_v1, 5  ;;  %7633 = vpow2.f32 %v2185_v31  ;;  %v3789_v24 = vrot.slane %v3763_v21, 4  ;;  %v7626_v46 = vpop.eup %7625  ;;  %v6003_v1 = vadd.f32 1.0, %v7622_v54  ;;  %v12954_v12 = vld [vmem:[#allocation44_spill] sm:$0xff] }
 0x329   :  { %12924 = vst [vmem:[#allocation112_spill] sm:$0xff] %v10211_v51  ;;  %v10213_v23 = vpop.permute.xlu1 %3759  ;;  %v1738_v45 = vpop.permute.xlu2 %1737  ;;  %v3795_v32 = vrot.slane %v3764_v16, 4  ;;  %7635 = vpow2.f32 %v2191_v62  ;;  %v2193_v33 = vmul.f32 1.442695, %v2166_v9  ;;  %v2135_v42 = vperm.slane %v2120_v44, 0 }
 0x32a   :  { %2248 = vperm.xlu2 %7342, %v12922_v11   ;;  %v3732_v25 = vpop.permute.xlu0 %3731  ;;  %v10221_v11 = vmul.f32 %v7618_v8, %v9989_v10  ;;  %12926 = vst [vmem:[#allocation114_spill] sm:$0xff] %v10225_v63  ;;  %v1823_v0 = vmul.f32 %v9594_v36, %v1738_v45  ;;  %v1824_v27 = vmul.f32 %v9656_v30, %v1738_v45  ;;  %v7628_v10 = vpop.eup %7627  ;;  %v10235_v31 = vperm.slane %v2291_v5, 0 }
 0x32b   :  { %v7630_v38 = vpop.eup %7629  ;;  %v12928_v36 = vperm.slane %v9633_v58, 7  ;;  %7637 = vpow2.f32 %v5985_v40  ;;  %v12930_v45 = vperm.slane %v9647_v3, 5  ;;  %v3796_v62 = vadd.f32 %v3795_v32, %v3764_v16  ;;  %v10257_v40 = vpop.f32.mrf.mxu2  ;;  %v12943_v16 = vld [vmem:[#allocation45_spill] sm:$0xff] }
 0x32c   :  { %12925 = vst [vmem:[#allocation113_spill] sm:$0xff] %v10221_v11  ;;  %v10230_v8 = vadd.f32 %v9658_v60, %v1823_v0  ;;  %v10233_v29 = vadd.f32 %v9665_v17, %v1824_v27  ;;  %v5987_v11 = vmul.f32 1.442695, %v5958_v4  ;;  %v3790_v60 = vadd.f32 %v3789_v24, %v3763_v21 }
 0x32d   :  { %12927 = vst [vmem:[#allocation115_spill] sm:$0xff] %v10235_v31  ;;  %v10242_v54 = vpop.eup %7631  ;;  %v12931_v4 = vperm.slane %v9633_v58, 6  ;;  %7639 = vrcp.f32 %v6003_v1  ;;  %v10259_v21 = vperm.slane %v2291_v5, 1  ;;  %v12937_v58 = vperm.slane %v9606_v20, 0 }
 0x32e   :  { %12929 = vst [vmem:[#allocation116_spill] sm:$0xff] %v10242_v54  ;;  %v3767_v17 = vmul.f32 %v3732_v25, %v10230_v8  ;;  %v10246_v0 = vmul.f32 %v3732_v25, %v10233_v29  ;;  %v10252_v27 = vpop.eup %7633  ;;  %v10261_v25 = vadd.f32 1.0, %v7628_v10  ;;  %v2136_v30 = vperm.slane %v2120_v44, 1 }
 0x32f   :  { %12932 = vst [vmem:[#allocation117_spill] sm:$0xff] %v10252_v27  ;;  %v2167_v35 = vmul.f32 %v2135_v42, %v9435_v52  ;;  %v10271_v32 = vmul.f32 %v7630_v38, %v10055_v22  ;;  %7641 = vpow2.f32 %v5987_v11  ;;  %v3791_v5 = vrot.slane %v3790_v60, 2 }
 0x330   :  { %2276 = vperm.xlu1 %7343, %v12928_v36   ;;  %4441 = vperm.xlu0 %7341, %v12930_v45   ;;  %v10255_v36 = vmul.f32 %v7626_v46, %v10037_v53  ;;  %12934 = vst [vmem:[#allocation119_spill] sm:$0xff] %v10257_v40  ;;  %v10268_v53 = vpop.eup %7635  ;;  %v3797_v44 = vrot.slane %v3796_v62, 2  ;;  %7643 = vpow2.f32 %v2193_v33  ;;  %v2168_v1 = vmul.f32 %v2136_v30, %v9443_v48 }
 0x331   :  { %v1717_v24 = vpop.permute.xlu1 %1716  ;;  %12935 = vst [vmem:[#allocation120_spill] sm:$0xff] %v10259_v21  ;;  %v1752_v45 = vpop.permute.xlu2 %1751  ;;  %v3819_v33 = vrot.slane %v10246_v0, 4  ;;  %v12946_v30 = vperm.slane %v9647_v3, 1 }
 0x332   :  { %2269 = vperm.xlu2 %7342, %v12931_v4   ;;  %12933 = vst [vmem:[#allocation118_spill] sm:$0xff] %v10255_v36  ;;  %v10263_v9 = vpop.permute.xlu0 %3752  ;;  %v1817_v4 = vmul.f32 %v12937_v58, %v1717_v24  ;;  %v1827_v10 = vmul.f32 %v9731_v49, %v1752_v45  ;;  %v2293_v58 = vrot.slane %v10146_v19, 6  ;;  %v1828_v42 = vmul.f32 %v9733_v6, %v1752_v45  ;;  %v10284_v38 = vpop.eup %7637  ;;  %v12947_v45 = vld [vmem:[#allocation42_spill] sm:$0xff] }
 0x333   :  { %12936 = vst [vmem:[#allocation121_spill] sm:$0xff] %v10261_v25  ;;  %v12940_v36 = vperm.slane %v9606_v20, 1  ;;  %v2195_v49 = vmul.f32 1.442695, %v2167_v35  ;;  %v10290_v46 = vpop.eup %7639  ;;  %v3813_v19 = vrot.slane %v3767_v17, 4  ;;  %v12944_v20 = vld [vmem:[#allocation49_spill] sm:$0xff] }
 0x334   :  { %12938 = vst [vmem:[#allocation122_spill] sm:$0xff] %v10268_v53  ;;  %v10282_v22 = vadd.f32 %v9776_v26, %v1817_v4  ;;  %v10287_v11 = vadd.f32 %v9772_v55, %v1827_v10  ;;  %v10293_v6 = vadd.f32 %v12943_v16, %v1828_v42  ;;  %v3792_v55 = vadd.f32 %v3791_v5, %v3790_v60 }
 0x335   :  { %12939 = vst [vmem:[#allocation123_spill] sm:$0xff] %v10271_v32  ;;  %v1818_v25 = vmul.f32 %v12940_v36, %v1717_v24  ;;  %v12945_v24 = vperm.slane %v9647_v3, 3  ;;  %v12948_v4 = vperm.slane %v12947_v45, 0  ;;  %v10313_v16 = vpop.eup %7641  ;;  %v3798_v10 = vadd.f32 %v3797_v44, %v3796_v62 }
 0x336   :  { %12941 = vst [vmem:[#allocation124_spill] sm:$0xff] %v10284_v38  ;;  %v3761_v26 = vmul.f32 %v10166_v14, %v10282_v22  ;;  %v10305_v35 = vmul.f32 %v10114_v47, %v10287_v11  ;;  %v3772_v60 = vmul.f32 %v10114_v47, %v10293_v6  ;;  %7645 = vpow2.f32 %v2195_v49  ;;  %v12951_v38 = vld [vmem:[#allocation43_spill] sm:$0xff]  ;;  %v10325_v40 = vpop.eup %7643 }
 0x337   :  { %12942 = vst [vmem:[#allocation125_spill] sm:$0xff] %v10290_v46  ;;  %v10296_v36 = vadd.f32 %v12944_v20, %v1818_v25  ;;  %v10311_v25 = vperm.slane %v2293_v58, 0  ;;  %v10328_v21 = vmul.f32 1.442695, %v2168_v1  ;;  %v10330_v31 = vperm.slane %v2293_v58, 1  ;;  %v12958_v1 = vld [vmem:[#allocation54_spill] sm:$0xff] }
 0x338   :  { %4427 = vperm.xlu1 %7343, %v12945_v24   ;;  %2483 = vperm.xlu0 %7341, %v12948_v4   ;;  %12950 = vst [vmem:[#allocation49_spill] sm:$0xff] %v10313_v16  ;;  %v3777_v42 = vrot.slane %v3761_v26, 4  ;;  %v3814_v16 = vadd.f32 %v3813_v19, %v3767_v17  ;;  %v3843_v49 = vrot.slane %v3772_v60, 4  ;;  %v12955_v17 = vld [vmem:[#allocation52_spill] sm:$0xff]  ;;  %v12959_v58 = vperm.slane %v9647_v3, 6 }
 0x339   :  { %12949 = vst [vmem:[#allocation45_spill] sm:$0xff] %v10311_v25  ;;  %v3762_v5 = vmul.f32 %v10166_v14, %v10296_v36  ;;  %v10319_v20 = vpop.permute.xlu1 %1744  ;;  %v1766_v32 = vpop.permute.xlu2 %1765  ;;  %v3793_v14 = vrot.slane %v3792_v55, 1  ;;  %v3820_v25 = vadd.f32 %v3819_v33, %v10246_v0  ;;  %7647 = vpow2.f32 %v10328_v21 }
 0x33a   :  { %4413 = vperm.xlu2 %7342, %v12946_v30   ;;  %v1731_v24 = vpop.permute.xlu0 %1730  ;;  %v3778_v62 = vadd.f32 %v3777_v42, %v3761_v26  ;;  %12952 = vst [vmem:[#allocation42_spill] sm:$0xff] %v10325_v40  ;;  %v3799_v30 = vrot.slane %v3798_v10, 1  ;;  %v12956_v26 = vld [vmem:[#allocation46_spill] sm:$0xff]  ;;  %v12957_v42 = vld [vmem:[#allocation47_spill] sm:$0xff]  ;;  %v3815_v15 = vrot.slane %v3814_v16, 2 }
 0x33b   :  { %v3783_v44 = vrot.slane %v3762_v5, 4  ;;  %v1821_v47 = vmul.f32 %v12951_v38, %v1731_v24  ;;  %12953 = vst [vmem:[#allocation43_spill] sm:$0xff] %v10330_v31  ;;  %v1822_v46 = vmul.f32 %v12954_v12, %v1731_v24  ;;  %v1831_v38 = vmul.f32 %v12956_v26, %v1766_v32 }
 0x33c   :  { %v3779_v53 = vrot.slane %v3778_v62, 2  ;;  %v1832_v40 = vmul.f32 %v12957_v42, %v1766_v32  ;;  %v3821_v12 = vrot.slane %v3820_v25, 2  ;;  %v3844_v31 = vadd.f32 %v3843_v49, %v3772_v60 }
 0x33d   :  { %v3784_v4 = vadd.f32 %v3783_v44, %v3762_v5  ;;  %v10334_v19 = vadd.f32 %v12955_v17, %v1821_v47  ;;  %v10339_v33 = vadd.f32 %v12958_v1, %v1822_v46  ;;  %v10343_v5 = vpop.eup %7645  ;;  %v12961_v44 = vld [vmem:[#allocation56_spill] sm:$0xff]  ;;  %v12962_v17 = vld [vmem:[#allocation57_spill] sm:$0xff]  ;;  %v3837_v46 = vrot.slane %v10305_v35, 4 }
 0x33e   :  { %v3780_v27 = vadd.f32 %v3779_v53, %v3778_v62  ;;  %12960 = vst [vmem:[#allocation44_spill] sm:$0xff] %v10343_v5  ;;  %v10348_v47 = vadd.f32 %v12961_v44, %v1831_v38  ;;  %v10351_v32 = vadd.f32 %v12962_v17, %v1832_v40  ;;  %v12963_v53 = vperm.slane %v9647_v3, 4 }
 0x33f   :  { %v3785_v0 = vrot.slane %v3784_v4, 2  ;;  %v3765_v24 = vmul.f32 %v10065_v13, %v10334_v19  ;;  %v3766_v42 = vmul.f32 %v10065_v13, %v10339_v33  ;;  %v12964_v1 = vperm.slane %v12947_v45, 3 }
 0x340   :  { %4448 = vperm.xlu1 %7343, %v12959_v58   ;;  %v3781_v62 = vrot.slane %v3780_v27, 1  ;;  %v3775_v40 = vmul.f32 %v10213_v23, %v10348_v47  ;;  %v10364_v44 = vmul.f32 %v10213_v23, %v10351_v32  ;;  %v3816_v7 = vadd.f32 %v3815_v15, %v3814_v16  ;;  %v12968_v15 = vld [vmem:[#allocation53_spill] sm:$0xff]  ;;  %v12969_v16 = vld [vmem:[#allocation55_spill] sm:$0xff] }
 0x341   :  { %v3786_v26 = vadd.f32 %v3785_v0, %v3784_v4  ;;  %2504 = vperm.xlu0 %7341, %v12964_v1   ;;  %v1759_v58 = vpop.permute.xlu1 %1758  ;;  %v3801_v38 = vrot.slane %v3765_v24, 4  ;;  %v3794_v4 = vadd.f32 %v3793_v14, %v3792_v55  ;;  %v3807_v5 = vrot.slane %v3766_v42, 4 }
 0x342   :  { %4434 = vperm.xlu2 %7342, %v12963_v53   ;;  %12965 = vst [vmem:[#allocation52_spill] sm:$0xff] %v10364_v44  ;;  %v10366_v17 = vpop.permute.xlu0 %3949  ;;  %v10368_v53 = vpop.permute.xlu2 %3963  ;;  %v3782_v0 = vadd.f32 %v3781_v62, %v3780_v27  ;;  %v3822_v1 = vadd.f32 %v3821_v12, %v3820_v25  ;;  %v3800_v49 = vadd.f32 %v3799_v30, %v3798_v10  ;;  %v3845_v57 = vrot.slane %v3844_v31, 2 }
 0x343   :  { %12966 = vst [vmem:[#allocation46_spill] sm:$0xff] %v10368_v53  ;;  %v3787_v13 = vrot.slane %v3786_v26, 1  ;;  %v3802_v54 = vadd.f32 %v3801_v38, %v3765_v24  ;;  %v3808_v28 = vadd.f32 %v3807_v5, %v3766_v42  ;;  %v3838_v23 = vadd.f32 %v3837_v46, %v10305_v35  ;;  %v12967_v53 = vld [vmem:[#allocation50_spill] sm:$0xff]  ;;  %v12971_v35 = vld [vmem:[#allocation61_spill] sm:$0xff] }
 0x344   :  { %v5513_v51 = vsel %vm1592_vm1, %v3794_v4, %v3782_v0  ;;  %v1825_v55 = vmul.f32 %v12967_v53, %v10319_v20  ;;  %v1826_v25 = vmul.f32 %v12968_v15, %v10319_v20  ;;  %v1829_v12 = vmul.f32 %v12969_v16, %v1759_v58  ;;  %v12973_v42 = vld [vmem:[#allocation62_spill] sm:$0xff]  ;;  %v12975_v20 = vld [vmem:[#allocation67_spill] sm:$0xff] }
 0x345   :  { %v3788_v63 = vadd.f32 %v3787_v13, %v3786_v26  ;;  %v3803_v48 = vrot.slane %v3802_v54, 2  ;;  %v3809_v14 = vrot.slane %v3808_v28, 2  ;;  %v12970_v10 = vperm.slane %v12947_v45, 2  ;;  %v12974_v38 = vld [vmem:[#allocation58_spill] sm:$0xff] }
 0x346   :  { %v3817_v30 = vrot.slane %v3816_v7, 1  ;;  %v3823_v5 = vrot.slane %v3822_v1, 1  ;;  %v3697_v46 = vadd.f32 %v12971_v35, %v1825_v55  ;;  %v12972_v62 = vperm.slane %v9647_v3, 7 }
 0x347   :  { %v5521_v27 = vsel %vm1592_vm1, %v3800_v49, %v3788_v63  ;;  %v3804_v24 = vadd.f32 %v3803_v48, %v3802_v54  ;;  %v3810_v26 = vadd.f32 %v3809_v14, %v3808_v28  ;;  %v10385_v63 = vadd.f32 %v12973_v42, %v1826_v25  ;;  %v12978_v25 = vld [vmem:[#allocation69_spill] sm:$0xff] }
 0x348   :  { %2497 = vperm.xlu1 %7343, %v12970_v10   ;;  %v1830_v53 = vmul.f32 %v12974_v38, %v1759_v58  ;;  %v10389_v4 = vadd.f32 %v12975_v20, %v1829_v12  ;;  %v12976_v0 = vperm.slane %v12947_v45, 6  ;;  %v3839_v48 = vrot.slane %v3838_v23, 2 }
 0x349   :  { %v10393_v13 = vpop.permute.xlu1 %3942  ;;  %v3846_v54 = vadd.f32 %v3845_v57, %v3844_v31  ;;  %v3805_v49 = vrot.slane %v3804_v24, 1  ;;  %v3769_v3 = vmul.f32 %v10159_v56, %v3697_v46  ;;  %v3811_v14 = vrot.slane %v3810_v26, 1 }
 0x34a   :  { %4455 = vperm.xlu2 %7342, %v12972_v62   ;;  %2525 = vperm.xlu0 %7341, %v12976_v0   ;;  %v10396_v55 = vpop.permute.xlu0 %3970  ;;  %v10398_v28 = vpop.permute.xlu2 %3984  ;;  %v3861_v15 = vrot.slane %v3775_v40, 4  ;;  %v3770_v58 = vmul.f32 %v10159_v56, %v10385_v63  ;;  %v10403_v16 = vadd.f32 %v12978_v25, %v1830_v53  ;;  %v3818_v12 = vadd.f32 %v3817_v30, %v3816_v7 }
 0x34b   :  { %12977 = vst [vmem:[#allocation47_spill] sm:$0xff] %v10398_v28  ;;  %v3824_v10 = vadd.f32 %v3823_v5, %v3822_v1  ;;  %v3806_v35 = vadd.f32 %v3805_v49, %v3804_v24  ;;  %v3825_v62 = vrot.slane %v3769_v3, 4  ;;  %v3812_v57 = vadd.f32 %v3811_v14, %v3810_v26  ;;  %v12983_v14 = vld [vmem:[#allocation72_spill] sm:$0xff] }
 0x34c   :  { %v3831_v31 = vrot.slane %v3770_v58, 4  ;;  %v3773_v42 = vmul.f32 %v10263_v9, %v10389_v4  ;;  %v3774_v38 = vmul.f32 %v10263_v9, %v10403_v16  ;;  %v10409_v20 = vadd.f32 %v3839_v48, %v3838_v23  ;;  %v12981_v23 = vld [vmem:[#allocation71_spill] sm:$0xff] }
 0x34d   :  { %v3847_v0 = vrot.slane %v3846_v54, 1  ;;  %v5514_v56 = vsel %vm1595_vm5, %v3806_v35, %v5513_v51  ;;  %v3826_v60 = vadd.f32 %v3825_v62, %v3769_v3  ;;  %v5522_v53 = vsel %vm1595_vm5, %v3812_v57, %v5521_v27  ;;  %v12986_v57 = vld [vmem:[#allocation78_spill] sm:$0xff] }
 0x34e   :  { %v3862_v7 = vadd.f32 %v3861_v15, %v3775_v40  ;;  %v5515_v1 = vsel %vm1598_vm2, %v3818_v12, %v5514_v56  ;;  %v3832_v30 = vadd.f32 %v3831_v31, %v3770_v58  ;;  %v12979_v5 = vperm.slane %v12947_v45, 5  ;;  %v12984_v58 = vld [vmem:[#allocation77_spill] sm:$0xff]  ;;  %v12987_v31 = vld [vmem:[#allocation79_spill] sm:$0xff] }
 0x34f   :  { %v5523_v24 = vsel %vm1598_vm2, %v3824_v10, %v5522_v53  ;;  %v3827_v26 = vrot.slane %v3826_v60, 2  ;;  %v3855_v49 = vrot.slane %v3774_v38, 4  ;;  %v12980_v9 = vperm.slane %v12947_v45, 1 }
 0x350   :  { %2518 = vperm.xlu1 %7343, %v12979_v5   ;;  %v3893_v51 = vmul.f32 %v12981_v23, %v10334_v19  ;;  %v3833_v48 = vrot.slane %v3832_v30, 2  ;;  %v3849_v3 = vrot.slane %v3773_v42, 4  ;;  %v12982_v40 = vperm.slane %v9739_v37, 0 }
 0x351   :  { %v3957_v27 = vpop.permute.xlu1 %3956  ;;  %v3894_v15 = vmul.f32 %v12983_v14, %v10339_v33  ;;  %v3899_v25 = vmul.f32 %v12984_v58, %v10287_v11  ;;  %v3828_v12 = vadd.f32 %v3827_v26, %v3826_v60  ;;  %v3856_v10 = vadd.f32 %v3855_v49, %v3774_v38  ;;  %v12990_v11 = vld [vmem:[#allocation80_spill] sm:$0xff]  ;;  %v12991_v38 = vld [vmem:[#allocation81_spill] sm:$0xff] }
 0x352   :  { %2490 = vperm.xlu2 %7342, %v12980_v9   ;;  %4638 = vperm.xlu0 %7341, %v12982_v40   ;;  %v10427_v35 = vpop.permute.xlu0 %3991  ;;  %v1986_v62 = vpop.permute.xlu2 %1985  ;;  %v3900_v19 = vmul.f32 %v12986_v57, %v10293_v6  ;;  %v3891_v56 = vmul.f32 %v12987_v31, %v10180_v59  ;;  %v3863_v53 = vrot.slane %v3862_v7, 2  ;;  %v3834_v5 = vadd.f32 %v3833_v48, %v3832_v30  ;;  %v12988_v9 = vld [vmem:[#allocation63_spill] sm:$0xff]  ;;  %v12989_v40 = vld [vmem:[#allocation64_spill] sm:$0xff] }
 0x353   :  { %12985 = vst [vmem:[#allocation54_spill] sm:$0xff] %v10427_v35  ;;  %v2076_v23 = vmul.f32 %v12988_v9, %v1986_v62  ;;  %v2077_v33 = vmul.f32 %v12989_v40, %v1986_v62  ;;  %v3829_v14 = vrot.slane %v3828_v12, 1  ;;  %v3857_v28 = vrot.slane %v3856_v10, 2  ;;  %v12992_v48 = vld [vmem:[#allocation84_spill] sm:$0xff]  ;;  %v12993_v62 = vld [vmem:[#allocation86_spill] sm:$0xff] }
 0x354   :  { %v3892_v60 = vmul.f32 %v12990_v11, %v10183_v41  ;;  %v10438_v26 = vmul.f32 %v12991_v38, %v3697_v46  ;;  %v3835_v49 = vrot.slane %v3834_v5, 1  ;;  %v3850_v58 = vadd.f32 %v3849_v3, %v3773_v42 }
 0x355   :  { %v10440_v6 = vadd.f32 %v3893_v51, %v2076_v23  ;;  %v10442_v57 = vadd.f32 %v3894_v15, %v2077_v33  ;;  %v3830_v59 = vadd.f32 %v3829_v14, %v3828_v12  ;;  %v3858_v30 = vadd.f32 %v3857_v28, %v3856_v10  ;;  %v12996_v15 = vld [vmem:[#allocation87_spill] sm:$0xff] }
 0x356   :  { %v10446_v31 = vmul.f32 %v12992_v48, %v10385_v63  ;;  %v10450_v9 = vmul.f32 %v12993_v62, %v10282_v22  ;;  %v3848_v41 = vadd.f32 %v3847_v0, %v3846_v54  ;;  %v3836_v40 = vadd.f32 %v3835_v49, %v3834_v5  ;;  %v13002_v49 = vld [vmem:[#allocation65_spill] sm:$0xff]  ;;  %v13003_v48 = vld [vmem:[#allocation68_spill] sm:$0xff] }
 0x357   :  { %v3997_v46 = vmul.f32 %v3957_v27, %v10440_v6  ;;  %v3998_v42 = vmul.f32 %v3957_v27, %v10442_v57  ;;  %v12994_v51 = vperm.slane %v9739_v37, 2  ;;  %v10457_v3 = vsel %vm1601_vm7, %v3830_v59, %v5515_v1 }
 0x358   :  { %v3859_v28 = vrot.slane %v3858_v30, 1  ;;  %v12995_v63 = vperm.slane %v12947_v45, 4  ;;  %v10463_v22 = vmul.f32 %v12996_v15, %v10296_v36  ;;  %v10467_v54 = vmul.f32 %v10068_v61, %v10348_v47 }
 0x359   :  { %4652 = vperm.xlu1 %7343, %v12994_v51   ;;  %v3864_v0 = vadd.f32 %v3863_v53, %v3862_v7  ;;  %v5524_v27 = vsel %vm1601_vm7, %v3836_v40, %v5523_v24  ;;  %v3851_v12 = vrot.slane %v3850_v58, 2  ;;  %v12997_v10 = vperm.slane %v9739_v37, 5  ;;  %v3978_v1 = vpop.permute.xlu1 %3977  ;;  %v12999_v7 = vld [vmem:[#allocation6_spill] sm:$0xff]  ;;  %v13000_v53 = vld [vmem:[#allocation16_spill] sm:$0xff]  ;;  %v13006_v40 = vld [vmem:[#allocation73_spill] sm:$0xff] }
 0x35a   :  { %2511 = vperm.xlu2 %7342, %v12995_v63   ;;  %v10474_v5 = vmul.f32 %v10072_v2, %v10351_v32  ;;  %v5525_v23 = vsel %vm1604_vm3, %v3848_v41, %v5524_v27  ;;  %v3860_v36 = vadd.f32 %v3859_v28, %v3858_v30  ;;  %v2007_v33 = vpop.permute.xlu2 %2006  ;;  %v1979_v14 = vpop.permute.xlu0 %1978  ;;  %v12998_v61 = vrot.slane %v10197_v18, 1  ;;  %v13005_v30 = vld [vmem:[#allocation70_spill] sm:$0xff] }
 0x35b   :  { %4673 = vperm.xlu0 %7341, %v12997_v10   ;;  %v10481_v24 = vmul.f32 %v13000_v53, %v12999_v7  ;;  %v4033_v11 = vrot.slane %v3997_v46, 4  ;;  %v4039_v38 = vrot.slane %v3998_v42, 4  ;;  %v2082_v59 = vmul.f32 %v13002_v49, %v2007_v33 }
 0x35c   :  { %v2125_v47 = vperm.slane %v12998_v61, 0  ;;  %v2083_v62 = vmul.f32 %v13003_v48, %v2007_v33  ;;  %v3841_v2 = vrot.slane %v10409_v20, 1  ;;  %v10487_v32 = vsel %vm1607_vm8, %v3860_v36, %v5525_v23 }
 0x35d   :  { %13001 = vst [vmem:[#allocation56_spill] sm:$0xff] %v10481_v24  ;;  %v2074_v41 = vmul.f32 %v13005_v30, %v1979_v14  ;;  %v2075_v51 = vmul.f32 %v13006_v40, %v1979_v14  ;;  %v3865_v28 = vrot.slane %v3864_v0, 1  ;;  %v3852_v63 = vadd.f32 %v3851_v12, %v3850_v58  ;;  %v13024_v24 = vld [vmem:[#allocation83_spill] sm:$0xff] }
 0x35e   :  { %13004 = vst [vmem:[#allocation57_spill] sm:$0xff] %v10487_v32  ;;  %v10491_v15 = vadd.f32 %v3899_v25, %v2082_v59  ;;  %v10493_v27 = vadd.f32 %v3900_v19, %v2083_v62  ;;  %v10501_v33 = vmul.f32 %v10100_v43, %v10230_v8  ;;  %v10505_v23 = vmul.f32 %v10109_v50, %v10233_v29  ;;  %v13023_v32 = vld [vmem:[#allocation82_spill] sm:$0xff] }
 0x35f   :  { %v10495_v10 = vadd.f32 %v3891_v56, %v2074_v41  ;;  %v10497_v61 = vadd.f32 %v3892_v60, %v2075_v51  ;;  %v4034_v36 = vadd.f32 %v4033_v11, %v3997_v46  ;;  %v4040_v14 = vadd.f32 %v4039_v38, %v3998_v42  ;;  %v13014_v51 = vld [vmem:[#allocation75_spill] sm:$0xff] }
 0x360   :  { %v4004_v58 = vmul.f32 %v3978_v1, %v10493_v27  ;;  %v13007_v25 = vperm.slane %v9739_v37, 3  ;;  %v13008_v8 = vperm.slane %v12947_v45, 7  ;;  %v13009_v50 = vrot.slane %v10197_v18, 1  ;;  %v7299_v45 = vld [vmem:[%s12639_s11 + $0x38] sm:$0xff] }
 0x361   :  { %v3995_v19 = vmul.f32 %v10366_v17, %v10495_v10  ;;  %v3996_v43 = vmul.f32 %v10366_v17, %v10497_v61  ;;  %v2157_v56 = vmul.f32 %v2125_v47, %v9435_v52  ;;  %v10521_v60 = vadd.f32 %v3841_v2, %v10409_v20  ;;  %v1972_v17 = vpop.permute.xlu1 %1971  ;;  %v13011_v20 = vld [vmem:[#allocation74_spill] sm:$0xff]  ;;  %6193 = vmatpush.bf16.msrb.mxu0 %v7299_v45 }
 0x362   :  { %4659 = vperm.xlu1 %7343, %v13007_v25   ;;  %2532 = vperm.xlu2 %7342, %v13008_v8   ;;  %v2126_v29 = vperm.slane %v13009_v50, 1  ;;  %v10523_v46 = vadd.f32 %v3865_v28, %v3864_v0  ;;  %v3853_v42 = vrot.slane %v3852_v63, 1  ;;  %v13010_v12 = vperm.slane %v9763_v34, 1  ;;  %v10531_v11 = vpop.permute.xlu2 %4174  ;;  %v2000_v47 = vpop.permute.xlu0 %1999  ;;  %v13015_v25 = vld [vmem:[#allocation76_spill] sm:$0xff] }
 0x363   :  { %v4021_v18 = vrot.slane %v3995_v19, 4  ;;  %v4027_v7 = vrot.slane %v3996_v43, 4  ;;  %v13012_v38 = vperm.slane %v13011_v20, 0  ;;  %v13013_v49 = vperm.slane %v13011_v20, 1  ;;  %v10540_v50 = vpop.eup %7647 }
 0x364   :  { %2746 = vperm.xlu0 %7341, %v13010_v12   ;;  %v4035_v48 = vrot.slane %v4034_v36, 2  ;;  %v4041_v62 = vrot.slane %v4040_v14, 2  ;;  %v4003_v2 = vmul.f32 %v3978_v1, %v10491_v15  ;;  %v4075_v30 = vrot.slane %v4004_v58, 4  ;;  %v7298_v1 = vld [vmem:[%s12639_s11 + $0x30] sm:$0xff] }
 0x365   :  { %v2072_v0 = vmul.f32 %v13012_v38, %v1972_v17  ;;  %v2073_v59 = vmul.f32 %v13013_v49, %v1972_v17  ;;  %v4022_v41 = vadd.f32 %v4021_v18, %v3995_v19  ;;  %v4028_v40 = vadd.f32 %v4027_v7, %v3996_v43  ;;  %6194 = vmatpush.bf16.msrb.mxu0 %v7298_v1 }
 0x366   :  { %v2080_v28 = vmul.f32 %v13014_v51, %v2000_v47  ;;  %v2081_v8 = vmul.f32 %v13015_v25, %v2000_v47  ;;  %v10542_v12 = vadd.f32 %v3853_v42, %v3852_v63  ;;  %v4036_v42 = vadd.f32 %v4035_v48, %v4034_v36  ;;  %v13022_v51 = vld [vmem:[#allocation23_spill] sm:$0xff] }
 0x367   :  { %v10545_v38 = vadd.f32 %v10450_v9, %v2072_v0  ;;  %v10548_v17 = vadd.f32 %v10463_v22, %v2073_v59  ;;  %v4023_v43 = vrot.slane %v4022_v41, 2  ;;  %v4029_v45 = vrot.slane %v4028_v40, 2 }
 0x368   :  { %v10555_v18 = vadd.f32 %v10438_v26, %v2080_v28  ;;  %v10558_v63 = vadd.f32 %v10446_v31, %v2081_v8  ;;  %v10560_v9 = vadd.f32 %v4041_v62, %v4040_v14  ;;  %v13018_v47 = vperm.slane %v9739_v37, 6 }
 0x369   :  { %v3993_v22 = vmul.f32 %v10393_v13, %v10545_v38  ;;  %v3994_v7 = vmul.f32 %v10393_v13, %v10548_v17  ;;  %v4069_v20 = vrot.slane %v4003_v2, 4  ;;  %v4076_v0 = vadd.f32 %v4075_v30, %v4004_v58  ;;  %v1993_v48 = vpop.permute.xlu1 %1992  ;;  %v13021_v13 = vld [vmem:[#allocation48_spill] sm:$0xff] }
 0x36a   :  { %13016 = vst [vmem:[#allocation50_spill] sm:$0xff] %v10555_v18  ;;  %4680 = vperm.xlu1 %7343, %v13018_v47   ;;  %v4002_v26 = vmul.f32 %v10396_v55, %v10558_v63  ;;  %v13019_v31 = vperm.slane %v9739_v37, 1  ;;  %v13020_v59 = vperm.slane %v9763_v34, 4  ;;  %v10577_v28 = vmul.f32 %v2126_v29, %v13022_v51  ;;  %v10579_v8 = vpop.permute.xlu2 %4195  ;;  %v2021_v47 = vpop.permute.xlu0 %2020 }
 0x36b   :  { %13017 = vst [vmem:[#allocation53_spill] sm:$0xff] %v10558_v63  ;;  %v4009_v14 = vrot.slane %v3993_v22, 4  ;;  %v4015_v49 = vrot.slane %v3994_v7, 4  ;;  %v4024_v58 = vadd.f32 %v4023_v43, %v4022_v41  ;;  %v4030_v30 = vadd.f32 %v4029_v45, %v4028_v40 }
 0x36c   :  { %4645 = vperm.xlu2 %7342, %v13019_v31   ;;  %2767 = vperm.xlu0 %7341, %v13020_v59   ;;  %v4063_v25 = vrot.slane %v4002_v26, 4  ;;  %v7297_v31 = vld [vmem:[%s12639_s11 + $0x28] sm:$0xff]  ;;  %v10584_v21 = vmul.f32 1.442695, %v2157_v56  ;;  %v4037_v59 = vrot.slane %v4036_v42, 1  ;;  %v4043_v1 = vrot.slane %v10560_v9, 1 }
 0x36d   :  { %v4010_v19 = vadd.f32 %v4009_v14, %v3993_v22  ;;  %v4016_v62 = vadd.f32 %v4015_v49, %v3994_v7  ;;  %v4070_v36 = vadd.f32 %v4069_v20, %v4003_v2  ;;  %v4077_v29 = vrot.slane %v4076_v0, 2  ;;  %6195 = vmatpush.bf16.msrb.mxu0 %v7297_v31  ;;  %v7296_v56 = vld [vmem:[%s12639_s11 + $0x20] sm:$0xff]  ;;  %v13025_v7 = vld [vmem:[#allocation89_spill] sm:$0xff]  ;;  %v13026_v20 = vld [vmem:[#allocation90_spill] sm:$0xff] }
 0x36e   :  { %v4001_v41 = vmul.f32 %v10396_v55, %v10555_v18  ;;  %v4064_v40 = vadd.f32 %v4063_v25, %v4002_v26  ;;  %v2086_v44 = vmul.f32 %v13023_v32, %v2021_v47  ;;  %v2087_v53 = vmul.f32 %v13024_v24, %v2021_v47 }
 0x36f   :  { %v4011_v43 = vrot.slane %v4010_v19, 2  ;;  %v4017_v45 = vrot.slane %v4016_v62, 2  ;;  %v4025_v63 = vrot.slane %v4024_v58, 1  ;;  %v4031_v22 = vrot.slane %v4030_v30, 1 }
 0x370   :  { %v2078_v2 = vmul.f32 %v13025_v7, %v1993_v48  ;;  %v2079_v14 = vmul.f32 %v13026_v20, %v1993_v48  ;;  %v10597_v26 = vadd.f32 %v10467_v54, %v2086_v44  ;;  %v10600_v32 = vadd.f32 %v10474_v5, %v2087_v53 }
 0x371   :  { %v4012_v49 = vadd.f32 %v4011_v43, %v4010_v19  ;;  %v4018_v55 = vadd.f32 %v4017_v45, %v4016_v62  ;;  %v13029_v24 = vperm.slane %v9763_v34, 0  ;;  %v4038_v25 = vadd.f32 %v4037_v59, %v4036_v42  ;;  %6196 = vmatpush.bf16.msrb.mxu0 %v7296_v56  ;;  %v13032_v59 = vld [vmem:[#allocation46_spill] sm:$0xff] }
 0x372   :  { %13027 = vst [vmem:[#allocation55_spill] sm:$0xff] %v10597_v26  ;;  %v4071_v47 = vrot.slane %v4070_v36, 2  ;;  %v10605_v31 = vadd.f32 %v10501_v33, %v2078_v2  ;;  %v10608_v7 = vadd.f32 %v10505_v23, %v2079_v14  ;;  %v13030_v19 = vperm.slane %v9739_v37, 4  ;;  %v2014_v42 = vpop.permute.xlu1 %2013  ;;  %v7295_v33 = vld [vmem:[%s12639_s11 + $0x18] sm:$0xff]  ;;  %v10623_v2 = vpop.permute.xlu2 %4216 }
 0x373   :  { %13028 = vst [vmem:[#allocation61_spill] sm:$0xff] %v10600_v32  ;;  %2739 = vperm.xlu1 %7343, %v13029_v24   ;;  %v4065_v48 = vrot.slane %v4064_v40, 2  ;;  %v4013_v44 = vrot.slane %v4012_v49, 1  ;;  %v4019_v54 = vrot.slane %v4018_v55, 1  ;;  %v4007_v5 = vmul.f32 %v10427_v35, %v10597_v26  ;;  %v10625_v20 = vpop.permute.xlu0 %4202 }
 0x374   :  { %4666 = vperm.xlu2 %7342, %v13030_v19   ;;  %v13031_v53 = vperm.slane %v9769_v39, 1  ;;  %v4078_v23 = vadd.f32 %v4077_v29, %v4076_v0  ;;  %v4057_v62 = vrot.slane %v4001_v41, 4  ;;  %v3999_v43 = vmul.f32 %v13032_v59, %v10605_v31 }
 0x375   :  { %v4000_v45 = vmul.f32 %v13032_v59, %v10608_v7  ;;  %v4026_v14 = vadd.f32 %v4025_v63, %v4024_v58  ;;  %v4032_v24 = vadd.f32 %v4031_v22, %v4030_v30  ;;  %v4014_v19 = vadd.f32 %v4013_v44, %v4012_v49  ;;  %6197 = vmatpush.bf16.msrb.mxu0 %v7295_v33  ;;  %v13034_v49 = vld [vmem:[#allocation100_spill] sm:$0xff]  ;;  %v13037_v44 = vld [vmem:[#allocation94_spill] sm:$0xff] }
 0x376   :  { %4877 = vperm.xlu0 %7341, %v13031_v53   ;;  %v4020_v56 = vadd.f32 %v4019_v54, %v4018_v55  ;;  %v4044_v53 = vadd.f32 %v4043_v1, %v10560_v9  ;;  %v10628_v35 = vadd.f32 %v4071_v47, %v4070_v36  ;;  %v4045_v0 = vrot.slane %v3999_v43, 4  ;;  %v7294_v9 = vld [vmem:[%s12639_s11 + $0x10] sm:$0xff] }
 0x377   :  { %v4051_v29 = vrot.slane %v4000_v45, 4  ;;  %v4066_v32 = vadd.f32 %v4065_v48, %v4064_v40  ;;  %v5546_v26 = vsel %vm1592_vm1, %v4026_v14, %v4014_v19  ;;  %v4093_v59 = vrot.slane %v4007_v5, 4  ;;  %v13033_v40 = vld [vmem:[#allocation98_spill] sm:$0xff]  ;;  %v13041_v14 = vld [vmem:[#allocation105_spill] sm:$0xff] }
 0x378   :  { %v5553_v18 = vsel %vm1592_vm1, %v4032_v24, %v4020_v56  ;;  %v5547_v51 = vsel %vm1595_vm5, %v4038_v25, %v5546_v26  ;;  %v4046_v58 = vadd.f32 %v4045_v0, %v3999_v43  ;;  %v4079_v36 = vrot.slane %v4078_v23, 1  ;;  %v7293_v0 = vld [vmem:[%s12639_s11 + $0x8] sm:$0xff] }
 0x379   :  { %v5554_v63 = vsel %vm1595_vm5, %v4044_v53, %v5553_v18  ;;  %v4052_v30 = vadd.f32 %v4051_v29, %v4000_v45  ;;  %v4058_v1 = vadd.f32 %v4057_v62, %v4001_v41  ;;  %v3901_v22 = vmul.f32 %v13033_v40, %v10389_v4  ;;  %v13036_v18 = vld [vmem:[#allocation93_spill] sm:$0xff]  ;;  %6198 = vmatpush.bf16.msrb.mxu0 %v7294_v9 }
 0x37a   :  { %v3902_v55 = vmul.f32 %v13034_v49, %v10403_v16  ;;  %v13035_v47 = vperm.slane %v9763_v34, 3  ;;  %v4047_v26 = vrot.slane %v4046_v58, 2  ;;  %v2084_v48 = vmul.f32 %v13036_v18, %v2014_v42  ;;  %v10649_v4 = vpop.permute.xlu1 %4181  ;;  %v13040_v16 = vld [vmem:[#allocation104_spill] sm:$0xff] }
 0x37b   :  { %v4053_v25 = vrot.slane %v4052_v30, 2  ;;  %v2085_v54 = vmul.f32 %v13037_v44, %v2014_v42  ;;  %v13038_v33 = vperm.slane %v9739_v37, 7  ;;  %v4067_v43 = vrot.slane %v4066_v32, 1  ;;  %v10659_v37 = vpop.permute.xlu0 %4223 }
 0x37c   :  { %2760 = vperm.xlu1 %7343, %v13035_v47   ;;  %v4094_v41 = vadd.f32 %v4093_v59, %v4007_v5  ;;  %v13039_v62 = vperm.slane %v9769_v39, 2  ;;  %v4121_v45 = vmul.f32 %v13040_v16, %v10545_v38  ;;  %v4122_v24 = vmul.f32 %v13041_v14, %v10548_v17  ;;  %v2228_v5 = vpop.permute.xlu2 %2227  ;;  %v13042_v38 = vld [vmem:[#allocation88_spill] sm:$0xff]  ;;  %v13048_v14 = vld [vmem:[#allocation114_spill] sm:$0xff] }
 0x37d   :  { %4687 = vperm.xlu2 %7342, %v13038_v33   ;;  %v4048_v19 = vadd.f32 %v4047_v26, %v4046_v58  ;;  %v4054_v56 = vadd.f32 %v4053_v25, %v4052_v30  ;;  %v10655_v53 = vadd.f32 %v3901_v22, %v2084_v48  ;;  %v10657_v42 = vadd.f32 %v3902_v55, %v2085_v54  ;;  %v13045_v55 = vld [vmem:[#allocation47_spill] sm:$0xff]  ;;  %v7292_v33 = vld [vmem:[%s12639_s11] sm:$0xff] }
 0x37e   :  { %4884 = vperm.xlu0 %7341, %v13039_v62   ;;  %v4080_v29 = vadd.f32 %v4079_v36, %v4078_v23  ;;  %v4059_v59 = vrot.slane %v4058_v1, 2  ;;  %v13043_v40 = vperm.slane %v13042_v38, 0  ;;  %v13044_v17 = vperm.slane %v13042_v38, 1  ;;  %6199 = vmatpush.bf16.msrb.mxu0 %v7293_v0  ;;  %v13047_v16 = vld [vmem:[#allocation112_spill] sm:$0xff] }
 0x37f   :  { %v4049_v30 = vrot.slane %v4048_v19, 1  ;;  %v4055_v22 = vrot.slane %v4054_v56, 1  ;;  %v4005_v47 = vmul.f32 %v13045_v55, %v10655_v53  ;;  %v4006_v9 = vmul.f32 %v13045_v55, %v10657_v42 }
 0x380   :  { %v2328_v49 = vmul.f32 %v13043_v40, %v2228_v5  ;;  %v2329_v58 = vmul.f32 %v13044_v17, %v2228_v5  ;;  %v4068_v26 = vadd.f32 %v4067_v43, %v4066_v32  ;;  %v4095_v25 = vrot.slane %v4094_v41, 2 }
 0x381   :  { %v4050_v36 = vadd.f32 %v4049_v30, %v4048_v19  ;;  %v4056_v48 = vadd.f32 %v4055_v22, %v4054_v56  ;;  %v4081_v44 = vrot.slane %v4005_v47, 4  ;;  %v4087_v54 = vrot.slane %v4006_v9, 4 }
 0x382   :  { %v10672_v18 = vadd.f32 %v4121_v45, %v2328_v49  ;;  %v10674_v23 = vadd.f32 %v4122_v24, %v2329_v58  ;;  %v13046_v43 = vperm.slane %v9763_v34, 6  ;;  %v4125_v45 = vmul.f32 %v13047_v16, %v10440_v6  ;;  %6200 = vmatpush.bf16.msrb.mxu0 %v7292_v33  ;;  %v13056_v33 = vld [vmem:[#allocation111_spill] sm:$0xff] }
 0x383   :  { %v4126_v24 = vmul.f32 %v13048_v14, %v10442_v57  ;;  %v4060_v19 = vadd.f32 %v4059_v59, %v4058_v1  ;;  %v10690_v56 = vsel %vm1598_vm2, %v4050_v36, %v5547_v51  ;;  %v5555_v5 = vsel %vm1598_vm2, %v4056_v48, %v5554_v63  ;;  %v2242_v59 = vpop.permute.xlu0 %2241  ;;  %v13051_v63 = vld [vmem:[#allocation116_spill] sm:$0xff]  ;;  %v13053_v36 = vld [vmem:[#allocation106_spill] sm:$0xff] }
 0x384   :  { %v4225_v62 = vmul.f32 %v10531_v11, %v10672_v18  ;;  %v4226_v32 = vmul.f32 %v10531_v11, %v10674_v23  ;;  %2781 = vperm.xlu1 %7343, %v13046_v43   ;;  %v4088_v0 = vadd.f32 %v4087_v54, %v4006_v9  ;;  %v13049_v38 = vperm.slane %v9763_v34, 2  ;;  %v2249_v30 = vpop.permute.xlu2 %2248  ;;  %v4189_v9 = vpop.permute.xlu1 %4188  ;;  %v13054_v43 = vld [vmem:[#allocation117_spill] sm:$0xff] }
 0x385   :  { %v5556_v11 = vsel %vm1601_vm7, %v4068_v26, %v5555_v5  ;;  %v4082_v40 = vadd.f32 %v4081_v44, %v4005_v47  ;;  %v13050_v6 = vperm.slane %v9769_v39, 3  ;;  %v4073_v57 = vrot.slane %v10628_v35, 1  ;;  %v13052_v47 = vld [vmem:[#allocation103_spill] sm:$0xff] }
 0x386   :  { %2753 = vperm.xlu2 %7342, %v13049_v38   ;;  %v4241_v49 = vrot.slane %v4225_v62, 4  ;;  %v4247_v17 = vrot.slane %v4226_v32, 4  ;;  %v5557_v1 = vsel %vm1604_vm3, %v4080_v29, %v5556_v11  ;;  %v4089_v51 = vrot.slane %v4088_v0, 2  ;;  %v13055_v29 = vld [vmem:[#allocation108_spill] sm:$0xff] }
 0x387   :  { %4891 = vperm.xlu0 %7341, %v13050_v6   ;;  %v4127_v58 = vmul.f32 %v13051_v63, %v10605_v31  ;;  %v4096_v22 = vadd.f32 %v4095_v25, %v4094_v41  ;;  %v2332_v26 = vmul.f32 %v13052_v47, %v2242_v59  ;;  %v2333_v48 = vmul.f32 %v13053_v36, %v2242_v59  ;;  %v13061_v36 = vld [vmem:[#allocation122_spill] sm:$0xff] }
 0x388   :  { %v4242_v55 = vadd.f32 %v4241_v49, %v4225_v62  ;;  %v4061_v44 = vrot.slane %v4060_v19, 1  ;;  %v4090_v54 = vadd.f32 %v4089_v51, %v4088_v0  ;;  %v4128_v16 = vmul.f32 %v13054_v43, %v10608_v7 }
 0x389   :  { %v2334_v14 = vmul.f32 %v13055_v29, %v2249_v30  ;;  %v4083_v5 = vrot.slane %v4082_v40, 2  ;;  %v4248_v38 = vadd.f32 %v4247_v17, %v4226_v32  ;;  %v10707_v11 = vadd.f32 %v4125_v45, %v2332_v26 }
 0x38a   :  { %v10709_v31 = vadd.f32 %v4126_v24, %v2333_v48  ;;  %v10712_v41 = vadd.f32 %v4073_v57, %v10628_v35  ;;  %v4091_v25 = vrot.slane %v4090_v54, 1  ;;  %v2335_v62 = vmul.f32 %v13056_v33, %v2249_v30 }
 0x38b   :  { %v10715_v49 = vadd.f32 %v4127_v58, %v2334_v14  ;;  %v4097_v0 = vrot.slane %v4096_v22, 1  ;;  %v4243_v6 = vrot.slane %v4242_v55, 2  ;;  %v4229_v7 = vmul.f32 %v4189_v9, %v10707_v11  ;;  %v13062_v14 = vld [vmem:[#allocation42_spill] sm:$0xff] }
 0x38c   :  { %v4230_v51 = vmul.f32 %v4189_v9, %v10709_v31  ;;  %v13057_v32 = vperm.slane %v9763_v34, 7  ;;  %v4062_v45 = vadd.f32 %v4061_v44, %v4060_v19  ;;  %v4092_v24 = vadd.f32 %v4091_v25, %v4090_v54  ;;  %v2263_v44 = vpop.permute.xlu0 %2262  ;;  %v2270_v33 = vpop.permute.xlu2 %2269 }
 0x38d   :  { %v10721_v17 = vadd.f32 %v4128_v16, %v2335_v62  ;;  %v4231_v35 = vmul.f32 %v10579_v8, %v10715_v49  ;;  %v13058_v57 = vperm.slane %v9763_v34, 5  ;;  %v4084_v59 = vadd.f32 %v4083_v5, %v4082_v40 }
 0x38e   :  { %2788 = vperm.xlu1 %7343, %v13057_v32   ;;  %v4249_v63 = vrot.slane %v4248_v38, 2  ;;  %v4265_v58 = vrot.slane %v4229_v7, 4  ;;  %v4271_v30 = vrot.slane %v4230_v51, 4  ;;  %v13059_v47 = vperm.slane %v9769_v39, 6  ;;  %v4210_v32 = vpop.permute.xlu1 %4209 }
 0x38f   :  { %2774 = vperm.xlu2 %7342, %v13058_v57   ;;  %v10730_v9 = vsel %vm1607_vm8, %v4092_v24, %v5557_v1  ;;  %v4232_v19 = vmul.f32 %v10579_v8, %v10721_v17  ;;  %v4277_v26 = vrot.slane %v4231_v35, 4  ;;  %v4131_v48 = vmul.f32 %v13061_v36, %v10491_v15  ;;  %v13063_v1 = vld [vmem:[#allocation115_spill] sm:$0xff]  ;;  %v13064_v24 = vld [vmem:[#allocation120_spill] sm:$0xff] }
 0x390   :  { %4912 = vperm.xlu0 %7341, %v13059_v47   ;;  %13060 = vst [vmem:[#allocation62_spill] sm:$0xff] %v10730_v9  ;;  %v10736_v34 = vadd.f32 %v4097_v0, %v4096_v22  ;;  %v4244_v40 = vadd.f32 %v4243_v6, %v4242_v55  ;;  %v4266_v54 = vadd.f32 %v4265_v58, %v4229_v7  ;;  %v4085_v62 = vrot.slane %v4084_v59, 1  ;;  %v13065_v15 = vld [vmem:[#allocation44_spill] sm:$0xff]  ;;  %v13068_v58 = vld [vmem:[#allocation45_spill] sm:$0xff] }
 0x391   :  { %v4272_v43 = vadd.f32 %v4271_v30, %v4230_v51  ;;  %v4278_v16 = vadd.f32 %v4277_v26, %v4231_v35  ;;  %v4283_v29 = vrot.slane %v4232_v19, 4  ;;  %v4132_v5 = vmul.f32 %v13062_v14, %v10493_v27 }
 0x392   :  { %v2338_v25 = vmul.f32 %v13063_v1, %v2263_v44  ;;  %v4267_v8 = vrot.slane %v4266_v54, 2  ;;  %v2339_v57 = vmul.f32 %v13064_v24, %v2263_v44  ;;  %v4133_v22 = vmul.f32 %v13065_v15, %v10655_v53 }
 0x393   :  { %v4250_v0 = vadd.f32 %v4249_v63, %v4248_v38  ;;  %v4284_v55 = vadd.f32 %v4283_v29, %v4232_v19  ;;  %v4134_v7 = vmul.f32 %v10540_v50, %v10657_v42  ;;  %v4245_v51 = vrot.slane %v4244_v40, 1  ;;  %v13070_v38 = vld [vmem:[#allocation43_spill] sm:$0xff] }
 0x394   :  { %v10744_v6 = vadd.f32 %v4131_v48, %v2338_v25  ;;  %v4273_v27 = vrot.slane %v4272_v43, 2  ;;  %v10748_v35 = vadd.f32 %v4132_v5, %v2339_v57  ;;  %v2340_v30 = vmul.f32 %v13068_v58, %v2270_v33 }
 0x395   :  { %v13069_v47 = vperm.slane %v9769_v39, 0  ;;  %v4268_v26 = vadd.f32 %v4267_v8, %v4266_v54  ;;  %v4279_v36 = vrot.slane %v4278_v16, 2  ;;  %v2341_v63 = vmul.f32 %v13070_v38, %v2270_v33 }
 0x396   :  { %13066 = vst [vmem:[#allocation58_spill] sm:$0xff] %v10744_v6  ;;  %v4235_v53 = vmul.f32 %v4210_v32, %v10744_v6  ;;  %v13071_v19 = vperm.slane %v9769_v39, 5  ;;  %v5549_v50 = vsel %vm1601_vm7, %v4062_v45, %v10690_v56  ;;  %v4285_v42 = vrot.slane %v4284_v55, 2 }
 0x397   :  { %13067 = vst [vmem:[#allocation67_spill] sm:$0xff] %v10748_v35  ;;  %4870 = vperm.xlu1 %7343, %v13069_v47   ;;  %v4236_v48 = vmul.f32 %v4210_v32, %v10748_v35  ;;  %v10760_v44 = vadd.f32 %v4133_v22, %v2340_v30  ;;  %v13072_v29 = vperm.slane %v13021_v13, 1  ;;  %v4086_v54 = vadd.f32 %v4085_v62, %v4084_v59 }
 0x398   :  { %4905 = vperm.xlu2 %7342, %v13071_v19   ;;  %v4251_v14 = vrot.slane %v4250_v0, 1  ;;  %v4301_v5 = vrot.slane %v4235_v53, 4  ;;  %v10764_v1 = vadd.f32 %v4134_v7, %v2341_v63  ;;  %v10766_v25 = vadd.f32 %v4245_v51, %v4244_v40  ;;  %v13075_v63 = vld [vmem:[#allocation22_spill] sm:$0xff]  ;;  %v10793_v19 = vpop.permute.xlu2 %4413 }
 0x399   :  { %3002 = vperm.xlu0 %7341, %v13072_v29   ;;  %v4274_v33 = vadd.f32 %v4273_v27, %v4272_v43  ;;  %v4307_v8 = vrot.slane %v4236_v48, 4  ;;  %v4237_v56 = vmul.f32 %v10623_v2, %v10760_v44  ;;  %v4269_v45 = vrot.slane %v4268_v26, 1  ;;  %v13076_v29 = vld [vmem:[#allocation25_spill] sm:$0xff] }
 0x39a   :  { %v4280_v24 = vadd.f32 %v4279_v36, %v4278_v16  ;;  %v4302_v32 = vadd.f32 %v4301_v5, %v4235_v53  ;;  %v4238_v57 = vmul.f32 %v10623_v2, %v10764_v1  ;;  %v4286_v15 = vadd.f32 %v4285_v42, %v4284_v55  ;;  %v2235_v55 = vpop.permute.xlu1 %2234  ;;  %v13079_v5 = vld [vmem:[#allocation95_spill] sm:$0xff] }
 0x39b   :  { %v4308_v22 = vadd.f32 %v4307_v8, %v4236_v48  ;;  %v5517_v59 = vsel %vm1604_vm3, %v10521_v60, %v10457_v3  ;;  %v4313_v62 = vrot.slane %v4237_v56, 4  ;;  %v4275_v51 = vrot.slane %v4274_v33, 1  ;;  %v13073_v60 = vld [vmem:[#allocation21_spill] sm:$0xff] }
 0x39c   :  { %v4303_v40 = vrot.slane %v4302_v32, 2  ;;  %v4319_v43 = vrot.slane %v4238_v57, 4  ;;  %v5518_v7 = vsel %vm1607_vm8, %v10542_v12, %v5517_v59  ;;  %v5550_v2 = vsel %vm1604_vm3, %v10712_v41, %v5549_v50 }
 0x39d   :  { %v4309_v27 = vrot.slane %v4308_v22, 2  ;;  %v5520_v16 = vsel %vm5519_vm9, %v10523_v46, %v5518_v7  ;;  %v10781_v58 = vadd.f32 %v4251_v14, %v4250_v0  ;;  %v5551_v3 = vsel %vm1607_vm8, %v4086_v54, %v5550_v2  ;;  %v13077_v54 = vld [vmem:[#allocation85_spill] sm:$0xff] }
 0x39e   :  { %v4320_v30 = vadd.f32 %v4319_v43, %v4238_v57  ;;  %v5775_v47 = vadd.f32 %v13073_v60, %v5520_v16  ;;  %v4281_v36 = vrot.slane %v4280_v24, 1  ;;  %v4287_v53 = vrot.slane %v4286_v15, 1  ;;  %v13089_v43 = vld [vmem:[#allocation50_spill] sm:$0xff] }
 0x39f   :  { %v5552_v12 = vsel %vm5519_vm9, %v10736_v34, %v5551_v3  ;;  %7649 = vpow2.f32 %v10584_v21  ;;  %v10788_v38 = vadd.f32 %v4269_v45, %v4268_v26  ;;  %v10790_v46 = vadd.f32 %v4303_v40, %v4302_v32  ;;  %v13078_v26 = vld [vmem:[#allocation91_spill] sm:$0xff] }
 0x3a0   :  { %v4314_v41 = vadd.f32 %v4313_v62, %v4237_v56  ;;  %v5777_v0 = vadd.f32 %v13075_v63, %v5552_v12  ;;  %v10795_v50 = vadd.f32 %v4275_v51, %v4274_v33  ;;  %v10797_v42 = vadd.f32 %v4309_v27, %v4308_v22  ;;  %v10805_v56 = vpop.permute.xlu0 %4406  ;;  %v13082_v27 = vld [vmem:[#allocation26_spill] sm:$0xff] }
 0x3a1   :  { %13074 = vst [vmem:[#allocation69_spill] sm:$0xff] %v10788_v38  ;;  %v2177_v48 = vmul.f32 1.442695, %v10577_v28  ;;  %v2282_v34 = vsel %vm1592_vm1, %v13077_v54, %v13076_v29  ;;  %v4321_v21 = vrot.slane %v4320_v30, 2  ;;  %v6041_v14 = vmul.f32 %v13078_v26, %v5775_v47  ;;  %v13090_v38 = vld [vmem:[#allocation53_spill] sm:$0xff] }
 0x3a2   :  { %v6043_v8 = vmul.f32 %v13079_v5, %v5777_v0  ;;  %v2283_v45 = vrot.slane %v2282_v34, 1  ;;  %v10807_v32 = vadd.f32 %v4281_v36, %v4280_v24  ;;  %v10809_v33 = vadd.f32 %v4287_v53, %v4286_v15  ;;  %v13081_v24 = vld [vmem:[#allocation24_spill] sm:$0xff]  ;;  %v2256_v53 = vpop.permute.xlu1 %2255  ;;  %v13083_v5 = vld [vmem:[#allocation27_spill] sm:$0xff] }
 0x3a3   :  { %7651 = vpow2.f32 %v2177_v48  ;;  %v4893_v57 = vperm.slane %v9769_v39, 4  ;;  %v4315_v22 = vrot.slane %v4314_v41, 2  ;;  %v3004_v7 = vperm.slane %v13021_v13, 2 }
 0x3a4   :  { %13080 = vst [vmem:[#allocation71_spill] sm:$0xff] %v10807_v32  ;;  %v6057_v59 = vpack.c.bf16 %v6043_v8, %v6041_v14  ;;  %v2298_v40 = vperm.slane %v2283_v45, 0  ;;  %v3011_v51 = vperm.slane %v13021_v13, 3  ;;  %v2115_v15 = vsel %vm1601_vm7, %v13082_v27, %v13081_v24  ;;  %v13084_v8 = vld [vmem:[#allocation29_spill] sm:$0xff] }
 0x3a5   :  { %v7650_v62 = vpop.eup %7649  ;;  %4898 = vperm.xlu1 %7343, %v4893_v57   ;;  %v10819_v16 = vadd.f32 %v4321_v21, %v4320_v30  ;;  %v2299_v2 = vperm.slane %v2283_v45, 1  ;;  %3009 = vperm.xlu2 %7342, %v3004_v7   ;;  %v2116_v47 = vrot.slane %v2115_v15, 4  ;;  %v2288_v36 = vsel %vm1601_vm7, %v13077_v54, %v13076_v29 }
 0x3a6   :  { %6201 = vmatmul.bf16.vlgmr.msrb.gmra.mxu0 %v6057_v59  ;;  %v4123_v3 = vmul.f32 %v7650_v62, %v10495_v10  ;;  %v2330_v60 = vmul.f32 %v2298_v40, %v2235_v55  ;;  %3016 = vperm.xlu0 %7341, %v3011_v51   ;;  %v2121_v12 = vsel %vm1610_vm6, %v13081_v24, %v13082_v27  ;;  %v2289_v48 = vrot.slane %v2288_v36, 4 }
 0x3a7   :  { %v2294_v30 = vsel %vm1610_vm6, %v13076_v29, %v13077_v54  ;;  %v10831_v63 = vadd.f32 %v4315_v22, %v4314_v41  ;;  %v2331_v10 = vmul.f32 %v2299_v2, %v2235_v55  ;;  %v2131_v21 = vperm.slane %v2116_v47, 0  ;;  %v10842_v29 = vpop.permute.xlu2 %4434  ;;  %v13085_v22 = vld [vmem:[#allocation23_spill] sm:$0xff] }
 0x3a8   :  { %v10833_v0 = vadd.f32 %v4123_v3, %v2330_v60  ;;  %v2132_v26 = vperm.slane %v2116_v47, 1  ;;  %v2122_v14 = vrot.slane %v2121_v12, 7  ;;  %v2365_v45 = vsel %vm1592_vm1, %v13084_v8, %v13083_v5  ;;  %v10849_v27 = vpop.permute.xlu0 %4420  ;;  %v13086_v60 = vld [vmem:[#allocation51_spill] sm:$0xff] }
 0x3a9   :  { %v7652_v34 = vpop.eup %7651  ;;  %v2295_v55 = vrot.slane %v2294_v30, 7  ;;  %v2163_v54 = vmul.f32 %v2131_v21, %v9435_v52  ;;  %v2304_v62 = vperm.slane %v2289_v48, 0  ;;  %v4914_v7 = vperm.slane %v9769_v39, 7  ;;  %v13087_v39 = vld [vmem:[#allocation5_spill] sm:$0xff] }
 0x3aa   :  { %v4124_v59 = vmul.f32 %v7652_v34, %v10497_v61  ;;  %v4227_v41 = vmul.f32 %v10649_v4, %v10833_v0  ;;  %v2164_v40 = vmul.f32 %v2132_v26, %v13085_v22  ;;  %v2305_v15 = vperm.slane %v2289_v48, 1 }
 0x3ab   :  { %v3018_v61 = vperm.slane %v13021_v13, 4  ;;  %v2187_v2 = vmul.f32 1.442695, %v2163_v54  ;;  %v5104_v47 = vperm.slane %v13086_v60, 1  ;;  %v2137_v36 = vperm.slane %v2122_v14, 0 }
 0x3ac   :  { %v10847_v51 = vadd.f32 %v4124_v59, %v2331_v10  ;;  %v4253_v24 = vrot.slane %v4227_v41, 4  ;;  %v2189_v3 = vmul.f32 1.442695, %v2164_v40  ;;  %v2138_v34 = vperm.slane %v2122_v14, 1  ;;  %v2277_v14 = vpop.permute.xlu1 %2276 }
 0x3ad   :  { %4919 = vperm.xlu1 %7343, %v4914_v7   ;;  %v10857_v10 = vmul.f32 %v13084_v8, %v13087_v39  ;;  %7653 = vpow2.f32 %v2187_v2  ;;  %v2336_v21 = vmul.f32 %v2304_v62, %v2256_v53  ;;  %v2337_v48 = vmul.f32 %v2305_v15, %v2256_v53  ;;  %3023 = vperm.xlu2 %7342, %v3018_v61   ;;  %v13088_v61 = vld [vmem:[#allocation28_spill] sm:$0xff] }
 0x3ae   :  { %v4228_v12 = vmul.f32 %v10649_v4, %v10847_v51  ;;  %v4254_v30 = vadd.f32 %v4253_v24, %v4227_v41  ;;  %5109 = vperm.xlu0 %7341, %v5104_v47   ;;  %v2169_v26 = vmul.f32 %v2137_v36, %v9435_v52  ;;  %7655 = vpow2.f32 %v2189_v3 }
 0x3af   :  { %v2170_v40 = vmul.f32 %v2138_v34, %v13085_v22  ;;  %v2310_v4 = vperm.slane %v2295_v55, 0  ;;  %v2311_v41 = vperm.slane %v2295_v55, 1  ;;  %v3032_v24 = vperm.slane %v13021_v13, 6  ;;  %v10863_v62 = vpop.permute.xlu2 %4455 }
 0x3b0   :  { %v4255_v59 = vrot.slane %v4254_v30, 2  ;;  %v4259_v54 = vrot.slane %v4228_v12, 4  ;;  %v2199_v7 = vmul.f32 1.442695, %v2169_v26  ;;  %v2990_v53 = vperm.slane %v13021_v13, 0  ;;  %v10873_v39 = vpop.permute.xlu0 %4441 }
 0x3b1   :  { %v2201_v2 = vmul.f32 1.442695, %v2170_v40  ;;  %v2366_v15 = vrot.slane %v2365_v45, 1  ;;  %v2538_v3 = vsel %vm1592_vm1, %v10857_v10, %v13088_v61  ;;  %v2364_v55 = vsel %vm1590_vm4, %v13084_v8, %v13083_v5 }
 0x3b2   :  { %v4256_v28 = vadd.f32 %v4255_v59, %v4254_v30  ;;  %v4260_v57 = vadd.f32 %v4259_v54, %v4228_v12  ;;  %7657 = vpow2.f32 %v2199_v7  ;;  %v2342_v30 = vmul.f32 %v2310_v4, %v2277_v14 }
 0x3b3   :  { %7659 = vpow2.f32 %v2201_v2  ;;  %v7654_v12 = vpop.eup %7653  ;;  %v5125_v34 = vperm.slane %v13086_v60, 4  ;;  %v2381_v26 = vperm.slane %v2366_v15, 0  ;;  %v2382_v59 = vperm.slane %v2366_v15, 1 }
 0x3b4   :  { %v4257_v47 = vrot.slane %v4256_v28, 1  ;;  %v4261_v36 = vrot.slane %v4260_v57, 2  ;;  %v2379_v54 = vperm.slane %v2364_v55, 0  ;;  %v7656_v45 = vpop.eup %7655  ;;  %v4129_v9 = vmul.f32 %v7654_v12, %v13089_v43  ;;  %v13091_v12 = vld [vmem:[#allocation55_spill] sm:$0xff] }
 0x3b5   :  { %2995 = vperm.xlu1 %7343, %v2990_v53   ;;  %v2343_v32 = vmul.f32 %v2311_v41, %v2277_v14  ;;  %v4130_v35 = vmul.f32 %v7656_v45, %v13090_v38  ;;  %3037 = vperm.xlu2 %7342, %v3032_v24   ;;  %v2413_v4 = vmul.f32 %v2381_v26, %v9435_v52  ;;  %v2380_v53 = vperm.slane %v2364_v55, 1 }
 0x3b6   :  { %v4258_v40 = vadd.f32 %v4257_v47, %v4256_v28  ;;  %v4262_v7 = vadd.f32 %v4261_v36, %v4260_v57  ;;  %5130 = vperm.xlu0 %7341, %v5125_v34   ;;  %v2414_v2 = vmul.f32 %v2382_v59, %v13085_v22  ;;  %v10882_v28 = vadd.f32 %v4129_v9, %v2336_v21 }
 0x3b7   :  { %v2411_v43 = vmul.f32 %v2379_v54, %v9435_v52  ;;  %v10885_v41 = vadd.f32 %v4130_v35, %v2337_v48  ;;  %v2431_v38 = vmul.f32 1.442695, %v2413_v4  ;;  %v2539_v24 = vrot.slane %v2538_v3, 1 }
 0x3b8   :  { %v4263_v6 = vrot.slane %v4262_v7, 1  ;;  %v10880_v15 = vsel %vm1592_vm1, %v4258_v40, %v10766_v25  ;;  %v7658_v57 = vpop.eup %7657  ;;  %v2433_v14 = vmul.f32 1.442695, %v2414_v2  ;;  %v4233_v55 = vmul.f32 %v10625_v20, %v10882_v28  ;;  %v13092_v25 = vld [vmem:[#allocation61_spill] sm:$0xff] }
 0x3b9   :  { %v7660_v47 = vpop.eup %7659  ;;  %v4135_v34 = vmul.f32 %v7658_v57, %v13091_v12  ;;  %v2427_v26 = vmul.f32 1.442695, %v2411_v43  ;;  %v4234_v9 = vmul.f32 %v10625_v20, %v10885_v41  ;;  %7661 = vpow2.f32 %v2431_v38  ;;  %v2491_v20 = vpop.permute.xlu2 %2490 }
 0x3ba   :  { %v4264_v36 = vadd.f32 %v4263_v6, %v4262_v7  ;;  %v4136_v21 = vmul.f32 %v7660_v47, %v13092_v25  ;;  %v2412_v35 = vmul.f32 %v2380_v53, %v13085_v22  ;;  %v4289_v3 = vrot.slane %v4233_v55, 4 }
 0x3bb   :  { %v10896_v59 = vadd.f32 %v4135_v34, %v2342_v30  ;;  %7663 = vpow2.f32 %v2433_v14  ;;  %v4295_v54 = vrot.slane %v4234_v9, 4  ;;  %v2554_v40 = vperm.slane %v2539_v24, 0 }
 0x3bc   :  { %v5585_v48 = vsel %vm1592_vm1, %v4264_v36, %v10781_v58  ;;  %v10900_v45 = vadd.f32 %v4136_v21, %v2343_v32  ;;  %v2555_v58 = vperm.slane %v2539_v24, 1  ;;  %7665 = vpow2.f32 %v2427_v26 }
 0x3bd   :  { %v5586_v6 = vsel %vm1595_vm5, %v10795_v50, %v5585_v48  ;;  %v10906_v4 = vmul.f32 %v10659_v37, %v10896_v59  ;;  %v4296_v30 = vadd.f32 %v4295_v54, %v4234_v9  ;;  %v2429_v53 = vmul.f32 1.442695, %v2412_v35 }
 0x3be   :  { %v5587_v7 = vsel %vm1598_vm2, %v10809_v33, %v5586_v6  ;;  %v4240_v2 = vmul.f32 %v10659_v37, %v10900_v45  ;;  %v2537_v50 = vsel %vm1590_vm4, %v10857_v10, %v13088_v61  ;;  %v4290_v32 = vadd.f32 %v4289_v3, %v4233_v55  ;;  %v2484_v33 = vpop.permute.xlu0 %2483 }
 0x3bf   :  { %v2586_v43 = vmul.f32 %v2554_v40, %v2491_v20  ;;  %v2587_v57 = vmul.f32 %v2555_v58, %v2491_v20  ;;  %v2552_v38 = vperm.slane %v2537_v50, 0  ;;  %v7662_v14 = vpop.eup %7661  ;;  %v4297_v47 = vrot.slane %v4296_v30, 2 }
 0x3c0   :  { %v4331_v36 = vrot.slane %v4240_v2, 4  ;;  %7667 = vpow2.f32 %v2429_v53  ;;  %v3039_v24 = vperm.slane %v13021_v13, 7  ;;  %v13093_v37 = vrot.slane %v10797_v42, 1 }
 0x3c1   :  { %v7664_v12 = vpop.eup %7663  ;;  %v13094_v55 = vrot.slane %v10819_v16, 1  ;;  %v4355_v21 = vmul.f32 %v7662_v14, %v10833_v0  ;;  %v4298_v35 = vadd.f32 %v4297_v47, %v4296_v30  ;;  %v2584_v6 = vmul.f32 %v2552_v38, %v2484_v33 }
 0x3c2   :  { %v4312_v34 = vadd.f32 %v13093_v37, %v10797_v42  ;;  %v4332_v48 = vadd.f32 %v4331_v36, %v4240_v2  ;;  %v4356_v3 = vmul.f32 %v7664_v12, %v10847_v51  ;;  %3044 = vperm.xlu2 %7342, %v3039_v24   ;;  %v7666_v54 = vpop.eup %7665  ;;  %v4291_v40 = vrot.slane %v4290_v32, 2  ;;  %v13095_v2 = vld [vmem:[#allocation59_spill] sm:$0xff] }
 0x3c3   :  { %v4324_v9 = vadd.f32 %v13094_v55, %v10819_v16  ;;  %v10923_v20 = vadd.f32 %v4355_v21, %v2586_v43  ;;  %v2553_v58 = vperm.slane %v2537_v50, 1  ;;  %v3025_v42 = vperm.slane %v13021_v13, 5 }
 0x3c4   :  { %v4299_v53 = vrot.slane %v4298_v35, 1  ;;  %v4333_v37 = vrot.slane %v4332_v48, 2  ;;  %v10926_v26 = vadd.f32 %v4356_v3, %v2587_v57  ;;  %v4353_v16 = vmul.f32 %v7666_v54, %v10672_v18 }
 0x3c5   :  { %v4325_v0 = vrot.slane %v10906_v4, 4  ;;  %v4459_v51 = vmul.f32 %v10793_v19, %v10923_v20  ;;  %v2585_v30 = vmul.f32 %v2553_v58, %v2484_v33  ;;  %3030 = vperm.xlu1 %7343, %v3025_v42   ;;  %v3246_v38 = vperm.slane %v13095_v2, 0 }
 0x3c6   :  { %v7668_v43 = vpop.eup %7667  ;;  %v4300_v14 = vadd.f32 %v4299_v53, %v4298_v35  ;;  %v4334_v50 = vadd.f32 %v4333_v37, %v4332_v48  ;;  %v4460_v13 = vmul.f32 %v10793_v19, %v10926_v26  ;;  %v10935_v47 = vadd.f32 %v4353_v16, %v2584_v6 }
 0x3c7   :  { %v10937_v57 = vadd.f32 %v4291_v40, %v4290_v32  ;;  %v4485_v18 = vrot.slane %v4459_v51, 4  ;;  %v4354_v36 = vmul.f32 %v7668_v43, %v10674_v23  ;;  %3251 = vperm.xlu0 %7341, %v3246_v38   ;;  %v2371_v33 = vsel %vm1601_vm7, %v13084_v8, %v13083_v5 }
 0x3c8   :  { %13096 = vst [vmem:[#allocation72_spill] sm:$0xff] %v10935_v47  ;;  %v5588_v24 = vsel %vm1601_vm7, %v4300_v14, %v5587_v7  ;;  %v4335_v12 = vrot.slane %v4334_v50, 1  ;;  %v4491_v55 = vrot.slane %v4460_v13, 4  ;;  %v4457_v21 = vmul.f32 %v10805_v56, %v10935_v47 }
 0x3c9   :  { %v5589_v19 = vsel %vm1604_vm3, %v4312_v34, %v5588_v24  ;;  %v4486_v35 = vadd.f32 %v4485_v18, %v4459_v51  ;;  %v10947_v32 = vadd.f32 %v4354_v36, %v2585_v30  ;;  %v2372_v48 = vrot.slane %v2371_v33, 4  ;;  %v10958_v51 = vpop.permute.xlu1 %4427 }
 0x3ca   :  { %v4336_v3 = vadd.f32 %v4335_v12, %v4334_v50  ;;  %v5590_v23 = vsel %vm1607_vm8, %v4324_v9, %v5589_v19  ;;  %v4492_v6 = vadd.f32 %v4491_v55, %v4460_v13  ;;  %v4473_v54 = vrot.slane %v4457_v21, 4 }
 0x3cb   :  { %13097 = vst [vmem:[#allocation77_spill] sm:$0xff] %v10947_v32  ;;  %v4487_v40 = vrot.slane %v4486_v35, 2  ;;  %v4458_v7 = vmul.f32 %v10805_v56, %v10947_v32  ;;  %v2387_v58 = vperm.slane %v2372_v48, 0  ;;  %v2388_v42 = vperm.slane %v2372_v48, 1 }
 0x3cc   :  { %v10953_v53 = vsel %vm5519_vm9, %v4336_v3, %v5590_v23  ;;  %v4493_v37 = vrot.slane %v4492_v6, 2  ;;  %v4474_v34 = vadd.f32 %v4473_v54, %v4457_v21  ;;  %v2544_v16 = vsel %vm1601_vm7, %v10857_v10, %v13088_v61 }
 0x3cd   :  { %v4488_v9 = vadd.f32 %v4487_v40, %v4486_v35  ;;  %v4479_v30 = vrot.slane %v4458_v7, 4  ;;  %v2419_v38 = vmul.f32 %v2387_v58, %v9435_v52  ;;  %v2420_v43 = vmul.f32 %v2388_v42, %v13085_v22  ;;  %v2512_v40 = vpop.permute.xlu2 %2511 }
 0x3ce   :  { %v4326_v56 = vadd.f32 %v4325_v0, %v10906_v4  ;;  %v4494_v14 = vadd.f32 %v4493_v37, %v4492_v6  ;;  %v4475_v50 = vrot.slane %v4474_v34, 2  ;;  %v2369_v13 = vsel %vm1598_vm2, %v13084_v8, %v13083_v5 }
 0x3cf   :  { %v4480_v18 = vadd.f32 %v4479_v30, %v4458_v7  ;;  %v2443_v36 = vmul.f32 1.442695, %v2419_v38  ;;  %v2445_v33 = vmul.f32 1.442695, %v2420_v43  ;;  %v2545_v24 = vrot.slane %v2544_v16, 4 }
 0x3d0   :  { %v13098_v12 = vrot.slane %v10790_v46, 1  ;;  %v13099_v21 = vrot.slane %v10831_v63, 1  ;;  %v4489_v4 = vrot.slane %v4488_v9, 1  ;;  %v4476_v0 = vadd.f32 %v4475_v50, %v4474_v34 }
 0x3d1   :  { %v4293_v35 = vrot.slane %v10937_v57, 1  ;;  %v4481_v48 = vrot.slane %v4480_v18, 2  ;;  %7669 = vpow2.f32 %v2443_v36  ;;  %v2370_v3 = vrot.slane %v2369_v13, 3 }
 0x3d2   :  { %v10969_v55 = vadd.f32 %v13098_v12, %v10790_v46  ;;  %v10974_v19 = vadd.f32 %v13099_v21, %v10831_v63  ;;  %v4327_v23 = vrot.slane %v4326_v56, 2  ;;  %v4495_v6 = vrot.slane %v4494_v14, 1 }
 0x3d3   :  { %v4477_v54 = vrot.slane %v4476_v0, 1  ;;  %7671 = vpow2.f32 %v2445_v33  ;;  %v2560_v7 = vperm.slane %v2545_v24, 0  ;;  %v2561_v46 = vperm.slane %v2545_v24, 1 }
 0x3d4   :  { %v2385_v58 = vperm.slane %v2370_v3, 0  ;;  %v2386_v42 = vperm.slane %v2370_v3, 1  ;;  %v4490_v37 = vadd.f32 %v4489_v4, %v4488_v9  ;;  %v2542_v63 = vsel %vm1598_vm2, %v10857_v10, %v13088_v61 }
 0x3d5   :  { %v5111_v34 = vperm.slane %v13086_v60, 2  ;;  %v5097_v16 = vperm.slane %v13086_v60, 0  ;;  %v4482_v30 = vadd.f32 %v4481_v48, %v4480_v18  ;;  %v2592_v38 = vmul.f32 %v2560_v7, %v2512_v40  ;;  %v10991_v18 = vpop.permute.xlu1 %4448 }
 0x3d6   :  { %v2417_v43 = vmul.f32 %v2385_v58, %v9435_v52  ;;  %v2418_v50 = vmul.f32 %v2386_v42, %v13085_v22  ;;  %v4478_v13 = vadd.f32 %v4477_v54, %v4476_v0  ;;  %v3267_v36 = vperm.slane %v13095_v2, 3 }
 0x3d7   :  { %5116 = vperm.xlu2 %7342, %v5111_v34   ;;  %5102 = vperm.xlu1 %7343, %v5097_v16   ;;  %v2367_v9 = vsel %vm1595_vm5, %v13084_v8, %v13083_v5  ;;  %v2540_v33 = vsel %vm1595_vm5, %v10857_v10, %v13088_v61  ;;  %v7670_v24 = vpop.eup %7669  ;;  %v2593_v12 = vmul.f32 %v2561_v46, %v2512_v40  ;;  %v2543_v48 = vrot.slane %v2542_v63, 3  ;;  %v2505_v63 = vpop.permute.xlu0 %2504 }
 0x3d8   :  { %v2439_v21 = vmul.f32 1.442695, %v2417_v43  ;;  %v2441_v4 = vmul.f32 1.442695, %v2418_v50  ;;  %v10994_v3 = vadd.f32 %v4293_v35, %v10937_v57  ;;  %v10996_v54 = vadd.f32 %v4327_v23, %v4326_v56  ;;  %3272 = vperm.xlu0 %7341, %v3267_v36  }
 0x3d9   :  { %v7672_v0 = vpop.eup %7671  ;;  %v4361_v7 = vmul.f32 %v7670_v24, %v10882_v28  ;;  %v2368_v58 = vrot.slane %v2367_v9, 2  ;;  %v4496_v42 = vadd.f32 %v4495_v6, %v4494_v14  ;;  %v4483_v34 = vrot.slane %v4482_v30, 1 }
 0x3da   :  { %v4362_v16 = vmul.f32 %v7672_v0, %v10885_v41  ;;  %7673 = vpow2.f32 %v2439_v21  ;;  %v11001_v40 = vsel %vm1592_vm1, %v4490_v37, %v4478_v13  ;;  %v2558_v56 = vperm.slane %v2543_v48, 0 }
 0x3db   :  { %v11003_v46 = vadd.f32 %v4361_v7, %v2592_v38  ;;  %7675 = vpow2.f32 %v2441_v4  ;;  %v2383_v57 = vperm.slane %v2368_v58, 0  ;;  %v2559_v23 = vperm.slane %v2543_v48, 1 }
 0x3dc   :  { %v11005_v35 = vadd.f32 %v4362_v16, %v2593_v12  ;;  %v2384_v28 = vperm.slane %v2368_v58, 1  ;;  %v2377_v41 = vsel %vm1610_vm6, %v13083_v5, %v13084_v8  ;;  %v2550_v37 = vsel %vm1610_vm6, %v13088_v61, %v10857_v10 }
 0x3dd   :  { %v4465_v14 = vmul.f32 %v10842_v29, %v11003_v46  ;;  %v2415_v6 = vmul.f32 %v2383_v57, %v9435_v52  ;;  %v2590_v43 = vmul.f32 %v2558_v56, %v2505_v63  ;;  %v2541_v13 = vrot.slane %v2540_v33, 2  ;;  %v2498_v56 = vpop.permute.xlu1 %2497 }
 0x3de   :  { %v4466_v38 = vmul.f32 %v10842_v29, %v11005_v35  ;;  %v2416_v50 = vmul.f32 %v2384_v28, %v13085_v22  ;;  %v2591_v9 = vmul.f32 %v2559_v23, %v2505_v63  ;;  %v2378_v12 = vrot.slane %v2377_v41, 7 }
 0x3df   :  { %v4521_v36 = vrot.slane %v4465_v14, 4  ;;  %v2435_v24 = vmul.f32 1.442695, %v2415_v6  ;;  %v2375_v0 = vsel %vm1607_vm8, %v13084_v8, %v13083_v5  ;;  %v11025_v7 = vsel %vm1607_vm8, %v10857_v10, %v13088_v61 }
 0x3e0   :  { %v7674_v21 = vpop.eup %7673  ;;  %v4527_v4 = vrot.slane %v4466_v38, 4  ;;  %v2437_v48 = vmul.f32 1.442695, %v2416_v50  ;;  %v4484_v58 = vadd.f32 %v4483_v34, %v4482_v30  ;;  %v2393_v16 = vperm.slane %v2378_v12, 0 }
 0x3e1   :  { %v7676_v29 = vpop.eup %7675  ;;  %v4359_v33 = vmul.f32 %v7674_v21, %v10715_v49  ;;  %7677 = vpow2.f32 %v2435_v24  ;;  %v4522_v63 = vadd.f32 %v4521_v36, %v4465_v14  ;;  %v2394_v23 = vperm.slane %v2378_v12, 1 }
 0x3e2   :  { %v4360_v57 = vmul.f32 %v7676_v29, %v10721_v17  ;;  %7679 = vpow2.f32 %v2437_v48  ;;  %v4528_v28 = vadd.f32 %v4527_v4, %v4466_v38  ;;  %v2556_v41 = vperm.slane %v2541_v13, 0 }
 0x3e3   :  { %v11029_v6 = vadd.f32 %v4359_v33, %v2590_v43  ;;  %v2425_v50 = vmul.f32 %v2393_v16, %v9435_v52  ;;  %v2557_v47 = vperm.slane %v2541_v13, 1  ;;  %v2426_v30 = vmul.f32 %v2394_v23, %v13085_v22  ;;  %v2533_v33 = vpop.permute.xlu2 %2532 }
 0x3e4   :  { %v11032_v32 = vadd.f32 %v4360_v57, %v2591_v9  ;;  %v2551_v49 = vrot.slane %v2550_v37, 7  ;;  %v11036_v34 = vsel %vm1592_vm1, %v4496_v42, %v4484_v58  ;;  %v2588_v14 = vmul.f32 %v2556_v41, %v2498_v56  ;;  %v7307_v42 = vld [vmem:[%s12639_s11 + $0x78] sm:$0xff] }
 0x3e5   :  { %13100 = vst [vmem:[#allocation78_spill] sm:$0xff] %v11029_v6  ;;  %v4463_v17 = vmul.f32 %v10958_v51, %v11029_v6  ;;  %v2455_v36 = vmul.f32 1.442695, %v2425_v50  ;;  %v4523_v38 = vrot.slane %v4522_v63, 2  ;;  %v2589_v24 = vmul.f32 %v2557_v47, %v2498_v56  ;;  %7324 = vmatpush.bf16.msrb.mxu1 %v7307_v42  ;;  %6222 = vmatpush.bf16.msra.mxu0 %v7307_v42  ;;  %v2526_v42 = vpop.permute.xlu0 %2525 }
 0x3e6   :  { %13101 = vst [vmem:[#allocation79_spill] sm:$0xff] %v11032_v32  ;;  %v4464_v43 = vmul.f32 %v10958_v51, %v11032_v32  ;;  %v2457_v12 = vmul.f32 1.442695, %v2426_v30  ;;  %v4529_v21 = vrot.slane %v4528_v28, 2  ;;  %v2376_v4 = vrot.slane %v2375_v0, 6 }
 0x3e7   :  { %v7678_v9 = vpop.eup %7677  ;;  %v4509_v13 = vrot.slane %v4463_v17, 4  ;;  %7681 = vpow2.f32 %v2455_v36  ;;  %v2566_v58 = vperm.slane %v2551_v49, 0  ;;  %v2567_v51 = vperm.slane %v2551_v49, 1 }
 0x3e8   :  { %v7680_v37 = vpop.eup %7679  ;;  %v4515_v48 = vrot.slane %v4464_v43, 4  ;;  %v4357_v29 = vmul.f32 %v7678_v9, %v10707_v11  ;;  %7683 = vpow2.f32 %v2457_v12  ;;  %v2391_v57 = vperm.slane %v2376_v4, 0 }
 0x3e9   :  { %v4510_v16 = vadd.f32 %v4509_v13, %v4463_v17  ;;  %v4358_v47 = vmul.f32 %v7680_v37, %v10709_v31  ;;  %v11047_v56 = vadd.f32 %v4523_v38, %v4522_v63  ;;  %v2392_v41 = vperm.slane %v2376_v4, 1 }
 0x3ea   :  { %v4516_v0 = vadd.f32 %v4515_v48, %v4464_v43  ;;  %v11049_v23 = vadd.f32 %v4357_v29, %v2588_v14  ;;  %v4530_v50 = vadd.f32 %v4529_v21, %v4528_v28  ;;  %v2598_v11 = vmul.f32 %v2566_v58, %v2533_v33 }
 0x3eb   :  { %v11051_v30 = vadd.f32 %v4358_v47, %v2589_v24  ;;  %v2423_v36 = vmul.f32 %v2391_v57, %v9435_v52  ;;  %v2424_v31 = vmul.f32 %v2392_v41, %v13085_v22  ;;  %v2549_v49 = vrot.slane %v11025_v7, 6 }
 0x3ec   :  { %v4461_v17 = vmul.f32 %v10849_v27, %v11049_v23  ;;  %v5118_v63 = vperm.slane %v13086_v60, 3  ;;  %v4511_v43 = vrot.slane %v4510_v16, 2  ;;  %v2599_v28 = vmul.f32 %v2567_v51, %v2533_v33 }
 0x3ed   :  { %v7682_v38 = vpop.eup %7681  ;;  %v4462_v14 = vmul.f32 %v10849_v27, %v11051_v30  ;;  %v2451_v24 = vmul.f32 1.442695, %v2423_v36  ;;  %v4517_v9 = vrot.slane %v4516_v0, 2  ;;  %v2453_v4 = vmul.f32 1.442695, %v2424_v31 }
 0x3ee   :  { %v7684_v12 = vpop.eup %7683  ;;  %v4497_v21 = vrot.slane %v4461_v17, 4  ;;  %v4367_v13 = vmul.f32 %v7682_v38, %v10896_v59  ;;  %5123 = vperm.xlu2 %7342, %v5118_v63   ;;  %v4531_v37 = vrot.slane %v4530_v50, 1  ;;  %v2564_v27 = vperm.slane %v2549_v49, 0 }
 0x3ef   :  { %v4503_v48 = vrot.slane %v4462_v14, 4  ;;  %v4368_v7 = vmul.f32 %v7684_v12, %v10900_v45  ;;  %7685 = vpow2.f32 %v2451_v24  ;;  %v4512_v33 = vadd.f32 %v4511_v43, %v4510_v16  ;;  %v13104_v16 = vld [vmem:[#allocation60_spill] sm:$0xff] }
 0x3f0   :  { %v4498_v29 = vadd.f32 %v4497_v21, %v4461_v17  ;;  %v11063_v58 = vadd.f32 %v4367_v13, %v2598_v11  ;;  %7687 = vpow2.f32 %v2453_v4  ;;  %v2565_v57 = vperm.slane %v2549_v49, 1 }
 0x3f1   :  { %v4504_v47 = vadd.f32 %v4503_v48, %v4462_v14  ;;  %v11065_v51 = vadd.f32 %v4368_v7, %v2599_v28  ;;  %v4518_v41 = vadd.f32 %v4517_v9, %v4516_v0  ;;  %v2596_v31 = vmul.f32 %v2564_v27, %v2526_v42 }
 0x3f2   :  { %13102 = vst [vmem:[#allocation63_spill] sm:$0xff] %v11063_v58  ;;  %v4499_v59 = vrot.slane %v4498_v29, 2  ;;  %v4471_v36 = vmul.f32 %v10863_v62, %v11063_v58  ;;  %v2597_v17 = vmul.f32 %v2565_v57, %v2526_v42  ;;  %v5132_v11 = vperm.slane %v13086_v60, 5 }
 0x3f3   :  { %13103 = vst [vmem:[#allocation64_spill] sm:$0xff] %v11065_v51  ;;  %v4505_v63 = vrot.slane %v4504_v47, 2  ;;  %v4472_v45 = vmul.f32 %v10863_v62, %v11065_v51  ;;  %v5364_v43 = vperm.slane %v13104_v16, 5  ;;  %v2373_v0 = vsel %vm1604_vm3, %v13084_v8, %v13083_v5 }
 0x3f4   :  { %v4500_v38 = vadd.f32 %v4499_v59, %v4498_v29  ;;  %v4557_v24 = vrot.slane %v4471_v36, 4  ;;  %5137 = vperm.xlu1 %7343, %v5132_v11   ;;  %v2374_v12 = vrot.slane %v2373_v0, 5  ;;  %v2546_v62 = vsel %vm1604_vm3, %v10857_v10, %v13088_v61  ;;  %v11084_v59 = vpop.permute.xlu2 %4645  ;;  %v11086_v10 = vpop.permute.xlu0 %4638  ;;  %v7306_v61 = vld [vmem:[%s12639_s11 + $0x70] sm:$0xff] }
 0x3f5   :  { %v7686_v49 = vpop.eup %7685  ;;  %v4506_v14 = vadd.f32 %v4505_v63, %v4504_v47  ;;  %v4563_v28 = vrot.slane %v4472_v45, 4  ;;  %v4525_v21 = vrot.slane %v11047_v56, 1  ;;  %v4532_v13 = vadd.f32 %v4531_v37, %v4530_v50  ;;  %5369 = vperm.xlu0 %7341, %v5364_v43   ;;  %13106 = vst [vmem:[#allocation81_spill] sm:$0xff] %v11086_v10  ;;  %7325 = vmatpush.bf16.msrb.mxu1 %v7306_v61 }
 0x3f6   :  { %v7688_v9 = vpop.eup %7687  ;;  %v4519_v4 = vrot.slane %v4518_v41, 1  ;;  %v4365_v42 = vmul.f32 %v7686_v49, %v10760_v44  ;;  %v4558_v7 = vadd.f32 %v4557_v24, %v4471_v36  ;;  %v2389_v8 = vperm.slane %v2374_v12, 0  ;;  %v7305_v24 = vld [vmem:[%s12639_s11 + $0x68] sm:$0xff]  ;;  %6223 = vmatpush.bf16.msra.mxu0 %v7306_v61 }
 0x3f7   :  { %v4507_v48 = vrot.slane %v4506_v14, 1  ;;  %v4366_v5 = vmul.f32 %v7688_v9, %v10764_v1  ;;  %v4513_v29 = vrot.slane %v4512_v33, 1  ;;  %v4501_v27 = vrot.slane %v4500_v38, 1 }
 0x3f8   :  { %v11082_v47 = vadd.f32 %v4365_v42, %v2596_v31  ;;  %v2390_v57 = vperm.slane %v2374_v12, 1  ;;  %v4564_v50 = vadd.f32 %v4563_v28, %v4472_v45  ;;  %v2421_v1 = vmul.f32 %v2389_v8, %v9435_v52  ;;  %v2519_v42 = vpop.permute.xlu1 %2518 }
 0x3f9   :  { %v4508_v44 = vadd.f32 %v4507_v48, %v4506_v14  ;;  %v11091_v37 = vadd.f32 %v4366_v5, %v2597_v17  ;;  %v4520_v36 = vadd.f32 %v4519_v4, %v4518_v41  ;;  %v2547_v11 = vrot.slane %v2546_v62, 5  ;;  %7326 = vmatpush.bf16.msrb.mxu1 %v7305_v24 }
 0x3fa   :  { %13105 = vst [vmem:[#allocation80_spill] sm:$0xff] %v11082_v47  ;;  %v4469_v31 = vmul.f32 %v10991_v18, %v11082_v47  ;;  %v2422_v63 = vmul.f32 %v2390_v57, %v13085_v22  ;;  %v4559_v45 = vrot.slane %v4558_v7, 2  ;;  %v2447_v0 = vmul.f32 1.442695, %v2421_v1  ;;  %6224 = vmatpush.bf16.msra.mxu0 %v7305_v24  ;;  %v13111_v24 = vld [vmem:[#allocation32_spill] sm:$0xff] }
 0x3fb   :  { %13107 = vst [vmem:[#allocation84_spill] sm:$0xff] %v11091_v37  ;;  %v5618_v43 = vsel %vm1595_vm5, %v4508_v44, %v11036_v34  ;;  %v4470_v17 = vmul.f32 %v10991_v18, %v11091_v37  ;;  %v4502_v41 = vadd.f32 %v4501_v27, %v4500_v38  ;;  %v11106_v12 = vadd.f32 %v4525_v21, %v11047_v56  ;;  %v7304_v56 = vld [vmem:[%s12639_s11 + $0x60] sm:$0xff] }
 0x3fc   :  { %v5619_v49 = vsel %vm1598_vm2, %v4520_v36, %v5618_v43  ;;  %v4545_v14 = vrot.slane %v4469_v31, 4  ;;  %v2449_v28 = vmul.f32 1.442695, %v2422_v63  ;;  %v4565_v62 = vrot.slane %v4564_v50, 2  ;;  %v11129_v36 = vpop.permute.xlu0 %4673 }
 0x3fd   :  { %v4551_v9 = vrot.slane %v4470_v17, 4  ;;  %7689 = vpow2.f32 %v2447_v0  ;;  %v11108_v4 = vadd.f32 %v4513_v29, %v4512_v33  ;;  %v11111_v18 = vsel %vm1601_vm7, %v4532_v13, %v5619_v49  ;;  %v13108_v29 = vld [vmem:[#allocation66_spill] sm:$0xff]  ;;  %13109 = vst [vmem:[#allocation86_spill] sm:$0xff] %v11129_v36  ;;  %7327 = vmatpush.bf16.msrb.mxu1 %v7304_v56 }
 0x3fe   :  { %v4546_v34 = vadd.f32 %v4545_v14, %v4469_v31  ;;  %7691 = vpow2.f32 %v2449_v28  ;;  %v11113_v38 = vadd.f32 %v4559_v45, %v4558_v7  ;;  %v2562_v5 = vperm.slane %v2547_v11, 0  ;;  %v11125_v7 = vpop.permute.xlu2 %4666  ;;  %v13112_v45 = vld [vmem:[#allocation7_spill] sm:$0xff]  ;;  %6225 = vmatpush.bf16.msra.mxu0 %v7304_v56 }
 0x3ff   :  { %v4552_v48 = vadd.f32 %v4551_v9, %v4470_v17  ;;  %v5139_v8 = vperm.slane %v13086_v60, 6  ;;  %v11121_v33 = vsel %vm1595_vm5, %v4502_v41, %v11001_v40  ;;  %v3260_v13 = vperm.slane %v13095_v2, 2  ;;  %v13110_v40 = vld [vmem:[#allocation30_spill] sm:$0xff]  ;;  %v7303_v41 = vld [vmem:[%s12639_s11 + $0x58] sm:$0xff] }
 0x400   :  { %v4547_v21 = vrot.slane %v4546_v34, 2  ;;  %v3502_v27 = vperm.slane %v13108_v29, 0  ;;  %v11127_v57 = vadd.f32 %v4565_v62, %v4564_v50  ;;  %v2563_v44 = vperm.slane %v2547_v11, 1  ;;  %v13113_v62 = vld [vmem:[#allocation58_spill] sm:$0xff] }
 0x401   :  { %v4553_v61 = vrot.slane %v4552_v48, 2  ;;  %v2594_v1 = vmul.f32 %v2562_v5, %v2519_v42  ;;  %5144 = vperm.xlu2 %7342, %v5139_v8   ;;  %3265 = vperm.xlu1 %7343, %v3260_v13   ;;  %v2621_v43 = vsel %vm1592_vm1, %v13111_v24, %v13110_v40  ;;  %v11137_v17 = vmul.f32 %v13111_v24, %v13112_v45  ;;  %v13114_v8 = vld [vmem:[#allocation31_spill] sm:$0xff] }
 0x402   :  { %v4548_v63 = vadd.f32 %v4547_v21, %v4546_v34  ;;  %3507 = vperm.xlu0 %7341, %v3502_v27   ;;  %v2595_v0 = vmul.f32 %v2563_v44, %v2519_v42  ;;  %v3281_v49 = vperm.slane %v13095_v2, 5  ;;  %v2622_v14 = vrot.slane %v2621_v43, 1  ;;  %v13115_v13 = vld [vmem:[#allocation67_spill] sm:$0xff]  ;;  %7328 = vmatpush.bf16.msrb.mxu1 %v7303_v41 }
 0x403   :  { %v7690_v50 = vpop.eup %7689  ;;  %v3253_v34 = vperm.slane %v13095_v2, 1  ;;  %v3516_v5 = vperm.slane %v13108_v29, 2  ;;  %v2794_v42 = vsel %vm1592_vm1, %v11137_v17, %v13114_v8  ;;  %v11150_v21 = vadd.f32 %v4553_v61, %v4552_v48  ;;  %6226 = vmatpush.bf16.msra.mxu0 %v7303_v41 }
 0x404   :  { %v7692_v28 = vpop.eup %7691  ;;  %v4363_v9 = vmul.f32 %v7690_v50, %v13113_v62  ;;  %v2637_v44 = vperm.slane %v2622_v14, 0  ;;  %v2638_v11 = vperm.slane %v2622_v14, 1  ;;  %v4549_v31 = vrot.slane %v4548_v63, 1  ;;  %v7302_v14 = vld [vmem:[%s12639_s11 + $0x50] sm:$0xff]  ;;  %v2747_v37 = vpop.permute.xlu0 %2746 }
 0x405   :  { %v4364_v27 = vmul.f32 %v7692_v28, %v13115_v13  ;;  %v2623_v50 = vsel %vm1595_vm5, %v13111_v24, %v13110_v40  ;;  %v2795_v61 = vrot.slane %v2794_v42, 1  ;;  %v13117_v10 = vperm.slane %v13095_v2, 6 }
 0x406   :  { %v11153_v43 = vadd.f32 %v4363_v9, %v2594_v1  ;;  %v2669_v51 = vmul.f32 %v2637_v44, %v9435_v52  ;;  %v2670_v48 = vmul.f32 %v2638_v11, %v13085_v22  ;;  %v11168_v28 = vpop.permute.xlu2 %4687  ;;  %v3274_v9 = vperm.slane %v13095_v2, 4  ;;  %7329 = vmatpush.bf16.msrb.mxu1 %v7302_v14 }
 0x407   :  { %v11159_v62 = vadd.f32 %v4364_v27, %v2595_v0  ;;  %13116 = vst [vmem:[#allocation87_spill] sm:$0xff] %v11168_v28  ;;  %v3530_v0 = vperm.slane %v13108_v29, 4  ;;  %v2624_v13 = vrot.slane %v2623_v50, 2  ;;  %v2796_v44 = vsel %vm1595_vm5, %v11137_v17, %v13114_v8  ;;  %6227 = vmatpush.bf16.msra.mxu0 %v7302_v14  ;;  %v7300_v14 = vld [vmem:[%s12639_s11 + $0x40] sm:$0xff] }
 0x408   :  { %v4467_v1 = vmul.f32 %v10873_v39, %v11153_v43  ;;  %v2687_v11 = vmul.f32 1.442695, %v2669_v51  ;;  %v2689_v42 = vmul.f32 1.442695, %v2670_v48  ;;  %v11177_v56 = vadd.f32 %v4549_v31, %v4548_v63 }
 0x409   :  { %v4468_v27 = vmul.f32 %v10873_v39, %v11159_v62  ;;  %3258 = vperm.xlu2 %7342, %v3253_v34   ;;  %3286 = vperm.xlu1 %7343, %v3281_v49   ;;  %v2639_v45 = vperm.slane %v2624_v13, 0  ;;  %v2810_v41 = vperm.slane %v2795_v61, 0  ;;  %v7301_v39 = vld [vmem:[%s12639_s11 + $0x48] sm:$0xff]  ;;  %v2640_v51 = vperm.slane %v2624_v13, 1 }
 0x40a   :  { %v4533_v58 = vrot.slane %v4467_v1, 4  ;;  %3521 = vperm.xlu0 %7341, %v3516_v5   ;;  %7693 = vpow2.f32 %v2687_v11  ;;  %v2627_v63 = vsel %vm1601_vm7, %v13111_v24, %v13110_v40  ;;  %v2811_v5 = vperm.slane %v2795_v61, 1  ;;  %7330 = vmatpush.bf16.msrb.mxu1 %v7301_v39 }
 0x40b   :  { %v4539_v50 = vrot.slane %v4468_v27, 4  ;;  %7695 = vpow2.f32 %v2689_v42  ;;  %v2671_v31 = vmul.f32 %v2639_v45, %v9435_v52  ;;  %v2672_v48 = vmul.f32 %v2640_v51, %v13085_v22  ;;  %6228 = vmatpush.bf16.msra.mxu0 %v7301_v39 }
 0x40c   :  { %v4534_v34 = vadd.f32 %v4533_v58, %v4467_v1  ;;  %v2797_v11 = vrot.slane %v2796_v44, 2  ;;  %v2628_v32 = vrot.slane %v2627_v63, 4  ;;  %v2800_v58 = vsel %vm1601_vm7, %v11137_v17, %v13114_v8 }
 0x40d   :  { %v4540_v49 = vadd.f32 %v4539_v50, %v4468_v27  ;;  %v2691_v47 = vmul.f32 1.442695, %v2671_v31  ;;  %v2842_v13 = vmul.f32 %v2810_v41, %v2747_v37  ;;  %v2843_v45 = vmul.f32 %v2811_v5, %v2747_v37  ;;  %v4653_v27 = vpop.permute.xlu1 %4652 }
 0x40e   :  { %v4535_v28 = vrot.slane %v4534_v34, 2  ;;  %v2693_v42 = vmul.f32 1.442695, %v2672_v48  ;;  %v2643_v44 = vperm.slane %v2628_v32, 0  ;;  %v2644_v50 = vperm.slane %v2628_v32, 1  ;;  %v2754_v6 = vpop.permute.xlu2 %2753  ;;  %7331 = vmatpush.bf16.msrb.mxu1 %v7300_v14 }
 0x40f   :  { %v4541_v1 = vrot.slane %v4540_v49, 2  ;;  %7697 = vpow2.f32 %v2691_v47  ;;  %v2812_v63 = vperm.slane %v2797_v11, 0  ;;  %v2801_v41 = vrot.slane %v2800_v58, 4  ;;  %6229 = vmatpush.bf16.msra.mxu0 %v7300_v14 }
 0x410   :  { %v4536_v61 = vadd.f32 %v4535_v28, %v4534_v34  ;;  %v7694_v51 = vpop.eup %7693  ;;  %7699 = vpow2.f32 %v2693_v42  ;;  %v2675_v47 = vmul.f32 %v2643_v44, %v9435_v52  ;;  %v2676_v32 = vmul.f32 %v2644_v50, %v13085_v22 }
 0x411   :  { %v4542_v31 = vadd.f32 %v4541_v1, %v4540_v49  ;;  %3279 = vperm.xlu2 %7342, %v3274_v9   ;;  %v7696_v37 = vpop.eup %7695  ;;  %v4587_v48 = vmul.f32 %v7694_v51, %v10923_v20  ;;  %3293 = vperm.xlu1 %7343, %v13117_v10   ;;  %v2813_v9 = vperm.slane %v2797_v11, 1  ;;  %v13118_v34 = vrot.slane %v10996_v54, 1  ;;  %v2768_v51 = vpop.permute.xlu0 %2767 }
 0x412   :  { %v4537_v5 = vrot.slane %v4536_v61, 1  ;;  %3535 = vperm.xlu0 %7341, %v3530_v0   ;;  %v4588_v39 = vmul.f32 %v7696_v37, %v10926_v26  ;;  %v2844_v20 = vmul.f32 %v2812_v63, %v2754_v6  ;;  %v2699_v1 = vmul.f32 1.442695, %v2675_v47 }
 0x413   :  { %v4543_v28 = vrot.slane %v4542_v31, 1  ;;  %v4330_v49 = vadd.f32 %v13118_v34, %v10996_v54  ;;  %v11203_v58 = vadd.f32 %v4587_v48, %v2842_v13  ;;  %v2701_v42 = vmul.f32 1.442695, %v2676_v32  ;;  %v13119_v54 = vld [vmem:[#allocation69_spill] sm:$0xff] }
 0x414   :  { %v11205_v0 = vadd.f32 %v4588_v39, %v2843_v45  ;;  %v2845_v44 = vmul.f32 %v2813_v9, %v2754_v6  ;;  %v2816_v50 = vperm.slane %v2801_v41, 0  ;;  %v4538_v26 = vadd.f32 %v4537_v5, %v4536_v61  ;;  %v13120_v5 = vld [vmem:[#allocation71_spill] sm:$0xff] }
 0x415   :  { %v4544_v10 = vadd.f32 %v4543_v28, %v4542_v31  ;;  %v7698_v36 = vpop.eup %7697  ;;  %v4691_v11 = vmul.f32 %v11084_v59, %v11203_v58  ;;  %7701 = vpow2.f32 %v2699_v1  ;;  %v5579_v13 = vsel %vm1595_vm5, %v13119_v54, %v10880_v15 }
 0x416   :  { %v7700_v63 = vpop.eup %7699  ;;  %v4692_v45 = vmul.f32 %v11084_v59, %v11205_v0  ;;  %v4589_v6 = vmul.f32 %v7698_v36, %v11049_v23  ;;  %7703 = vpow2.f32 %v2701_v42  ;;  %v2817_v31 = vperm.slane %v2801_v41, 1 }
 0x417   :  { %v5621_v14 = vsel %vm1604_vm3, %v4544_v10, %v11111_v18  ;;  %v4590_v61 = vmul.f32 %v7700_v63, %v11051_v30  ;;  %v2848_v37 = vmul.f32 %v2816_v50, %v2768_v51  ;;  %v5580_v48 = vsel %vm1598_vm2, %v13120_v5, %v5579_v13  ;;  %v11227_v18 = vpop.permute.xlu1 %4659  ;;  %v13125_v13 = vld [vmem:[#allocation121_spill] sm:$0xff]  ;;  %v13130_v5 = vld [vmem:[#allocation52_spill] sm:$0xff] }
 0x418   :  { %v4717_v47 = vrot.slane %v4691_v11, 4  ;;  %v11220_v32 = vadd.f32 %v4589_v6, %v2844_v20  ;;  %v5581_v15 = vsel %vm1601_vm7, %v10994_v3, %v5580_v48  ;;  %v5612_v59 = vsel %vm1598_vm2, %v11108_v4, %v11121_v33 }
 0x419   :  { %v4723_v23 = vrot.slane %v4692_v45, 4  ;;  %v11229_v36 = vadd.f32 %v4590_v61, %v2845_v44  ;;  %v5582_v30 = vsel %vm1604_vm3, %v10969_v55, %v5581_v15  ;;  %v5613_v41 = vsel %vm1601_vm7, %v11106_v12, %v5612_v59 }
 0x41a   :  { %v4693_v28 = vmul.f32 %v4653_v27, %v11220_v32  ;;  %v13121_v3 = vrot.slane %v11113_v38, 1  ;;  %v5583_v4 = vsel %vm1607_vm8, %v10974_v19, %v5582_v30  ;;  %v5614_v33 = vsel %vm1604_vm3, %v4538_v26, %v5613_v41 }
 0x41b   :  { %v7702_v9 = vpop.eup %7701  ;;  %v4694_v34 = vmul.f32 %v4653_v27, %v11229_v36  ;;  %v2849_v20 = vmul.f32 %v2817_v31, %v2768_v51  ;;  %v5584_v55 = vsel %vm5519_vm9, %v4330_v49, %v5583_v4  ;;  %v5615_v12 = vsel %vm1607_vm8, %v11177_v56, %v5614_v33  ;;  %v13123_v51 = vld [vmem:[#allocation5_spill] sm:$0xff]  ;;  %v13124_v49 = vld [vmem:[#allocation16_spill] sm:$0xff]  ;;  %v13126_v56 = vld [vmem:[#allocation119_spill] sm:$0xff]  ;;  %v11261_v31 = vpop.f32.mrf.mxu3 }
 0x41c   :  { %v4562_v39 = vadd.f32 %v13121_v3, %v11113_v38  ;;  %v7704_v1 = vpop.eup %7703  ;;  %v4567_v42 = vrot.slane %v11127_v57, 1  ;;  %v4718_v10 = vadd.f32 %v4717_v47, %v4691_v11  ;;  %v4593_v38 = vmul.f32 %v7702_v9, %v11003_v46  ;;  %v13128_v46 = vld [vmem:[#allocation56_spill] sm:$0xff]  ;;  %13129 = vst [vmem:[#allocation6_spill] sm:$0xff] %v11261_v31  ;;  %v13132_v3 = vld [vmem:[#allocation101_spill] sm:$0xff] }
 0x41d   :  { %v13122_v19 = vrot.slane %v11150_v21, 1  ;;  %v4724_v26 = vadd.f32 %v4723_v23, %v4692_v45  ;;  %v4594_v27 = vmul.f32 %v7704_v1, %v11005_v35  ;;  %v5765_v54 = vmul.f32 %v13124_v49, %v13123_v51  ;;  %v13133_v4 = vld [vmem:[#allocation109_spill] sm:$0xff]  ;;  %v13134_v33 = vld [vmem:[#allocation124_spill] sm:$0xff]  ;;  %v13136_v1 = vld [vmem:[#allocation54_spill] sm:$0xff] }
 0x41e   :  { %v5616_v44 = vsel %vm5519_vm9, %v4562_v39, %v5615_v12  ;;  %7705 = vrcp.f32 %v13125_v13  ;;  %v13127_v63 = vsub.f32 0.0, %v13126_v56  ;;  %v11258_v11 = vadd.f32 %v4593_v38, %v2848_v37 }
 0x41f   :  { %v4556_v50 = vadd.f32 %v13122_v19, %v11150_v21  ;;  %v5779_v61 = vadd.f32 %v13128_v46, %v5584_v55  ;;  %v13131_v21 = vrot.slane %v13130_v5, 4  ;;  %v11267_v48 = vadd.f32 %v4594_v27, %v2849_v20  ;;  %v11287_v38 = vpop.permute.xlu1 %4680  ;;  %v13139_v46 = vld [vmem:[#allocation96_spill] sm:$0xff] }
 0x420   :  { %v5989_v6 = vmul.f32 1.442695, %v13127_v63  ;;  %v5781_v47 = vadd.f32 %v5765_v54, %v5616_v44  ;;  %v4568_v15 = vadd.f32 %v4567_v42, %v11127_v57  ;;  %v4719_v59 = vrot.slane %v4718_v10, 2  ;;  %v13137_v44 = vld [vmem:[#allocation19_spill] sm:$0xff]  ;;  %v13138_v54 = vld [vmem:[#allocation20_spill] sm:$0xff] }
 0x421   :  { %v3868_v45 = vadd.f32 %v13131_v21, %v13130_v5  ;;  %v5622_v35 = vsel %vm1607_vm8, %v4556_v50, %v5621_v14  ;;  %v4729_v23 = vrot.slane %v4693_v28, 4  ;;  %v11272_v37 = vmul.f32 %v11125_v7, %v11258_v11 }
 0x422   :  { %v4725_v30 = vrot.slane %v4724_v26, 2  ;;  %v11276_v41 = vmul.f32 %v11125_v7, %v11267_v48  ;;  %v6045_v39 = vmul.f32 %v13132_v3, %v5779_v61  ;;  %v6047_v14 = vmul.f32 %v13133_v4, %v5781_v47  ;;  %v13140_v61 = vld [vmem:[#allocation125_spill] sm:$0xff]  ;;  %v13142_v47 = vld [vmem:[#allocation102_spill] sm:$0xff] }
 0x423   :  { %v11281_v9 = vadd.f32 1.0, %v13134_v33  ;;  %v5960_v57 = vsub.f32 0.0, %v11261_v31  ;;  %v4735_v20 = vrot.slane %v4694_v34, 4  ;;  %v5623_v55 = vsel %vm5519_vm9, %v4568_v15, %v5622_v35  ;;  %v13146_v33 = vld [vmem:[#allocation99_spill] sm:$0xff] }
 0x424   :  { %v3869_v12 = vrot.slane %v3868_v45, 2  ;;  %v4008_v42 = vmul.f32 %v13136_v1, %v13092_v25  ;;  %v6059_v7 = vpack.c.bf16 %v6047_v14, %v6045_v39  ;;  %v5780_v19 = vadd.f32 %v13137_v44, %v10953_v53  ;;  %v7706_v50 = vpop.eup %7705  ;;  %v13143_v53 = vld [vmem:[#allocation113_spill] sm:$0xff] }
 0x425   :  { %13135 = vst [vmem:[#allocation65_spill] sm:$0xff] %v11281_v9  ;;  %v4720_v27 = vadd.f32 %v4719_v59, %v4718_v10  ;;  %v4730_v51 = vadd.f32 %v4729_v23, %v4693_v28  ;;  %v5782_v13 = vadd.f32 %v13138_v54, %v5623_v55  ;;  %v5336_v63 = vperm.slane %v13104_v16, 1 }
 0x426   :  { %v11295_v5 = vmul.f32 %v13140_v61, %v13139_v46  ;;  %7707 = vpow2.f32 %v5989_v6  ;;  %v4726_v21 = vadd.f32 %v4725_v30, %v4724_v26  ;;  %6206 = vmatmul.bf16.gmra.mxu0 %v6059_v7  ;;  %v3295_v25 = vperm.slane %v13095_v2, 7 }
 0x427   :  { %v4736_v35 = vadd.f32 %v4735_v20, %v4694_v34  ;;  %v6046_v15 = vmul.f32 %v13142_v47, %v5780_v19  ;;  %v6048_v3 = vmul.f32 %v13143_v53, %v5782_v13  ;;  %5341 = vperm.xlu1 %7343, %v5336_v63   ;;  %v3544_v28 = vperm.slane %v13108_v29, 6 }
 0x428   :  { %13141 = vst [vmem:[#allocation68_spill] sm:$0xff] %v11295_v5  ;;  %v11301_v10 = vadd.f32 %v3869_v12, %v3868_v45  ;;  %v4099_v59 = vrot.slane %v4008_v42, 4  ;;  %3300 = vperm.xlu2 %7342, %v3295_v25   ;;  %v2629_v6 = vsel %vm1604_vm3, %v13111_v24, %v13110_v40  ;;  %v2802_v2 = vsel %vm1604_vm3, %v11137_v17, %v13114_v8 }
 0x429   :  { %v4721_v34 = vrot.slane %v4720_v27, 1  ;;  %v4731_v26 = vrot.slane %v4730_v51, 2  ;;  %v6060_v23 = vpack.c.bf16 %v6048_v3, %v6046_v15  ;;  %3549 = vperm.xlu0 %7341, %v3544_v28   ;;  %v2630_v30 = vrot.slane %v2629_v6, 5 }
 0x42a   :  { %13144 = vst [vmem:[#allocation70_spill] sm:$0xff] %v11301_v10  ;;  %v11309_v39 = vmul.f32 1.442695, %v5960_v57  ;;  %v4727_v4 = vrot.slane %v4726_v21, 1  ;;  %v2620_v45 = vsel %vm1590_vm4, %v13111_v24, %v13110_v40  ;;  %v2793_v14 = vsel %vm1590_vm4, %v11137_v17, %v13114_v8 }
 0x42b   :  { %v11318_v20 = vmul.f32 %v7706_v50, %v13146_v33  ;;  %v4737_v55 = vrot.slane %v4736_v35, 2  ;;  %6235 = vmatmul.bf16.vlgmr.msrb.gmra.mxu1 %v6060_v23  ;;  %v2645_v12 = vperm.slane %v2630_v30, 0  ;;  %v2646_v1 = vperm.slane %v2630_v30, 1 }
 0x42c   :  { %13145 = vst [vmem:[#allocation73_spill] sm:$0xff] %v11309_v39  ;;  %v11320_v7 = vpop.eup %7707  ;;  %v11323_v44 = vadd.f32 %v4099_v59, %v4008_v42  ;;  %v2635_v19 = vperm.slane %v2620_v45, 0  ;;  %v2636_v54 = vperm.slane %v2620_v45, 1  ;;  %v11325_v13 = vadd.f32 %v4721_v34, %v4720_v27  ;;  %v2740_v42 = vpop.permute.xlu1 %2739 }
 0x42d   :  { %13147 = vst [vmem:[#allocation74_spill] sm:$0xff] %v11318_v20  ;;  %v11327_v63 = vadd.f32 %v4731_v26, %v4730_v51  ;;  %v2677_v46 = vmul.f32 %v2645_v12, %v9435_v52  ;;  %v2678_v50 = vmul.f32 %v2646_v1, %v13085_v22  ;;  %v11331_v61 = vadd.f32 %v4727_v4, %v4726_v21 }
 0x42e   :  { %13148 = vst [vmem:[#allocation75_spill] sm:$0xff] %v11320_v7  ;;  %v4753_v25 = vrot.slane %v11272_v37, 4  ;;  %v2667_v47 = vmul.f32 %v2635_v19, %v9435_v52  ;;  %v2668_v15 = vmul.f32 %v2636_v54, %v13085_v22  ;;  %v11336_v53 = vadd.f32 %v4737_v55, %v4736_v35  ;;  %v2775_v35 = vpop.permute.xlu2 %2774  ;;  %v13154_v7 = vld [vmem:[#allocation77_spill] sm:$0xff] }
 0x42f   :  { %13149 = vst [vmem:[#allocation76_spill] sm:$0xff] %v11323_v44  ;;  %v2703_v3 = vmul.f32 1.442695, %v2677_v46  ;;  %v2705_v27 = vmul.f32 1.442695, %v2678_v50  ;;  %v2803_v28 = vrot.slane %v2802_v2, 5  ;;  %v2625_v2 = vsel %vm1598_vm2, %v13111_v24, %v13110_v40 }
 0x430   :  { %v2683_v51 = vmul.f32 1.442695, %v2667_v47  ;;  %v2685_v59 = vmul.f32 1.442695, %v2668_v15  ;;  %v5343_v6 = vperm.slane %v13104_v16, 2  ;;  %v5329_v34 = vperm.slane %v13104_v16, 0 }
 0x431   :  { %v4733_v21 = vrot.slane %v11327_v63, 1  ;;  %v4759_v26 = vrot.slane %v11276_v41, 4  ;;  %7709 = vpow2.f32 %v2703_v3  ;;  %v3551_v23 = vperm.slane %v13108_v29, 7 }
 0x432   :  { %v11344_v30 = vadd.f32 %v4753_v25, %v11272_v37  ;;  %7711 = vpow2.f32 %v2705_v27  ;;  %5348 = vperm.xlu1 %7343, %v5343_v6   ;;  %5334 = vperm.xlu2 %7342, %v5329_v34   ;;  %v2798_v4 = vsel %vm1598_vm2, %v11137_v17, %v13114_v8  ;;  %v2818_v45 = vperm.slane %v2803_v28, 0 }
 0x433   :  { %v2819_v33 = vperm.slane %v2803_v28, 1  ;;  %7713 = vpow2.f32 %v2683_v51  ;;  %3556 = vperm.xlu0 %7341, %v3551_v23   ;;  %v2626_v55 = vrot.slane %v2625_v2, 3  ;;  %v4739_v37 = vrot.slane %v11336_v53, 1  ;;  %v13150_v2 = vld [vmem:[#allocation33_spill] sm:$0xff] }
 0x434   :  { %7715 = vpow2.f32 %v2685_v59  ;;  %v2808_v12 = vperm.slane %v2793_v14, 0  ;;  %v2809_v1 = vperm.slane %v2793_v14, 1  ;;  %v2850_v19 = vmul.f32 %v2818_v45, %v2775_v35  ;;  %v2761_v23 = vpop.permute.xlu1 %2760 }
 0x435   :  { %v2851_v54 = vmul.f32 %v2819_v33, %v2775_v35  ;;  %v2641_v46 = vperm.slane %v2626_v55, 0  ;;  %v2642_v50 = vperm.slane %v2626_v55, 1  ;;  %v2799_v15 = vrot.slane %v2798_v4, 3  ;;  %v13151_v4 = vld [vmem:[#allocation35_spill] sm:$0xff] }
 0x436   :  { %v2840_v25 = vmul.f32 %v2808_v12, %v2740_v42  ;;  %v2841_v47 = vmul.f32 %v2809_v1, %v2740_v42  ;;  %v2631_v3 = vsel %vm1607_vm8, %v13111_v24, %v13110_v40  ;;  %v5350_v59 = vperm.slane %v13104_v16, 3 }
 0x437   :  { %v7710_v27 = vpop.eup %7709  ;;  %v2673_v28 = vmul.f32 %v2641_v46, %v9435_v52  ;;  %v2674_v51 = vmul.f32 %v2642_v50, %v13085_v22  ;;  %v5357_v14 = vperm.slane %v13104_v16, 4  ;;  %v2632_v35 = vrot.slane %v2631_v3, 6 }
 0x438   :  { %v7712_v6 = vpop.eup %7711  ;;  %v4595_v34 = vmul.f32 %v7710_v27, %v11153_v43  ;;  %v2804_v42 = vsel %vm1607_vm8, %v11137_v17, %v13114_v8  ;;  %v2879_v45 = vsel %vm1595_vm5, %v13151_v4, %v13150_v2  ;;  %v5146_v46 = vperm.slane %v13086_v60, 7  ;;  %v13152_v43 = vld [vmem:[#allocation72_spill] sm:$0xff]  ;;  %v13155_v60 = vld [vmem:[#allocation86_spill] sm:$0xff] }
 0x439   :  { %v7714_v33 = vpop.eup %7713  ;;  %v4596_v55 = vmul.f32 %v7712_v6, %v11159_v62  ;;  %v2695_v12 = vmul.f32 1.442695, %v2673_v28  ;;  %v2697_v1 = vmul.f32 1.442695, %v2674_v51  ;;  %v2647_v27 = vperm.slane %v2632_v35, 0 }
 0x43a   :  { %v7716_v50 = vpop.eup %7715  ;;  %v11369_v57 = vadd.f32 %v4595_v34, %v2850_v19  ;;  %v4585_v3 = vmul.f32 %v7714_v33, %v13152_v43  ;;  %5355 = vperm.xlu1 %7343, %v5350_v59   ;;  %5362 = vperm.xlu2 %7342, %v5357_v14   ;;  %v2648_v31 = vperm.slane %v2632_v35, 1  ;;  %v11373_v56 = vadd.f32 %v4759_v26, %v11276_v41  ;;  %v13156_v14 = vld [vmem:[#allocation81_spill] sm:$0xff] }
 0x43b   :  { %v11375_v9 = vadd.f32 %v4596_v55, %v2851_v54  ;;  %v4586_v62 = vmul.f32 %v7716_v50, %v13154_v7  ;;  %7717 = vpow2.f32 %v2695_v12  ;;  %5151 = vperm.xlu0 %7341, %v5146_v46   ;;  %v2679_v51 = vmul.f32 %v2647_v27, %v9435_v52 }
 0x43c   :  { %v11380_v28 = vmul.f32 %v13155_v60, %v11369_v57  ;;  %v11382_v19 = vadd.f32 %v4585_v3, %v2840_v25  ;;  %7719 = vpow2.f32 %v2697_v1  ;;  %v11386_v59 = vadd.f32 %v4733_v21, %v11327_v63 }
 0x43d   :  { %13153 = vst [vmem:[#allocation48_spill] sm:$0xff] %v11375_v9  ;;  %v11390_v41 = vmul.f32 %v13155_v60, %v11375_v9  ;;  %v11392_v26 = vadd.f32 %v4586_v62, %v2841_v47  ;;  %v2680_v7 = vmul.f32 %v2648_v31, %v13085_v22  ;;  %v4755_v54 = vrot.slane %v11344_v30, 2  ;;  %v13157_v62 = vld [vmem:[#allocation78_spill] sm:$0xff] }
 0x43e   :  { %v4689_v25 = vmul.f32 %v13156_v14, %v11382_v19  ;;  %v2814_v6 = vperm.slane %v2799_v15, 0  ;;  %v2707_v34 = vmul.f32 1.442695, %v2679_v51  ;;  %v2815_v63 = vperm.slane %v2799_v15, 1  ;;  %v2782_v51 = vpop.permute.xlu1 %2781 }
 0x43f   :  { %v4690_v35 = vmul.f32 %v13156_v14, %v11392_v26  ;;  %v2709_v21 = vmul.f32 1.442695, %v2680_v7  ;;  %v2805_v33 = vrot.slane %v2804_v42, 6  ;;  %v2880_v47 = vrot.slane %v2879_v45, 2  ;;  %v11403_v7 = vpop.permute.xlu0 %4877  ;;  %v13158_v14 = vld [vmem:[#allocation79_spill] sm:$0xff] }
 0x440   :  { %v4705_v55 = vrot.slane %v4689_v25, 4  ;;  %v2846_v12 = vmul.f32 %v2814_v6, %v2761_v23  ;;  %7721 = vpow2.f32 %v2707_v34  ;;  %v4740_v31 = vadd.f32 %v4739_v37, %v11336_v53 }
 0x441   :  { %v7718_v1 = vpop.eup %7717  ;;  %v4711_v46 = vrot.slane %v4690_v35, 4  ;;  %v2847_v50 = vmul.f32 %v2815_v63, %v2761_v23  ;;  %7723 = vpow2.f32 %v2709_v21  ;;  %v4761_v3 = vrot.slane %v11373_v56, 2 }
 0x442   :  { %v7720_v43 = vpop.eup %7719  ;;  %v4706_v27 = vadd.f32 %v4705_v55, %v4689_v25  ;;  %v4591_v60 = vmul.f32 %v7718_v1, %v13157_v62  ;;  %v2895_v15 = vperm.slane %v2880_v47, 0  ;;  %v2820_v45 = vperm.slane %v2805_v33, 0 }
 0x443   :  { %v4712_v42 = vadd.f32 %v4711_v46, %v4690_v35  ;;  %v4592_v6 = vmul.f32 %v7720_v43, %v13158_v14  ;;  %v2896_v34 = vperm.slane %v2880_v47, 1  ;;  %v2821_v37 = vperm.slane %v2805_v33, 1  ;;  %v11414_v35 = vpop.permute.xlu2 %4905 }
 0x444   :  { %v4707_v10 = vrot.slane %v4706_v27, 2  ;;  %v11406_v53 = vadd.f32 %v4591_v60, %v2846_v12  ;;  %v2927_v23 = vmul.f32 %v2895_v15, %v9435_v52  ;;  %v11410_v63 = vadd.f32 %v4755_v54, %v11344_v30  ;;  %13159 = vst [vmem:[#allocation82_spill] sm:$0xff] %v11414_v35  ;;  %v13160_v30 = vld [vmem:[#allocation80_spill] sm:$0xff] }
 0x445   :  { %v4713_v25 = vrot.slane %v4712_v42, 2  ;;  %v11412_v21 = vadd.f32 %v4592_v6, %v2847_v50  ;;  %v2852_v55 = vmul.f32 %v2820_v45, %v2782_v51  ;;  %v2853_v46 = vmul.f32 %v2821_v37, %v2782_v51  ;;  %v13161_v6 = vld [vmem:[#allocation84_spill] sm:$0xff] }
 0x446   :  { %v7722_v1 = vpop.eup %7721  ;;  %v4708_v62 = vadd.f32 %v4707_v10, %v4706_v27  ;;  %v4695_v47 = vmul.f32 %v11227_v18, %v11406_v53  ;;  %v2947_v12 = vmul.f32 1.442695, %v2927_v23  ;;  %v2928_v50 = vmul.f32 %v2896_v34, %v13085_v22  ;;  %v13162_v27 = vld [vmem:[#allocation8_spill] sm:$0xff] }
 0x447   :  { %v7724_v43 = vpop.eup %7723  ;;  %v4714_v33 = vadd.f32 %v4713_v25, %v4712_v42  ;;  %v4696_v60 = vmul.f32 %v11227_v18, %v11412_v21  ;;  %v4597_v54 = vmul.f32 %v7722_v1, %v13160_v30  ;;  %v11425_v45 = vmul.f32 %v13151_v4, %v13162_v27 }
 0x448   :  { %v4709_v15 = vrot.slane %v4708_v62, 1  ;;  %v4741_v14 = vrot.slane %v4695_v47, 4  ;;  %v4598_v10 = vmul.f32 %v7724_v43, %v13161_v6  ;;  %v4765_v51 = vrot.slane %v11380_v28, 4 }
 0x449   :  { %v4715_v37 = vrot.slane %v4714_v33, 1  ;;  %v4747_v23 = vrot.slane %v4696_v60, 4  ;;  %v11428_v42 = vadd.f32 %v4597_v54, %v2852_v55  ;;  %7725 = vpow2.f32 %v2947_v12  ;;  %v13163_v55 = vld [vmem:[#allocation34_spill] sm:$0xff]  ;;  %v11446_v12 = vpop.permute.xlu0 %4884 }
 0x44a   :  { %v4710_v25 = vadd.f32 %v4709_v15, %v4708_v62  ;;  %v4742_v18 = vadd.f32 %v4741_v14, %v4695_v47  ;;  %v11430_v39 = vadd.f32 %v4598_v10, %v2853_v46  ;;  %v2949_v30 = vmul.f32 1.442695, %v2928_v50 }
 0x44b   :  { %v4716_v34 = vadd.f32 %v4715_v37, %v4714_v33  ;;  %v4748_v1 = vadd.f32 %v4747_v23, %v4696_v60  ;;  %v4701_v43 = vmul.f32 %v11287_v38, %v11428_v42  ;;  %v3052_v62 = vsel %vm1595_vm5, %v11425_v45, %v13163_v55  ;;  %v3010_v37 = vpop.permute.xlu2 %3009 }
 0x44c   :  { %v5642_v6 = vsel %vm1592_vm1, %v11325_v13, %v4710_v25  ;;  %v4743_v20 = vrot.slane %v4742_v18, 2  ;;  %v4702_v5 = vmul.f32 %v11287_v38, %v11430_v39  ;;  %v11442_v47 = vadd.f32 %v4761_v3, %v11373_v56 }
 0x44d   :  { %v5649_v46 = vsel %vm1592_vm1, %v11331_v61, %v4716_v34  ;;  %v5643_v33 = vsel %vm1595_vm5, %v11386_v59, %v5642_v6  ;;  %v4749_v13 = vrot.slane %v4748_v1, 2  ;;  %v4771_v60 = vrot.slane %v11390_v41, 4 }
 0x44e   :  { %v5650_v38 = vsel %vm1595_vm5, %v4740_v31, %v5649_v46  ;;  %v4744_v54 = vadd.f32 %v4743_v20, %v4742_v18  ;;  %7727 = vpow2.f32 %v2949_v30  ;;  %v4766_v50 = vadd.f32 %v4765_v51, %v11380_v28 }
 0x44f   :  { %v4750_v15 = vadd.f32 %v4749_v13, %v4748_v1  ;;  %v3053_v56 = vrot.slane %v3052_v62, 2  ;;  %v3523_v3 = vperm.slane %v13108_v29, 3  ;;  %v7726_v14 = vpop.eup %7725  ;;  %v4757_v61 = vrot.slane %v11410_v63, 1 }
 0x450   :  { %v4745_v10 = vrot.slane %v4744_v54, 1  ;;  %v3509_v59 = vperm.slane %v13108_v29, 1  ;;  %v2633_v23 = vsel %vm1610_vm6, %v13110_v40, %v13111_v24  ;;  %v4777_v20 = vrot.slane %v4701_v43, 4 }
 0x451   :  { %v4751_v31 = vrot.slane %v4750_v15, 1  ;;  %v3068_v25 = vperm.slane %v3053_v56, 0  ;;  %v3069_v18 = vperm.slane %v3053_v56, 1  ;;  %3528 = vperm.xlu1 %7343, %v3523_v3   ;;  %v4772_v28 = vadd.f32 %v4771_v60, %v11390_v41 }
 0x452   :  { %v4746_v51 = vadd.f32 %v4745_v10, %v4744_v54  ;;  %v4821_v34 = vmul.f32 %v7726_v14, %v11220_v32  ;;  %3514 = vperm.xlu2 %7342, %v3509_v59   ;;  %v2634_v1 = vrot.slane %v2633_v23, 7  ;;  %v4767_v30 = vrot.slane %v4766_v50, 2 }
 0x453   :  { %v4752_v6 = vadd.f32 %v4751_v31, %v4750_v15  ;;  %v3100_v62 = vmul.f32 %v3068_v25, %v3010_v37  ;;  %v3101_v46 = vmul.f32 %v3069_v18, %v3010_v37  ;;  %v4783_v40 = vrot.slane %v4702_v5, 4  ;;  %v11477_v37 = vpop.permute.xlu0 %4891 }
 0x454   :  { %v7728_v13 = vpop.eup %7727  ;;  %v11462_v35 = vsel %vm1598_vm2, %v4746_v51, %v5643_v33  ;;  %v2649_v24 = vperm.slane %v2634_v1, 0  ;;  %v2650_v9 = vperm.slane %v2634_v1, 1  ;;  %v4778_v41 = vadd.f32 %v4777_v20, %v4701_v43  ;;  %v13165_v20 = vld [vmem:[#allocation7_spill] sm:$0xff] }
 0x455   :  { %v11465_v56 = vsel %vm1598_vm2, %v4752_v6, %v5650_v38  ;;  %v4822_v60 = vmul.f32 %v7728_v13, %v11229_v36  ;;  %v11468_v32 = vadd.f32 %v4821_v34, %v3100_v62  ;;  %v4773_v54 = vrot.slane %v4772_v28, 2  ;;  %v13170_v6 = vld [vmem:[#allocation15_spill] sm:$0xff] }
 0x456   :  { %13164 = vst [vmem:[#allocation83_spill] sm:$0xff] %v11465_v56  ;;  %v2681_v15 = vmul.f32 %v2649_v24, %v9435_v52  ;;  %v2682_v3 = vmul.f32 %v2650_v9, %v13085_v22  ;;  %v2806_v33 = vsel %vm1610_vm6, %v13114_v8, %v11137_v17  ;;  %v4763_v10 = vrot.slane %v11442_v47, 1 }
 0x457   :  { %v4768_v38 = vadd.f32 %v4767_v30, %v4766_v50  ;;  %v11479_v43 = vadd.f32 %v4822_v60, %v3101_v46  ;;  %v4784_v36 = vadd.f32 %v4783_v40, %v4702_v5  ;;  %v11484_v9 = vsel %vm1601_vm7, %v11425_v45, %v13163_v55  ;;  %v2789_v30 = vpop.permute.xlu1 %2788 }
 0x458   :  { %v2711_v59 = vmul.f32 1.442695, %v2681_v15  ;;  %v2713_v23 = vmul.f32 1.442695, %v2682_v3  ;;  %v11487_v31 = vadd.f32 %v4757_v61, %v11410_v63  ;;  %v4779_v17 = vrot.slane %v4778_v41, 2  ;;  %v13172_v15 = vld [vmem:[#allocation9_spill] sm:$0xff] }
 0x459   :  { %v2807_v8 = vrot.slane %v2806_v33, 7  ;;  %v11491_v50 = vmul.f32 %v13124_v49, %v13165_v20  ;;  %v4774_v25 = vadd.f32 %v4773_v54, %v4772_v28  ;;  %v5371_v5 = vperm.slane %v13104_v16, 6  ;;  %v11504_v28 = vpop.permute.xlu2 %3023 }
 0x45a   :  { %7729 = vpow2.f32 %v2711_v59  ;;  %v3537_v18 = vperm.slane %v13108_v29, 5  ;;  %v11496_v51 = vadd.f32 %v4763_v10, %v11442_v47  ;;  %v4925_v34 = vmul.f32 %v11446_v12, %v11468_v32  ;;  %v13169_v47 = vld [vmem:[#allocation10_spill] sm:$0xff] }
 0x45b   :  { %13166 = vst [vmem:[#allocation89_spill] sm:$0xff] %v11491_v50  ;;  %7731 = vpow2.f32 %v2713_v23  ;;  %v11502_v63 = vmul.f32 %v13124_v49, %v13162_v27  ;;  %v4769_v61 = vrot.slane %v4768_v38, 1  ;;  %v4785_v1 = vrot.slane %v4784_v36, 2  ;;  %5376 = vperm.xlu1 %7343, %v5371_v5   ;;  %v11530_v14 = vpop.permute.xlu0 %4912 }
 0x45c   :  { %13167 = vst [vmem:[#allocation90_spill] sm:$0xff] %v11496_v51  ;;  %3542 = vperm.xlu2 %7342, %v3537_v18   ;;  %v2887_v29 = vsel %vm1607_vm8, %v13151_v4, %v13150_v2  ;;  %v11511_v62 = vmul.f32 %v13170_v6, %v13169_v47  ;;  %v4780_v46 = vadd.f32 %v4779_v17, %v4778_v41  ;;  %v2822_v13 = vperm.slane %v2807_v8, 0 }
 0x45d   :  { %13168 = vst [vmem:[#allocation46_spill] sm:$0xff] %v11502_v63  ;;  %v2888_v40 = vrot.slane %v2887_v29, 6  ;;  %v3060_v27 = vsel %vm1607_vm8, %v11425_v45, %v13163_v55  ;;  %v4775_v24 = vrot.slane %v4774_v25, 1  ;;  %v2823_v60 = vperm.slane %v2807_v8, 1 }
 0x45e   :  { %13171 = vst [vmem:[#allocation98_spill] sm:$0xff] %v11511_v62  ;;  %v2877_v54 = vsel %vm1592_vm1, %v13151_v4, %v13150_v2  ;;  %v11521_v3 = vmul.f32 %v13170_v6, %v13172_v15  ;;  %v4961_v33 = vrot.slane %v4925_v34, 4  ;;  %v2854_v10 = vmul.f32 %v2822_v13, %v2789_v30  ;;  %v13175_v15 = vld [vmem:[#allocation63_spill] sm:$0xff] }
 0x45f   :  { %v2903_v59 = vperm.slane %v2888_v40, 0  ;;  %v2904_v41 = vperm.slane %v2888_v40, 1  ;;  %v11523_v17 = vadd.f32 %v4769_v61, %v4768_v38  ;;  %v2855_v20 = vmul.f32 %v2823_v60, %v2789_v30  ;;  %v13177_v61 = vld [vmem:[#allocation64_spill] sm:$0xff] }
 0x460   :  { %13173 = vst [vmem:[#allocation100_spill] sm:$0xff] %v11521_v3  ;;  %v7730_v23 = vpop.eup %7729  ;;  %v2878_v5 = vrot.slane %v2877_v54, 1  ;;  %v3050_v8 = vsel %vm1592_vm1, %v11425_v45, %v13163_v55  ;;  %v4781_v29 = vrot.slane %v4780_v46, 1  ;;  %v11528_v47 = vadd.f32 %v4785_v1, %v4784_v36 }
 0x461   :  { %13174 = vst [vmem:[#allocation93_spill] sm:$0xff] %v11523_v17  ;;  %v7732_v18 = vpop.eup %7731  ;;  %v4599_v6 = vmul.f32 %v7730_v23, %v13175_v15  ;;  %v2935_v13 = vmul.f32 %v2903_v59, %v9435_v52  ;;  %v11534_v40 = vadd.f32 %v4775_v24, %v4774_v25  ;;  %v4926_v38 = vmul.f32 %v11446_v12, %v11479_v43  ;;  %v13179_v12 = vld [vmem:[#allocation87_spill] sm:$0xff] }
 0x462   :  { %v4600_v30 = vmul.f32 %v7732_v18, %v13177_v61  ;;  %v2936_v60 = vmul.f32 %v2904_v41, %v13085_v22  ;;  %v4962_v54 = vadd.f32 %v4961_v33, %v4925_v34  ;;  %v3061_v1 = vrot.slane %v3060_v27, 6 }
 0x463   :  { %13176 = vst [vmem:[#allocation94_spill] sm:$0xff] %v11534_v40  ;;  %v11540_v49 = vadd.f32 %v4599_v6, %v2854_v10  ;;  %v2963_v36 = vmul.f32 1.442695, %v2935_v13  ;;  %v2893_v23 = vperm.slane %v2878_v5, 0  ;;  %v2894_v15 = vperm.slane %v2878_v5, 1  ;;  %v3038_v6 = vpop.permute.xlu2 %3037 }
 0x464   :  { %v11542_v44 = vadd.f32 %v4600_v30, %v2855_v20  ;;  %v2965_v3 = vmul.f32 1.442695, %v2936_v60  ;;  %v11544_v59 = vadd.f32 %v4781_v29, %v4780_v46  ;;  %v4963_v10 = vrot.slane %v4962_v54, 2 }
 0x465   :  { %v4703_v24 = vmul.f32 %v13179_v12, %v11540_v49  ;;  %7733 = vpow2.f32 %v2963_v36  ;;  %v2925_v27 = vmul.f32 %v2893_v23, %v9435_v52  ;;  %v2926_v33 = vmul.f32 %v2894_v15, %v13085_v22 }
 0x466   :  { %13178 = vst [vmem:[#allocation104_spill] sm:$0xff] %v11544_v59  ;;  %v4704_v34 = vmul.f32 %v13179_v12, %v11542_v44  ;;  %7735 = vpow2.f32 %v2965_v3  ;;  %v4967_v41 = vrot.slane %v4926_v38, 4  ;;  %v3076_v20 = vperm.slane %v3061_v1, 0  ;;  %v3003_v12 = vpop.permute.xlu0 %3002 }
 0x467   :  { %v5378_v46 = vperm.slane %v13104_v16, 7  ;;  %v2943_v5 = vmul.f32 1.442695, %v2925_v27  ;;  %v2945_v18 = vmul.f32 1.442695, %v2926_v33  ;;  %v3051_v29 = vrot.slane %v3050_v8, 1 }
 0x468   :  { %v2883_v13 = vsel %vm1601_vm7, %v13151_v4, %v13150_v2  ;;  %v3057_v61 = vrot.slane %v11484_v9, 4  ;;  %v3077_v3 = vperm.slane %v3061_v1, 1  ;;  %v3108_v30 = vmul.f32 %v3076_v20, %v3038_v6 }
 0x469   :  { %5383 = vperm.xlu2 %7342, %v5378_v46   ;;  %v2884_v60 = vrot.slane %v2883_v13, 4  ;;  %v4789_v36 = vrot.slane %v4703_v24, 4  ;;  %7737 = vpow2.f32 %v2943_v5  ;;  %v11561_v23 = vsel %vm1610_vm6, %v13163_v55, %v11425_v45  ;;  %v11567_v13 = vpop.permute.xlu1 %4870 }
 0x46a   :  { %v2881_v16 = vsel %vm1598_vm2, %v13151_v4, %v13150_v2  ;;  %v3109_v15 = vmul.f32 %v3077_v3, %v3038_v6  ;;  %7739 = vpow2.f32 %v2945_v18  ;;  %v4964_v33 = vadd.f32 %v4963_v10, %v4962_v54 }
 0x46b   :  { %v7734_v8 = vpop.eup %7733  ;;  %v2899_v9 = vperm.slane %v2884_v60, 0  ;;  %v2900_v1 = vperm.slane %v2884_v60, 1  ;;  %v4968_v20 = vadd.f32 %v4967_v41, %v4926_v38  ;;  %v3066_v5 = vperm.slane %v3051_v29, 0 }
 0x46c   :  { %v7736_v27 = vpop.eup %7735  ;;  %v4829_v46 = vmul.f32 %v7734_v8, %v11428_v42  ;;  %v3067_v62 = vperm.slane %v3051_v29, 1  ;;  %v4790_v6 = vadd.f32 %v4789_v36, %v4703_v24  ;;  %v4795_v18 = vrot.slane %v4704_v34, 4 }
 0x46d   :  { %v4830_v25 = vmul.f32 %v7736_v27, %v11430_v39  ;;  %v2931_v63 = vmul.f32 %v2899_v9, %v9435_v52  ;;  %v2932_v40 = vmul.f32 %v2900_v1, %v13085_v22  ;;  %v3098_v60 = vmul.f32 %v3066_v5, %v3003_v12 }
 0x46e   :  { %v11572_v3 = vadd.f32 %v4829_v46, %v3108_v30  ;;  %v2882_v42 = vrot.slane %v2881_v16, 3  ;;  %v3072_v41 = vperm.slane %v3057_v61, 0  ;;  %v3073_v8 = vperm.slane %v3057_v61, 1 }
 0x46f   :  { %v11574_v51 = vadd.f32 %v4830_v25, %v3109_v15  ;;  %v2955_v38 = vmul.f32 1.442695, %v2931_v63  ;;  %v2957_v54 = vmul.f32 1.442695, %v2932_v40  ;;  %v7738_v10 = vpop.eup %7737  ;;  %v3099_v29 = vmul.f32 %v3067_v62, %v3003_v12 }
 0x470   :  { %13180 = vst [vmem:[#allocation105_spill] sm:$0xff] %v11572_v3  ;;  %v4933_v39 = vmul.f32 %v11530_v14, %v11572_v3  ;;  %v7740_v9 = vpop.eup %7739  ;;  %v4965_v27 = vrot.slane %v4964_v33, 1  ;;  %v4969_v1 = vrot.slane %v4968_v20, 2  ;;  %v4819_v24 = vmul.f32 %v7738_v10, %v11203_v58 }
 0x471   :  { %13181 = vst [vmem:[#allocation88_spill] sm:$0xff] %v11574_v51  ;;  %7741 = vpow2.f32 %v2955_v38  ;;  %v4791_v30 = vrot.slane %v4790_v6, 2  ;;  %v4796_v36 = vadd.f32 %v4795_v18, %v4704_v34  ;;  %v4820_v25 = vmul.f32 %v7740_v9, %v11205_v0 }
 0x472   :  { %7743 = vpow2.f32 %v2957_v54  ;;  %v4934_v63 = vmul.f32 %v11530_v14, %v11574_v51  ;;  %v11582_v40 = vadd.f32 %v4819_v24, %v3098_v60  ;;  %v2897_v61 = vperm.slane %v2882_v42, 0 }
 0x473   :  { %v2898_v16 = vperm.slane %v2882_v42, 1  ;;  %v5009_v15 = vrot.slane %v4933_v39, 4  ;;  %v11584_v62 = vadd.f32 %v4820_v25, %v3099_v29  ;;  %v3054_v58 = vsel %vm1598_vm2, %v11425_v45, %v13163_v55  ;;  %v4899_v29 = vpop.permute.xlu1 %4898 }
 0x474   :  { %v2889_v34 = vsel %vm1610_vm6, %v13150_v2, %v13151_v4  ;;  %v13182_v0 = vrot.slane %v11528_v47, 1  ;;  %v3104_v14 = vmul.f32 %v3072_v41, %v11504_v28  ;;  %v2929_v46 = vmul.f32 %v2897_v61, %v9435_v52 }
 0x475   :  { %v2930_v5 = vmul.f32 %v2898_v16, %v13085_v22  ;;  %v11600_v18 = vadd.f32 %v4965_v27, %v4964_v33  ;;  %v11602_v60 = vadd.f32 %v4969_v1, %v4968_v20  ;;  %v4797_v38 = vrot.slane %v4796_v36, 2 }
 0x476   :  { %v11595_v12 = vadd.f32 %v13182_v0, %v11528_v47  ;;  %v3105_v54 = vmul.f32 %v3073_v8, %v11504_v28  ;;  %v11605_v10 = vadd.f32 %v4791_v30, %v4790_v6  ;;  %v3063_v47 = vrot.slane %v11561_v23, 7 }
 0x477   :  { %v7742_v42 = vpop.eup %7741  ;;  %v2951_v9 = vmul.f32 1.442695, %v2929_v46  ;;  %v2953_v24 = vmul.f32 1.442695, %v2930_v5  ;;  %v5010_v25 = vadd.f32 %v5009_v15, %v4933_v39  ;;  %v5015_v61 = vrot.slane %v4934_v63, 4  ;;  %v3017_v15 = vpop.permute.xlu0 %3016 }
 0x478   :  { %13183 = vst [vmem:[#allocation47_spill] sm:$0xff] %v11595_v12  ;;  %v7744_v41 = vpop.eup %7743  ;;  %v4825_v16 = vmul.f32 %v7742_v42, %v11258_v11  ;;  %v3055_v33 = vrot.slane %v3054_v58, 3  ;;  %v4923_v20 = vmul.f32 %v11403_v7, %v11582_v40  ;;  %v4924_v28 = vmul.f32 %v11403_v7, %v11584_v62 }
 0x479   :  { %v4826_v6 = vmul.f32 %v7744_v41, %v11267_v48  ;;  %7745 = vpow2.f32 %v2951_v9  ;;  %v4971_v8 = vrot.slane %v11602_v60, 1  ;;  %v2890_v27 = vrot.slane %v2889_v34, 7 }
 0x47a   :  { %v11615_v23 = vadd.f32 %v4825_v16, %v3104_v14  ;;  %7747 = vpow2.f32 %v2953_v24  ;;  %v4798_v39 = vadd.f32 %v4797_v38, %v4796_v36  ;;  %v3078_v11 = vperm.slane %v3063_v47, 0  ;;  %v3045_v24 = vpop.permute.xlu2 %3044 }
 0x47b   :  { %v11617_v1 = vadd.f32 %v4826_v6, %v3105_v54  ;;  %v3079_v30 = vperm.slane %v3063_v47, 1  ;;  %v5011_v58 = vrot.slane %v5010_v25, 2  ;;  %v5016_v0 = vadd.f32 %v5015_v61, %v4934_v63  ;;  %v11634_v3 = vpop.permute.xlu1 %4919 }
 0x47c   :  { %v4929_v46 = vmul.f32 %v4899_v29, %v11615_v23  ;;  %v3070_v7 = vperm.slane %v3055_v33, 0  ;;  %v4793_v48 = vrot.slane %v11605_v10, 1  ;;  %v4949_v5 = vrot.slane %v4923_v20, 4 }
 0x47d   :  { %v4955_v42 = vrot.slane %v4924_v28, 4  ;;  %v3071_v9 = vperm.slane %v3055_v33, 1  ;;  %v4930_v14 = vmul.f32 %v4899_v29, %v11617_v1  ;;  %v2905_v36 = vperm.slane %v2890_v27, 0 }
 0x47e   :  { %v3102_v34 = vmul.f32 %v3070_v7, %v3017_v15  ;;  %v2906_v38 = vperm.slane %v2890_v27, 1  ;;  %v4985_v41 = vrot.slane %v4929_v46, 4  ;;  %v2876_v63 = vsel %vm1590_vm4, %v13151_v4, %v13150_v2 }
 0x47f   :  { %v7746_v54 = vpop.eup %7745  ;;  %v3103_v47 = vmul.f32 %v3071_v9, %v3017_v15  ;;  %v11628_v61 = vsel %vm1590_vm4, %v11425_v45, %v13163_v55  ;;  %v5012_v33 = vadd.f32 %v5011_v58, %v5010_v25  ;;  %v5017_v6 = vrot.slane %v5016_v0, 2 }
 0x480   :  { %v7748_v16 = vpop.eup %7747  ;;  %v4823_v29 = vmul.f32 %v7746_v54, %v11406_v53  ;;  %v2937_v7 = vmul.f32 %v2905_v36, %v9435_v52  ;;  %v4950_v27 = vadd.f32 %v4949_v5, %v4923_v20  ;;  %v4956_v51 = vadd.f32 %v4955_v42, %v4924_v28 }
 0x481   :  { %v4824_v15 = vmul.f32 %v7748_v16, %v11412_v21  ;;  %v2938_v9 = vmul.f32 %v2906_v38, %v13085_v22  ;;  %v4799_v12 = vrot.slane %v4798_v39, 1  ;;  %v4991_v56 = vrot.slane %v4930_v14, 4 }
 0x482   :  { %v11636_v50 = vadd.f32 %v4823_v29, %v3102_v34  ;;  %v2967_v59 = vmul.f32 1.442695, %v2937_v7  ;;  %v4986_v17 = vadd.f32 %v4985_v41, %v4929_v46  ;;  %v2891_v53 = vperm.slane %v2876_v63, 0  ;;  %v11652_v29 = vpop.permute.xlu2 %5116 }
 0x483   :  { %v11638_v25 = vadd.f32 %v4824_v15, %v3103_v47  ;;  %v2969_v58 = vmul.f32 1.442695, %v2938_v9  ;;  %v5013_v54 = vrot.slane %v5012_v33, 1  ;;  %v5018_v36 = vadd.f32 %v5017_v6, %v5016_v0  ;;  %v2996_v7 = vpop.permute.xlu1 %2995 }
 0x484   :  { %7749 = vpow2.f32 %v2967_v59  ;;  %v2892_v20 = vperm.slane %v2876_v63, 1  ;;  %v4951_v28 = vrot.slane %v4950_v27, 2  ;;  %v4957_v21 = vrot.slane %v4956_v51, 2 }
 0x485   :  { %7751 = vpow2.f32 %v2969_v58  ;;  %v2923_v5 = vmul.f32 %v2891_v53, %v9435_v52  ;;  %v11642_v42 = vadd.f32 %v4971_v8, %v11602_v60  ;;  %v3110_v34 = vmul.f32 %v3078_v11, %v3045_v24  ;;  %v13186_v58 = vld [vmem:[#allocation36_spill] sm:$0xff]  ;;  %v13187_v53 = vld [vmem:[#allocation38_spill] sm:$0xff] }
 0x486   :  { %v3111_v38 = vmul.f32 %v3079_v30, %v3045_v24  ;;  %v2924_v46 = vmul.f32 %v2892_v20, %v13085_v22  ;;  %v11646_v41 = vadd.f32 %v4793_v48, %v11605_v10  ;;  %v4987_v47 = vrot.slane %v4986_v17, 2  ;;  %v11656_v24 = vpop.permute.xlu0 %5109 }
 0x487   :  { %v4992_v16 = vadd.f32 %v4991_v56, %v4930_v14  ;;  %v2939_v0 = vmul.f32 1.442695, %v2923_v5  ;;  %v11648_v59 = vadd.f32 %v4799_v12, %v4798_v39  ;;  %v5019_v63 = vrot.slane %v5018_v36, 1 }
 0x488   :  { %v4927_v6 = vmul.f32 %v11477_v37, %v11636_v50  ;;  %v2941_v60 = vmul.f32 1.442695, %v2924_v46  ;;  %v11654_v8 = vadd.f32 %v5013_v54, %v5012_v33  ;;  %v4952_v11 = vadd.f32 %v4951_v28, %v4950_v27 }
 0x489   :  { %13184 = vst [vmem:[#allocation112_spill] sm:$0xff] %v11648_v59  ;;  %v4958_v30 = vadd.f32 %v4957_v21, %v4956_v51  ;;  %7753 = vpow2.f32 %v2939_v0  ;;  %v4928_v56 = vmul.f32 %v11477_v37, %v11638_v25  ;;  %v2885_v12 = vsel %vm1604_vm3, %v13151_v4, %v13150_v2 }
 0x48a   :  { %13185 = vst [vmem:[#allocation114_spill] sm:$0xff] %v11654_v8  ;;  %v7750_v10 = vpop.eup %7749  ;;  %7755 = vpow2.f32 %v2941_v60  ;;  %v3058_v39 = vsel %vm1604_vm3, %v11425_v45, %v13163_v55  ;;  %v4988_v14 = vadd.f32 %v4987_v47, %v4986_v17  ;;  %v4993_v33 = vrot.slane %v4992_v16, 2  ;;  %v13188_v47 = vld [vmem:[#allocation13_spill] sm:$0xff] }
 0x48b   :  { %v7752_v48 = vpop.eup %7751  ;;  %v4831_v51 = vmul.f32 %v7750_v10, %v11540_v49  ;;  %v2886_v27 = vrot.slane %v2885_v12, 5  ;;  %v4973_v15 = vrot.slane %v4927_v6, 4  ;;  %v3064_v37 = vperm.slane %v11628_v61, 0 }
 0x48c   :  { %v4832_v9 = vmul.f32 %v7752_v48, %v11542_v44  ;;  %v3132_v2 = vsel %vm1590_vm4, %v13187_v53, %v13186_v58  ;;  %v3065_v45 = vperm.slane %v11628_v61, 1  ;;  %v4953_v54 = vrot.slane %v4952_v11, 1 }
 0x48d   :  { %v11672_v4 = vadd.f32 %v4831_v51, %v3110_v34  ;;  %v2901_v55 = vperm.slane %v2886_v27, 0  ;;  %v2902_v17 = vperm.slane %v2886_v27, 1  ;;  %v4979_v20 = vrot.slane %v4928_v56, 4 }
 0x48e   :  { %v11675_v49 = vadd.f32 %v4832_v9, %v3111_v38  ;;  %v3096_v28 = vmul.f32 %v3064_v37, %v2996_v7  ;;  %v3097_v5 = vmul.f32 %v3065_v45, %v2996_v7  ;;  %v11681_v0 = vmul.f32 %v13187_v53, %v13188_v47  ;;  %v11691_v9 = vpop.permute.xlu2 %5123 }
 0x48f   :  { %v7754_v21 = vpop.eup %7753  ;;  %v2933_v44 = vmul.f32 %v2901_v55, %v9435_v52  ;;  %v2934_v46 = vmul.f32 %v2902_v17, %v13085_v22  ;;  %v11683_v60 = vadd.f32 %v5019_v63, %v5018_v36  ;;  %v4959_v61 = vrot.slane %v4958_v30, 1  ;;  %v11697_v63 = vpop.permute.xlu0 %5130 }
 0x490   :  { %v7756_v34 = vpop.eup %7755  ;;  %v11685_v10 = vadd.f32 %v4993_v33, %v4992_v16  ;;  %v4817_v38 = vmul.f32 %v7754_v21, %v11382_v19  ;;  %v4989_v12 = vrot.slane %v4988_v14, 1  ;;  %v4974_v48 = vadd.f32 %v4973_v15, %v4927_v6  ;;  %v13190_v19 = vld [vmem:[#allocation37_spill] sm:$0xff]  ;;  %v3031_v17 = vpop.permute.xlu1 %3030 }
 0x491   :  { %13189 = vst [vmem:[#allocation116_spill] sm:$0xff] %v11683_v60  ;;  %v4818_v51 = vmul.f32 %v7756_v34, %v11392_v26  ;;  %v2959_v7 = vmul.f32 1.442695, %v2933_v44  ;;  %v11689_v27 = vadd.f32 %v4979_v20, %v4928_v56  ;;  %v2961_v45 = vmul.f32 1.442695, %v2934_v46 }
 0x492   :  { %v11693_v37 = vadd.f32 %v4817_v38, %v3096_v28  ;;  %v3059_v55 = vrot.slane %v3058_v39, 5  ;;  %v11695_v36 = vadd.f32 %v4953_v54, %v4952_v11  ;;  %v3305_v26 = vsel %vm1590_vm4, %v11681_v0, %v13190_v19 }
 0x493   :  { %v11699_v16 = vadd.f32 %v4818_v51, %v3097_v5  ;;  %7757 = vpow2.f32 %v2959_v7  ;;  %v11704_v6 = vadd.f32 %v4959_v61, %v4958_v30  ;;  %v11709_v39 = vadd.f32 %v4989_v12, %v4988_v14 }
 0x494   :  { %v4921_v33 = vmul.f32 %v11567_v13, %v11693_v37  ;;  %7759 = vpow2.f32 %v2961_v45  ;;  %v4975_v11 = vrot.slane %v4974_v48, 2  ;;  %v3147_v54 = vperm.slane %v3132_v2, 0 }
 0x495   :  { %v4922_v15 = vmul.f32 %v11567_v13, %v11699_v16  ;;  %v4981_v20 = vrot.slane %v11689_v27, 2  ;;  %v3074_v21 = vperm.slane %v3059_v55, 0  ;;  %v3148_v30 = vperm.slane %v3132_v2, 1 }
 0x496   :  { %v4937_v28 = vrot.slane %v4921_v33, 4  ;;  %v4935_v5 = vmul.f32 %v11634_v3, %v11672_v4  ;;  %v3075_v46 = vperm.slane %v3059_v55, 1  ;;  %v3179_v34 = vmul.f32 %v3147_v54, %v9435_v52 }
 0x497   :  { %v4943_v44 = vrot.slane %v4922_v15, 4  ;;  %v3106_v61 = vmul.f32 %v3074_v21, %v3031_v17  ;;  %v3180_v38 = vmul.f32 %v3148_v30, %v13085_v22  ;;  %v3133_v13 = vsel %vm1592_vm1, %v13187_v53, %v13186_v58  ;;  %v13191_v21 = vld [vmem:[#allocation48_spill] sm:$0xff] }
 0x498   :  { %v4938_v14 = vadd.f32 %v4937_v28, %v4921_v33  ;;  %v3107_v7 = vmul.f32 %v3075_v46, %v3031_v17  ;;  %v3195_v45 = vmul.f32 1.442695, %v3179_v34  ;;  %v3134_v2 = vrot.slane %v3133_v13, 1 }
 0x499   :  { %v7758_v12 = vpop.eup %7757  ;;  %v4944_v51 = vadd.f32 %v4943_v44, %v4922_v15  ;;  %v11721_v47 = vadd.f32 %v4975_v11, %v4974_v48  ;;  %v3197_v54 = vmul.f32 1.442695, %v3180_v38  ;;  %v4936_v33 = vmul.f32 %v11634_v3, %v11675_v49  ;;  %v11727_v15 = vpop.permute.xlu2 %5144 }
 0x49a   :  { %v7760_v56 = vpop.eup %7759  ;;  %v4939_v60 = vrot.slane %v4938_v14, 2  ;;  %v4827_v55 = vmul.f32 %v7758_v12, %v11369_v57  ;;  %7761 = vpow2.f32 %v3195_v45  ;;  %v5021_v59 = vrot.slane %v4935_v5, 4  ;;  %13192 = vst [vmem:[#allocation103_spill] sm:$0xff] %v11727_v15  ;;  %v3252_v44 = vpop.permute.xlu0 %3251 }
 0x49b   :  { %v4945_v28 = vrot.slane %v4944_v51, 2  ;;  %v4828_v30 = vmul.f32 %v7760_v56, %v13191_v21  ;;  %7763 = vpow2.f32 %v3197_v54  ;;  %v3149_v57 = vperm.slane %v3134_v2, 0 }
 0x49c   :  { %v4940_v8 = vadd.f32 %v4939_v60, %v4938_v14  ;;  %v11729_v17 = vadd.f32 %v4827_v55, %v3106_v61  ;;  %v3150_v46 = vperm.slane %v3134_v2, 1  ;;  %v3320_v38 = vperm.slane %v3305_v26, 0 }
 0x49d   :  { %v4946_v48 = vadd.f32 %v4945_v28, %v4944_v51  ;;  %v11731_v11 = vadd.f32 %v4828_v30, %v3107_v7  ;;  %v3306_v3 = vsel %vm1592_vm1, %v11681_v0, %v13190_v19  ;;  %v3137_v60 = vsel %vm1598_vm2, %v13187_v53, %v13186_v58 }
 0x49e   :  { %v4941_v34 = vrot.slane %v4940_v8, 1  ;;  %v3321_v14 = vperm.slane %v3305_v26, 1  ;;  %v3181_v61 = vmul.f32 %v3149_v57, %v9435_v52  ;;  %v3182_v13 = vmul.f32 %v3150_v46, %v13085_v22 }
 0x49f   :  { %v4947_v56 = vrot.slane %v4946_v48, 1  ;;  %v11742_v12 = vadd.f32 %v4981_v20, %v11689_v27  ;;  %v5027_v51 = vrot.slane %v4936_v33, 4  ;;  %v3352_v45 = vmul.f32 %v3320_v38, %v3252_v44 }
 0x4a0   :  { %v4942_v7 = vadd.f32 %v4941_v34, %v4940_v8  ;;  %v7762_v2 = vpop.eup %7761  ;;  %v3353_v54 = vmul.f32 %v3321_v14, %v3252_v44  ;;  %v3199_v28 = vmul.f32 1.442695, %v3181_v61  ;;  %v3201_v21 = vmul.f32 1.442695, %v3182_v13  ;;  %v13193_v8 = vld [vmem:[#allocation82_spill] sm:$0xff]  ;;  %v5103_v44 = vpop.permute.xlu1 %5102 }
 0x4a1   :  { %v4948_v55 = vadd.f32 %v4947_v56, %v4946_v48  ;;  %v7764_v30 = vpop.eup %7763  ;;  %v5022_v15 = vadd.f32 %v5021_v59, %v4935_v5  ;;  %v5049_v57 = vmul.f32 %v7762_v2, %v11693_v37  ;;  %v3138_v46 = vrot.slane %v3137_v60, 3 }
 0x4a2   :  { %v11746_v26 = vsel %vm1592_vm1, %v11695_v36, %v4942_v7  ;;  %v4931_v20 = vmul.f32 %v13193_v8, %v11729_v17  ;;  %v5050_v48 = vmul.f32 %v7764_v30, %v11699_v16  ;;  %v3307_v34 = vrot.slane %v3306_v3, 1 }
 0x4a3   :  { %v11751_v27 = vsel %vm1592_vm1, %v11704_v6, %v4948_v55  ;;  %v13194_v59 = vrot.slane %v11685_v10, 1  ;;  %v11762_v37 = vadd.f32 %v5049_v57, %v3352_v45  ;;  %7765 = vpow2.f32 %v3199_v28 }
 0x4a4   :  { %v4932_v38 = vmul.f32 %v13193_v8, %v11731_v11  ;;  %v11767_v60 = vadd.f32 %v5050_v48, %v3353_v54  ;;  %7767 = vpow2.f32 %v3201_v21  ;;  %v5023_v16 = vrot.slane %v5022_v15, 2 }
 0x4a5   :  { %v11759_v5 = vadd.f32 %v13194_v59, %v11685_v10  ;;  %13195 = vst [vmem:[#allocation106_spill] sm:$0xff] %v11762_v37  ;;  %v11769_v3 = vadd.f32 %v5027_v51, %v4936_v33  ;;  %v5153_v56 = vmul.f32 %v5103_v44, %v11762_v37  ;;  %v3259_v10 = vpop.permute.xlu2 %3258  ;;  %v3153_v14 = vperm.slane %v3138_v46, 0 }
 0x4a6   :  { %13196 = vst [vmem:[#allocation117_spill] sm:$0xff] %v11767_v60  ;;  %v4997_v61 = vrot.slane %v4931_v20, 4  ;;  %v5154_v13 = vmul.f32 %v5103_v44, %v11767_v60  ;;  %v3322_v7 = vperm.slane %v3307_v34, 0  ;;  %v3154_v45 = vperm.slane %v3138_v46, 1 }
 0x4a7   :  { %v5169_v2 = vrot.slane %v5153_v56, 4  ;;  %v3323_v55 = vperm.slane %v3307_v34, 1  ;;  %v3185_v28 = vmul.f32 %v3153_v14, %v9435_v52  ;;  %v3310_v54 = vsel %vm1598_vm2, %v11681_v0, %v13190_v19 }
 0x4a8   :  { %v5003_v21 = vrot.slane %v4932_v38, 4  ;;  %v5175_v33 = vrot.slane %v5154_v13, 4  ;;  %v3354_v51 = vmul.f32 %v3322_v7, %v3259_v10  ;;  %v3186_v30 = vmul.f32 %v3154_v45, %v13085_v22 }
 0x4a9   :  { %v7766_v57 = vpop.eup %7765  ;;  %v5170_v8 = vadd.f32 %v5169_v2, %v5153_v56  ;;  %v3355_v48 = vmul.f32 %v3323_v55, %v3259_v10  ;;  %v3207_v59 = vmul.f32 1.442695, %v3185_v28  ;;  %v3139_v46 = vsel %vm1601_vm7, %v13187_v53, %v13186_v58 }
 0x4aa   :  { %v7768_v44 = vpop.eup %7767  ;;  %v5176_v34 = vadd.f32 %v5175_v33, %v5154_v13  ;;  %v5051_v14 = vmul.f32 %v7766_v57, %v11582_v40  ;;  %v3209_v6 = vmul.f32 1.442695, %v3186_v30  ;;  %v3311_v36 = vrot.slane %v3310_v54, 3  ;;  %v3273_v40 = vpop.permute.xlu0 %3272 }
 0x4ab   :  { %v5171_v37 = vrot.slane %v5170_v8, 2  ;;  %v5052_v7 = vmul.f32 %v7768_v44, %v11584_v62  ;;  %7769 = vpow2.f32 %v3207_v59  ;;  %v11784_v45 = vadd.f32 %v5023_v16, %v5022_v15 }
 0x4ac   :  { %v5177_v56 = vrot.slane %v5176_v34, 2  ;;  %v11786_v10 = vadd.f32 %v5051_v14, %v3354_v51  ;;  %7771 = vpow2.f32 %v3209_v6  ;;  %v11788_v2 = vadd.f32 %v4997_v61, %v4931_v20 }
 0x4ad   :  { %v11790_v55 = vadd.f32 %v5003_v21, %v4932_v38  ;;  %v11792_v13 = vadd.f32 %v5052_v7, %v3355_v48  ;;  %v3140_v28 = vrot.slane %v3139_v46, 4  ;;  %v3326_v33 = vperm.slane %v3311_v36, 0 }
 0x4ae   :  { %13197 = vst [vmem:[#allocation108_spill] sm:$0xff] %v11786_v10  ;;  %v5155_v54 = vmul.f32 %v11656_v24, %v11786_v10  ;;  %v3327_v62 = vperm.slane %v3311_v36, 1  ;;  %v3312_v15 = vsel %vm1601_vm7, %v11681_v0, %v13190_v19  ;;  %v5172_v16 = vadd.f32 %v5171_v37, %v5170_v8 }
 0x4af   :  { %13198 = vst [vmem:[#allocation111_spill] sm:$0xff] %v11792_v13  ;;  %v5156_v20 = vmul.f32 %v11656_v24, %v11792_v13  ;;  %v3155_v6 = vperm.slane %v3140_v28, 0  ;;  %v3156_v38 = vperm.slane %v3140_v28, 1  ;;  %v5178_v61 = vadd.f32 %v5177_v56, %v5176_v34 }
 0x4b0   :  { %v5181_v21 = vrot.slane %v5155_v54, 4  ;;  %v3358_v51 = vmul.f32 %v3326_v33, %v3273_v40  ;;  %v3135_v30 = vsel %vm1595_vm5, %v13187_v53, %v13186_v58  ;;  %v3359_v36 = vmul.f32 %v3327_v62, %v3273_v40 }
 0x4b1   :  { %v7770_v57 = vpop.eup %7769  ;;  %v5187_v48 = vrot.slane %v5156_v20, 4  ;;  %v3187_v59 = vmul.f32 %v3155_v6, %v9435_v52  ;;  %v3188_v46 = vmul.f32 %v3156_v38, %v13085_v22  ;;  %v4999_v8 = vrot.slane %v11788_v2, 2  ;;  %v11813_v38 = vpop.permute.xlu1 %5137 }
 0x4b2   :  { %v7772_v37 = vpop.eup %7771  ;;  %v5182_v24 = vadd.f32 %v5181_v21, %v5155_v54  ;;  %v5055_v44 = vmul.f32 %v7770_v57, %v11636_v50  ;;  %v3313_v34 = vrot.slane %v3312_v15, 4  ;;  %v5173_v33 = vrot.slane %v5172_v16, 1  ;;  %13201 = vst [vmem:[#allocation115_spill] sm:$0xff] %v11813_v38 }
 0x4b3   :  { %v5188_v14 = vadd.f32 %v5187_v48, %v5156_v20  ;;  %v5056_v7 = vmul.f32 %v7772_v37, %v11638_v25  ;;  %v3211_v56 = vmul.f32 1.442695, %v3187_v59  ;;  %v3213_v28 = vmul.f32 1.442695, %v3188_v46 }
 0x4b4   :  { %v5179_v60 = vrot.slane %v5178_v61, 1  ;;  %v5183_v13 = vrot.slane %v5182_v24, 2  ;;  %v11809_v40 = vadd.f32 %v5055_v44, %v3358_v51  ;;  %v3136_v54 = vrot.slane %v3135_v30, 2  ;;  %v3280_v51 = vpop.permute.xlu2 %3279 }
 0x4b5   :  { %v5189_v62 = vrot.slane %v5188_v14, 2  ;;  %v11811_v6 = vadd.f32 %v5056_v7, %v3359_v36  ;;  %7773 = vpow2.f32 %v3211_v56  ;;  %v3328_v25 = vperm.slane %v3313_v34, 0 }
 0x4b6   :  { %13199 = vst [vmem:[#allocation122_spill] sm:$0xff] %v11809_v40  ;;  %v5184_v21 = vadd.f32 %v5183_v13, %v5182_v24  ;;  %v11817_v50 = vmul.f32 %v11691_v9, %v11809_v40  ;;  %7775 = vpow2.f32 %v3213_v28  ;;  %v3151_v57 = vperm.slane %v3136_v54, 0 }
 0x4b7   :  { %13200 = vst [vmem:[#allocation42_spill] sm:$0xff] %v11811_v6  ;;  %v5190_v15 = vadd.f32 %v5189_v62, %v5188_v14  ;;  %v11821_v20 = vmul.f32 %v11691_v9, %v11811_v6  ;;  %v3152_v48 = vperm.slane %v3136_v54, 1  ;;  %v3329_v59 = vperm.slane %v3313_v34, 1 }
 0x4b8   :  { %v5185_v36 = vrot.slane %v5184_v21, 1  ;;  %v3308_v13 = vsel %vm1595_vm5, %v11681_v0, %v13190_v19  ;;  %v3145_v30 = vsel %vm1610_vm6, %v13186_v58, %v13187_v53  ;;  %v5174_v46 = vadd.f32 %v5173_v33, %v5172_v16 }
 0x4b9   :  { %v5191_v37 = vrot.slane %v5190_v15, 1  ;;  %v3183_v24 = vmul.f32 %v3151_v57, %v9435_v52  ;;  %v3184_v9 = vmul.f32 %v3152_v48, %v13085_v22  ;;  %v5180_v44 = vadd.f32 %v5179_v60, %v5178_v61 }
 0x4ba   :  { %v5186_v14 = vadd.f32 %v5185_v36, %v5184_v21  ;;  %v3360_v7 = vmul.f32 %v3328_v25, %v3280_v51  ;;  %v3361_v56 = vmul.f32 %v3329_v59, %v3280_v51  ;;  %v3146_v6 = vrot.slane %v3145_v30, 7 }
 0x4bb   :  { %v7774_v28 = vpop.eup %7773  ;;  %v5192_v34 = vadd.f32 %v5191_v37, %v5190_v15  ;;  %v3203_v62 = vmul.f32 1.442695, %v3183_v24  ;;  %v3205_v54 = vmul.f32 1.442695, %v3184_v9  ;;  %v5005_v10 = vrot.slane %v11790_v55, 2 }
 0x4bc   :  { %v7776_v40 = vpop.eup %7775  ;;  %v11833_v38 = vsel %vm1592_vm1, %v5186_v14, %v5174_v46  ;;  %v5057_v16 = vmul.f32 %v7774_v28, %v11615_v23  ;;  %v3309_v33 = vrot.slane %v3308_v13, 2  ;;  %v13202_v60 = vrot.slane %v11721_v47, 1 }
 0x4bd   :  { %v11840_v21 = vsel %vm1592_vm1, %v5192_v34, %v5180_v44  ;;  %v5058_v25 = vmul.f32 %v7776_v40, %v11617_v1  ;;  %7777 = vpow2.f32 %v3203_v62  ;;  %v13203_v15 = vrot.slane %v11742_v12, 1  ;;  %v3266_v1 = vpop.permute.xlu1 %3265 }
 0x4be   :  { %v4978_v61 = vadd.f32 %v13202_v60, %v11721_v47  ;;  %v13204_v57 = vrot.slane %v11769_v3, 2  ;;  %v11851_v48 = vadd.f32 %v5057_v16, %v3360_v7  ;;  %7779 = vpow2.f32 %v3205_v54 }
 0x4bf   :  { %v11846_v51 = vadd.f32 %v13203_v15, %v11742_v12  ;;  %v5025_v47 = vrot.slane %v11784_v45, 1  ;;  %v5000_v36 = vadd.f32 %v4999_v8, %v11788_v2  ;;  %v11855_v59 = vadd.f32 %v5058_v25, %v3361_v56  ;;  %v13205_v56 = vld [vmem:[#allocation11_spill] sm:$0xff] }
 0x4c0   :  { %v5030_v23 = vadd.f32 %v13204_v57, %v11769_v3  ;;  %v3161_v40 = vperm.slane %v3146_v6, 0  ;;  %v5006_v13 = vadd.f32 %v5005_v10, %v11790_v55  ;;  %v11860_v12 = vmul.f32 %v11697_v63, %v11851_v48 }
 0x4c1   :  { %v3324_v30 = vperm.slane %v3309_v33, 0  ;;  %v3162_v46 = vperm.slane %v3146_v6, 1  ;;  %v11864_v3 = vmul.f32 %v11697_v63, %v11855_v59  ;;  %v3325_v37 = vperm.slane %v3309_v33, 1  ;;  %v13206_v63 = vld [vmem:[#allocation41_spill] sm:$0xff] }
 0x4c2   :  { %v3193_v24 = vmul.f32 %v3161_v40, %v9435_v52  ;;  %v3318_v2 = vsel %vm1610_vm6, %v13190_v19, %v11681_v0  ;;  %v5031_v8 = vrot.slane %v5030_v23, 1  ;;  %v5205_v10 = vrot.slane %v11817_v50, 4 }
 0x4c3   :  { %v3356_v55 = vmul.f32 %v3324_v30, %v3266_v1  ;;  %v3194_v9 = vmul.f32 %v3162_v46, %v13085_v22  ;;  %v7778_v44 = vpop.eup %7777  ;;  %v5001_v14 = vrot.slane %v5000_v36, 1  ;;  %v3357_v6 = vmul.f32 %v3325_v37, %v3266_v1 }
 0x4c4   :  { %v3223_v7 = vmul.f32 1.442695, %v3193_v24  ;;  %v11874_v28 = vmul.f32 %v13206_v63, %v13205_v56  ;;  %v7780_v34 = vpop.eup %7779  ;;  %v5007_v62 = vrot.slane %v5006_v13, 1  ;;  %v5053_v54 = vmul.f32 %v7778_v44, %v11468_v32 }
 0x4c5   :  { %v3225_v16 = vmul.f32 1.442695, %v3194_v9  ;;  %v3319_v33 = vrot.slane %v3318_v2, 7  ;;  %v5026_v60 = vadd.f32 %v5025_v47, %v11784_v45  ;;  %v5675_v25 = vsel %vm1595_vm5, %v11600_v18, %v11746_v26  ;;  %v3301_v18 = vpop.permute.xlu2 %3300  ;;  %v13207_v26 = vld [vmem:[#allocation40_spill] sm:$0xff] }
 0x4c6   :  { %v5054_v15 = vmul.f32 %v7780_v34, %v11479_v43  ;;  %7781 = vpow2.f32 %v3223_v7  ;;  %v11883_v57 = vadd.f32 %v5205_v10, %v11817_v50  ;;  %v5211_v1 = vrot.slane %v11821_v20, 4 }
 0x4c7   :  { %v11886_v40 = vadd.f32 %v5053_v54, %v3356_v55  ;;  %7783 = vpow2.f32 %v3225_v16  ;;  %v11888_v32 = vadd.f32 %v5031_v8, %v5030_v23  ;;  %v5682_v45 = vsel %vm1595_vm5, %v11642_v42, %v11751_v27 }
 0x4c8   :  { %v11893_v47 = vadd.f32 %v5054_v15, %v3357_v6  ;;  %v11898_v43 = vsel %vm1590_vm4, %v11874_v28, %v13207_v26  ;;  %v5002_v50 = vadd.f32 %v5001_v14, %v5000_v36  ;;  %v5008_v30 = vadd.f32 %v5007_v62, %v5006_v13 }
 0x4c9   :  { %v5157_v46 = vmul.f32 %v11652_v29, %v11886_v40  ;;  %v3334_v37 = vperm.slane %v3319_v33, 0  ;;  %v3335_v24 = vperm.slane %v3319_v33, 1  ;;  %v5645_v42 = vsel %vm1601_vm7, %v11487_v31, %v11462_v35  ;;  %v11916_v31 = vpop.permute.xlu0 %5369 }
 0x4ca   :  { %v5158_v23 = vmul.f32 %v11652_v29, %v11893_v47  ;;  %v5676_v27 = vsel %vm1598_vm2, %v4978_v61, %v5675_v25  ;;  %v5207_v2 = vrot.slane %v11883_v57, 2  ;;  %v11910_v8 = vadd.f32 %v5211_v1, %v11821_v20  ;;  %v13208_v29 = vld [vmem:[#allocation93_spill] sm:$0xff]  ;;  %v13209_v20 = vld [vmem:[#allocation104_spill] sm:$0xff] }
 0x4cb   :  { %v5193_v36 = vrot.slane %v5157_v46, 4  ;;  %v3366_v13 = vmul.f32 %v3334_v37, %v3301_v18  ;;  %v5217_v55 = vrot.slane %v11860_v12, 4  ;;  %v3367_v44 = vmul.f32 %v3335_v24, %v3301_v18  ;;  %v13210_v18 = vld [vmem:[#allocation89_spill] sm:$0xff]  ;;  %v13211_v24 = vld [vmem:[#allocation114_spill] sm:$0xff] }
 0x4cc   :  { %v7782_v10 = vpop.eup %7781  ;;  %v5199_v9 = vrot.slane %v5158_v23, 4  ;;  %v5646_v14 = vsel %vm1604_vm3, %v13208_v29, %v5645_v42  ;;  %v5223_v35 = vrot.slane %v11864_v3, 4  ;;  %v5677_v33 = vsel %vm1601_vm7, %v11709_v39, %v5676_v27  ;;  %v13213_v42 = vld [vmem:[#allocation90_spill] sm:$0xff] }
 0x4cd   :  { %v7784_v6 = vpop.eup %7783  ;;  %v5194_v61 = vadd.f32 %v5193_v36, %v5157_v46  ;;  %v5063_v7 = vmul.f32 %v7782_v10, %v11672_v4  ;;  %v5647_v34 = vsel %vm1607_vm8, %v13209_v20, %v5646_v14  ;;  %v5678_v1 = vsel %vm1604_vm3, %v5002_v50, %v5677_v33  ;;  %v13214_v27 = vld [vmem:[#allocation118_spill] sm:$0xff] }
 0x4ce   :  { %v5200_v62 = vadd.f32 %v5199_v9, %v5158_v23  ;;  %v5064_v54 = vmul.f32 %v7784_v6, %v11675_v49  ;;  %v5648_v16 = vsel %vm5519_vm9, %v11646_v41, %v5647_v34  ;;  %v5679_v23 = vsel %vm1607_vm8, %v13211_v24, %v5678_v1  ;;  %v13212_v49 = vld [vmem:[#allocation83_spill] sm:$0xff]  ;;  %v13215_v10 = vld [vmem:[#allocation94_spill] sm:$0xff]  ;;  %v13218_v34 = vld [vmem:[#allocation112_spill] sm:$0xff] }
 0x4cf   :  { %v5195_v25 = vrot.slane %v5194_v61, 2  ;;  %v11926_v15 = vadd.f32 %v5063_v7, %v3366_v13  ;;  %v5783_v46 = vadd.f32 %v13210_v18, %v5648_v16  ;;  %v5652_v41 = vsel %vm1601_vm7, %v13213_v42, %v13212_v49  ;;  %v13216_v29 = vld [vmem:[#allocation46_spill] sm:$0xff]  ;;  %v13219_v16 = vld [vmem:[#allocation68_spill] sm:$0xff] }
 0x4d0   :  { %v5201_v4 = vrot.slane %v5200_v62, 2  ;;  %v11930_v37 = vadd.f32 %v5064_v54, %v3367_v44  ;;  %v5680_v39 = vsel %vm5519_vm9, %v5026_v60, %v5679_v23  ;;  %v5653_v50 = vsel %vm1604_vm3, %v13215_v10, %v5652_v41  ;;  %v13217_v44 = vld [vmem:[#allocation47_spill] sm:$0xff]  ;;  %v13220_v1 = vld [vmem:[#allocation98_spill] sm:$0xff] }
 0x4d1   :  { %v5196_v36 = vadd.f32 %v5195_v25, %v5194_v61  ;;  %v6049_v13 = vmul.f32 %v13214_v27, %v5783_v46  ;;  %v5785_v14 = vadd.f32 %v13216_v29, %v5680_v39  ;;  %v5654_v6 = vsel %vm1607_vm8, %v13217_v44, %v5653_v50  ;;  %v3508_v41 = vpop.permute.xlu0 %3507 }
 0x4d2   :  { %v5202_v9 = vadd.f32 %v5201_v4, %v5200_v62  ;;  %v5683_v7 = vsel %vm1598_vm2, %v11846_v51, %v5682_v45  ;;  %v5655_v61 = vsel %vm5519_vm9, %v13218_v34, %v5654_v6  ;;  %v3141_v54 = vsel %vm1604_vm3, %v13187_v53, %v13186_v58  ;;  %v13221_v51 = vld [vmem:[#allocation116_spill] sm:$0xff] }
 0x4d3   :  { %v5197_v20 = vrot.slane %v5196_v36, 1  ;;  %v5684_v60 = vsel %vm1601_vm7, %v11759_v5, %v5683_v7  ;;  %v6051_v33 = vmul.f32 %v13219_v16, %v5785_v14  ;;  %v5784_v18 = vadd.f32 %v13220_v1, %v5655_v61  ;;  %v13226_v6 = vld [vmem:[#allocation76_spill] sm:$0xff] }
 0x4d4   :  { %v5203_v62 = vrot.slane %v5202_v9, 1  ;;  %v5685_v25 = vsel %vm1604_vm3, %v5008_v30, %v5684_v60  ;;  %v3142_v4 = vrot.slane %v3141_v54, 5  ;;  %v3314_v5 = vsel %vm1604_vm3, %v11681_v0, %v13190_v19 }
 0x4d5   :  { %v5198_v46 = vadd.f32 %v5197_v20, %v5196_v36  ;;  %v5686_v45 = vsel %vm1607_vm8, %v13221_v51, %v5685_v25  ;;  %v11962_v24 = vadd.f32 %v5217_v55, %v11860_v12  ;;  %v6061_v49 = vpack.c.bf16 %v6051_v33, %v6049_v13  ;;  %v13222_v36 = vld [vmem:[#allocation100_spill] sm:$0xff]  ;;  %v13223_v12 = vld [vmem:[#allocation123_spill] sm:$0xff] }
 0x4d6   :  { %v5204_v23 = vadd.f32 %v5203_v62, %v5202_v9  ;;  %v5687_v42 = vsel %vm5519_vm9, %v11888_v32, %v5686_v45  ;;  %v3157_v27 = vperm.slane %v3142_v4, 0  ;;  %v3158_v10 = vperm.slane %v3142_v4, 1  ;;  %v13224_v13 = vld [vmem:[#allocation39_spill] sm:$0xff]  ;;  %v13225_v9 = vld [vmem:[#allocation74_spill] sm:$0xff]  ;;  %v3287_v45 = vpop.permute.xlu1 %3286 }
 0x4d7   :  { %v11968_v30 = vsel %vm1595_vm5, %v5198_v46, %v11833_v38  ;;  %v5786_v39 = vadd.f32 %v13222_v36, %v5687_v42  ;;  %6211 = vmatmul.bf16.gmra.mxu0 %v6061_v49  ;;  %v6050_v55 = vmul.f32 %v13223_v12, %v5784_v18  ;;  %v3388_v32 = vsel %vm1590_vm4, %v13206_v63, %v13224_v13 }
 0x4d8   :  { %v11973_v50 = vsel %vm1595_vm5, %v5204_v23, %v11840_v21  ;;  %v11982_v38 = vsel %vm1595_vm5, %v11874_v28, %v13207_v26  ;;  %v3189_v14 = vmul.f32 %v3157_v27, %v9435_v52  ;;  %v3190_v44 = vmul.f32 %v3158_v10, %v13085_v22 }
 0x4d9   :  { %v6052_v29 = vmul.f32 %v13225_v9, %v5786_v39  ;;  %v3403_v21 = vperm.slane %v3388_v32, 0  ;;  %v13227_v7 = vrot.slane %v13226_v6, 2  ;;  %v5213_v34 = vrot.slane %v11910_v8, 2  ;;  %v12016_v27 = vpop.permute.xlu0 %3521 }
 0x4da   :  { %v3315_v61 = vrot.slane %v3314_v5, 5  ;;  %v3404_v60 = vperm.slane %v3388_v32, 1  ;;  %v3215_v62 = vmul.f32 1.442695, %v3189_v14  ;;  %v3217_v16 = vmul.f32 1.442695, %v3190_v44 }
 0x4db   :  { %v11990_v20 = vadd.f32 %v13227_v7, %v13226_v6  ;;  %v6062_v54 = vpack.c.bf16 %v6052_v29, %v6050_v55  ;;  %v3435_v33 = vmul.f32 %v3403_v21, %v9435_v52  ;;  %v11997_v25 = vadd.f32 %v5207_v2, %v11883_v57 }
 0x4dc   :  { %v5219_v1 = vrot.slane %v11962_v24, 2  ;;  %v12003_v18 = vadd.f32 %v5223_v35, %v11864_v3  ;;  %v3436_v46 = vmul.f32 %v3404_v60, %v13085_v22  ;;  %v3576_v51 = vperm.slane %v11898_v43, 0  ;;  %v5335_v60 = vpop.permute.xlu2 %5334 }
 0x4dd   :  { %6240 = vmatmul.bf16.gmra.mxu1 %v6062_v54  ;;  %7785 = vpow2.f32 %v3215_v62  ;;  %v3451_v4 = vmul.f32 1.442695, %v3435_v33  ;;  %v3143_v57 = vsel %vm1607_vm8, %v13187_v53, %v13186_v58  ;;  %v3330_v2 = vperm.slane %v3315_v61, 0 }
 0x4de   :  { %7787 = vpow2.f32 %v3217_v16  ;;  %v3453_v5 = vmul.f32 1.442695, %v3436_v46  ;;  %v3144_v23 = vrot.slane %v3143_v57, 6  ;;  %v3331_v49 = vperm.slane %v3315_v61, 1 }
 0x4df   :  { %7789 = vpow2.f32 %v3451_v4  ;;  %v3316_v3 = vsel %vm1607_vm8, %v11681_v0, %v13190_v19  ;;  %v3395_v35 = vsel %vm1601_vm7, %v13206_v63, %v13224_v13  ;;  %v3568_v53 = vsel %vm1601_vm7, %v11874_v28, %v13207_v26 }
 0x4e0   :  { %7791 = vpow2.f32 %v3453_v5  ;;  %v3159_v42 = vperm.slane %v3144_v23, 0  ;;  %v3160_v36 = vperm.slane %v3144_v23, 1  ;;  %v3317_v39 = vrot.slane %v3316_v3, 6  ;;  %v13229_v5 = vld [vmem:[#allocation117_spill] sm:$0xff]  ;;  %v13230_v3 = vld [vmem:[#allocation115_spill] sm:$0xff] }
 0x4e1   :  { %v3396_v58 = vrot.slane %v3395_v35, 4  ;;  %v12024_v10 = vsel %vm1592_vm1, %v13206_v63, %v13224_v13  ;;  %v12029_v0 = vsel %vm1592_vm1, %v11874_v28, %v13207_v26  ;;  %v3577_v19 = vperm.slane %v11898_v43, 1 }
 0x4e2   :  { %v3362_v12 = vmul.f32 %v3330_v2, %v3287_v45  ;;  %v3191_v55 = vmul.f32 %v3159_v42, %v9435_v52  ;;  %v3192_v32 = vmul.f32 %v3160_v36, %v13085_v22  ;;  %v3608_v29 = vmul.f32 %v3576_v51, %v3508_v41 }
 0x4e3   :  { %v7786_v9 = vpop.eup %7785  ;;  %v3363_v14 = vmul.f32 %v3331_v49, %v3287_v45  ;;  %v3411_v44 = vperm.slane %v3396_v58, 0  ;;  %v3412_v21 = vperm.slane %v3396_v58, 1  ;;  %v3609_v7 = vmul.f32 %v3577_v19, %v3508_v41  ;;  %v13228_v45 = vld [vmem:[#allocation106_spill] sm:$0xff]  ;;  %v3294_v49 = vpop.permute.xlu1 %3293 }
 0x4e4   :  { %v7788_v6 = vpop.eup %7787  ;;  %v5059_v61 = vmul.f32 %v7786_v9, %v11729_v17  ;;  %v3219_v54 = vmul.f32 1.442695, %v3191_v55  ;;  %v3221_v62 = vmul.f32 1.442695, %v3192_v32  ;;  %v3332_v33 = vperm.slane %v3317_v39, 0 }
 0x4e5   :  { %v7790_v16 = vpop.eup %7789  ;;  %v5060_v43 = vmul.f32 %v7788_v6, %v11731_v11  ;;  %v3443_v46 = vmul.f32 %v3411_v44, %v9435_v52  ;;  %v3444_v4 = vmul.f32 %v3412_v21, %v13085_v22  ;;  %v3390_v41 = vrot.slane %v12024_v10, 1  ;;  %v3536_v6 = vpop.permute.xlu0 %3535 }
 0x4e6   :  { %v7792_v57 = vpop.eup %7791  ;;  %v12038_v51 = vadd.f32 %v5059_v61, %v3362_v12  ;;  %v5281_v2 = vmul.f32 %v7790_v16, %v13228_v45  ;;  %7793 = vpow2.f32 %v3219_v54  ;;  %v3569_v58 = vrot.slane %v3568_v53, 4 }
 0x4e7   :  { %v12042_v17 = vadd.f32 %v5060_v43, %v3363_v14  ;;  %v5282_v23 = vmul.f32 %v7792_v57, %v13229_v5  ;;  %7795 = vpow2.f32 %v3221_v62  ;;  %v3467_v11 = vmul.f32 1.442695, %v3443_v46  ;;  %v13232_v57 = vld [vmem:[#allocation88_spill] sm:$0xff] }
 0x4e8   :  { %v5163_v35 = vmul.f32 %v13230_v3, %v12038_v51  ;;  %v5313_v42 = vadd.f32 %v5281_v2, %v3608_v29  ;;  %v3469_v36 = vmul.f32 1.442695, %v3444_v4  ;;  %v3333_v55 = vperm.slane %v3317_v39, 1  ;;  %v12057_v2 = vpop.permute.xlu2 %5362 }
 0x4e9   :  { %v5164_v19 = vmul.f32 %v13230_v3, %v12042_v17  ;;  %v5314_v12 = vadd.f32 %v5282_v23, %v3609_v7  ;;  %7797 = vpow2.f32 %v3467_v11  ;;  %v3364_v9 = vmul.f32 %v3332_v33, %v3294_v49  ;;  %v13231_v33 = vld [vmem:[#allocation105_spill] sm:$0xff] }
 0x4ea   :  { %v5229_v10 = vrot.slane %v5163_v35, 4  ;;  %v5385_v32 = vmul.f32 %v5335_v60, %v5313_v42  ;;  %7799 = vpow2.f32 %v3469_v36  ;;  %v3365_v21 = vmul.f32 %v3333_v55, %v3294_v49 }
 0x4eb   :  { %v5235_v14 = vrot.slane %v5164_v19, 4  ;;  %v5386_v44 = vmul.f32 %v5335_v60, %v5314_v12  ;;  %v3405_v61 = vperm.slane %v3390_v41, 0  ;;  %v3584_v16 = vperm.slane %v3569_v58, 0 }
 0x4ec   :  { %v7794_v54 = vpop.eup %7793  ;;  %v5230_v62 = vadd.f32 %v5229_v10, %v5163_v35  ;;  %v5401_v29 = vrot.slane %v5385_v32, 4  ;;  %v12052_v53 = vsel %vm1607_vm8, %v11874_v28, %v13207_v26  ;;  %v5225_v7 = vrot.slane %v12003_v18, 2 }
 0x4ed   :  { %v7796_v39 = vpop.eup %7795  ;;  %v5236_v43 = vadd.f32 %v5235_v14, %v5164_v19  ;;  %v5061_v46 = vmul.f32 %v7794_v54, %v13231_v33  ;;  %v3585_v4 = vperm.slane %v3569_v58, 1  ;;  %v5407_v60 = vrot.slane %v5386_v44, 4  ;;  %v13236_v54 = vld [vmem:[#allocation103_spill] sm:$0xff] }
 0x4ee   :  { %v5062_v45 = vmul.f32 %v7796_v39, %v13232_v57  ;;  %v3616_v5 = vmul.f32 %v3584_v16, %v3536_v6  ;;  %v3437_v23 = vmul.f32 %v3405_v61, %v9435_v52  ;;  %v5231_v11 = vrot.slane %v5230_v62, 2  ;;  %v13237_v39 = vld [vmem:[#allocation73_spill] sm:$0xff]  ;;  %v13238_v57 = vld [vmem:[#allocation70_spill] sm:$0xff] }
 0x4ef   :  { %v7798_v49 = vpop.eup %7797  ;;  %v12060_v3 = vadd.f32 %v5061_v46, %v3364_v9  ;;  %v3617_v35 = vmul.f32 %v3585_v4, %v3536_v6  ;;  %v3406_v42 = vperm.slane %v3390_v41, 1  ;;  %v5214_v19 = vadd.f32 %v5213_v34, %v11910_v8  ;;  %v12073_v41 = vpop.f32.mrf.mxu0 }
 0x4f0   :  { %v7800_v36 = vpop.eup %7799  ;;  %v5402_v58 = vadd.f32 %v5401_v29, %v5385_v32  ;;  %v12065_v12 = vadd.f32 %v5062_v45, %v3365_v21  ;;  %v5289_v55 = vmul.f32 %v7798_v49, %v11851_v48  ;;  %v5220_v10 = vadd.f32 %v5219_v1, %v11962_v24  ;;  %13235 = vst [vmem:[#allocation45_spill] sm:$0xff] %v12073_v41 }
 0x4f1   :  { %13233 = vst [vmem:[#allocation120_spill] sm:$0xff] %v12060_v3  ;;  %v5226_v14 = vadd.f32 %v5225_v7, %v12003_v18  ;;  %v5237_v9 = vrot.slane %v5236_v43, 2  ;;  %v5290_v6 = vmul.f32 %v7800_v36, %v11855_v59  ;;  %v5408_v61 = vadd.f32 %v5407_v60, %v5386_v44  ;;  %v12087_v60 = vpop.permute.xlu0 %3549 }
 0x4f2   :  { %13234 = vst [vmem:[#allocation44_spill] sm:$0xff] %v12065_v12  ;;  %v12077_v8 = vmul.f32 %v13236_v54, %v12065_v12  ;;  %v5321_v34 = vadd.f32 %v5289_v55, %v3616_v5  ;;  %v3455_v32 = vmul.f32 1.442695, %v3437_v23  ;;  %v4103_v48 = vrot.slane %v11990_v20, 1 }
 0x4f3   :  { %v5232_v21 = vadd.f32 %v5231_v11, %v5230_v62  ;;  %v5322_v29 = vadd.f32 %v5290_v6, %v3617_v35  ;;  %v3438_v24 = vmul.f32 %v3406_v42, %v13085_v22  ;;  %v5209_v1 = vrot.slane %v11997_v25, 1  ;;  %v3515_v42 = vpop.permute.xlu2 %3514 }
 0x4f4   :  { %v5215_v18 = vrot.slane %v5214_v19, 1  ;;  %v5403_v16 = vrot.slane %v5402_v58, 2  ;;  %v3565_v59 = vrot.slane %v11982_v38, 2  ;;  %7801 = vpow2.f32 %v13237_v39  ;;  %v13242_v39 = vld [vmem:[#allocation108_spill] sm:$0xff] }
 0x4f5   :  { %v5221_v44 = vrot.slane %v5220_v10, 1  ;;  %v5238_v7 = vadd.f32 %v5237_v9, %v5236_v43  ;;  %v3563_v33 = vrot.slane %v12029_v0, 1  ;;  %v5227_v46 = vrot.slane %v5226_v14, 1 }
 0x4f6   :  { %v5409_v4 = vrot.slane %v5408_v61, 2  ;;  %v5165_v62 = vmul.f32 %v13236_v54, %v12060_v3  ;;  %7803 = vpow2.f32 %v3455_v32  ;;  %v13239_v45 = vrot.slane %v13238_v57, 1 }
 0x4f7   :  { %v12095_v38 = vadd.f32 %v4103_v48, %v11990_v20  ;;  %v5233_v23 = vrot.slane %v5232_v21, 1  ;;  %v3457_v43 = vmul.f32 1.442695, %v3438_v24  ;;  %v12098_v0 = vadd.f32 %v5209_v1, %v11997_v25 }
 0x4f8   :  { %v12092_v5 = vadd.f32 %v13239_v45, %v13238_v57  ;;  %v12100_v49 = vadd.f32 %v5215_v18, %v5214_v19  ;;  %v5404_v11 = vadd.f32 %v5403_v16, %v5402_v58  ;;  %v3580_v35 = vperm.slane %v3565_v59, 0  ;;  %v12116_v18 = vpop.f32.mrf.mxu0 }
 0x4f9   :  { %v5239_v36 = vrot.slane %v5238_v7, 1  ;;  %v3581_v55 = vperm.slane %v3565_v59, 1  ;;  %7805 = vpow2.f32 %v3457_v43  ;;  %v3578_v9 = vperm.slane %v3563_v33, 0  ;;  %13241 = vst [vmem:[#allocation21_spill] sm:$0xff] %v12116_v18 }
 0x4fa   :  { %v12102_v6 = vadd.f32 %v5221_v44, %v5220_v10  ;;  %v12104_v54 = vadd.f32 %v5227_v46, %v5226_v14  ;;  %v5410_v20 = vadd.f32 %v5409_v4, %v5408_v61  ;;  %v5241_v32 = vrot.slane %v5165_v62, 4  ;;  %v12106_v48 = vpop.eup %7801 }
 0x4fb   :  { %13240 = vst [vmem:[#allocation43_spill] sm:$0xff] %v12106_v48  ;;  %v12108_v24 = vadd.f32 %v5233_v23, %v5232_v21  ;;  %v12111_v25 = vmul.f32 %v3580_v35, %v12016_v27  ;;  %v12114_v19 = vmul.f32 %v3581_v55, %v12016_v27  ;;  %v3610_v58 = vmul.f32 %v3578_v9, %v3515_v42  ;;  %v5342_v55 = vpop.permute.xlu1 %5341 }
 0x4fc   :  { %v7804_v1 = vpop.eup %7803  ;;  %v5405_v10 = vrot.slane %v5404_v11, 1  ;;  %v3579_v16 = vperm.slane %v3563_v33, 1  ;;  %v3391_v14 = vsel %vm1595_vm5, %v13206_v63, %v13224_v13  ;;  %v3397_v61 = vsel %vm1604_vm3, %v13206_v63, %v13224_v13 }
 0x4fd   :  { %v12124_v21 = vadd.f32 %v5239_v36, %v5238_v7  ;;  %v5247_v59 = vrot.slane %v12077_v8, 4  ;;  %v5393_v27 = vmul.f32 %v12057_v2, %v5321_v34  ;;  %v5283_v44 = vmul.f32 %v7804_v1, %v13242_v39  ;;  %v13243_v34 = vld [vmem:[#allocation111_spill] sm:$0xff] }
 0x4fe   :  { %v5411_v46 = vrot.slane %v5410_v20, 1  ;;  %v5242_v4 = vadd.f32 %v5241_v32, %v5165_v62  ;;  %v3611_v57 = vmul.f32 %v3579_v16, %v3515_v42  ;;  %v3392_v33 = vrot.slane %v3391_v14, 2  ;;  %v12138_v62 = vpop.permute.xlu0 %3556 }
 0x4ff   :  { %v7806_v45 = vpop.eup %7805  ;;  %v12130_v23 = vmul.f32 %v12057_v2, %v5322_v29  ;;  %v5315_v43 = vadd.f32 %v5283_v44, %v3610_v58  ;;  %v3398_v35 = vrot.slane %v3397_v61, 5  ;;  %v3570_v7 = vsel %vm1604_vm3, %v11874_v28, %v13207_v26 }
 0x500   :  { %v12135_v36 = vadd.f32 %v5405_v10, %v5404_v11  ;;  %v5284_v9 = vmul.f32 %v7806_v45, %v13243_v34  ;;  %v3407_v1 = vperm.slane %v3392_v33, 0  ;;  %v3408_v39 = vperm.slane %v3392_v33, 1 }
 0x501   :  { %v12141_v42 = vadd.f32 %v5247_v59, %v12077_v8  ;;  %v5387_v2 = vmul.f32 %v5342_v55, %v5315_v43  ;;  %v3413_v29 = vperm.slane %v3398_v35, 0  ;;  %v3414_v32 = vperm.slane %v3398_v35, 1  ;;  %v6207_v35 = vpop.f32.mrf.mxu0 }
 0x502   :  { %v5449_v58 = vrot.slane %v5393_v27, 4  ;;  %v5316_v16 = vadd.f32 %v5284_v9, %v3611_v57  ;;  %v3439_v14 = vmul.f32 %v3407_v1, %v9435_v52  ;;  %v3440_v11 = vmul.f32 %v3408_v39, %v13085_v22  ;;  %v6236_v57 = vpop.f32.mrf.mxu1 }
 0x503   :  { %v5413_v10 = vrot.slane %v5387_v2, 4  ;;  %v3445_v61 = vmul.f32 %v3413_v29, %v9435_v52  ;;  %v3446_v44 = vmul.f32 %v3414_v32, %v13085_v22  ;;  %v12150_v33 = vsel %vm1610_vm6, %v13207_v26, %v11874_v28 }
 0x504   :  { %v5388_v8 = vmul.f32 %v5342_v55, %v5316_v16  ;;  %v3459_v59 = vmul.f32 1.442695, %v3439_v14  ;;  %v3461_v45 = vmul.f32 1.442695, %v3440_v11  ;;  %v3571_v43 = vrot.slane %v3570_v7, 5  ;;  %v3543_v16 = vpop.permute.xlu2 %3542 }
 0x505   :  { %v5412_v34 = vadd.f32 %v5411_v46, %v5410_v20  ;;  %v5414_v9 = vadd.f32 %v5413_v10, %v5387_v2  ;;  %v3471_v1 = vmul.f32 1.442695, %v3445_v61  ;;  %v3473_v39 = vmul.f32 1.442695, %v3446_v44 }
 0x506   :  { %v5243_v18 = vrot.slane %v5242_v4, 2  ;;  %v5455_v29 = vrot.slane %v12130_v23, 4  ;;  %v5419_v41 = vrot.slane %v5388_v8, 4  ;;  %7807 = vpow2.f32 %v3459_v59  ;;  %v5152_v10 = vpop.permute.xlu0 %5151 }
 0x507   :  { %v5249_v32 = vrot.slane %v12141_v42, 2  ;;  %v5415_v56 = vrot.slane %v5414_v9, 2  ;;  %7809 = vpow2.f32 %v3461_v45  ;;  %v12154_v48 = vadd.f32 %v6236_v57, %v6207_v35  ;;  %v5349_v35 = vpop.permute.xlu1 %5348 }
 0x508   :  { %v12156_v55 = vadd.f32 %v5449_v58, %v5393_v27  ;;  %v5420_v7 = vadd.f32 %v5419_v41, %v5388_v8  ;;  %7811 = vpow2.f32 %v3471_v1  ;;  %v3586_v20 = vperm.slane %v3571_v43, 0 }
 0x509   :  { %13244 = vst [vmem:[#allocation22_spill] sm:$0xff] %v12154_v48  ;;  %v5416_v46 = vadd.f32 %v5415_v56, %v5414_v9  ;;  %7813 = vpow2.f32 %v3473_v39  ;;  %6257 = vadd.xlane.f32.xlu2 %v12154_v48  ;;  %v3401_v2 = vsel %vm1610_vm6, %v13224_v13, %v13206_v63  ;;  %v3393_v14 = vsel %vm1598_vm2, %v13206_v63, %v13224_v13 }
 0x50a   :  { %v12165_v11 = vadd.f32 %v5243_v18, %v5242_v4  ;;  %v5421_v27 = vrot.slane %v5420_v7, 2  ;;  %v3587_v58 = vperm.slane %v3571_v43, 1  ;;  %v3402_v41 = vrot.slane %v3401_v2, 7 }
 0x50b   :  { %v5417_v61 = vrot.slane %v5416_v46, 1  ;;  %v3618_v44 = vmul.f32 %v3586_v20, %v3543_v16  ;;  %v3575_v56 = vrot.slane %v12150_v33, 7  ;;  %v5167_v8 = vmul.f32 %v5152_v10, %v11926_v15 }
 0x50c   :  { %v7808_v59 = vpop.eup %7807  ;;  %v5422_v45 = vadd.f32 %v5421_v27, %v5420_v7  ;;  %v3619_v57 = vmul.f32 %v3587_v58, %v3543_v16  ;;  %v3417_v9 = vperm.slane %v3402_v41, 0  ;;  %v3418_v1 = vperm.slane %v3402_v41, 1 }
 0x50d   :  { %v7810_v39 = vpop.eup %7809  ;;  %v5418_v48 = vadd.f32 %v5417_v61, %v5416_v46  ;;  %v5285_v18 = vmul.f32 %v7808_v59, %v11886_v40  ;;  %v5168_v4 = vmul.f32 %v5152_v10, %v11930_v37  ;;  %v5253_v43 = vrot.slane %v5167_v8, 4 }
 0x50e   :  { %v7812_v2 = vpop.eup %7811  ;;  %v5423_v12 = vrot.slane %v5422_v45, 1  ;;  %v5286_v20 = vmul.f32 %v7810_v39, %v11893_v47  ;;  %v3449_v33 = vmul.f32 %v3417_v9, %v9435_v52  ;;  %v3450_v3 = vmul.f32 %v3418_v1, %v13085_v22 }
 0x50f   :  { %v7814_v7 = vpop.eup %7813  ;;  %v5317_v16 = vadd.f32 %v5285_v18, %v12111_v25  ;;  %v12177_v27 = vsel %vm1592_vm1, %v5418_v48, %v12135_v36  ;;  %v5291_v40 = vmul.f32 %v7812_v2, %v12038_v51  ;;  %v3394_v46 = vrot.slane %v3393_v14, 3 }
 0x510   :  { %v5424_v58 = vadd.f32 %v5423_v12, %v5422_v45  ;;  %v5318_v41 = vadd.f32 %v5286_v20, %v12114_v19  ;;  %v5292_v10 = vmul.f32 %v7814_v7, %v12042_v17  ;;  %v3479_v47 = vmul.f32 1.442695, %v3449_v33 }
 0x511   :  { %v5389_v61 = vmul.f32 %v5349_v35, %v5317_v16  ;;  %v5323_v59 = vadd.f32 %v5291_v40, %v3618_v44  ;;  %v3481_v9 = vmul.f32 1.442695, %v3450_v3  ;;  %v5254_v1 = vadd.f32 %v5253_v43, %v5167_v8 }
 0x512   :  { %v5390_v39 = vmul.f32 %v5349_v35, %v5318_v41  ;;  %v5745_v25 = vsel %vm1592_vm1, %v5424_v58, %v5412_v34  ;;  %v5324_v18 = vadd.f32 %v5292_v10, %v3619_v57  ;;  %7815 = vpow2.f32 %v3479_v47  ;;  %v12189_v57 = vpop.permute.xlu1 %5355 }
 0x513   :  { %v5456_v48 = vadd.f32 %v5455_v29, %v12130_v23  ;;  %v3573_v51 = vrot.slane %v12052_v53, 6  ;;  %v5425_v36 = vrot.slane %v5389_v61, 4  ;;  %7817 = vpow2.f32 %v3481_v9 }
 0x514   :  { %v12186_v12 = vadd.f32 %v5249_v32, %v12141_v42  ;;  %v5451_v17 = vrot.slane %v12156_v55, 2  ;;  %v5431_v19 = vrot.slane %v5390_v39, 4  ;;  %v3409_v14 = vperm.slane %v3394_v46, 0 }
 0x515   :  { %v5426_v3 = vadd.f32 %v5425_v36, %v5389_v61  ;;  %v3590_v44 = vperm.slane %v3575_v56, 0  ;;  %v5259_v8 = vrot.slane %v5168_v4, 4  ;;  %v3410_v45 = vperm.slane %v3394_v46, 1 }
 0x516   :  { %v5432_v34 = vadd.f32 %v5431_v19, %v5390_v39  ;;  %v3591_v35 = vperm.slane %v3575_v56, 1  ;;  %v5255_v23 = vrot.slane %v5254_v1, 2  ;;  %v3441_v53 = vmul.f32 %v3409_v14, %v9435_v52 }
 0x517   :  { %v5245_v29 = vrot.slane %v12165_v11, 1  ;;  %v5427_v43 = vrot.slane %v5426_v3, 2  ;;  %v3622_v42 = vmul.f32 %v3590_v44, %v12138_v62  ;;  %v3442_v32 = vmul.f32 %v3410_v45, %v13085_v22 }
 0x518   :  { %v7816_v2 = vpop.eup %7815  ;;  %v5457_v20 = vrot.slane %v5456_v48, 2  ;;  %v5433_v33 = vrot.slane %v5432_v34, 2  ;;  %v3623_v7 = vmul.f32 %v3591_v35, %v12138_v62  ;;  %v3463_v16 = vmul.f32 1.442695, %v3441_v53 }
 0x519   :  { %v7818_v40 = vpop.eup %7817  ;;  %v5428_v56 = vadd.f32 %v5427_v43, %v5426_v3  ;;  %v5295_v46 = vmul.f32 %v7816_v2, %v11926_v15  ;;  %v5260_v58 = vadd.f32 %v5259_v8, %v5168_v4  ;;  %v3465_v41 = vmul.f32 1.442695, %v3442_v32 }
 0x51a   :  { %v5434_v10 = vadd.f32 %v5433_v33, %v5432_v34  ;;  %v5395_v47 = vmul.f32 %v11916_v31, %v5323_v59  ;;  %v5296_v61 = vmul.f32 %v7818_v40, %v11930_v37  ;;  %v5256_v9 = vadd.f32 %v5255_v23, %v5254_v1  ;;  %v3529_v43 = vpop.permute.xlu1 %3528  ;;  %v13245_v33 = vld [vmem:[#allocation122_spill] sm:$0xff] }
 0x51b   :  { %v5429_v39 = vrot.slane %v5428_v56, 1  ;;  %v5396_v36 = vmul.f32 %v11916_v31, %v5324_v18  ;;  %v5327_v19 = vadd.f32 %v5295_v46, %v3622_v42  ;;  %7819 = vpow2.f32 %v3463_v16 }
 0x51c   :  { %v3588_v14 = vperm.slane %v3573_v51, 0  ;;  %v12200_v62 = vperm.slane %v3573_v51, 1  ;;  %v5435_v44 = vrot.slane %v5434_v10, 1  ;;  %v5328_v3 = vadd.f32 %v5296_v61, %v3623_v7 }
 0x51d   :  { %v5251_v15 = vrot.slane %v12186_v12, 1  ;;  %v5430_v4 = vadd.f32 %v5429_v39, %v5428_v56  ;;  %v5261_v8 = vrot.slane %v5260_v58, 2  ;;  %7821 = vpow2.f32 %v3465_v41 }
 0x51e   :  { %v5436_v45 = vadd.f32 %v5435_v44, %v5434_v10  ;;  %v5461_v59 = vrot.slane %v5395_v47, 4  ;;  %v5257_v34 = vrot.slane %v5256_v9, 1  ;;  %v3566_v37 = vsel %vm1598_vm2, %v11874_v28, %v13207_v26 }
 0x51f   :  { %v12207_v31 = vadd.f32 %v5451_v17, %v12156_v55  ;;  %v12211_v1 = vsel %vm1595_vm5, %v5430_v4, %v12177_v27  ;;  %v5467_v18 = vrot.slane %v5396_v36, 4  ;;  %v3567_v51 = vrot.slane %v3566_v37, 3 }
 0x520   :  { %v5246_v35 = vadd.f32 %v5245_v29, %v12165_v11  ;;  %v12214_v23 = vadd.f32 %v5457_v20, %v5456_v48  ;;  %v12217_v53 = vsel %vm1595_vm5, %v5436_v45, %v5745_v25  ;;  %v3399_v28 = vsel %vm1607_vm8, %v13206_v63, %v13224_v13  ;;  %v13246_v13 = vld [vmem:[#allocation42_spill] sm:$0xff] }
 0x521   :  { %v7820_v26 = vpop.eup %7819  ;;  %v5262_v55 = vadd.f32 %v5261_v8, %v5260_v58  ;;  %v3582_v17 = vperm.slane %v3567_v51, 0  ;;  %v3583_v42 = vperm.slane %v3567_v51, 1  ;;  %v3400_v27 = vrot.slane %v3399_v28, 6  ;;  %v5384_v58 = vpop.permute.xlu2 %5383  ;;  %v13247_v28 = vld [vmem:[#allocation57_spill] sm:$0xff] }
 0x522   :  { %v5462_v32 = vadd.f32 %v5461_v59, %v5395_v47  ;;  %v5258_v2 = vadd.f32 %v5257_v34, %v5256_v9  ;;  %v5287_v7 = vmul.f32 %v7820_v26, %v13245_v33  ;;  %v5708_v11 = vsel %vm1598_vm2, %v12098_v0, %v11968_v30 }
 0x523   :  { %v7822_v25 = vpop.eup %7821  ;;  %v5468_v48 = vadd.f32 %v5467_v18, %v5396_v36  ;;  %v3614_v29 = vmul.f32 %v3582_v17, %v3529_v43  ;;  %v3615_v20 = vmul.f32 %v3583_v42, %v3529_v43  ;;  %v3415_v16 = vperm.slane %v3400_v27, 0  ;;  %v13248_v17 = vld [vmem:[#allocation62_spill] sm:$0xff] }
 0x524   :  { %v3620_v63 = vmul.f32 %v3588_v14, %v12087_v60  ;;  %v5288_v40 = vmul.f32 %v7822_v25, %v13246_v13  ;;  %v3416_v56 = vperm.slane %v3400_v27, 1  ;;  %v5709_v46 = vsel %vm1601_vm7, %v12102_v6, %v5708_v11  ;;  %v13251_v25 = vld [vmem:[#allocation92_spill] sm:$0xff] }
 0x525   :  { %v5263_v41 = vrot.slane %v5262_v55, 1  ;;  %v5319_v10 = vadd.f32 %v5287_v7, %v3614_v29  ;;  %v3447_v47 = vmul.f32 %v3415_v16, %v9435_v52  ;;  %v5710_v30 = vsel %vm1604_vm3, %v12108_v24, %v5709_v46  ;;  %v13252_v16 = vld [vmem:[#allocation120_spill] sm:$0xff] }
 0x526   :  { %v5463_v0 = vrot.slane %v5462_v32, 2  ;;  %v5320_v61 = vadd.f32 %v5288_v40, %v3615_v20  ;;  %v3448_v9 = vmul.f32 %v3416_v56, %v13085_v22  ;;  %v5711_v39 = vsel %vm1607_vm8, %v5246_v35, %v5710_v30  ;;  %v13253_v40 = vld [vmem:[#allocation97_spill] sm:$0xff] }
 0x527   :  { %v5469_v36 = vrot.slane %v5468_v48, 2  ;;  %v5391_v14 = vmul.f32 %v12189_v57, %v5319_v10  ;;  %v3475_v44 = vmul.f32 1.442695, %v3447_v47  ;;  %v12237_v6 = vsel %vm5519_vm9, %v5258_v2, %v5711_v39  ;;  %v13250_v2 = vld [vmem:[#allocation18_spill] sm:$0xff]  ;;  %v5377_v10 = vpop.permute.xlu1 %5376  ;;  %v13254_v47 = vld [vmem:[#allocation44_spill] sm:$0xff] }
 0x528   :  { %v5252_v4 = vadd.f32 %v5251_v15, %v12186_v12  ;;  %v5399_v8 = vmul.f32 %v5384_v58, %v5327_v19  ;;  %v5392_v52 = vmul.f32 %v12189_v57, %v5320_v61  ;;  %v3477_v45 = vmul.f32 1.442695, %v3448_v9  ;;  %v13255_v9 = vld [vmem:[#allocation49_spill] sm:$0xff] }
 0x529   :  { %v5453_v24 = vrot.slane %v12207_v31, 1  ;;  %v5264_v59 = vadd.f32 %v5263_v41, %v5262_v55  ;;  %v5437_v34 = vrot.slane %v5391_v14, 4  ;;  %7823 = vpow2.f32 %v3475_v44 }
 0x52a   :  { %v5400_v22 = vmul.f32 %v5384_v58, %v5328_v3  ;;  %v5443_v37 = vrot.slane %v5392_v52, 4  ;;  %7825 = vpow2.f32 %v3477_v45  ;;  %v5715_v18 = vsel %vm1598_vm2, %v12100_v49, %v11973_v50  ;;  %v13249_v49 = vld [vmem:[#allocation17_spill] sm:$0xff] }
 0x52b   :  { %v5464_v51 = vadd.f32 %v5463_v0, %v5462_v32  ;;  %v5470_v35 = vadd.f32 %v5469_v36, %v5468_v48  ;;  %v5438_v43 = vadd.f32 %v5437_v34, %v5391_v14  ;;  %v5716_v12 = vsel %vm1601_vm7, %v12104_v54, %v5715_v18 }
 0x52c   :  { %v5485_v57 = vrot.slane %v5399_v8, 4  ;;  %v5444_v19 = vadd.f32 %v5443_v37, %v5392_v52  ;;  %v5717_v15 = vsel %vm1604_vm3, %v12124_v21, %v5716_v12  ;;  %v5527_v3 = vsel %vm5519_vm9, %v12092_v5, %v13247_v28  ;;  %v13258_v28 = vld [vmem:[#allocation65_spill] sm:$0xff] }
 0x52d   :  { %v5439_v26 = vrot.slane %v5438_v43, 2  ;;  %v5718_v55 = vsel %vm1607_vm8, %v5252_v4, %v5717_v15  ;;  %v5559_v50 = vsel %vm5519_vm9, %v12095_v38, %v13248_v17  ;;  %v5776_v42 = vadd.f32 %v13249_v49, %v5527_v3 }
 0x52e   :  { %v5491_v27 = vrot.slane %v5400_v22, 4  ;;  %v5445_v54 = vrot.slane %v5444_v19, 2  ;;  %v12258_v32 = vsel %vm5519_vm9, %v5264_v59, %v5718_v55  ;;  %v5778_v21 = vadd.f32 %v13250_v2, %v5559_v50 }
 0x52f   :  { %v7824_v33 = vpop.eup %7823  ;;  %v5459_v7 = vrot.slane %v12214_v23, 1  ;;  %v3621_v5 = vmul.f32 %v12200_v62, %v12087_v60  ;;  %v5440_v11 = vadd.f32 %v5439_v26, %v5438_v43  ;;  %v12265_v48 = vmul.f32 %v13251_v25, %v5776_v42 }
 0x530   :  { %v7826_v38 = vpop.eup %7825  ;;  %v5465_v29 = vrot.slane %v5464_v51, 1  ;;  %v5446_v20 = vadd.f32 %v5445_v54, %v5444_v19  ;;  %v5293_v13 = vmul.f32 %v7824_v33, %v13252_v16  ;;  %v12269_v56 = vmul.f32 %v13253_v40, %v5778_v21  ;;  %v13261_v16 = vld [vmem:[#allocation14_spill] sm:$0xff] }
 0x531   :  { %v5471_v46 = vrot.slane %v5470_v35, 1  ;;  %v5486_v58 = vadd.f32 %v5485_v57, %v5399_v8  ;;  %v5441_v41 = vrot.slane %v5440_v11, 1  ;;  %v5294_v30 = vmul.f32 %v7826_v38, %v13254_v47 }
 0x532   :  { %v5492_v0 = vadd.f32 %v5491_v27, %v5400_v22  ;;  %v5447_v60 = vrot.slane %v5446_v20, 1  ;;  %v5325_v62 = vadd.f32 %v5293_v13, %v3620_v63  ;;  %v6058_v61 = vpack.c.bf16 %v12269_v56, %v12265_v48  ;;  %v13262_v13 = vld [vmem:[#allocation15_spill] sm:$0xff]  ;;  %v13271_v48 = vld [vmem:[#allocation45_spill] sm:$0xff] }
 0x533   :  { %v6006_v39 = vadd.f32 1.0, %v13255_v9  ;;  %v5454_v36 = vadd.f32 %v5453_v24, %v12207_v31  ;;  %v5442_v14 = vadd.f32 %v5441_v41, %v5440_v11  ;;  %v5326_v44 = vadd.f32 %v5294_v30, %v3621_v5  ;;  %v13256_v24 = vld [vmem:[#allocation75_spill] sm:$0xff]  ;;  %v13259_v5 = vld [vmem:[#allocation13_spill] sm:$0xff]  ;;  %v13260_v11 = vld [vmem:[#allocation16_spill] sm:$0xff] }
 0x534   :  { %v5460_v4 = vadd.f32 %v5459_v7, %v12214_v23  ;;  %v5466_v52 = vadd.f32 %v5465_v29, %v5464_v51  ;;  %v5448_v8 = vadd.f32 %v5447_v60, %v5446_v20  ;;  %v5397_v45 = vmul.f32 %v5377_v10, %v5325_v62  ;;  %v13264_v62 = vld [vmem:[#allocation12_spill] sm:$0xff] }
 0x535   :  { %v5472_v59 = vadd.f32 %v5471_v46, %v5470_v35  ;;  %v5487_v34 = vrot.slane %v5486_v58, 2  ;;  %v5740_v22 = vsel %vm1598_vm2, %v5442_v14, %v12211_v1  ;;  %v5398_v63 = vmul.f32 %v5377_v10, %v5326_v44  ;;  %v13257_v35 = vld [vmem:[#allocation43_spill] sm:$0xff] }
 0x536   :  { %v5493_v37 = vrot.slane %v5492_v0, 2  ;;  %v5747_v18 = vsel %vm1598_vm2, %v5448_v8, %v12217_v53  ;;  %v5473_v43 = vrot.slane %v5397_v45, 4  ;;  %v5741_v31 = vsel %vm1601_vm7, %v5454_v36, %v5740_v22  ;;  %v13263_v10 = vld [vmem:[#allocation11_spill] sm:$0xff] }
 0x537   :  { %v6007_v12 = vadd.f32 1.0, %v13256_v24  ;;  %v5479_v57 = vrot.slane %v5398_v63, 4  ;;  %v5742_v23 = vsel %vm1604_vm3, %v5466_v52, %v5741_v31  ;;  %v5748_v51 = vsel %vm1601_vm7, %v5460_v4, %v5747_v18  ;;  %v13265_v36 = vld [vmem:[#allocation107_spill] sm:$0xff] }
 0x538   :  { %v6008_v19 = vadd.f32 1.0, %v13257_v35  ;;  %v5474_v15 = vadd.f32 %v5473_v43, %v5397_v45  ;;  %v5749_v1 = vsel %vm1604_vm3, %v5472_v59, %v5748_v51  ;;  %7827 = vrcp.f32 %v13258_v28  ;;  %v13266_v44 = vld [vmem:[#allocation119_spill] sm:$0xff]  ;;  %v13267_v45 = vld [vmem:[#allocation110_spill] sm:$0xff] }
 0x539   :  { %v5488_v3 = vadd.f32 %v5487_v34, %v5486_v58  ;;  %v5480_v26 = vadd.f32 %v5479_v57, %v5398_v63  ;;  %7829 = vrcp.f32 %v6006_v39  ;;  %v5494_v53 = vadd.f32 %v5493_v37, %v5492_v0  ;;  %v13268_v34 = vld [vmem:[#allocation6_spill] sm:$0xff] }
 0x53a   :  { %v5475_v55 = vrot.slane %v5474_v15, 2  ;;  %7831 = vrcp.f32 %v6007_v12  ;;  %v5771_v25 = vmul.f32 %v13260_v11, %v13259_v5  ;;  %v5772_v40 = vmul.f32 %v13262_v13, %v13261_v16  ;;  %v6238_v12 = vpop.f32.mrf.mxu1  ;;  %v7315_v5 = vld [vmem:[%s12640_s14 + $0x38] sm:$0xff] }
 0x53b   :  { %v5481_v17 = vrot.slane %v5480_v26, 2  ;;  %7833 = vrcp.f32 %v6008_v19  ;;  %v5489_v49 = vrot.slane %v5488_v3, 1  ;;  %v5495_v27 = vrot.slane %v5494_v53, 1  ;;  %6635 = vmatpush.bf16.msrb.mxu2 %v7315_v5  ;;  %7332 = vmatpush.bf16.msra.mxu3 %v7315_v5 }
 0x53c   :  { %v5476_v50 = vadd.f32 %v5475_v55, %v5474_v15  ;;  %v5773_v47 = vmul.f32 %v13260_v11, %v13263_v10  ;;  %v5787_v30 = vadd.f32 %v5771_v25, %v12237_v6  ;;  %v5774_v9 = vmul.f32 %v13262_v13, %v13264_v62 }
 0x53d   :  { %v5482_v42 = vadd.f32 %v5481_v17, %v5480_v26  ;;  %v5490_v29 = vadd.f32 %v5489_v49, %v5488_v3  ;;  %v5496_v58 = vadd.f32 %v5495_v27, %v5494_v53  ;;  %v5788_v39 = vadd.f32 %v5772_v40, %v12258_v32  ;;  %v6209_v32 = vpop.f32.mrf.mxu0  ;;  %v13269_v53 = vld [vmem:[#allocation4_spill] sm:$0xff] }
 0x53e   :  { %v5477_v54 = vrot.slane %v5476_v50, 1  ;;  %v7828_v2 = vpop.eup %7827 }
 0x53f   :  { %v5483_v21 = vrot.slane %v5482_v42, 1  ;;  %v7830_v33 = vpop.eup %7829  ;;  %v6037_v14 = vmul.f32 %v7828_v2, %v13265_v36  ;;  %v13272_v2 = vld [vmem:[#allocation21_spill] sm:$0xff] }
 0x540   :  { %v5478_v7 = vadd.f32 %v5477_v54, %v5476_v50  ;;  %v7832_v38 = vpop.eup %7831  ;;  %v6038_v59 = vmul.f32 %v7830_v33, %v13267_v45  ;;  %v13270_v50 = vld [vmem:[#allocation22_spill] sm:$0xff]  ;;  %v6239_v54 = vadd.f32 %v6238_v12, %v6209_v32 }
 0x541   :  { %v5484_v20 = vadd.f32 %v5483_v21, %v5482_v42  ;;  %v7834_v46 = vpop.eup %7833  ;;  %v6039_v4 = vmul.f32 %v7832_v38, %v13266_v44  ;;  %v6053_v63 = vmul.f32 %v6037_v14, %v5787_v30 }
 0x542   :  { %v5743_v41 = vsel %vm1607_vm8, %v5478_v7, %v5742_v23  ;;  %v6040_v6 = vmul.f32 %v7834_v46, %v13268_v34  ;;  %v6054_v18 = vmul.f32 %v6038_v59, %v5788_v39 }
 0x543   :  { %v5744_v0 = vsel %vm5519_vm9, %v5490_v29, %v5743_v41  ;;  %v5750_v60 = vsel %vm1607_vm8, %v5484_v20, %v5749_v1 }
 0x544   :  { %v5789_v52 = vadd.f32 %v5773_v47, %v5744_v0  ;;  %v5751_v8 = vsel %vm5519_vm9, %v5496_v58, %v5750_v60 }
 0x545   :  { %v5790_v22 = vadd.f32 %v5774_v9, %v5751_v8 }
 0x546   :  { %v6055_v37 = vmul.f32 %v6039_v4, %v5789_v52 }
 0x547   :  { %v6056_v43 = vmul.f32 %v6040_v6, %v5790_v22 }
 0x548   :  { %v6063_v31 = vpack.c.bf16 %v6055_v37, %v6053_v63  ;;  %v7314_v63 = vld [vmem:[%s12640_s14 + $0x30] sm:$0xff] }
 0x549   :  { %v6064_v24 = vpack.c.bf16 %v6056_v43, %v6054_v18  ;;  %6636 = vmatpush.bf16.msrb.mxu2 %v7314_v63  ;;  %7333 = vmatpush.bf16.msra.mxu3 %v7314_v63 }
 0x54a   :  { %6216 = vmatmul.bf16.gmra.mxu0 %v6063_v31 }
 0x54b   :  { %6245 = vmatmul.bf16.gmra.mxu1 %v6064_v24  ;;  %v7313_v24 = vld [vmem:[%s12640_s14 + $0x28] sm:$0xff] }
 0x54d   :  { %6637 = vmatpush.bf16.msrb.mxu2 %v7313_v24  ;;  %7334 = vmatpush.bf16.msra.mxu3 %v7313_v24 }
 0x554   :  { %v6212_v57 = vpop.f32.mrf.mxu0 }
 0x55a   :  { %6230 = vmatmul.bf16.vlgmr.msra.gmra.mxu0 %v6058_v61  ;;  %v6241_v23 = vpop.f32.mrf.mxu1 }
 0x55b   :  { %v6242_v51 = vadd.f32 %v6241_v23, %v6212_v57 }
 0x55c   :  { %v6214_v35 = vpop.f32.mrf.mxu0 }
 0x55d   :  { %6261 = vadd.xlane.f32.xlu2 %v6242_v51 }
 0x562   :  { %v6243_v19 = vpop.f32.mrf.mxu1 }
 0x563   :  { %v6244_v33 = vadd.f32 %v6243_v19, %v6214_v35 }
 0x57c   :  { %v6258_v28 = vpop.xlane.xlu2 %6257 }
 0x57d   :  { %v6271_v55 = vmul.f32 %v6258_v28, %v13269_v53  ;;  %v7312_v28 = vld [vmem:[%s12640_s14 + $0x20] sm:$0xff] }
 0x57e   :  { %6638 = vmatpush.bf16.msrb.mxu2 %v7312_v28  ;;  %7335 = vmatpush.bf16.msra.mxu3 %v7312_v28 }
 0x57f   :  { %v12311_v49 = vsub.f32 %v13270_v50, %v6271_v55 }
 0x581   :  { %v6287_v61 = vmul.f32 %v12311_v49, %v12311_v49 }
 0x5c7   :  { %v6217_v15 = vpop.f32.mrf.mxu0 }
 0x5c8   :  { %v6246_v1 = vpop.f32.mrf.mxu1 }
 0x5c9   :  { %v6247_v7 = vadd.f32 %v6246_v1, %v6217_v15 }
 0x5cf   :  { %v6219_v3 = vpop.f32.mrf.mxu0 }
 0x5d0   :  { %v6248_v26 = vpop.f32.mrf.mxu1  ;;  %v6262_v46 = vpop.xlane.xlu2 %6261 }
 0x5d1   :  { %v6249_v17 = vadd.f32 %v6248_v26, %v6219_v3  ;;  %v6273_v10 = vmul.f32 %v6262_v46, %v13269_v53 }
 0x5d3   :  { %6267 = vadd.xlane.f32.xlu2 %v6249_v17  ;;  %v12336_v62 = vsub.f32 %v6242_v51, %v6273_v10 }
 0x5d5   :  { %v6289_v8 = vmul.f32 %v12336_v62, %v12336_v62 }
 0x5d7   :  { %v6231_v42 = vpop.f32.mrf.mxu0 }
 0x5d8   :  { %v6232_v56 = vadd.f32 %v6231_v42, %v13271_v48 }
 0x5da   :  { %6253 = vadd.xlane.f32.xlu1 %v6232_v56 }
 0x5db   :  { %6297 = vadd.xlane.f32.xlu2 %v6287_v61 }
 0x5df   :  { %v6233_v27 = vpop.f32.mrf.mxu0 }
 0x5e0   :  { %v6234_v21 = vadd.f32 %v6233_v27, %v13272_v2 }
 0x5e2   :  { %6255 = vadd.xlane.f32.xlu0 %v6234_v21  ;;  %6259 = vadd.xlane.f32.xlu1 %v6239_v54 }
 0x5ea   :  { %6263 = vadd.xlane.f32.xlu0 %v6244_v33  ;;  %6265 = vadd.xlane.f32.xlu1 %v6247_v7 }
 0x646   :  { %v6268_v36 = vpop.xlane.xlu2 %6267 }
 0x647   :  { %v6276_v4 = vmul.f32 %v6268_v36, %v13269_v53  ;;  %v7309_v36 = vld [vmem:[%s12640_s14 + $0x8] sm:$0xff] }
 0x649   :  { %v12351_v59 = vsub.f32 %v6249_v17, %v6276_v4 }
 0x64b   :  { %v6292_v34 = vmul.f32 %v12351_v59, %v12351_v59 }
 0x64d   :  { %v6254_v11 = vpop.xlane.xlu1 %6253 }
 0x64e   :  { %v6269_v25 = vmul.f32 %v6254_v11, %v13269_v53  ;;  %v6298_v6 = vpop.xlane.xlu2 %6297 }
 0x64f   :  { %v6311_v22 = vmul.f32 %v6298_v6, %v13269_v53 }
 0x650   :  { %v12321_v38 = vsub.f32 %v6232_v56, %v6269_v25 }
 0x651   :  { %v12359_v37 = vadd.f32 1e-12, %v6311_v22 }
 0x652   :  { %v6285_v29 = vmul.f32 %v12321_v38, %v12321_v38 }
 0x653   :  { %7835 = vrsqrt.f32 %v12359_v37  ;;  %vm6356_vm2 = vcmp.eq.f32.partialorder %v12359_v37, inf  ;;  %vm6358_vm4 = vcmp.eq.f32.partialorder %v12359_v37, 0.0 }
 0x654   :  { %6293 = vadd.xlane.f32.xlu0 %v6285_v29 }
 0x655   :  { %v6256_v20 = vpop.xlane.xlu0 %6255  ;;  %v6260_v16 = vpop.xlane.xlu1 %6259 }
 0x656   :  { %v6270_v13 = vmul.f32 %v6256_v20, %v13269_v53  ;;  %v6272_v40 = vmul.f32 %v6260_v16, %v13269_v53 }
 0x658   :  { %v12327_v58 = vsub.f32 %v6234_v21, %v6270_v13  ;;  %v12329_v41 = vsub.f32 %v6239_v54, %v6272_v40  ;;  %v7311_v21 = vld [vmem:[%s12640_s14 + $0x18] sm:$0xff]  ;;  %v7310_v13 = vld [vmem:[%s12640_s14 + $0x10] sm:$0xff] }
 0x659   :  { %v7836_v32 = vpop.eup %7835  ;;  %6639 = vmatpush.bf16.msrb.mxu2 %v7311_v21  ;;  %7336 = vmatpush.bf16.msra.mxu3 %v7311_v21 }
 0x65a   :  { %v6286_v47 = vmul.f32 %v12327_v58, %v12327_v58  ;;  %v6288_v30 = vmul.f32 %v12329_v41, %v12329_v41  ;;  %v6350_v12 = vmul.f32 %v7836_v32, %v12359_v37 }
 0x65c   :  { %6295 = vadd.xlane.f32.xlu1 %v6286_v47  ;;  %6299 = vadd.xlane.f32.xlu0 %v6288_v30  ;;  %v6351_v3 = vmul.f32 %v7836_v32, %v6350_v12 }
 0x65d   :  { %v6264_v0 = vpop.xlane.xlu0 %6263  ;;  %v6266_v60 = vpop.xlane.xlu1 %6265  ;;  %6640 = vmatpush.bf16.msrb.mxu2 %v7310_v13  ;;  %7337 = vmatpush.bf16.msra.mxu3 %v7310_v13 }
 0x65e   :  { %v6274_v9 = vmul.f32 %v6264_v0, %v13269_v53  ;;  %v6275_v39 = vmul.f32 %v6266_v60, %v13269_v53  ;;  %v6352_v17 = vmul.f32 0.5, %v6351_v3 }
 0x660   :  { %v12340_v14 = vsub.f32 %v6244_v33, %v6274_v9  ;;  %v12342_v44 = vsub.f32 %v6247_v7, %v6275_v39  ;;  %v6353_v25 = vsub.f32 1.5, %v6352_v17 }
 0x661   :  { %6641 = vmatpush.bf16.msrb.mxu2 %v7309_v36  ;;  %7338 = vmatpush.bf16.msra.mxu3 %v7309_v36 }
 0x662   :  { %v6290_v52 = vmul.f32 %v12340_v14, %v12340_v14  ;;  %v6291_v45 = vmul.f32 %v12342_v44, %v12342_v44  ;;  %v6354_v0 = vmul.f32 %v7836_v32, %v6353_v25 }
 0x664   :  { %6303 = vadd.xlane.f32.xlu2 %v6290_v52  ;;  %6301 = vadd.xlane.f32.xlu1 %v6289_v8  ;;  %v6355_v63 = vmul.f32 %v6354_v0, %v12359_v37 }
 0x665   :  { %6305 = vadd.xlane.f32.xlu0 %v6291_v45 }
 0x666   :  { %v6357_v25 = vsel %vm6356_vm2, %v12359_v37, %v6355_v63 }
 0x66c   :  { %6307 = vadd.xlane.f32.xlu1 %v6292_v34 }
 0x6c7   :  { %v6294_v18 = vpop.xlane.xlu0 %6293 }
 0x6c8   :  { %v6309_v43 = vmul.f32 %v6294_v18, %v13269_v53 }
 0x6ca   :  { %v6317_v31 = vadd.f32 1e-12, %v6309_v43 }
 0x6cc   :  { %7837 = vrsqrt.f32 %v6317_v31  ;;  %vm6332_vm10 = vcmp.eq.f32.partialorder %v6317_v31, inf  ;;  %v6335_v47 = vand.u32 2147483648, %v6317_v31  ;;  %vm6334_vm11 = vcmp.eq.f32.partialorder %v6317_v31, 0.0 }
 0x6cf   :  { %v6300_v57 = vpop.xlane.xlu0 %6299  ;;  %v6296_v23 = vpop.xlane.xlu1 %6295 }
 0x6d0   :  { %v6312_v51 = vmul.f32 %v6300_v57, %v13269_v53  ;;  %v6310_v35 = vmul.f32 %v6296_v23, %v13269_v53 }
 0x6d2   :  { %v7838_v19 = vpop.eup %7837  ;;  %v12369_v15 = vadd.f32 1e-12, %v6312_v51  ;;  %v12371_v1 = vadd.f32 1e-12, %v6310_v35 }
 0x6d3   :  { %v6326_v26 = vmul.f32 %v7838_v19, %v6317_v31 }
 0x6d4   :  { %7839 = vrsqrt.f32 %v12369_v15  ;;  %vm6344_vm12 = vcmp.eq.f32.partialorder %v12371_v1, inf  ;;  %vm6346_vm13 = vcmp.eq.f32.partialorder %v12371_v1, 0.0  ;;  %v6347_v57 = vand.u32 2147483648, %v12371_v1 }
 0x6d5   :  { %v6327_v55 = vmul.f32 %v7838_v19, %v6326_v26  ;;  %7841 = vrsqrt.f32 %v12371_v1  ;;  %vm6368_vm6 = vcmp.eq.f32.partialorder %v12369_v15, inf  ;;  %vm6370_vm8 = vcmp.eq.f32.partialorder %v12369_v15, 0.0 }
 0x6d7   :  { %v6328_v50 = vmul.f32 0.5, %v6327_v55  ;;  %v6304_v42 = vpop.xlane.xlu2 %6303  ;;  %v6302_v48 = vpop.xlane.xlu1 %6301 }
 0x6d8   :  { %v6314_v56 = vmul.f32 %v6304_v42, %v13269_v53  ;;  %v6306_v61 = vpop.xlane.xlu0 %6305  ;;  %v6313_v27 = vmul.f32 %v6302_v48, %v13269_v53 }
 0x6d9   :  { %v6329_v54 = vsub.f32 1.5, %v6328_v50  ;;  %v6315_v2 = vmul.f32 %v6306_v61, %v13269_v53 }
 0x6da   :  { %v7840_v33 = vpop.eup %7839  ;;  %v12384_v7 = vadd.f32 1e-12, %v6314_v56  ;;  %v12386_v5 = vadd.f32 1e-12, %v6313_v27 }
 0x6db   :  { %v7842_v11 = vpop.eup %7841  ;;  %v6330_v29 = vmul.f32 %v7838_v19, %v6329_v54  ;;  %v6362_v20 = vmul.f32 %v7840_v33, %v12369_v15  ;;  %v12389_v16 = vadd.f32 1e-12, %v6315_v2 }
 0x6dc   :  { %v6338_v40 = vmul.f32 %v7842_v11, %v12371_v1  ;;  %7843 = vrsqrt.f32 %v12384_v7 }
 0x6dd   :  { %v6331_v46 = vmul.f32 %v6330_v29, %v6317_v31  ;;  %v6363_v10 = vmul.f32 %v7840_v33, %v6362_v20  ;;  %7845 = vrsqrt.f32 %v12389_v16  ;;  %v6407_v28 = vand.u32 2147483648, %v12389_v16 }
 0x6de   :  { %v6339_v30 = vmul.f32 %v7842_v11, %v6338_v40  ;;  %7847 = vrsqrt.f32 %v12386_v5  ;;  %vm6404_vm15 = vcmp.eq.f32.partialorder %v12389_v16, inf  ;;  %vm6406_vm0 = vcmp.eq.f32.partialorder %v12389_v16, 0.0 }
 0x6df   :  { %v6333_v60 = vsel %vm6332_vm10, %v6317_v31, %v6331_v46  ;;  %v6364_v9 = vmul.f32 0.5, %v6363_v10  ;;  %v6308_v39 = vpop.xlane.xlu1 %6307  ;;  %v7308_v31 = vld [vmem:[%s12640_s14] sm:$0xff] }
 0x6e0   :  { %v12401_v4 = vsel %vm6334_vm11, %v6335_v47, %v6333_v60  ;;  %v6340_v52 = vmul.f32 0.5, %v6339_v30  ;;  %v6316_v8 = vmul.f32 %v6308_v39, %v13269_v53  ;;  %6642 = vmatpush.bf16.msrb.mxu2 %v7308_v31  ;;  %7339 = vmatpush.bf16.msra.mxu3 %v7308_v31 }
 0x6e1   :  { %7849 = vrcp.f32 %v12401_v4  ;;  %v6365_v18 = vsub.f32 1.5, %v6364_v9  ;;  %v6430_v12 = vand.u32 2147483647, %v12401_v4  ;;  %vm6426_vm14 = vweird.f32 %v12401_v4 }
 0x6e2   :  { %v7844_v45 = vpop.eup %7843  ;;  %v6341_v34 = vsub.f32 1.5, %v6340_v52  ;;  %v12405_v6 = vadd.f32 1e-12, %v6316_v8  ;;  %v6432_v50 = vand.u32 2147483648, %v12401_v4 }
 0x6e3   :  { %v7846_v22 = vpop.eup %7845  ;;  %v6386_v43 = vmul.f32 %v7844_v45, %v12384_v7  ;;  %v6366_v26 = vmul.f32 %v7840_v33, %v6365_v18  ;;  %vm12433_vm1 = vcmp.eq.f32.partialorder %v6430_v12, 8.507059e+37 }
 0x6e4   :  { %v12413_v53 = vpop.eup %7847  ;;  %v6342_v24 = vmul.f32 %v7842_v11, %v6341_v34  ;;  %v6398_v32 = vmul.f32 %v7846_v22, %v12389_v16  ;;  %7851 = vrsqrt.f32 %v12405_v6  ;;  %v6433_v13 = vor.u32 1.1754944e-38, %v6432_v50 }
 0x6e5   :  { %v6387_v23 = vmul.f32 %v7844_v45, %v6386_v43  ;;  %v6374_v51 = vmul.f32 %v12413_v53, %v12386_v5  ;;  %v6367_v29 = vmul.f32 %v6366_v26, %v12369_v15  ;;  %vm6416_vm5 = vcmp.eq.f32.partialorder %v12405_v6, inf }
 0x6e6   :  { %v6343_v35 = vmul.f32 %v6342_v24, %v12371_v1  ;;  %v6399_v19 = vmul.f32 %v7846_v22, %v6398_v32  ;;  %vm6418_vm9 = vcmp.eq.f32.partialorder %v12405_v6, 0.0  ;;  %v6419_v12 = vand.u32 2147483648, %v12405_v6 }
 0x6e7   :  { %v7850_v3 = vpop.eup %7849  ;;  %v6388_v55 = vmul.f32 0.5, %v6387_v23  ;;  %v6375_v17 = vmul.f32 %v12413_v53, %v6374_v51  ;;  %v6369_v52 = vsel %vm6368_vm6, %v12369_v15, %v6367_v29 }
 0x6e8   :  { %v6345_v42 = vsel %vm6344_vm12, %v12371_v1, %v6343_v35  ;;  %v6400_v48 = vmul.f32 0.5, %v6399_v19  ;;  %v6422_v56 = vmul.f32 %v7850_v3, %v12401_v4  ;;  %v6359_v1 = vand.u32 2147483648, %v12359_v37 }
 0x6e9   :  { %v12439_v27 = vsel %vm6346_vm13, %v6347_v57, %v6345_v42  ;;  %v6389_v54 = vsub.f32 1.5, %v6388_v55  ;;  %v6376_v2 = vmul.f32 0.5, %v6375_v17  ;;  %vm6427_vm3 = vweird.f32 %v7850_v3  ;;  %v12499_v55 = vld [vmem:[%s12642_s13] ss:$0 sm:$0xff] }
 0x6ea   :  { %v7852_v21 = vpop.eup %7851  ;;  %7853 = vrcp.f32 %v12439_v27  ;;  %v6401_v33 = vsub.f32 1.5, %v6400_v48  ;;  %v6423_v11 = vsub.f32 1.0, %v6422_v56  ;;  %v12448_v0 = vsel %vm6358_vm4, %v6359_v1, %v6357_v25  ;;  %vm6428_vm7 = vmor %vm6426_vm14, %vm6427_vm3 }
 0x6eb   :  { %v6410_v20 = vmul.f32 %v7852_v21, %v12405_v6  ;;  %v6390_v10 = vmul.f32 %v7844_v45, %v6389_v54  ;;  %v6377_v47 = vsub.f32 1.5, %v6376_v2  ;;  %v6445_v39 = vand.u32 2147483647, %v12439_v27 }
 0x6ec   :  { %v6402_v40 = vmul.f32 %v7846_v22, %v6401_v33  ;;  %v6424_v46 = vmul.f32 %v7850_v3, %v6423_v11  ;;  %v6447_v37 = vand.u32 2147483648, %v12439_v27  ;;  %v6371_v22 = vand.u32 2147483648, %v12369_v15  ;;  %v12477_v15 = vld [vmem:[%s12641_s12] ss:$0 sm:$0xff] }
 0x6ed   :  { %v6411_v30 = vmul.f32 %v7852_v21, %v6410_v20  ;;  %7855 = vrcp.f32 %v12448_v0  ;;  %v6378_v31 = vmul.f32 %v12413_v53, %v6377_v47  ;;  %v12484_v23 = vmul.f32 %v6390_v10, %v12384_v7 }
 0x6ee   :  { %v6403_v60 = vmul.f32 %v6402_v40, %v12389_v16  ;;  %v6425_v9 = vadd.f32 %v7850_v3, %v6424_v46  ;;  %vm6441_vm10 = vweird.f32 %v12439_v27  ;;  %v6460_v35 = vand.u32 2147483647, %v12448_v0 }
 0x6ef   :  { %v6412_v36 = vmul.f32 0.5, %v6411_v30  ;;  %vm12492_vm12 = vcmp.eq.f32.partialorder %v6445_v39, 8.507059e+37  ;;  %v6448_v26 = vor.u32 1.1754944e-38, %v6447_v37  ;;  %v6462_v17 = vand.u32 2147483648, %v12448_v0 }
 0x6f0   :  { %v7854_v8 = vpop.eup %7853  ;;  %v6405_v45 = vsel %vm6404_vm15, %v12389_v16, %v6403_v60  ;;  %v6429_v34 = vsel %vm6428_vm7, %v7850_v3, %v6425_v9  ;;  %v12479_v16 = vsel %vm6370_vm8, %v6371_v22, %v6369_v52  ;;  %vm6456_vm13 = vweird.f32 %v12448_v0 }
 0x6f1   :  { %v12466_v4 = vsel %vm6406_vm0, %v6407_v28, %v6405_v45  ;;  %v6413_v63 = vsub.f32 1.5, %v6412_v36  ;;  %v6434_v18 = vsel %vm12433_vm1, %v6433_v13, %v6429_v34  ;;  %v6437_v43 = vmul.f32 %v7854_v8, %v12439_v27 }
 0x6f2   :  { %7857 = vrcp.f32 %v12466_v4  ;;  %v6435_v24 = vmul.f32 %v6434_v18, %v12321_v38  ;;  %vm6442_vm11 = vweird.f32 %v7854_v8  ;;  %v6379_v28 = vmul.f32 %v6378_v31, %v12386_v5 }
 0x6f3   :  { %v6414_v32 = vmul.f32 %v7852_v21, %v6413_v63  ;;  %v6438_v57 = vsub.f32 1.0, %v6437_v43  ;;  %7859 = vrcp.f32 %v12479_v16  ;;  %v7856_v19 = vpop.eup %7855  ;;  %vm6443_vm14 = vmor %vm6441_vm10, %vm6442_vm11  ;;  %v6475_v2 = vand.u32 2147483647, %v12479_v16 }
 0x6f4   :  { %v6544_v38 = vmul.f32 %v12477_v15, %v6435_v24  ;;  %v6452_v48 = vmul.f32 %v7856_v19, %v12448_v0  ;;  %v6477_v21 = vand.u32 2147483648, %v12479_v16  ;;  %vm12517_vm15 = vcmp.eq.f32.partialorder %v6460_v35, 8.507059e+37 }
 0x6f5   :  { %v6415_v53 = vmul.f32 %v6414_v32, %v12405_v6  ;;  %v6439_v51 = vmul.f32 %v7854_v8, %v6438_v57  ;;  %vm6471_vm0 = vweird.f32 %v12479_v16  ;;  %v6463_v20 = vor.u32 1.1754944e-38, %v6462_v17 }
 0x6f6   :  { %v6555_v54 = vadd.f32 %v12499_v55, %v6544_v38  ;;  %v6453_v11 = vsub.f32 1.0, %v6452_v48  ;;  %v6520_v13 = vand.u32 2147483647, %v12466_v4  ;;  %v6522_v1 = vand.u32 2147483648, %v12466_v4 }
 0x6f7   :  { %v6417_v50 = vsel %vm6416_vm5, %v12405_v6, %v6415_v53  ;;  %v6440_v42 = vadd.f32 %v7854_v8, %v6439_v51  ;;  %vm6457_vm1 = vweird.f32 %v7856_v19  ;;  %vm12529_vm2 = vcmp.eq.f32.partialorder %v6475_v2, 8.507059e+37 }
 0x6f8   :  { %v7858_v56 = vpop.eup %7857  ;;  %v12509_v61 = vsel %vm6418_vm9, %v6419_v12, %v6417_v50  ;;  %v6454_v46 = vmul.f32 %v7856_v19, %v6453_v11  ;;  %v6478_v30 = vor.u32 1.1754944e-38, %v6477_v21  ;;  %vm6516_vm3 = vweird.f32 %v12466_v4  ;;  %vm12537_vm5 = vmor %vm6456_vm13, %vm6457_vm1 }
 0x6f9   :  { %7861 = vrcp.f32 %v12509_v61  ;;  %v6444_v33 = vsel %vm6443_vm14, %v7854_v8, %v6440_v42  ;;  %v6512_v6 = vmul.f32 %v7858_v56, %v12466_v4  ;;  %v7860_v27 = vpop.eup %7859  ;;  %vm6517_vm4 = vweird.f32 %v7858_v56 }
 0x6fa   :  { %v6449_v29 = vsel %vm12492_vm12, %v6448_v26, %v6444_v33  ;;  %v6467_v10 = vmul.f32 %v7860_v27, %v12479_v16  ;;  %v6455_v39 = vadd.f32 %v7856_v19, %v6454_v46  ;;  %vm6472_vm6 = vweird.f32 %v7860_v27  ;;  %vm6518_vm9 = vmor %vm6516_vm3, %vm6517_vm4 }
 0x6fb   :  { %v6450_v40 = vmul.f32 %v6449_v29, %v12327_v58  ;;  %v6513_v60 = vsub.f32 1.0, %v6512_v6  ;;  %vm12541_vm7 = vcmp.eq.f32.partialorder %v6520_v13, 8.507059e+37  ;;  %v6523_v8 = vor.u32 1.1754944e-38, %v6522_v1  ;;  %vm6473_vm11 = vmor %vm6471_vm0, %vm6472_vm6 }
 0x6fc   :  { %v6468_v36 = vsub.f32 1.0, %v6467_v10  ;;  %v6459_v22 = vsel %vm12537_vm5, %v7856_v19, %v6455_v39  ;;  %v6535_v0 = vand.u32 2147483647, %v12509_v61  ;;  %v6537_v31 = vand.u32 2147483648, %v12509_v61 }
 0x6fd   :  { %v6545_v9 = vmul.f32 %v12477_v15, %v6450_v40  ;;  %v6514_v37 = vmul.f32 %v7858_v56, %v6513_v60  ;;  %vm6380_vm8 = vcmp.eq.f32.partialorder %v12386_v5, inf  ;;  %vm6382_vm10 = vcmp.eq.f32.partialorder %v12386_v5, 0.0 }
 0x6fe   :  { %v6469_v63 = vmul.f32 %v7860_v27, %v6468_v36  ;;  %v6381_v12 = vsel %vm6380_vm8, %v12386_v5, %v6379_v28  ;;  %v6464_v57 = vsel %vm12517_vm15, %v6463_v20, %v6459_v22  ;;  %v6383_v51 = vand.u32 2147483648, %v12386_v5 }
 0x6ff   :  { %v7862_v45 = vpop.eup %7861  ;;  %v6556_v34 = vadd.f32 %v12499_v55, %v6545_v9  ;;  %v6515_v18 = vadd.f32 %v7858_v56, %v6514_v37  ;;  %vm6392_vm13 = vcmp.eq.f32.partialorder %v12384_v7, inf  ;;  %vm6531_vm14 = vweird.f32 %v12509_v61 }
 0x700   :  { %v6527_v43 = vmul.f32 %v7862_v45, %v12509_v61  ;;  %v6470_v32 = vadd.f32 %v7860_v27, %v6469_v63  ;;  %vm6532_vm12 = vweird.f32 %v7862_v45  ;;  %v6384_v3 = vsel %vm6382_vm10, %v6383_v51, %v6381_v12 }
 0x701   :  { %v6563_v24 = vpack.c.bf16 %v6556_v34, %v6555_v54  ;;  %v6519_v38 = vsel %vm6518_vm9, %v7858_v56, %v6515_v18  ;;  %v6393_v16 = vsel %vm6392_vm13, %v12384_v7, %v12484_v23  ;;  %v6395_v5 = vand.u32 2147483648, %v12384_v7  ;;  %vm6533_vm0 = vmor %vm6531_vm14, %vm6532_vm12 }
 0x702   :  { %v6528_v53 = vsub.f32 1.0, %v6527_v43  ;;  %v6474_v35 = vsel %vm6473_vm11, %v7860_v27, %v6470_v32  ;;  %v6524_v4 = vsel %vm12541_vm7, %v6523_v8, %v6519_v38  ;;  %vm6394_vm15 = vcmp.eq.f32.partialorder %v12384_v7, 0.0 }
 0x703   :  { %6643 = vmatmul.bf16.vlgmr.msrb.gmra.mxu2 %v6563_v24  ;;  %v6479_v19 = vsel %vm12529_vm2, %v6478_v30, %v6474_v35  ;;  %v6525_v17 = vmul.f32 %v6524_v4, %v12342_v44  ;;  %7863 = vrcp.f32 %v6384_v3  ;;  %v6465_v42 = vmul.f32 %v6464_v57, %v12311_v49  ;;  %v12594_v24 = vld [vmem:[%s12643_s15] ss:$0 sm:$0xff] }
 0x704   :  { %v6529_v28 = vmul.f32 %v7862_v45, %v6528_v53  ;;  %v6480_v26 = vmul.f32 %v6479_v19, %v12329_v41  ;;  %v6538_v48 = vor.u32 1.1754944e-38, %v6537_v31  ;;  %v6396_v56 = vsel %vm6394_vm15, %v6395_v5, %v6393_v16 }
 0x705   :  { %vm6536_vm1 = vcmp.eq.f32.partialorder %v6535_v0, 8.507059e+37  ;;  %7865 = vrcp.f32 %v6396_v56  ;;  %v6550_v2 = vmul.f32 %v12477_v15, %v6525_v17  ;;  %v6546_v44 = vmul.f32 %v12477_v15, %v6465_v42 }
 0x706   :  { %v6530_v50 = vadd.f32 %v7862_v45, %v6529_v28  ;;  %v6547_v41 = vmul.f32 %v12477_v15, %v6480_v26  ;;  %v6490_v13 = vand.u32 2147483647, %v6384_v3  ;;  %v6492_v1 = vand.u32 2147483648, %v6384_v3 }
 0x707   :  { %v6561_v25 = vadd.f32 %v12499_v55, %v6550_v2  ;;  %v6557_v27 = vadd.f32 %v12499_v55, %v6546_v44  ;;  %vm6486_vm3 = vweird.f32 %v6384_v3  ;;  %v6507_v47 = vand.u32 2147483648, %v6396_v56 }
 0x708   :  { %v6534_v54 = vsel %vm6533_vm0, %v7862_v45, %v6530_v50  ;;  %v6558_v49 = vadd.f32 %v12499_v55, %v6547_v41  ;;  %v6505_v9 = vand.u32 2147483647, %v6396_v56  ;;  %v6493_v39 = vor.u32 1.1754944e-38, %v6492_v1 }
 0x709   :  { %v6539_v23 = vsel %vm6536_vm1, %v6538_v48, %v6534_v54  ;;  %v7864_v21 = vpop.eup %7863  ;;  %vm6491_vm6 = vcmp.eq.f32.partialorder %v6490_v13, 8.507059e+37  ;;  %vm6501_vm7 = vweird.f32 %v6396_v56  ;;  %v6508_v52 = vor.u32 1.1754944e-38, %v6507_v47 }
 0x70a   :  { %v6540_v61 = vmul.f32 %v6539_v23, %v12351_v59  ;;  %v6482_v33 = vmul.f32 %v7864_v21, %v6384_v3  ;;  %v6564_v40 = vpack.c.bf16 %v6558_v49, %v6557_v27  ;;  %vm6487_vm2 = vweird.f32 %v7864_v21 }
 0x70b   :  { %v7866_v11 = vpop.eup %7865  ;;  %vm6488_vm5 = vmor %vm6486_vm3, %vm6487_vm2  ;;  %vm6506_vm9 = vcmp.eq.f32.partialorder %v6505_v9, 8.507059e+37 }
 0x70c   :  { %v6551_v7 = vmul.f32 %v12477_v15, %v6540_v61  ;;  %v6483_v29 = vsub.f32 1.0, %v6482_v33  ;;  %v6497_v20 = vmul.f32 %v7866_v11, %v6396_v56  ;;  %vm6502_vm4 = vweird.f32 %v7866_v11 }
 0x70d   :  { %vm6503_vm8 = vmor %vm6501_vm7, %vm6502_vm4 }
 0x70e   :  { %v6562_v6 = vadd.f32 %v12499_v55, %v6551_v7  ;;  %v6484_v46 = vmul.f32 %v7864_v21, %v6483_v29  ;;  %v6498_v10 = vsub.f32 1.0, %v6497_v20 }
 0x710   :  { %v6566_v59 = vpack.c.bf16 %v6562_v6, %v6561_v25  ;;  %v6485_v30 = vadd.f32 %v7864_v21, %v6484_v46  ;;  %v6499_v60 = vmul.f32 %v7866_v11, %v6498_v10 }
 0x712   :  { %6658 = vmatmul.bf16.vlgmr.msra.gmra.mxu3 %v6566_v59  ;;  %v6489_v36 = vsel %vm6488_vm5, %v7864_v21, %v6485_v30  ;;  %v6500_v58 = vadd.f32 %v7866_v11, %v6499_v60 }
 0x713   :  { %6648 = vmatmul.bf16.gmra.mxu2 %v6564_v40  ;;  %v6494_v37 = vsel %vm6491_vm6, %v6493_v39, %v6489_v36 }
 0x714   :  { %v6495_v8 = vmul.f32 %v6494_v37, %v12336_v62  ;;  %v6504_v45 = vsel %vm6503_vm8, %v7866_v11, %v6500_v58 }
 0x715   :  { %v6509_v34 = vsel %vm6506_vm9, %v6508_v52, %v6504_v45 }
 0x716   :  { %v6510_v22 = vmul.f32 %v6509_v34, %v12340_v14  ;;  %v6548_v63 = vmul.f32 %v12477_v15, %v6495_v8 }
 0x718   :  { %v6549_v0 = vmul.f32 %v12477_v15, %v6510_v22  ;;  %v6559_v18 = vadd.f32 %v12499_v55, %v6548_v63 }
 0x71a   :  { %v6560_v43 = vadd.f32 %v12499_v55, %v6549_v0 }
 0x71c   :  { %v6565_v31 = vpack.c.bf16 %v6560_v43, %v6559_v18 }
 0x723   :  { %6653 = vmatmul.bf16.gmra.mxu2 %v6565_v31 }
 0x786   :  { %v6644_v62 = vpop.f32.mrf.mxu2 }
 0x787   :  { %v6645_v32 = vadd.f32 %v12594_v24, %v6644_v62 }
 0x789   :  { %v6664_v12 = vsub.f32 0.0, %v6645_v32 }
 0x78b   :  { %v6672_v14 = vmul.f32 1.442695, %v6664_v12 }
 0x78d   :  { %7867 = vpow2.f32 %v6672_v14 }
 0x78e   :  { %v6646_v57 = vpop.f32.mrf.mxu2 }
 0x78f   :  { %v6647_v15 = vadd.f32 %v12594_v24, %v6646_v57 }
 0x791   :  { %v6665_v38 = vsub.f32 0.0, %v6647_v15 }
 0x793   :  { %v7868_v53 = vpop.eup %7867  ;;  %v6674_v51 = vmul.f32 1.442695, %v6665_v38 }
 0x794   :  { %v6688_v55 = vadd.f32 1.0, %v7868_v53 }
 0x795   :  { %7869 = vpow2.f32 %v6674_v51  ;;  %v6659_v35 = vpop.f32.mrf.mxu3 }
 0x796   :  { %7871 = vrcp.f32 %v6688_v55  ;;  %v6649_v4 = vpop.f32.mrf.mxu2  ;;  %v6660_v19 = vadd.f32 %v12594_v24, %v6659_v35 }
 0x797   :  { %v6650_v28 = vadd.f32 %v12594_v24, %v6649_v4 }
 0x798   :  { %v6670_v3 = vsub.f32 0.0, %v6660_v19 }
 0x799   :  { %v6666_v16 = vsub.f32 0.0, %v6650_v28 }
 0x79a   :  { %v6684_v26 = vmul.f32 1.442695, %v6670_v3 }
 0x79b   :  { %v7870_v5 = vpop.eup %7869  ;;  %v6676_v17 = vmul.f32 1.442695, %v6666_v16 }
 0x79c   :  { %v7872_v50 = vpop.eup %7871  ;;  %v6689_v42 = vadd.f32 1.0, %v7870_v5  ;;  %7873 = vpow2.f32 %v6684_v26 }
 0x79d   :  { %6704 = vst [vmem:[%s12644_s16] sm:$0xff] %v7872_v50  ;;  %7875 = vpow2.f32 %v6676_v17  ;;  %v6661_v48 = vpop.f32.mrf.mxu3 }
 0x79e   :  { %7877 = vrcp.f32 %v6689_v42  ;;  %v6651_v56 = vpop.f32.mrf.mxu2  ;;  %v6662_v54 = vadd.f32 %v12594_v24, %v6661_v48 }
 0x79f   :  { %v6652_v41 = vadd.f32 %v12594_v24, %v6651_v56 }
 0x7a0   :  { %v6671_v23 = vsub.f32 0.0, %v6662_v54 }
 0x7a1   :  { %v6667_v61 = vsub.f32 0.0, %v6652_v41 }
 0x7a2   :  { %v7874_v2 = vpop.eup %7873  ;;  %v6686_v44 = vmul.f32 1.442695, %v6671_v23 }
 0x7a3   :  { %v7876_v21 = vpop.eup %7875  ;;  %v6694_v7 = vadd.f32 1.0, %v7874_v2  ;;  %v6678_v49 = vmul.f32 1.442695, %v6667_v61 }
 0x7a4   :  { %v7878_v33 = vpop.eup %7877  ;;  %v6690_v11 = vadd.f32 1.0, %v7876_v21  ;;  %7879 = vpow2.f32 %v6686_v44 }
 0x7a5   :  { %6705 = vst [vmem:[%s12644_s16 + $0x8] sm:$0xff] %v7878_v33  ;;  %7881 = vrcp.f32 %v6694_v7 }
 0x7a6   :  { %7883 = vrcp.f32 %v6690_v11  ;;  %v6654_v25 = vpop.f32.mrf.mxu2 }
 0x7a7   :  { %7885 = vpow2.f32 %v6678_v49  ;;  %v6655_v6 = vadd.f32 %v12594_v24, %v6654_v25 }
 0x7a9   :  { %v6668_v27 = vsub.f32 0.0, %v6655_v6 }
 0x7aa   :  { %v7880_v29 = vpop.eup %7879 }
 0x7ab   :  { %v7882_v20 = vpop.eup %7881  ;;  %v6695_v59 = vadd.f32 1.0, %v7880_v29  ;;  %v6680_v13 = vmul.f32 1.442695, %v6668_v27 }
 0x7ac   :  { %v7884_v1 = vpop.eup %7883  ;;  %6710 = vst [vmem:[%s12644_s16 + $0x30] sm:$0xff] %v7882_v20 }
 0x7ad   :  { %v7886_v40 = vpop.eup %7885  ;;  %6706 = vst [vmem:[%s12644_s16 + $0x10] sm:$0xff] %v7884_v1  ;;  %7887 = vrcp.f32 %v6695_v59 }
 0x7ae   :  { %v6691_v46 = vadd.f32 1.0, %v7886_v40  ;;  %7889 = vpow2.f32 %v6680_v13  ;;  %v6656_v10 = vpop.f32.mrf.mxu2 }
 0x7af   :  { %v6657_v47 = vadd.f32 %v12594_v24, %v6656_v10 }
 0x7b0   :  { %7891 = vrcp.f32 %v6691_v46 }
 0x7b1   :  { %v6669_v30 = vsub.f32 0.0, %v6657_v47 }
 0x7b3   :  { %v7888_v60 = vpop.eup %7887  ;;  %v6682_v9 = vmul.f32 1.442695, %v6669_v30 }
 0x7b4   :  { %v7890_v39 = vpop.eup %7889  ;;  %6711 = vst [vmem:[%s12644_s16 + $0x38] sm:$0xff] %v7888_v60 }
 0x7b5   :  { %v6692_v36 = vadd.f32 1.0, %v7890_v39  ;;  %7893 = vpow2.f32 %v6682_v9 }
 0x7b6   :  { %v7892_v58 = vpop.eup %7891 }
 0x7b7   :  { %6707 = vst [vmem:[%s12644_s16 + $0x18] sm:$0xff] %v7892_v58  ;;  %7895 = vrcp.f32 %v6692_v36 }
 0x7bb   :  { %v7894_v37 = vpop.eup %7893 }
 0x7bc   :  { %v6693_v52 = vadd.f32 1.0, %v7894_v37 }
 0x7bd   :  { %v7896_v8 = vpop.eup %7895 }
 0x7be   :  { %6708 = vst [vmem:[%s12644_s16 + $0x20] sm:$0xff] %v7896_v8  ;;  %7897 = vrcp.f32 %v6693_v52 }
 0x7c4   :  { %v7898_v45 = vpop.eup %7897 }
 0x7c5   :  { %6709 = vst [vmem:[%s12644_s16 + $0x28] sm:$0xff] %v7898_v45 }

</bundles_post_ra>
